<compile_context>
chip_gen: v5e
topology: v5e:2x2
jax: 0.10.0
libtpu: 0.0.40
codegen_flags: <defaults>
</compile_context>

<pallas_src>
import jax
import jax.numpy as jnp
from jax import lax
from jax.experimental import pallas as pl
from jax.experimental.pallas import tpu as pltpu

# ---- hyperparameters from the PyTorch module ----
N_EMBD = 384
N_HEAD = 6
HEAD_SIZE = N_EMBD // N_HEAD          # 64
LN_EPS = 1e-5


def _layernorm(x, gamma, beta):
    # One-pass LayerNorm: var = E[x^2] - mu^2 (single sweep over x).
    mu = jnp.mean(x, axis=-1, keepdims=True)
    var = jnp.mean(x * x, axis=-1, keepdims=True) - mu * mu
    return (x - mu) * lax.rsqrt(var + LN_EPS) * gamma + beta


def block_kernel(x_ref, ln1_g_ref, ln1_b_ref, wqkv_ref, wproj_ref, bproj_ref,
                 ln2_g_ref, ln2_b_ref, w1_ref, b1_ref, w2_ref, b2_ref, y_ref):
    bb, T, C = x_ref.shape
    H, D = N_HEAD, HEAD_SIZE
    M = bb * T

    # Pack the bb sequences into a single (M, C) row block so every matmul
    # sees a dense M dimension.
    x = x_ref[...].reshape(M, C)

    # ---- LayerNorm 1 (f32 VPU math) ----
    xn = _layernorm(x, ln1_g_ref[...], ln1_b_ref[...])

    # ---- fused QKV projection: one lane-dense MXU pass (N = 3C) ----
    # 1/sqrt(head_size) is already folded into the q columns of wqkv.
    qkv = jnp.dot(xn.astype(jnp.bfloat16), wqkv_ref[...],
                  preferred_element_type=jnp.float32)          # (M, 3C) f32

    q = qkv[:, 0 * C:1 * C]
    k = qkv[:, 1 * C:2 * C]
    v = qkv[:, 2 * C:3 * C]

    def split_heads(t):                    # (M, C) -> (bb*H, T, D)
        t = t.reshape(bb, T, H, D)
        t = jnp.transpose(t, (0, 2, 1, 3))
        return t.reshape(bb * H, T, D)

    qh = split_heads(q).astype(jnp.bfloat16)
    kh = split_heads(k).astype(jnp.bfloat16)
    vh = split_heads(v).astype(jnp.bfloat16)

    # ---- batched causal attention over all (batch, head) pairs ----
    # dot_general contracts the last dims directly (no explicit kh.T).
    s = jnp.einsum('bqd,bkd->bqk', qh, kh,
                   preferred_element_type=jnp.float32)          # (bb*H, T, T)
    row = lax.broadcasted_iota(jnp.int32, (T, T), 0)
    col = lax.broadcasted_iota(jnp.int32, (T, T), 1)
    causal = (col <= row)[None, :, :]
    s = jnp.where(causal, s, -jnp.inf)
    s = s - jnp.max(s, axis=-1, keepdims=True)
    p = jnp.exp(s)
    p = p * pl.reciprocal(jnp.sum(p, axis=-1, keepdims=True), approx=True)
    o = jnp.einsum('bqk,bkd->bqd', p.astype(jnp.bfloat16), vh,
                   preferred_element_type=jnp.float32)          # (bb*H, T, D)

    # merge heads back into the channel dim (PyTorch torch.cat order)
    att = jnp.transpose(o.reshape(bb, H, T, D), (0, 2, 1, 3)).reshape(M, C)

    # ---- output projection + first residual ----
    att = jnp.dot(att.astype(jnp.bfloat16), wproj_ref[...],
                  preferred_element_type=jnp.float32) + bproj_ref[...]
    x1 = x + att

    # ---- LayerNorm 2 + FeedForward + second residual ----
    x1n = _layernorm(x1, ln2_g_ref[...], ln2_b_ref[...])
    hdn = jnp.maximum(
        jnp.dot(x1n.astype(jnp.bfloat16), w1_ref[...],
                preferred_element_type=jnp.float32) + b1_ref[...], 0.0)
    ff = jnp.dot(hdn.astype(jnp.bfloat16), w2_ref[...],
                 preferred_element_type=jnp.float32) + b2_ref[...]

    y_ref[...] = (x1 + ff).reshape(bb, T, C)


# ------------------------- host-side helpers -------------------------

def prepare_block_params(params):
    """One-time weight prep: fold 1/sqrt(d) into the q columns and cast the
    matmul weights to bf16. Call once and reuse across gpt_block calls."""
    (ln1_g, ln1_b, wqkv, wproj, bproj, ln2_g, ln2_b, w1, b1, w2, b2) = params
    scale = jnp.float32(HEAD_SIZE ** -0.5)
    wqkv = wqkv.at[:, :N_EMBD].multiply(scale)
    return (
        ln1_g, ln1_b,
        wqkv.astype(jnp.bfloat16),
        wproj.astype(jnp.bfloat16), bproj,
        ln2_g, ln2_b,
        w1.astype(jnp.bfloat16), b1,
        w2.astype(jnp.bfloat16), b2,
    )


def _is_v7x():
    try:
        kind = jax.devices()[0].device_kind.lower()
    except Exception:
        return True                       # unknown -> assume the tightest VMEM
    return ("v7" in kind) or ("7x" in kind)


def _vmem_limit_bytes():
    # v7x: 64 MiB physical -> 48 MiB cap. v5e/v6e: 128 MiB physical -> 64 MiB.
    return (48 if _is_v7x() else 64) * 1024 * 1024


def _choose_bb(B, T, target_rows=512):
    """Sequences packed per grid step. Never shrinks below target just to make
    B divisible -- the wrapper pads the batch instead."""
    bb = max(1, min(B, max(1, target_rows // max(T, 1))))
    # Megacore (v7x, 2 TCs): prefer a grid of >= 2 parallel steps, but only if
    # a halved step still carries a full 256-row MXU M pass.
    if _is_v7x() and (B + bb - 1) // bb < 2 and bb > 1 and (bb // 2) * T >= 256:
        bb //= 2
    return bb


def _const_spec(a):
    """Full-array spec for grid-invariant weights; single-buffered since the
    block never changes across grid steps."""
    nd = a.ndim
    idx = lambda b, _nd=nd: (0,) * _nd
    try:
        return pl.BlockSpec(a.shape, idx, pipeline_mode=pl.Buffered(1))
    except (TypeError, AttributeError):
        return pl.BlockSpec(a.shape, idx)


def gpt_block(x, kern_params):
    """x: (B, T, C) f32. kern_params: output of prepare_block_params()."""
    B, T, C = x.shape
    assert C == N_EMBD

    bb = _choose_bb(B, T)
    grid_b = pl.cdiv(B, bb)
    B_pad = grid_b * bb
    if B_pad != B:
        # Pad with zero sequences (LayerNorm/softmax stay finite on zeros);
        # padded rows are sliced off below. Cheaper than running at tiny M.
        x_in = jnp.pad(x, ((0, B_pad - B), (0, 0), (0, 0)))
    else:
        x_in = x

    x_spec = pl.BlockSpec((bb, T, C), lambda b: (b, 0, 0))
    in_specs = [x_spec] + [_const_spec(p) for p in kern_params]
    out_spec = pl.BlockSpec((bb, T, C), lambda b: (b, 0, 0))

    out = pl.pallas_call(
        block_kernel,
        out_shape=jax.ShapeDtypeStruct((B_pad, T, C), jnp.float32),
        grid=(grid_b,),
        in_specs=in_specs,
        out_specs=out_spec,
        compiler_params=pltpu.CompilerParams(
            dimension_semantics=("parallel",),
            vmem_limit_bytes=_vmem_limit_bytes()),
    )(x_in, *kern_params)

    return out[:B] if B_pad != B else out


# ------------------------- pure-JAX reference -------------------------

def gpt_block_ref(x, params):
    """Pure-JAX f32 reference (same math as the PyTorch module, eval mode)."""
    (ln1_g, ln1_b, wqkv, wproj, bproj, ln2_g, ln2_b, w1, b1, w2, b2) = params
    B, T, C = x.shape
    H, D = N_HEAD, HEAD_SIZE

    def ln(a, g, b):
        mu = jnp.mean(a, axis=-1, keepdims=True)
        var = jnp.mean((a - mu) ** 2, axis=-1, keepdims=True)
        return (a - mu) * lax.rsqrt(var + LN_EPS) * g + b

    xn = ln(x, ln1_g, ln1_b)
    q = xn @ wqkv[:, 0 * C:1 * C]
    k = xn @ wqkv[:, 1 * C:2 * C]
    v = xn @ wqkv[:, 2 * C:3 * C]
    q = q.reshape(B, T, H, D).transpose(0, 2, 1, 3)
    k = k.reshape(B, T, H, D).transpose(0, 2, 1, 3)
    v = v.reshape(B, T, H, D).transpose(0, 2, 1, 3)
    wei = jnp.einsum("bhqd,bhkd->bhqk", q, k) * D ** -0.5
    mask = jnp.tril(jnp.ones((T, T), dtype=bool))
    wei = jnp.where(mask, wei, -jnp.inf)
    wei = jax.nn.softmax(wei, axis=-1)
    out = jnp.einsum("bhqk,bhkd->bhqd", wei, v)
    out = out.transpose(0, 2, 1, 3).reshape(B, T, C)
    x1 = x + (out @ wproj + bproj)
    x1n = ln(x1, ln2_g, ln2_b)
    ff = jnp.maximum(x1n @ w1 + b1, 0.0) @ w2 + b2
    return x1 + ff


def init_params(key):
    ks = jax.random.split(key, 8)
    scale = 0.02
    wqkv = scale * jax.random.normal(ks[0], (N_EMBD, 3 * N_EMBD), jnp.float32)
    wproj = scale * jax.random.normal(ks[1], (N_EMBD, N_EMBD), jnp.float32)
    bproj = scale * jax.random.normal(ks[2], (1, N_EMBD), jnp.float32)
    w1 = scale * jax.random.normal(ks[3], (N_EMBD, 4 * N_EMBD), jnp.float32)
    b1 = scale * jax.random.normal(ks[4], (1, 4 * N_EMBD), jnp.float32)
    w2 = scale * jax.random.normal(ks[5], (4 * N_EMBD, N_EMBD), jnp.float32)
    b2 = scale * jax.random.normal(ks[6], (1, N_EMBD), jnp.float32)
    ln1_g = jnp.ones((1, N_EMBD), jnp.float32)
    ln1_b = jnp.zeros((1, N_EMBD), jnp.float32)
    ln2_g = jnp.ones((1, N_EMBD), jnp.float32)
    ln2_b = jnp.zeros((1, N_EMBD), jnp.float32)
    return (ln1_g, ln1_b, wqkv, wproj, bproj, ln2_g, ln2_b, w1, b1, w2, b2)


if __name__ == "__main__":
    key = jax.random.PRNGKey(0)
    k_x, k_p = jax.random.split(key)

    B, T = 2, 8                          # small batch / sequence (T <= block_size)
    x = jax.random.normal(k_x, (B, T, N_EMBD), jnp.float32)
    params = init_params(k_p)

    kern_params = prepare_block_params(params)   # one-time bf16 weight prep
    y = jax.block_until_ready(gpt_block(x, kern_params))
    y_ref = gpt_block_ref(x, params)

    # Tolerance covers bf16 matmul operands + approximate reciprocal vs. the
    # pure-f32 reference.
    assert jnp.allclose(y, y_ref, rtol=2e-2, atol=2e-2), "mismatch vs reference"

    print("KERNEL_OK")
</pallas_src>

<mosaic_0001>
module attributes {stable_mosaic.version = 11 : i64} {
  func.func @block_kernel(%arg0: i32, %arg1: memref<2x8x384xf32, #tpu.memory_space<vmem>>, %arg2: memref<1x384xf32, #tpu.memory_space<vmem>>, %arg3: memref<1x384xf32, #tpu.memory_space<vmem>>, %arg4: memref<384x1152xbf16, #tpu.memory_space<vmem>>, %arg5: memref<384x384xbf16, #tpu.memory_space<vmem>>, %arg6: memref<1x384xf32, #tpu.memory_space<vmem>>, %arg7: memref<1x384xf32, #tpu.memory_space<vmem>>, %arg8: memref<1x384xf32, #tpu.memory_space<vmem>>, %arg9: memref<384x1536xbf16, #tpu.memory_space<vmem>>, %arg10: memref<1x1536xf32, #tpu.memory_space<vmem>>, %arg11: memref<1536x384xbf16, #tpu.memory_space<vmem>>, %arg12: memref<1x384xf32, #tpu.memory_space<vmem>>, %arg13: memref<2x8x384xf32, #tpu.memory_space<vmem>>) attributes {dimension_semantics = [#tpu.dimension_semantics<parallel>], iteration_bounds = array<i64: 1>, scalar_prefetch = 0 : i64, scratch_operands = 0 : i64, tpu.core_type = #tpu.core_type<tc>, window_params = [{transform_indices = @transform_0, window_bounds = array<i64: 2, 8, 384>}, {pipeline_mode = #tpu.pipeline_mode<synchronous>, transform_indices = @transform_1, window_bounds = array<i64: 1, 384>}, {pipeline_mode = #tpu.pipeline_mode<synchronous>, transform_indices = @transform_2, window_bounds = array<i64: 1, 384>}, {pipeline_mode = #tpu.pipeline_mode<synchronous>, transform_indices = @transform_3, window_bounds = array<i64: 384, 1152>}, {pipeline_mode = #tpu.pipeline_mode<synchronous>, transform_indices = @transform_4, window_bounds = array<i64: 384, 384>}, {pipeline_mode = #tpu.pipeline_mode<synchronous>, transform_indices = @transform_5, window_bounds = array<i64: 1, 384>}, {pipeline_mode = #tpu.pipeline_mode<synchronous>, transform_indices = @transform_6, window_bounds = array<i64: 1, 384>}, {pipeline_mode = #tpu.pipeline_mode<synchronous>, transform_indices = @transform_7, window_bounds = array<i64: 1, 384>}, {pipeline_mode = #tpu.pipeline_mode<synchronous>, transform_indices = @transform_8, window_bounds = array<i64: 384, 1536>}, {pipeline_mode = #tpu.pipeline_mode<synchronous>, transform_indices = @transform_9, window_bounds = array<i64: 1, 1536>}, {pipeline_mode = #tpu.pipeline_mode<synchronous>, transform_indices = @transform_10, window_bounds = array<i64: 1536, 384>}, {pipeline_mode = #tpu.pipeline_mode<synchronous>, transform_indices = @transform_11, window_bounds = array<i64: 1, 384>}, {transform_indices = @transform_12, window_bounds = array<i64: 2, 8, 384>}]} {
    %c0 = arith.constant 0 : index
    %c0_0 = arith.constant 0 : index
    %c0_1 = arith.constant 0 : index
    %0 = vector.load %arg1[%c0, %c0_0, %c0_1] : memref<2x8x384xf32, #tpu.memory_space<vmem>>, vector<2x8x384xf32>
    %1 = vector.shape_cast %0 : vector<2x8x384xf32> to vector<16x384xf32>
    %c0_2 = arith.constant 0 : index
    %c0_3 = arith.constant 0 : index
    %2 = vector.load %arg2[%c0_2, %c0_3] : memref<1x384xf32, #tpu.memory_space<vmem>>, vector<1x384xf32>
    %c0_4 = arith.constant 0 : index
    %c0_5 = arith.constant 0 : index
    %3 = vector.load %arg3[%c0_4, %c0_5] : memref<1x384xf32, #tpu.memory_space<vmem>>, vector<1x384xf32>
    %cst = arith.constant dense<0.000000e+00> : vector<16xf32>
    %4 = vector.multi_reduction <add>, %1, %cst [1] : vector<16x384xf32> to vector<16xf32>
    %5 = vector.shape_cast %4 : vector<16xf32> to vector<16x1xf32>
    %cst_6 = arith.constant 3.840000e+02 : f32
    %6 = vector.broadcast %cst_6 : f32 to vector<16x1xf32>
    %7 = arith.divf %5, %6 : vector<16x1xf32>
    %8 = arith.mulf %1, %1 : vector<16x384xf32>
    %cst_7 = arith.constant dense<0.000000e+00> : vector<16xf32>
    %9 = vector.multi_reduction <add>, %8, %cst_7 [1] : vector<16x384xf32> to vector<16xf32>
    %10 = vector.shape_cast %9 : vector<16xf32> to vector<16x1xf32>
    %cst_8 = arith.constant 3.840000e+02 : f32
    %11 = vector.broadcast %cst_8 : f32 to vector<16x1xf32>
    %12 = arith.divf %10, %11 : vector<16x1xf32>
    %13 = arith.mulf %7, %7 : vector<16x1xf32>
    %14 = arith.subf %12, %13 : vector<16x1xf32>
    %15 = vector.broadcast %7 : vector<16x1xf32> to vector<16x384xf32>
    %16 = arith.subf %1, %15 : vector<16x384xf32>
    %cst_9 = arith.constant 9.99999974E-6 : f32
    %17 = vector.broadcast %cst_9 : f32 to vector<16x1xf32>
    %18 = arith.addf %14, %17 : vector<16x1xf32>
    %19 = math.rsqrt %18 : vector<16x1xf32>
    %20 = vector.broadcast %19 : vector<16x1xf32> to vector<16x384xf32>
    %21 = arith.mulf %16, %20 : vector<16x384xf32>
    %22 = vector.broadcast %2 : vector<1x384xf32> to vector<16x384xf32>
    %23 = arith.mulf %21, %22 : vector<16x384xf32>
    %24 = vector.broadcast %3 : vector<1x384xf32> to vector<16x384xf32>
    %25 = arith.addf %23, %24 : vector<16x384xf32>
    %26 = arith.truncf %25 : vector<16x384xf32> to vector<16x384xbf16>
    %c0_10 = arith.constant 0 : index
    %c0_11 = arith.constant 0 : index
    %27 = vector.load %arg4[%c0_10, %c0_11] : memref<384x1152xbf16, #tpu.memory_space<vmem>>, vector<384x1152xbf16>
    %cst_12 = arith.constant dense<0.000000e+00> : vector<16x1152xf32>
    %28 = tpu.matmul %26, %27, %cst_12 {dimension_numbers = #tpu.dot_dimension_numbers<[1], [0], [0], [1], [0, 0, 1, 1], [], []>} : vector<16x384xbf16>, vector<384x1152xbf16>, vector<16x1152xf32> -> vector<16x1152xf32>
    %29 = vector.extract_strided_slice %28 {offsets = [0, 0], sizes = [16, 384], strides = [1, 1]} : vector<16x1152xf32> to vector<16x384xf32>
    %30 = vector.extract_strided_slice %28 {offsets = [0, 384], sizes = [16, 384], strides = [1, 1]} : vector<16x1152xf32> to vector<16x384xf32>
    %31 = vector.extract_strided_slice %28 {offsets = [0, 768], sizes = [16, 384], strides = [1, 1]} : vector<16x1152xf32> to vector<16x384xf32>
    %32 = vector.shape_cast %29 : vector<16x384xf32> to vector<2x8x6x64xf32>
    %33 = tpu.transpose %32, [0, 2, 1, 3] : vector<2x8x6x64xf32> -> vector<2x6x8x64xf32>
    %34 = vector.shape_cast %33 : vector<2x6x8x64xf32> to vector<12x8x64xf32>
    %35 = arith.truncf %34 : vector<12x8x64xf32> to vector<12x8x64xbf16>
    %36 = vector.shape_cast %30 : vector<16x384xf32> to vector<2x8x6x64xf32>
    %37 = tpu.transpose %36, [0, 2, 1, 3] : vector<2x8x6x64xf32> -> vector<2x6x8x64xf32>
    %38 = vector.shape_cast %37 : vector<2x6x8x64xf32> to vector<12x8x64xf32>
    %39 = arith.truncf %38 : vector<12x8x64xf32> to vector<12x8x64xbf16>
    %40 = vector.shape_cast %31 : vector<16x384xf32> to vector<2x8x6x64xf32>
    %41 = tpu.transpose %40, [0, 2, 1, 3] : vector<2x8x6x64xf32> -> vector<2x6x8x64xf32>
    %42 = vector.shape_cast %41 : vector<2x6x8x64xf32> to vector<12x8x64xf32>
    %43 = arith.truncf %42 : vector<12x8x64xf32> to vector<12x8x64xbf16>
    "tpu.trace_start"() <{level = 10 : i32, message = "bqd,bkd->bqk"}> : () -> ()
    %cst_13 = arith.constant dense<0.000000e+00> : vector<12x8x8xf32>
    %44 = tpu.matmul %35, %39, %cst_13 {dimension_numbers = #tpu.dot_dimension_numbers<[2], [2], [1], [1], [0, 0, 0, 1, 1, 1], [0], [0]>} : vector<12x8x64xbf16>, vector<12x8x64xbf16>, vector<12x8x8xf32> -> vector<12x8x8xf32>
    "tpu.trace_stop"() : () -> ()
    %45 = tpu.iota {dimensions = array<i32: 0>} : vector<8x8xi32>
    %46 = tpu.iota {dimensions = array<i32: 1>} : vector<8x8xi32>
    %47 = arith.cmpi sle, %46, %45 : vector<8x8xi32>
    %48 = vector.shape_cast %47 : vector<8x8xi1> to vector<1x8x8xi1>
    %cst_14 = arith.constant 0xFF800000 : f32
    %49 = vector.shape_cast %48 : vector<1x8x8xi1> to vector<1x8x8xi1>
    %50 = vector.broadcast %49 : vector<1x8x8xi1> to vector<12x8x8xi1>
    %51 = vector.broadcast %cst_14 : f32 to vector<12x8x8xf32>
    %52 = arith.select %50, %44, %51 : vector<12x8x8xi1>, vector<12x8x8xf32>
    %cst_15 = arith.constant dense<0xFF800000> : vector<12x8xf32>
    %53 = vector.multi_reduction <maximumf>, %52, %cst_15 [2] : vector<12x8x8xf32> to vector<12x8xf32>
    %54 = vector.shape_cast %53 : vector<12x8xf32> to vector<12x8x1xf32>
    %55 = vector.broadcast %54 : vector<12x8x1xf32> to vector<12x8x8xf32>
    %56 = arith.subf %52, %55 : vector<12x8x8xf32>
    %57 = math.exp %56 : vector<12x8x8xf32>
    %cst_16 = arith.constant dense<0.000000e+00> : vector<12x8xf32>
    %58 = vector.multi_reduction <add>, %57, %cst_16 [2] : vector<12x8x8xf32> to vector<12x8xf32>
    %59 = vector.shape_cast %58 : vector<12x8xf32> to vector<12x8x1xf32>
    %60 = tpu.reciprocal %59 {approx = true} : vector<12x8x1xf32> -> vector<12x8x1xf32>
    %61 = vector.broadcast %60 : vector<12x8x1xf32> to vector<12x8x8xf32>
    %62 = arith.mulf %57, %61 : vector<12x8x8xf32>
    %63 = arith.truncf %62 : vector<12x8x8xf32> to vector<12x8x8xbf16>
    "tpu.trace_start"() <{level = 10 : i32, message = "bqk,bkd->bqd"}> : () -> ()
    %cst_17 = arith.constant dense<0.000000e+00> : vector<12x8x64xf32>
    %64 = tpu.matmul %63, %43, %cst_17 {dimension_numbers = #tpu.dot_dimension_numbers<[2], [1], [1], [2], [0, 0, 0, 1, 1, 2], [0], [0]>} : vector<12x8x8xbf16>, vector<12x8x64xbf16>, vector<12x8x64xf32> -> vector<12x8x64xf32>
    "tpu.trace_stop"() : () -> ()
    %65 = vector.shape_cast %64 : vector<12x8x64xf32> to vector<2x6x8x64xf32>
    %66 = tpu.transpose %65, [0, 2, 1, 3] : vector<2x6x8x64xf32> -> vector<2x8x6x64xf32>
    %67 = vector.shape_cast %66 : vector<2x8x6x64xf32> to vector<16x384xf32>
    %68 = arith.truncf %67 : vector<16x384xf32> to vector<16x384xbf16>
    %c0_18 = arith.constant 0 : index
    %c0_19 = arith.constant 0 : index
    %69 = vector.load %arg5[%c0_18, %c0_19] : memref<384x384xbf16, #tpu.memory_space<vmem>>, vector<384x384xbf16>
    %cst_20 = arith.constant dense<0.000000e+00> : vector<16x384xf32>
    %70 = tpu.matmul %68, %69, %cst_20 {dimension_numbers = #tpu.dot_dimension_numbers<[1], [0], [0], [1], [0, 0, 1, 1], [], []>} : vector<16x384xbf16>, vector<384x384xbf16>, vector<16x384xf32> -> vector<16x384xf32>
    %c0_21 = arith.constant 0 : index
    %c0_22 = arith.constant 0 : index
    %71 = vector.load %arg6[%c0_21, %c0_22] : memref<1x384xf32, #tpu.memory_space<vmem>>, vector<1x384xf32>
    %72 = vector.broadcast %71 : vector<1x384xf32> to vector<16x384xf32>
    %73 = arith.addf %70, %72 : vector<16x384xf32>
    %74 = arith.addf %1, %73 : vector<16x384xf32>
    %c0_23 = arith.constant 0 : index
    %c0_24 = arith.constant 0 : index
    %75 = vector.load %arg7[%c0_23, %c0_24] : memref<1x384xf32, #tpu.memory_space<vmem>>, vector<1x384xf32>
    %c0_25 = arith.constant 0 : index
    %c0_26 = arith.constant 0 : index
    %76 = vector.load %arg8[%c0_25, %c0_26] : memref<1x384xf32, #tpu.memory_space<vmem>>, vector<1x384xf32>
    %cst_27 = arith.constant dense<0.000000e+00> : vector<16xf32>
    %77 = vector.multi_reduction <add>, %74, %cst_27 [1] : vector<16x384xf32> to vector<16xf32>
    %78 = vector.shape_cast %77 : vector<16xf32> to vector<16x1xf32>
    %cst_28 = arith.constant 3.840000e+02 : f32
    %79 = vector.broadcast %cst_28 : f32 to vector<16x1xf32>
    %80 = arith.divf %78, %79 : vector<16x1xf32>
    %81 = arith.mulf %74, %74 : vector<16x384xf32>
    %cst_29 = arith.constant dense<0.000000e+00> : vector<16xf32>
    %82 = vector.multi_reduction <add>, %81, %cst_29 [1] : vector<16x384xf32> to vector<16xf32>
    %83 = vector.shape_cast %82 : vector<16xf32> to vector<16x1xf32>
    %cst_30 = arith.constant 3.840000e+02 : f32
    %84 = vector.broadcast %cst_30 : f32 to vector<16x1xf32>
    %85 = arith.divf %83, %84 : vector<16x1xf32>
    %86 = arith.mulf %80, %80 : vector<16x1xf32>
    %87 = arith.subf %85, %86 : vector<16x1xf32>
    %88 = vector.broadcast %80 : vector<16x1xf32> to vector<16x384xf32>
    %89 = arith.subf %74, %88 : vector<16x384xf32>
    %cst_31 = arith.constant 9.99999974E-6 : f32
    %90 = vector.broadcast %cst_31 : f32 to vector<16x1xf32>
    %91 = arith.addf %87, %90 : vector<16x1xf32>
    %92 = math.rsqrt %91 : vector<16x1xf32>
    %93 = vector.broadcast %92 : vector<16x1xf32> to vector<16x384xf32>
    %94 = arith.mulf %89, %93 : vector<16x384xf32>
    %95 = vector.broadcast %75 : vector<1x384xf32> to vector<16x384xf32>
    %96 = arith.mulf %94, %95 : vector<16x384xf32>
    %97 = vector.broadcast %76 : vector<1x384xf32> to vector<16x384xf32>
    %98 = arith.addf %96, %97 : vector<16x384xf32>
    %99 = arith.truncf %98 : vector<16x384xf32> to vector<16x384xbf16>
    %c0_32 = arith.constant 0 : index
    %c0_33 = arith.constant 0 : index
    %100 = vector.load %arg9[%c0_32, %c0_33] : memref<384x1536xbf16, #tpu.memory_space<vmem>>, vector<384x1536xbf16>
    %cst_34 = arith.constant dense<0.000000e+00> : vector<16x1536xf32>
    %101 = tpu.matmul %99, %100, %cst_34 {dimension_numbers = #tpu.dot_dimension_numbers<[1], [0], [0], [1], [0, 0, 1, 1], [], []>} : vector<16x384xbf16>, vector<384x1536xbf16>, vector<16x1536xf32> -> vector<16x1536xf32>
    %c0_35 = arith.constant 0 : index
    %c0_36 = arith.constant 0 : index
    %102 = vector.load %arg10[%c0_35, %c0_36] : memref<1x1536xf32, #tpu.memory_space<vmem>>, vector<1x1536xf32>
    %103 = vector.broadcast %102 : vector<1x1536xf32> to vector<16x1536xf32>
    %104 = arith.addf %101, %103 : vector<16x1536xf32>
    %cst_37 = arith.constant 0.000000e+00 : f32
    %105 = vector.broadcast %cst_37 : f32 to vector<16x1536xf32>
    %106 = arith.maximumf %104, %105 : vector<16x1536xf32>
    %107 = arith.truncf %106 : vector<16x1536xf32> to vector<16x1536xbf16>
    %c0_38 = arith.constant 0 : index
    %c0_39 = arith.constant 0 : index
    %108 = vector.load %arg11[%c0_38, %c0_39] : memref<1536x384xbf16, #tpu.memory_space<vmem>>, vector<1536x384xbf16>
    %cst_40 = arith.constant dense<0.000000e+00> : vector<16x384xf32>
    %109 = tpu.matmul %107, %108, %cst_40 {dimension_numbers = #tpu.dot_dimension_numbers<[1], [0], [0], [1], [0, 0, 1, 1], [], []>} : vector<16x1536xbf16>, vector<1536x384xbf16>, vector<16x384xf32> -> vector<16x384xf32>
    %c0_41 = arith.constant 0 : index
    %c0_42 = arith.constant 0 : index
    %110 = vector.load %arg12[%c0_41, %c0_42] : memref<1x384xf32, #tpu.memory_space<vmem>>, vector<1x384xf32>
    %111 = vector.broadcast %110 : vector<1x384xf32> to vector<16x384xf32>
    %112 = arith.addf %109, %111 : vector<16x384xf32>
    %113 = arith.addf %74, %112 : vector<16x384xf32>
    %114 = vector.shape_cast %113 : vector<16x384xf32> to vector<2x8x384xf32>
    %c0_43 = arith.constant 0 : index
    %c0_44 = arith.constant 0 : index
    %c0_45 = arith.constant 0 : index
    %115 = vector.load %arg13[%c0_43, %c0_44, %c0_45] : memref<2x8x384xf32, #tpu.memory_space<vmem>>, vector<2x8x384xf32>
    tpu.vector_store %arg13[%c0_43, %c0_44, %c0_45], %114 {strides = array<i32>} : memref<2x8x384xf32, #tpu.memory_space<vmem>>, vector<2x8x384xf32>,
    return
  }
  func.func @transform_0(%arg0: i32) -> (i32, i32, i32) {
    %c0_i32 = arith.constant 0 : i32
    %c0_i32_0 = arith.constant 0 : i32
    %c0_i32_1 = arith.constant 0 : i32
    return %arg0, %c0_i32, %c0_i32_0 : i32, i32, i32
  }
  func.func @transform_1(%arg0: i32) -> (i32, i32) {
    %c0_i32 = arith.constant 0 : i32
    %c0_i32_0 = arith.constant 0 : i32
    %c0_i32_1 = arith.constant 0 : i32
    return %c0_i32, %c0_i32_0 : i32, i32
  }
  func.func @transform_2(%arg0: i32) -> (i32, i32) {
    %c0_i32 = arith.constant 0 : i32
    %c0_i32_0 = arith.constant 0 : i32
    %c0_i32_1 = arith.constant 0 : i32
    return %c0_i32, %c0_i32_0 : i32, i32
  }
  func.func @transform_3(%arg0: i32) -> (i32, i32) {
    %c0_i32 = arith.constant 0 : i32
    %c0_i32_0 = arith.constant 0 : i32
    %c0_i32_1 = arith.constant 0 : i32
    return %c0_i32, %c0_i32_0 : i32, i32
  }
  func.func @transform_4(%arg0: i32) -> (i32, i32) {
    %c0_i32 = arith.constant 0 : i32
    %c0_i32_0 = arith.constant 0 : i32
    %c0_i32_1 = arith.constant 0 : i32
    return %c0_i32, %c0_i32_0 : i32, i32
  }
  func.func @transform_5(%arg0: i32) -> (i32, i32) {
    %c0_i32 = arith.constant 0 : i32
    %c0_i32_0 = arith.constant 0 : i32
    %c0_i32_1 = arith.constant 0 : i32
    return %c0_i32, %c0_i32_0 : i32, i32
  }
  func.func @transform_6(%arg0: i32) -> (i32, i32) {
    %c0_i32 = arith.constant 0 : i32
    %c0_i32_0 = arith.constant 0 : i32
    %c0_i32_1 = arith.constant 0 : i32
    return %c0_i32, %c0_i32_0 : i32, i32
  }
  func.func @transform_7(%arg0: i32) -> (i32, i32) {
    %c0_i32 = arith.constant 0 : i32
    %c0_i32_0 = arith.constant 0 : i32
    %c0_i32_1 = arith.constant 0 : i32
    return %c0_i32, %c0_i32_0 : i32, i32
  }
  func.func @transform_8(%arg0: i32) -> (i32, i32) {
    %c0_i32 = arith.constant 0 : i32
    %c0_i32_0 = arith.constant 0 : i32
    %c0_i32_1 = arith.constant 0 : i32
    return %c0_i32, %c0_i32_0 : i32, i32
  }
  func.func @transform_9(%arg0: i32) -> (i32, i32) {
    %c0_i32 = arith.constant 0 : i32
    %c0_i32_0 = arith.constant 0 : i32
    %c0_i32_1 = arith.constant 0 : i32
    return %c0_i32, %c0_i32_0 : i32, i32
  }
  func.func @transform_10(%arg0: i32) -> (i32, i32) {
    %c0_i32 = arith.constant 0 : i32
    %c0_i32_0 = arith.constant 0 : i32
    %c0_i32_1 = arith.constant 0 : i32
    return %c0_i32, %c0_i32_0 : i32, i32
  }
  func.func @transform_11(%arg0: i32) -> (i32, i32) {
    %c0_i32 = arith.constant 0 : i32
    %c0_i32_0 = arith.constant 0 : i32
    %c0_i32_1 = arith.constant 0 : i32
    return %c0_i32, %c0_i32_0 : i32, i32
  }
  func.func @transform_12(%arg0: i32) -> (i32, i32, i32) {
    %c0_i32 = arith.constant 0 : i32
    %c0_i32_0 = arith.constant 0 : i32
    %c0_i32_1 = arith.constant 0 : i32
    return %arg0, %c0_i32, %c0_i32_0 : i32, i32, i32
  }
}

</mosaic_0001>

<bundles_post_ra>
// kernel: tpu_custom_call.1
= control target key start
LH: loop header
LB: loop body
LE: loop exit
PB: predicated region body
PF: predicated region fallthrough
CT: control target
= control target key end

     0   :  { %17 = vsyncpa [#allocation3], 0  ;;  %s16714_s0 = inlined_call_operand.hbm [shape: f32[2,8,384], index: 0, kind: input, shape index: {}]   ;;  %s16715_s1 = inlined_call_operand.hbm [shape: f32[1,384], index: 1, kind: input, shape index: {}]   ;;  %s16716_s2 = inlined_call_operand.hbm [shape: f32[1,384], index: 2, kind: input, shape index: {}]   ;;  %s16717_s3 = inlined_call_operand.hbm [shape: bf16[384,1152], index: 3, kind: input, shape index: {}]   ;;  %s16718_s4 = inlined_call_operand.hbm [shape: bf16[384,384], index: 4, kind: input, shape index: {}]   ;;  %s16719_s5 = inlined_call_operand.hbm [shape: f32[1,384], index: 5, kind: input, shape index: {}]   ;;  %s16720_s6 = inlined_call_operand.hbm [shape: f32[1,384], index: 6, kind: input, shape index: {}]   ;;  %s16721_s7 = inlined_call_operand.hbm [shape: f32[1,384], index: 7, kind: input, shape index: {}]   ;;  %s16722_s8 = inlined_call_operand.hbm [shape: bf16[384,1536], index: 8, kind: input, shape index: {}]   ;;  %s16723_s9 = inlined_call_operand.hbm [shape: f32[1,1536], index: 9, kind: input, shape index: {}]   ;;  %s16724_s10 = inlined_call_operand.hbm [shape: bf16[1536,384], index: 10, kind: input, shape index: {}]   ;;  %s16725_s11 = inlined_call_operand.hbm [shape: f32[1,384], index: 11, kind: input, shape index: {}]   ;;  %s16726_s12 = inlined_call_operand.hbm [shape: f32[2,8,384], index: 12, kind: output, shape index: {}]  }
   0x1   :  { %18 = vsyncpa [#allocation6], 0 }
   0x2   :  { %19 = vsyncpa [#allocation9], 0 }
   0x3   :  { %20 = vsyncpa [#allocation12], 0 }
   0x4   :  { %21 = vsyncpa [#allocation15], 0 }
   0x5   :  { %22 = vsyncpa [#allocation18], 0 }
   0x6   :  { %23 = vsyncpa [#allocation21], 0  ;;  %s43_s23 = sshll.u32 %s16715_s1, 4  ;;  %s44_s23 = int_to_ptr.hbm [resolvable:$true] %s43_s23 }
   0x7   :  { %24 = vsyncpa [#allocation4], 0  ;;  %s14743_s24 = smov [#allocation5]   ;;  %s64_s28 = sshll.u32 %s16717_s3, 4  ;;  %s65_s28 = int_to_ptr.hbm [resolvable:$true] %s64_s28 }
   0x8   :  { %s45_s25 = sshll.u32 %s14743_s24, 4  ;;  %s14744_s29 = smov [#allocation8]   ;;  %s46_s25 = int_to_ptr.vmem [resolvable:$true] %s45_s25 }
   0x9   :  { %48 = dma.hbm_to_vmem [thread:$0]  %s44_s23, 48, %s46_s25, [#allocation6]  }
   0xa   :  { %s66_s30 = sshll.u32 %s14744_s29, 4  ;;  %s14745_s13 = smov 576   ;;  %s67_s30 = int_to_ptr.vmem [resolvable:$true] %s66_s30 }
   0xb   :  { %s14746_s14 = smov 36   ;;  %s91_s1 = sshll.u32 %s16719_s5, 4  ;;  %s92_s1 = int_to_ptr.hbm [resolvable:$true] %s91_s1 }
   0xc   :  { %72 = dma.hbm_to_vmem [thread:$0]  %s65_s28, 27648, %s67_s30, [#allocation9], %s14745_s13, %s14745_s13, %s14746_s14  }
   0xd   :  { %s14747_s17 = smov [#allocation11]   ;;  %s113_s3 = sshll.u32 %s16721_s7, 4  ;;  %s114_s3 = int_to_ptr.hbm [resolvable:$true] %s113_s3 }
   0xe   :  { %s93_s18 = sshll.u32 %s14747_s17, 4  ;;  %s14748_s21 = smov [#allocation14]   ;;  %s94_s18 = int_to_ptr.vmem [resolvable:$true] %s93_s18 }
   0xf   :  { %96 = dma.hbm_to_vmem [thread:$0]  %s92_s1, 48, %s94_s18, [#allocation12]  }
  0x10   :  { %s115_s22 = sshll.u32 %s14748_s21, 4  ;;  %s137_s25 = sshll.u32 %s16723_s9, 4  ;;  %s116_s22 = int_to_ptr.vmem [resolvable:$true] %s115_s22  ;;  %s138_s25 = int_to_ptr.hbm [resolvable:$true] %s137_s25 }
  0x11   :  { %118 = dma.hbm_to_vmem [thread:$0]  %s114_s3, 48, %s116_s22, [#allocation15]  }
  0x12   :  { %s29_s27 = sshll.u32 %s16714_s0, 4  ;;  %s14749_s28 = smov [#allocation17]   ;;  %s30_s27 = int_to_ptr.hbm [resolvable:$true] %s29_s27 }
  0x13   :  { %s139_s29 = sshll.u32 %s14749_s28, 4  ;;  %s14750_s7 = smov [#allocation2]   ;;  %s140_s29 = int_to_ptr.vmem [resolvable:$true] %s139_s29 }
  0x14   :  { %142 = dma.hbm_to_vmem [thread:$0]  %s138_s25, 192, %s140_s29, [#allocation18]  }
  0x15   :  { %s31_s30 = sshll.u32 %s14750_s7, 4  ;;  %s14751_s13 = smov 384   ;;  %s32_s30 = int_to_ptr.vmem [resolvable:$true] %s31_s30 }
  0x16   :  { %s14752_s14 = smov 24   ;;  %s54_s16 = sshll.u32 %s16716_s2, 4  ;;  %s55_s16 = int_to_ptr.hbm [resolvable:$true] %s54_s16 }
  0x17   :  { %37 = dma.hbm_to_vmem [thread:$0]  %s30_s27, 768, %s32_s30, [#allocation3], %s14751_s13, %s14751_s13, %s14752_s14  }
  0x18   :  { %s14753_s0 = smov [#allocation7]   ;;  %s77_s19 = sshll.u32 %s16718_s4, 4  ;;  %s78_s19 = int_to_ptr.hbm [resolvable:$true] %s77_s19 }
  0x19   :  { %s56_s1 = sshll.u32 %s14753_s0, 4  ;;  %s14754_s20 = smov [#allocation10]   ;;  %s57_s1 = int_to_ptr.vmem [resolvable:$true] %s56_s1 }
  0x1a   :  { %59 = dma.hbm_to_vmem [thread:$0]  %s55_s16, 48, %s57_s1, [#allocation6]  }
  0x1b   :  { %s79_s3 = sshll.u32 %s14754_s20, 4  ;;  %s14755_s21 = smov 192   ;;  %s80_s3 = int_to_ptr.vmem [resolvable:$true] %s79_s3 }
  0x1c   :  { %s14756_s22 = smov 12   ;;  %s102_s2 = sshll.u32 %s16720_s6, 4  ;;  %s103_s2 = int_to_ptr.hbm [resolvable:$true] %s102_s2 }
  0x1d   :  { %85 = dma.hbm_to_vmem [thread:$0]  %s78_s19, 9216, %s80_s3, [#allocation9], %s14755_s21, %s14755_s21, %s14756_s22  }
  0x1e   :  { %s14757_s25 = smov [#allocation13]   ;;  %s123_s4 = sshll.u32 %s16722_s8, 4  ;;  %s124_s4 = int_to_ptr.hbm [resolvable:$true] %s123_s4 }
  0x1f   :  { %s104_s5 = sshll.u32 %s14757_s25, 4  ;;  %s14758_s28 = smov [#allocation16]   ;;  %s105_s5 = int_to_ptr.vmem [resolvable:$true] %s104_s5 }
  0x20   :  { %107 = dma.hbm_to_vmem [thread:$0]  %s103_s2, 48, %s105_s5, [#allocation12]  }
  0x21   :  { %s125_s29 = sshll.u32 %s14758_s28, 4  ;;  %s14759_s7 = smov 768   ;;  %s126_s29 = int_to_ptr.vmem [resolvable:$true] %s125_s29 }
  0x22   :  { %s14760_s30 = smov 48   ;;  %s147_s6 = sshll.u32 %s16724_s10, 4  ;;  %s148_s6 = int_to_ptr.hbm [resolvable:$true] %s147_s6 }
  0x23   :  { %131 = dma.hbm_to_vmem [thread:$0]  %s124_s4, 36864, %s126_s29, [#allocation15], %s14759_s7, %s14759_s7, %s14760_s30  }
  0x24   :  { %s14761_s16 = smov [#allocation19]   ;;  %s161_s8 = sshll.u32 %s16725_s11, 4  ;;  %s162_s8 = int_to_ptr.hbm [resolvable:$true] %s161_s8 }
  0x25   :  { %s149_s0 = sshll.u32 %s14761_s16, 4  ;;  %s14762_s18 = smov [#allocation20]   ;;  %s150_s0 = int_to_ptr.vmem [resolvable:$true] %s149_s0 }
  0x26   :  { %155 = dma.hbm_to_vmem [thread:$0]  %s148_s6, 36864, %s150_s0, [#allocation18], %s14755_s21, %s14755_s21, %s14756_s22  }
  0x27   :  { %s163_s19 = sshll.u32 %s14762_s18, 4  ;;  %s164_s19 = int_to_ptr.vmem [resolvable:$true] %s163_s19 }
  0x28   :  { %166 = dma.hbm_to_vmem [thread:$0]  %s162_s8, 48, %s164_s19, [#allocation21]  }
  0x29   :  { %14727 = dma.done.wait [#allocation3], 768  }
  0x2a   :  { %14728 = vsyncadd [#allocation3], 4294966528 }
  0x2b   :  { %14729 = dma.done.wait [#allocation6], 96  }
  0x2c   :  { %14730 = vsyncadd [#allocation6], 4294967200 }
  0x2d   :  { %14731 = dma.done.wait [#allocation9], 36864  }
  0x2e   :  { %14732 = vsyncadd [#allocation9], 4294930432 }
  0x2f   :  { %14733 = dma.done.wait [#allocation12], 96  }
  0x30   :  { %14734 = vsyncadd [#allocation12], 4294967200 }
  0x31   :  { %14735 = dma.done.wait [#allocation15], 36912  }
  0x32   :  { %14736 = vsyncadd [#allocation15], 4294930384 }
  0x33   :  { %14737 = dma.done.wait [#allocation18], 37056  }
  0x34   :  { %14738 = vsyncadd [#allocation18], 4294930240 }
  0x35   :  { %14739 = dma.done.wait [#allocation21], 48  }
  0x36   :  { %14740 = vsyncadd [#allocation21], 4294967248  ;;  %v14872_v0 = vld [vmem:[#allocation2] sm:$0xff]  ;;  %v14874_v1 = vld [vmem:[#allocation2 + $0x8] sm:$0xff]  ;;  %vm2071_vm7 = vcmask 1047556   ;;  %s14764_s10 = smov 64  }
  0x37   :  { %v14876_v2 = vld [vmem:[#allocation2 + $0x10] sm:$0xff]  ;;  %v224_v3 = vadd.f32 %v14874_v1, %v14872_v0  ;;  %v241_v4 = vmul.f32 %v14872_v0, %v14872_v0  ;;  %v242_v5 = vmul.f32 %v14874_v1, %v14874_v1  ;;  %v14886_v7 = vld [vmem:[#allocation2 + $0x18] sm:$0xff]  ;;  %v14888_v8 = vld [vmem:[#allocation2 + $0x20] sm:$0xff]  ;;  %vm3379_vm8 = vcmask 523264   ;;  %s14767_s11 = smov [#allocation22]   ;;  %s9903_s22 = sshll.u32 %s16726_s12, 4  ;;  %s9904_s22 = int_to_ptr.hbm [resolvable:$true] %s9903_s22 }
  0x38   :  { %v243_v6 = vmul.f32 %v14876_v2, %v14876_v2  ;;  %v14890_v9 = vld [vmem:[#allocation2 + $0x28] sm:$0xff]  ;;  %v244_v10 = vmul.f32 %v14886_v7, %v14886_v7  ;;  %v10176_v11 = vld [vmem:[#allocation8 + $0x1f8] sm:$0xf]  ;;  %v13469_v12 = vld [vmem:[#allocation8 + $0x218] sm:$0xf0]  ;;  %v245_v16 = vmul.f32 %v14888_v8, %v14888_v8  ;;  %v228_v27 = vadd.f32 %v14888_v8, %v14886_v7  ;;  %s9901_s20 = sshll.u32 %s14767_s11, 4  ;;  %s9902_s20 = int_to_ptr.vmem [resolvable:$true] %s9901_s20 }
  0x39   :  { %v10464_v13 = vld [vmem:[#allocation8 + $0x438] sm:$0xf]  ;;  %v225_v14 = vadd.f32 %v224_v3, %v14876_v2  ;;  %v247_v15 = vadd.f32 %v242_v5, %v241_v4  ;;  %v10177_v17 = vor.u32 %v13469_v12, %v10176_v11  ;;  %v13541_v18 = vld [vmem:[#allocation8 + $0x458] sm:$0xf0]  ;;  %v10178_v24 = vld [vmem:[#allocation8 + $0x21c] sm:$0xf0]  ;;  %v246_v37 = vmul.f32 %v14890_v9, %v14890_v9 }
  0x3a   :  { %v10752_v19 = vld [vmem:[#allocation8 + $0x678] sm:$0xf]  ;;  %v13613_v20 = vld [vmem:[#allocation8 + $0x698] sm:$0xf0]  ;;  %v10465_v21 = vor.u32 %v13541_v18, %v10464_v13  ;;  %v10140_v25 = vld [vmem:[#allocation8 + $0x1b0] sm:$0xf]  ;;  %v251_v38 = vadd.f32 %v245_v16, %v244_v10  ;;  %v229_v47 = vadd.f32 %v228_v27, %v14890_v9 }
  0x3b   :  { %v10753_v22 = vor.u32 %v13613_v20, %v10752_v19  ;;  %v13465_v23 = vld [vmem:[#allocation8 + $0x1fc] sm:$0xf]  ;;  %226 = vadd.xlane.f32.xlu0 %v225_v14  ;;  %v248_v26 = vadd.f32 %v247_v15, %v243_v6  ;;  %1668 = vmatpush.bf16.msra.mxu0 %v10177_v17  ;;  %v13460_v29 = vld [vmem:[#allocation8 + $0x1d0] sm:$0xf0]  ;;  %v10428_v30 = vld [vmem:[#allocation8 + $0x3f0] sm:$0xf] }
  0x3c   :  { %v10181_v28 = vor.u32 %v13465_v23, %v10178_v24  ;;  %v13532_v31 = vld [vmem:[#allocation8 + $0x410] sm:$0xf0]  ;;  %1682 = vmatpush.bf16.msra.mxu1 %v10465_v21  ;;  %v10141_v32 = vor.u32 %v13460_v29, %v10140_v25  ;;  %v10716_v34 = vld [vmem:[#allocation8 + $0x630] sm:$0xf]  ;;  %v10142_v40 = vld [vmem:[#allocation8 + $0x1d4] sm:$0xf0]  ;;  %v252_v57 = vadd.f32 %v251_v38, %v246_v37 }
  0x3d   :  { %1696 = vmatpush.bf16.msra.mxu2 %v10753_v22  ;;  %v10429_v33 = vor.u32 %v13532_v31, %v10428_v30  ;;  %v13604_v35 = vld [vmem:[#allocation8 + $0x650] sm:$0xf0]  ;;  %249 = vadd.xlane.f32.xlu1 %v248_v26  ;;  %v10104_v41 = vld [vmem:[#allocation8 + $0x168] sm:$0xf]  ;;  %v13451_v42 = vld [vmem:[#allocation8 + $0x188] sm:$0xf0] }
  0x3e   :  { %v13456_v36 = vld [vmem:[#allocation8 + $0x1b4] sm:$0xf]  ;;  %1710 = vmatpush.bf16.msra.mxu3 %v10181_v28  ;;  %v10717_v39 = vor.u32 %v13604_v35, %v10716_v34  ;;  %v10392_v44 = vld [vmem:[#allocation8 + $0x3a8] sm:$0xf]  ;;  %v13523_v45 = vld [vmem:[#allocation8 + $0x3c8] sm:$0xf0]  ;;  %v10105_v48 = vor.u32 %v13451_v42, %v10104_v41 }
  0x3f   :  { %v10145_v43 = vor.u32 %v13456_v36, %v10142_v40  ;;  %v10680_v46 = vld [vmem:[#allocation8 + $0x5e8] sm:$0xf]  ;;  %1669 = vmatpush.bf16.msra.mxu0 %v10141_v32  ;;  %v13595_v49 = vld [vmem:[#allocation8 + $0x608] sm:$0xf0]  ;;  %v10106_v51 = vld [vmem:[#allocation8 + $0x18c] sm:$0xf0]  ;;  %v10393_v52 = vor.u32 %v13523_v45, %v10392_v44 }
  0x40   :  { %v13447_v50 = vld [vmem:[#allocation8 + $0x16c] sm:$0xf]  ;;  %1683 = vmatpush.bf16.msra.mxu1 %v10429_v33  ;;  %v10681_v53 = vor.u32 %v13595_v49, %v10680_v46  ;;  %v10068_v54 = vld [vmem:[#allocation8 + $0x120] sm:$0xf]  ;;  %v13442_v55 = vld [vmem:[#allocation8 + $0x140] sm:$0xf0] }
  0x41   :  { %1697 = vmatpush.bf16.msra.mxu2 %v10717_v39  ;;  %v10356_v56 = vld [vmem:[#allocation8 + $0x360] sm:$0xf]  ;;  %v10109_v58 = vor.u32 %v13447_v50, %v10106_v51  ;;  %v13514_v59 = vld [vmem:[#allocation8 + $0x380] sm:$0xf0]  ;;  %v10070_v63 = vld [vmem:[#allocation8 + $0x144] sm:$0xf0]  ;;  %v10069_v3 = vor.u32 %v13442_v55, %v10068_v54 }
  0x42   :  { %1711 = vmatpush.bf16.msra.mxu3 %v10145_v43  ;;  %v10644_v60 = vld [vmem:[#allocation8 + $0x5a0] sm:$0xf]  ;;  %v13586_v61 = vld [vmem:[#allocation8 + $0x5c0] sm:$0xf0]  ;;  %v10357_v4 = vor.u32 %v13514_v59, %v10356_v56  ;;  %v14763_v10 = vmov 384.0   ;;  %vm3627_vm10 = vcmask 64512  }
  0x43   :  { %v13438_v62 = vld [vmem:[#allocation8 + $0x124] sm:$0xf]  ;;  %230 = vadd.xlane.f32.xlu0 %v229_v47  ;;  %1670 = vmatpush.bf16.msra.mxu0 %v10105_v48  ;;  %v10645_v5 = vor.u32 %v13586_v61, %v10644_v60  ;;  %14351 = vrcp.f32 %v14763_v10  ;;  %v10032_v11 = vld [vmem:[#allocation8 + $0xd8] sm:$0xf]  ;;  %v13433_v12 = vld [vmem:[#allocation8 + $0xf8] sm:$0xf0] }
  0x44   :  { %1684 = vmatpush.bf16.msra.mxu1 %v10393_v52  ;;  %v10073_v6 = vor.u32 %v13438_v62, %v10070_v63  ;;  %v10320_v13 = vld [vmem:[#allocation8 + $0x318] sm:$0xf]  ;;  %v10033_v14 = vor.u32 %v13433_v12, %v10032_v11  ;;  %v13505_v15 = vld [vmem:[#allocation8 + $0x338] sm:$0xf0]  ;;  %v10034_v21 = vld [vmem:[#allocation8 + $0xfc] sm:$0xf0] }
  0x45   :  { %1698 = vmatpush.bf16.msra.mxu2 %v10681_v53  ;;  %253 = vadd.xlane.f32.xlu1 %v252_v57  ;;  %v10608_v16 = vld [vmem:[#allocation8 + $0x558] sm:$0xf]  ;;  %v13577_v17 = vld [vmem:[#allocation8 + $0x578] sm:$0xf0]  ;;  %v10321_v18 = vor.u32 %v13505_v15, %v10320_v13  ;;  %v9996_v24 = vld [vmem:[#allocation8 + $0x90] sm:$0xf] }
  0x46   :  { %1712 = vmatpush.bf16.msra.mxu3 %v10109_v58  ;;  %v10609_v19 = vor.u32 %v13577_v17, %v10608_v16  ;;  %v13429_v20 = vld [vmem:[#allocation8 + $0xdc] sm:$0xf]  ;;  %v13424_v25 = vld [vmem:[#allocation8 + $0xb0] sm:$0xf0]  ;;  %v10284_v28 = vld [vmem:[#allocation8 + $0x2d0] sm:$0xf] }
  0x47   :  { %1671 = vmatpush.bf16.msra.mxu0 %v10069_v3  ;;  %v10037_v22 = vor.u32 %v13429_v20, %v10034_v21  ;;  %v9997_v27 = vor.u32 %v13424_v25, %v9996_v24  ;;  %v13496_v29 = vld [vmem:[#allocation8 + $0x2f0] sm:$0xf0]  ;;  %v10572_v31 = vld [vmem:[#allocation8 + $0x510] sm:$0xf]  ;;  %v9998_v35 = vld [vmem:[#allocation8 + $0xb4] sm:$0xf0] }
  0x48   :  { %1685 = vmatpush.bf16.msra.mxu1 %v10357_v4  ;;  %v10285_v30 = vor.u32 %v13496_v29, %v10284_v28  ;;  %v13568_v32 = vld [vmem:[#allocation8 + $0x530] sm:$0xf0]  ;;  %v9960_v36 = vld [vmem:[#allocation8 + $0x48] sm:$0xf]  ;;  %v13415_v37 = vld [vmem:[#allocation8 + $0x68] sm:$0xf0] }
  0x49   :  { %1699 = vmatpush.bf16.msra.mxu2 %v10645_v5  ;;  %v14902_v23 = vpop.eup %14351  ;;  %v13420_v33 = vld [vmem:[#allocation8 + $0x94] sm:$0xf]  ;;  %v10573_v34 = vor.u32 %v13568_v32, %v10572_v31  ;;  %v9961_v39 = vor.u32 %v13415_v37, %v9960_v36  ;;  %v10248_v40 = vld [vmem:[#allocation8 + $0x288] sm:$0xf]  ;;  %v13487_v41 = vld [vmem:[#allocation8 + $0x2a8] sm:$0xf0] }
  0x4a   :  { %1713 = vmatpush.bf16.msra.mxu3 %v10073_v6  ;;  %v14905_v26 = vmul.f32 384.0, %v14902_v23  ;;  %v10001_v38 = vor.u32 %v13420_v33, %v9998_v35  ;;  %v10536_v42 = vld [vmem:[#allocation8 + $0x4c8] sm:$0xf]  ;;  %v10249_v43 = vor.u32 %v13487_v41, %v10248_v40  ;;  %v13559_v44 = vld [vmem:[#allocation8 + $0x4e8] sm:$0xf0]  ;;  %vm237_vm0 = vweird.f32 %v14902_v23 }
  0x4b   :  { %1672 = vmatpush.bf16.msra.mxu0 %v10033_v14  ;;  %v13411_v45 = vld [vmem:[#allocation8 + $0x4c] sm:$0xf]  ;;  %v9962_v46 = vld [vmem:[#allocation8 + $0x6c] sm:$0xf0]  ;;  %v10537_v48 = vor.u32 %v13559_v44, %v10536_v42  ;;  %v9924_v50 = vld [vmem:[#allocation8] sm:$0xf] }
  0x4c   :  { %1686 = vmatpush.bf16.msra.mxu1 %v10321_v18  ;;  %v234_v47 = vsub.f32 1.0, %v14905_v26  ;;  %v9965_v49 = vor.u32 %v13411_v45, %v9962_v46  ;;  %v13406_v51 = vld [vmem:[#allocation8 + $0x20] sm:$0xf0]  ;;  %v10212_v52 = vld [vmem:[#allocation8 + $0x240] sm:$0xf]  ;;  %vm3775_vm11 = vcmask 1043456  }
  0x4d   :  { %1700 = vmatpush.bf16.msra.mxu2 %v10609_v19  ;;  %v9925_v53 = vor.u32 %v13406_v51, %v9924_v50  ;;  %v13478_v54 = vld [vmem:[#allocation8 + $0x260] sm:$0xf0]  ;;  %v10500_v55 = vld [vmem:[#allocation8 + $0x480] sm:$0xf]  ;;  %v9926_v60 = vld [vmem:[#allocation8 + $0x24] sm:$0xf0] }
  0x4e   :  { %1714 = vmatpush.bf16.msra.mxu3 %v10037_v22  ;;  %v13550_v56 = vld [vmem:[#allocation8 + $0x4a0] sm:$0xf0]  ;;  %v10213_v57 = vor.u32 %v13478_v54, %v10212_v52  ;;  %v13537_v61 = vld [vmem:[#allocation8 + $0x43c] sm:$0xf]  ;;  %v10466_v63 = vld [vmem:[#allocation8 + $0x45c] sm:$0xf0]  ;;  %v235_v36 = vmul.f32 %v14902_v23, %v234_v47 }
  0x4f   :  { %1673 = vmatpush.bf16.msra.mxu0 %v9997_v27  ;;  %v10501_v58 = vor.u32 %v13550_v56, %v10500_v55  ;;  %v13402_v59 = vld [vmem:[#allocation8 + $0x4] sm:$0xf]  ;;  %v13609_v3 = vld [vmem:[#allocation8 + $0x67c] sm:$0xf]  ;;  %v10754_v4 = vld [vmem:[#allocation8 + $0x69c] sm:$0xf0]  ;;  %v10469_v5 = vor.u32 %v13537_v61, %v10466_v63 }
  0x50   :  { %1687 = vmatpush.bf16.msra.mxu1 %v10285_v30  ;;  %v9929_v62 = vor.u32 %v13402_v59, %v9926_v60  ;;  %v10757_v6 = vor.u32 %v13609_v3, %v10754_v4  ;;  %v10184_v10 = vld [vmem:[#allocation8 + $0x200] sm:$0xf]  ;;  %v13470_v11 = vld [vmem:[#allocation8 + $0x220] sm:$0xf0]  ;;  %v13528_v15 = vld [vmem:[#allocation8 + $0x3f4] sm:$0xf]  ;;  %v236_v50 = vadd.f32 %v14902_v23, %v235_v36 }
  0x51   :  { %1701 = vmatpush.bf16.msra.mxu2 %v10573_v34  ;;  %v10472_v12 = vld [vmem:[#allocation8 + $0x440] sm:$0xf]  ;;  %v10185_v13 = vor.u32 %v13470_v11, %v10184_v10  ;;  %v13542_v14 = vld [vmem:[#allocation8 + $0x460] sm:$0xf0]  ;;  %v10430_v16 = vld [vmem:[#allocation8 + $0x414] sm:$0xf0] }
  0x52   :  { %1715 = vmatpush.bf16.msra.mxu3 %v10001_v38  ;;  %v10473_v17 = vor.u32 %v13542_v14, %v10472_v12  ;;  %v10433_v18 = vor.u32 %v13528_v15, %v10430_v16  ;;  %v13600_v19 = vld [vmem:[#allocation8 + $0x634] sm:$0xf]  ;;  %v10718_v20 = vld [vmem:[#allocation8 + $0x654] sm:$0xf0]  ;;  %v13461_v24 = vld [vmem:[#allocation8 + $0x1d8] sm:$0xf0] }
  0x53   :  { %1674 = vmatpush.bf16.msra.mxu0 %v9961_v39  ;;  %v10148_v21 = vld [vmem:[#allocation8 + $0x1b8] sm:$0xf]  ;;  %v10721_v22 = vor.u32 %v13600_v19, %v10718_v20  ;;  %v13533_v26 = vld [vmem:[#allocation8 + $0x418] sm:$0xf0]  ;;  %v13519_v29 = vld [vmem:[#allocation8 + $0x3ac] sm:$0xf] }
  0x54   :  { %1688 = vmatpush.bf16.msra.mxu1 %v10249_v43  ;;  %v10436_v25 = vld [vmem:[#allocation8 + $0x3f8] sm:$0xf]  ;;  %v10149_v27 = vor.u32 %v13461_v24, %v10148_v21  ;;  %v10394_v30 = vld [vmem:[#allocation8 + $0x3cc] sm:$0xf0]  ;;  %v13591_v31 = vld [vmem:[#allocation8 + $0x5ec] sm:$0xf] }
  0x55   :  { %1702 = vmatpush.bf16.msra.mxu2 %v10537_v48  ;;  %v10437_v28 = vor.u32 %v13533_v26, %v10436_v25  ;;  %v10397_v32 = vor.u32 %v13519_v29, %v10394_v30  ;;  %v10682_v33 = vld [vmem:[#allocation8 + $0x60c] sm:$0xf0]  ;;  %v13452_v35 = vld [vmem:[#allocation8 + $0x190] sm:$0xf0]  ;;  %v13510_v42 = vld [vmem:[#allocation8 + $0x364] sm:$0xf] }
  0x56   :  { %1716 = vmatpush.bf16.msra.mxu3 %v9965_v49  ;;  %v10112_v34 = vld [vmem:[#allocation8 + $0x170] sm:$0xf]  ;;  %v10685_v37 = vor.u32 %v13591_v31, %v10682_v33  ;;  %v13524_v39 = vld [vmem:[#allocation8 + $0x3d0] sm:$0xf0]  ;;  %v10358_v43 = vld [vmem:[#allocation8 + $0x384] sm:$0xf0] }
  0x57   :  { %1675 = vmatpush.bf16.msra.mxu0 %v9925_v53  ;;  %v10400_v38 = vld [vmem:[#allocation8 + $0x3b0] sm:$0xf]  ;;  %v10113_v40 = vor.u32 %v13452_v35, %v10112_v34  ;;  %v13582_v44 = vld [vmem:[#allocation8 + $0x5a4] sm:$0xf]  ;;  %v10361_v45 = vor.u32 %v13510_v42, %v10358_v43  ;;  %v10646_v46 = vld [vmem:[#allocation8 + $0x5c4] sm:$0xf0] }
  0x58   :  { %1689 = vmatpush.bf16.msra.mxu1 %v10213_v57  ;;  %v10401_v41 = vor.u32 %v13524_v39, %v10400_v38  ;;  %v10076_v48 = vld [vmem:[#allocation8 + $0x128] sm:$0xf]  ;;  %v13443_v49 = vld [vmem:[#allocation8 + $0x148] sm:$0xf0]  ;;  %v10649_v47 = vor.u32 %v13582_v44, %v10646_v46  ;;  %v13501_v55 = vld [vmem:[#allocation8 + $0x31c] sm:$0xf] }
  0x59   :  { %1703 = vmatpush.bf16.msra.mxu2 %v10501_v58  ;;  %v10364_v51 = vld [vmem:[#allocation8 + $0x368] sm:$0xf]  ;;  %v13515_v52 = vld [vmem:[#allocation8 + $0x388] sm:$0xf0]  ;;  %v10077_v53 = vor.u32 %v13443_v49, %v10076_v48  ;;  %v10322_v56 = vld [vmem:[#allocation8 + $0x33c] sm:$0xf0] }
  0x5a   :  { %1717 = vmatpush.bf16.msra.mxu3 %v9929_v62  ;;  %v10365_v54 = vor.u32 %v13515_v52, %v10364_v51  ;;  %v13573_v57 = vld [vmem:[#allocation8 + $0x55c] sm:$0xf]  ;;  %v10325_v58 = vor.u32 %v13501_v55, %v10322_v56  ;;  %v10610_v59 = vld [vmem:[#allocation8 + $0x57c] sm:$0xf0]  ;;  %v13434_v61 = vld [vmem:[#allocation8 + $0x100] sm:$0xf0]  ;;  %v14912_v62 = vsel %vm237_vm0, %v14902_v23, %v236_v50 }
  0x5b   :  { %1724 = vmatpush.bf16.msrb.mxu0 %v10469_v5  ;;  %v10040_v60 = vld [vmem:[#allocation8 + $0xe0] sm:$0xf]  ;;  %16729 = vst [vmem:[#allocation31_spill] sm:$0xff] %v14912_v62  ;;  %v10613_v63 = vor.u32 %v13573_v57, %v10610_v59  ;;  %v13506_v4 = vld [vmem:[#allocation8 + $0x340] sm:$0xf0] }
  0x5c   :  { %1738 = vmatpush.bf16.msrb.mxu1 %v10757_v6  ;;  %v10328_v3 = vld [vmem:[#allocation8 + $0x320] sm:$0xf]  ;;  %v10041_v5 = vor.u32 %v13434_v61, %v10040_v60  ;;  %v13492_v11 = vld [vmem:[#allocation8 + $0x2d4] sm:$0xf]  ;;  %v10286_v12 = vld [vmem:[#allocation8 + $0x2f4] sm:$0xf0] }
  0x5d   :  { %1752 = vmatpush.bf16.msrb.mxu2 %v10185_v13  ;;  %v10329_v10 = vor.u32 %v13506_v4, %v10328_v3  ;;  %v13564_v13 = vld [vmem:[#allocation8 + $0x514] sm:$0xf]  ;;  %v10289_v15 = vor.u32 %v13492_v11, %v10286_v12  ;;  %v10574_v16 = vld [vmem:[#allocation8 + $0x534] sm:$0xf0]  ;;  %v13497_v21 = vld [vmem:[#allocation8 + $0x2f8] sm:$0xf0] }
  0x5e   :  { %1766 = vmatpush.bf16.msrb.mxu3 %v10473_v17  ;;  %v10004_v23 = vld [vmem:[#allocation8 + $0x98] sm:$0xf]  ;;  %v13425_v17 = vld [vmem:[#allocation8 + $0xb8] sm:$0xf0]  ;;  %v10577_v19 = vor.u32 %v13564_v13, %v10574_v16  ;;  %v13555_v29 = vld [vmem:[#allocation8 + $0x4cc] sm:$0xf] }
  0x5f   :  { %1725 = vmatpush.bf16.msrb.mxu0 %v10433_v18  ;;  %v10292_v20 = vld [vmem:[#allocation8 + $0x2d8] sm:$0xf]  ;;  %v10005_v24 = vor.u32 %v13425_v17, %v10004_v23  ;;  %v10538_v31 = vld [vmem:[#allocation8 + $0x4ec] sm:$0xf0]  ;;  %v13416_v33 = vld [vmem:[#allocation8 + $0x70] sm:$0xf0] }
  0x60   :  { %1739 = vmatpush.bf16.msrb.mxu1 %v10721_v22  ;;  %v10293_v26 = vor.u32 %v13497_v21, %v10292_v20  ;;  %v10541_v35 = vor.u32 %v13555_v29, %v10538_v31  ;;  %v10256_v36 = vld [vmem:[#allocation8 + $0x290] sm:$0xf]  ;;  %v13474_v42 = vld [vmem:[#allocation8 + $0x244] sm:$0xf]  ;;  %v10214_v43 = vld [vmem:[#allocation8 + $0x264] sm:$0xf0] }
  0x61   :  { %1753 = vmatpush.bf16.msrb.mxu2 %v10149_v27  ;;  %v13483_v27 = vld [vmem:[#allocation8 + $0x28c] sm:$0xf]  ;;  %v13546_v46 = vld [vmem:[#allocation8 + $0x484] sm:$0xf]  ;;  %v10502_v48 = vld [vmem:[#allocation8 + $0x4a4] sm:$0xf0] }
  0x62   :  { %1767 = vmatpush.bf16.msrb.mxu3 %v10437_v28  ;;  %v10250_v28 = vld [vmem:[#allocation8 + $0x2ac] sm:$0xf0]  ;;  %v9932_v49 = vld [vmem:[#allocation8 + $0x8] sm:$0xf]  ;;  %v13407_v51 = vld [vmem:[#allocation8 + $0x28] sm:$0xf0] }
  0x63   :  { %1726 = vmatpush.bf16.msrb.mxu0 %v10397_v32  ;;  %v10253_v30 = vor.u32 %v13483_v27, %v10250_v28  ;;  %v9968_v32 = vld [vmem:[#allocation8 + $0x50] sm:$0xf]  ;;  %v10220_v52 = vld [vmem:[#allocation8 + $0x248] sm:$0xf]  ;;  %v9933_v56 = vor.u32 %v13407_v51, %v9932_v49  ;;  %v222_v11 = vld [vmem:[#allocation5] sm:$0x7] }
  0x64   :  { %1740 = vmatpush.bf16.msrb.mxu1 %v10685_v37  ;;  %v13488_v37 = vld [vmem:[#allocation8 + $0x2b0] sm:$0xf0]  ;;  %v9969_v38 = vor.u32 %v13416_v33, %v9968_v32  ;;  %v297_v20 = vperm.slane %v222_v11, 1  ;;  %v10474_v49 = vld [vmem:[#allocation8 + $0x464] sm:$0xf0] }
  0x65   :  { %1754 = vmatpush.bf16.msrb.mxu2 %v10113_v40 }
  0x66   :  { %1768 = vmatpush.bf16.msrb.mxu3 %v10401_v41  ;;  %v10257_v41 = vor.u32 %v13488_v37, %v10256_v36 }
  0x67   :  { %1727 = vmatpush.bf16.msrb.mxu0 %v10361_v45  ;;  %v10217_v45 = vor.u32 %v13474_v42, %v10214_v43  ;;  %v10186_v43 = vld [vmem:[#allocation8 + $0x224] sm:$0xf0] }
  0x68   :  { %1741 = vmatpush.bf16.msrb.mxu1 %v10649_v47  ;;  %v10505_v47 = vor.u32 %v13546_v46, %v10502_v48 }
  0x69   :  { %1755 = vmatpush.bf16.msrb.mxu2 %v10077_v53  ;;  %v13479_v53 = vld [vmem:[#allocation8 + $0x268] sm:$0xf0] }
  0x6a   :  { %1769 = vmatpush.bf16.msrb.mxu3 %v10365_v54  ;;  %v10221_v57 = vor.u32 %v13479_v53, %v10220_v52 }
  0x6b   :  { %1728 = vmatpush.bf16.msrb.mxu0 %v10325_v58 }
  0x6c   :  { %1742 = vmatpush.bf16.msrb.mxu1 %v10613_v63 }
  0x6d   :  { %1756 = vmatpush.bf16.msrb.mxu2 %v10041_v5 }
  0x6e   :  { %1770 = vmatpush.bf16.msrb.mxu3 %v10329_v10 }
  0x6f   :  { %1729 = vmatpush.bf16.msrb.mxu0 %v10289_v15 }
  0x70   :  { %1743 = vmatpush.bf16.msrb.mxu1 %v10577_v19  ;;  %v296_v19 = vperm.slane %v222_v11, 0 }
  0x71   :  { %1757 = vmatpush.bf16.msrb.mxu2 %v10005_v24 }
  0x72   :  { %1771 = vmatpush.bf16.msrb.mxu3 %v10293_v26 }
  0x73   :  { %1730 = vmatpush.bf16.msrb.mxu0 %v10253_v30 }
  0x74   :  { %1744 = vmatpush.bf16.msrb.mxu1 %v10541_v35 }
  0x75   :  { %1758 = vmatpush.bf16.msrb.mxu2 %v9969_v38 }
  0x76   :  { %1772 = vmatpush.bf16.msrb.mxu3 %v10257_v41 }
  0x77   :  { %1731 = vmatpush.bf16.msrb.mxu0 %v10217_v45  ;;  %v13538_v45 = vld [vmem:[#allocation8 + $0x444] sm:$0xf] }
  0x78   :  { %1745 = vmatpush.bf16.msrb.mxu1 %v10505_v47  ;;  %v10762_v47 = vld [vmem:[#allocation8 + $0x6a4] sm:$0xf0] }
  0x79   :  { %1759 = vmatpush.bf16.msrb.mxu2 %v9933_v56  ;;  %v10724_v56 = vld [vmem:[#allocation8 + $0x638] sm:$0xf] }
  0x7a   :  { %1773 = vmatpush.bf16.msrb.mxu3 %v10221_v57  ;;  %v13605_v57 = vld [vmem:[#allocation8 + $0x658] sm:$0xf0] }
  0xae   :  { %v227_v6 = vpop.xlane.xlu0 %226 }
  0xaf   :  { %v14915_v14 = vmul.f32 %v14912_v62, %v227_v6 }
  0xb0   :  { %v250_v18 = vpop.xlane.xlu1 %249 }
  0xb1   :  { %v255_v22 = vmul.f32 %v250_v18, %v14912_v62  ;;  %v257_v25 = vmul.f32 %v14915_v14, %v14915_v14  ;;  %v261_v15 = vsub.f32 %v14872_v0, %v14915_v14  ;;  %v262_v16 = vsub.f32 %v14874_v1, %v14915_v14  ;;  %v223_v18 = vld [vmem:[#allocation7] sm:$0x7] }
  0xb2   :  { %v263_v17 = vsub.f32 %v14876_v2, %v14915_v14  ;;  %v309_v27 = vperm.slane %v223_v18, 0  ;;  %v310_v0 = vperm.slane %v223_v18, 1  ;;  %v311_v14 = vperm.slane %v223_v18, 2  ;;  %v10402_v18 = vld [vmem:[#allocation8 + $0x3d4] sm:$0xf0] }
  0xb3   :  { %v259_v34 = vsub.f32 %v255_v22, %v257_v25  ;;  %v298_v25 = vperm.slane %v222_v11, 2  ;;  %v10688_v11 = vld [vmem:[#allocation8 + $0x5f0] sm:$0xf] }
  0xb5   :  { %v267_v39 = vadd.f32 1e-05, %v259_v34 }
  0xb6   :  { %v231_v40 = vpop.xlane.xlu0 %230 }
  0xb7   :  { %v14921_v44 = vmul.f32 %v14912_v62, %v231_v40  ;;  %14353 = vrsqrt.f32 %v267_v39  ;;  %vm275_vm2 = vweird.f32 %v267_v39  ;;  %v10760_v40 = vld [vmem:[#allocation8 + $0x680] sm:$0xf] }
  0xb8   :  { %v254_v50 = vpop.xlane.xlu1 %253 }
  0xb9   :  { %v256_v54 = vmul.f32 %v254_v50, %v14912_v62  ;;  %v258_v55 = vmul.f32 %v14921_v44, %v14921_v44  ;;  %v264_v1 = vsub.f32 %v14886_v7, %v14921_v44  ;;  %v265_v29 = vsub.f32 %v14888_v8, %v14921_v44  ;;  %v13614_v7 = vld [vmem:[#allocation8 + $0x6a0] sm:$0xf0] }
  0xba   :  { %v266_v2 = vsub.f32 %v14890_v9, %v14921_v44  ;;  %v13466_v8 = vld [vmem:[#allocation8 + $0x204] sm:$0xf]  ;;  %v10761_v51 = vor.u32 %v13614_v7, %v10760_v40  ;;  %v10618_v7 = vld [vmem:[#allocation8 + $0x584] sm:$0xf0] }
  0xbb   :  { %v260_v58 = vsub.f32 %v256_v54, %v258_v55  ;;  %v13610_v50 = vld [vmem:[#allocation8 + $0x684] sm:$0xf]  ;;  %v10189_v55 = vor.u32 %v13466_v8, %v10186_v43  ;;  %v10580_v8 = vld [vmem:[#allocation8 + $0x518] sm:$0xf]  ;;  %v13569_v43 = vld [vmem:[#allocation8 + $0x538] sm:$0xf0] }
  0xbc   :  { %v13574_v40 = vld [vmem:[#allocation8 + $0x564] sm:$0xf] }
  0xbd   :  { %v14354_v59 = vpop.eup %14353  ;;  %v268_v60 = vadd.f32 1e-05, %v260_v58  ;;  %v10477_v58 = vor.u32 %v13538_v45, %v10474_v49  ;;  %v10294_v49 = vld [vmem:[#allocation8 + $0x2fc] sm:$0xf0] }
  0xbe   :  { %v270_v61 = vmul.f32 %v14354_v59, %v267_v39  ;;  %vm276_vm1 = vweird.f32 %v14354_v59 }
  0xbf   :  { %14355 = vrsqrt.f32 %v268_v60  ;;  %vm277_vm3 = vmor %vm275_vm2, %vm276_vm1  ;;  %vm285_vm5 = vweird.f32 %v268_v60 }
  0xc0   :  { %v271_v63 = vmul.f32 %v14354_v59, %v270_v61  ;;  %v10150_v61 = vld [vmem:[#allocation8 + $0x1dc] sm:$0xf0] }
  0xc2   :  { %v272_v3 = vmul.f32 0.5, %v271_v63  ;;  %v13529_v63 = vld [vmem:[#allocation8 + $0x3fc] sm:$0xf] }
  0xc4   :  { %v273_v4 = vsub.f32 1.5, %v272_v3  ;;  %v10438_v3 = vld [vmem:[#allocation8 + $0x41c] sm:$0xf0] }
  0xc5   :  { %v14356_v5 = vpop.eup %14355 }
  0xc6   :  { %v274_v6 = vmul.f32 %v14354_v59, %v273_v4  ;;  %v280_v10 = vmul.f32 %v14356_v5, %v268_v60  ;;  %vm286_vm4 = vweird.f32 %v14356_v5  ;;  %v13457_v60 = vld [vmem:[#allocation8 + $0x1bc] sm:$0xf] }
  0xc7   :  { %vm287_vm6 = vmor %vm285_vm5, %vm286_vm4  ;;  %v13601_v4 = vld [vmem:[#allocation8 + $0x63c] sm:$0xf] }
  0xc8   :  { %v281_v12 = vmul.f32 %v14356_v5, %v280_v10  ;;  %v278_v13 = vsel %vm277_vm3, %v14354_v59, %v274_v6  ;;  %v10765_v59 = vor.u32 %v13610_v50, %v10762_v47  ;;  %v10725_v6 = vor.u32 %v13605_v57, %v10724_v56  ;;  %v13565_v50 = vld [vmem:[#allocation8 + $0x51c] sm:$0xf]  ;;  %v10582_v47 = vld [vmem:[#allocation8 + $0x53c] sm:$0xf0]  ;;  %v10544_v56 = vld [vmem:[#allocation8 + $0x4d0] sm:$0xf] }
  0xc9   :  { %v289_v21 = vmul.f32 %v278_v13, %v261_v15  ;;  %v290_v22 = vmul.f32 %v278_v13, %v262_v16  ;;  %v291_v26 = vmul.f32 %v278_v13, %v263_v17  ;;  %v10153_v10 = vor.u32 %v13457_v60, %v10150_v61  ;;  %v13448_v16 = vld [vmem:[#allocation8 + $0x174] sm:$0xf]  ;;  %v9970_v61 = vld [vmem:[#allocation8 + $0x74] sm:$0xf0] }
  0xca   :  { %v282_v23 = vmul.f32 0.5, %v281_v12  ;;  %v13596_v12 = vld [vmem:[#allocation8 + $0x610] sm:$0xf0]  ;;  %v10441_v13 = vor.u32 %v13529_v63, %v10438_v3  ;;  %v10258_v3 = vld [vmem:[#allocation8 + $0x2b4] sm:$0xf0] }
  0xcb   :  { %v302_v30 = vmul.f32 %v296_v19, %v289_v21  ;;  %v303_v31 = vmul.f32 %v297_v20, %v290_v22  ;;  %v304_v33 = vmul.f32 %v298_v25, %v291_v26  ;;  %v13520_v17 = vld [vmem:[#allocation8 + $0x3b4] sm:$0xf]  ;;  %v10689_v21 = vor.u32 %v13596_v12, %v10688_v11  ;;  %v13551_v12 = vld [vmem:[#allocation8 + $0x4a8] sm:$0xf0] }
  0xcc   :  { %v283_v24 = vsub.f32 1.5, %v282_v23  ;;  %v10114_v23 = vld [vmem:[#allocation8 + $0x194] sm:$0xf0]  ;;  %v10405_v26 = vor.u32 %v13520_v17, %v10402_v18  ;;  %v13560_v57 = vld [vmem:[#allocation8 + $0x4f0] sm:$0xf0] }
  0xcd   :  { %v315_v41 = vadd.f32 %v309_v27, %v302_v30  ;;  %v316_v42 = vadd.f32 %v310_v0, %v303_v31  ;;  %v317_v9 = vadd.f32 %v311_v14, %v304_v33  ;;  %v10117_v22 = vor.u32 %v13448_v16, %v10114_v23  ;;  %v13578_v33 = vld [vmem:[#allocation8 + $0x580] sm:$0xf0]  ;;  %v13412_v60 = vld [vmem:[#allocation8 + $0x54] sm:$0xf]  ;;  %v13475_v17 = vld [vmem:[#allocation8 + $0x24c] sm:$0xf] }
  0xce   :  { %v284_v28 = vmul.f32 %v14356_v5, %v283_v24  ;;  %v10652_v24 = vld [vmem:[#allocation8 + $0x5a8] sm:$0xf]  ;;  %v13484_v63 = vld [vmem:[#allocation8 + $0x294] sm:$0xf]  ;;  %v9973_v11 = vor.u32 %v13412_v60, %v9970_v61  ;;  %v10222_v18 = vld [vmem:[#allocation8 + $0x26c] sm:$0xf0] }
  0xcf   :  { %v10261_v16 = vor.u32 %v13484_v63, %v10258_v3  ;;  %v10372_v60 = vld [vmem:[#allocation8 + $0x370] sm:$0xf]  ;;  %v13516_v61 = vld [vmem:[#allocation8 + $0x390] sm:$0xf0] }
  0xd0   :  { %v288_v32 = vsel %vm287_vm6, %v14356_v5, %v284_v28  ;;  %v10726_v5 = vld [vmem:[#allocation8 + $0x65c] sm:$0xf0]  ;;  %v13439_v28 = vld [vmem:[#allocation8 + $0x12c] sm:$0xf]  ;;  %v10660_v63 = vld [vmem:[#allocation8 + $0x5b0] sm:$0xf] }
  0xd1   :  { %v292_v34 = vmul.f32 %v288_v32, %v264_v1  ;;  %v293_v35 = vmul.f32 %v288_v32, %v265_v29  ;;  %v294_v36 = vmul.f32 %v288_v32, %v266_v2  ;;  %v10729_v15 = vor.u32 %v13601_v4, %v10726_v5  ;;  %v13511_v1 = vld [vmem:[#allocation8 + $0x36c] sm:$0xf]  ;;  %v10366_v29 = vld [vmem:[#allocation8 + $0x38c] sm:$0xf0]  ;;  %v10616_v32 = vld [vmem:[#allocation8 + $0x560] sm:$0xf] }
  0xd2   :  { %v13583_v2 = vld [vmem:[#allocation8 + $0x5ac] sm:$0xf]  ;;  %v13556_v4 = vld [vmem:[#allocation8 + $0x4d4] sm:$0xf]  ;;  %v10546_v5 = vld [vmem:[#allocation8 + $0x4f4] sm:$0xf0] }
  0xd3   :  { %v305_v37 = vmul.f32 %v296_v19, %v292_v34  ;;  %v306_v38 = vmul.f32 %v297_v20, %v293_v35  ;;  %v307_v39 = vmul.f32 %v298_v25, %v294_v36  ;;  %v13592_v19 = vld [vmem:[#allocation8 + $0x5f4] sm:$0xf]  ;;  %v10690_v20 = vld [vmem:[#allocation8 + $0x614] sm:$0xf0]  ;;  %v13587_v25 = vld [vmem:[#allocation8 + $0x5c8] sm:$0xf0]  ;;  %v10369_v34 = vor.u32 %v13511_v1, %v10366_v29 }
  0xd4   :  { %v10653_v30 = vor.u32 %v13587_v25, %v10652_v24  ;;  %v13430_v36 = vld [vmem:[#allocation8 + $0xe4] sm:$0xf]  ;;  %v10549_v23 = vor.u32 %v13556_v4, %v10546_v5  ;;  %v10480_v24 = vld [vmem:[#allocation8 + $0x448] sm:$0xf]  ;;  %v13543_v25 = vld [vmem:[#allocation8 + $0x468] sm:$0xf0] }
  0xd5   :  { %v318_v44 = vadd.f32 %v309_v27, %v305_v37  ;;  %v319_v46 = vadd.f32 %v310_v0, %v306_v38  ;;  %v320_v48 = vadd.f32 %v311_v14, %v307_v39  ;;  %v10693_v27 = vor.u32 %v13592_v19, %v10690_v20  ;;  %v10078_v0 = vld [vmem:[#allocation8 + $0x14c] sm:$0xf0]  ;;  %v10042_v37 = vld [vmem:[#allocation8 + $0x104] sm:$0xf0]  ;;  %v13502_v38 = vld [vmem:[#allocation8 + $0x324] sm:$0xf] }
  0xd6   :  { %v10654_v14 = vld [vmem:[#allocation8 + $0x5cc] sm:$0xf0]  ;;  %v10081_v31 = vor.u32 %v13439_v28, %v10078_v0  ;;  %v10330_v39 = vld [vmem:[#allocation8 + $0x344] sm:$0xf0]  ;;  %v13547_v19 = vld [vmem:[#allocation8 + $0x48c] sm:$0xf] }
  0xd7   :  { %v14938_v52 = vpack.c.bf16 %v318_v44, %v315_v41  ;;  %v14940_v53 = vpack.c.bf16 %v319_v46, %v316_v42  ;;  %v14942_v54 = vpack.c.bf16 %v320_v48, %v317_v9  ;;  %v10657_v35 = vor.u32 %v13583_v2, %v10654_v14  ;;  %v13421_v44 = vld [vmem:[#allocation8 + $0x9c] sm:$0xf]  ;;  %v10006_v46 = vld [vmem:[#allocation8 + $0xbc] sm:$0xf0]  ;;  %v10510_v20 = vld [vmem:[#allocation8 + $0x4ac] sm:$0xf0] }
  0xd8   :  { %v10617_v41 = vor.u32 %v13578_v33, %v10616_v32  ;;  %v10045_v42 = vor.u32 %v13430_v36, %v10042_v37  ;;  %v10333_v45 = vor.u32 %v13502_v38, %v10330_v39  ;;  %v10621_v9 = vor.u32 %v13574_v40, %v10618_v7  ;;  %v13493_v48 = vld [vmem:[#allocation8 + $0x2dc] sm:$0xf]  ;;  %v13615_v0 = vld [vmem:[#allocation8 + $0x6a8] sm:$0xf0]  ;;  %v10194_v29 = vld [vmem:[#allocation8 + $0x22c] sm:$0xf0] }
  0xd9   :  { %1676 = vmatmul.bf16.vlgmr.msra.gmra.mxu0 %v14938_v52  ;;  %1690 = vmatmul.bf16.vlgmr.msra.gmra.mxu1 %v14940_v53  ;;  %v13467_v1 = vld [vmem:[#allocation8 + $0x20c] sm:$0xf]  ;;  %v10225_v2 = vor.u32 %v13475_v17, %v10222_v18  ;;  %v10513_v14 = vor.u32 %v13547_v19, %v10510_v20  ;;  %v10156_v32 = vld [vmem:[#allocation8 + $0x1c0] sm:$0xf]  ;;  %v13462_v33 = vld [vmem:[#allocation8 + $0x1e0] sm:$0xf0] }
  0xda   :  { %1704 = vmatmul.bf16.vlgmr.msra.gmra.mxu2 %v14942_v54  ;;  %1718 = vmatmul.bf16.vlgmr.msra.gmra.mxu3 %v14938_v52  ;;  %v10444_v36 = vld [vmem:[#allocation8 + $0x400] sm:$0xf]  ;;  %v13534_v37 = vld [vmem:[#allocation8 + $0x420] sm:$0xf0]  ;;  %v10158_v7 = vld [vmem:[#allocation8 + $0x1e4] sm:$0xf0] }
  0xdb   :  { %1780 = vmatpush.bf16.msra.mxu0 %v10761_v51  ;;  %1794 = vmatpush.bf16.msra.mxu1 %v10189_v55  ;;  %v10581_v51 = vor.u32 %v13569_v43, %v10580_v8  ;;  %v10009_v55 = vor.u32 %v13421_v44, %v10006_v46  ;;  %v10732_v38 = vld [vmem:[#allocation8 + $0x640] sm:$0xf]  ;;  %v13606_v39 = vld [vmem:[#allocation8 + $0x660] sm:$0xf0]  ;;  %v10120_v8 = vld [vmem:[#allocation8 + $0x178] sm:$0xf] }
  0xdc   :  { %1808 = vmatpush.bf16.msra.mxu2 %v10477_v58  ;;  %1822 = vmatpush.bf16.msra.mxu3 %v10765_v59  ;;  %v10297_v58 = vor.u32 %v13493_v48, %v10294_v49  ;;  %v10585_v59 = vor.u32 %v13565_v50, %v10582_v47  ;;  %v13458_v40 = vld [vmem:[#allocation8 + $0x1c4] sm:$0xf]  ;;  %v13453_v43 = vld [vmem:[#allocation8 + $0x198] sm:$0xf0]  ;;  %v10408_v44 = vld [vmem:[#allocation8 + $0x3b8] sm:$0xf] }
  0xdd   :  { %v13525_v46 = vld [vmem:[#allocation8 + $0x3d8] sm:$0xf0]  ;;  %v10696_v48 = vld [vmem:[#allocation8 + $0x5f8] sm:$0xf]  ;;  %v10122_v47 = vld [vmem:[#allocation8 + $0x19c] sm:$0xf0] }
  0xde   :  { %v13597_v49 = vld [vmem:[#allocation8 + $0x618] sm:$0xf0]  ;;  %v13588_v3 = vld [vmem:[#allocation8 + $0x5d0] sm:$0xf0]  ;;  %v10086_v5 = vld [vmem:[#allocation8 + $0x154] sm:$0xf0] }
  0xdf   :  { %1781 = vmatpush.bf16.msra.mxu0 %v10725_v6  ;;  %1795 = vmatpush.bf16.msra.mxu1 %v10153_v10  ;;  %v10508_v6 = vld [vmem:[#allocation8 + $0x488] sm:$0xf]  ;;  %v10545_v10 = vor.u32 %v13560_v57, %v10544_v56  ;;  %v13449_v50 = vld [vmem:[#allocation8 + $0x17c] sm:$0xf]  ;;  %v10084_v56 = vld [vmem:[#allocation8 + $0x130] sm:$0xf] }
  0xe0   :  { %1809 = vmatpush.bf16.msra.mxu2 %v10441_v13  ;;  %1823 = vmatpush.bf16.msra.mxu3 %v10729_v15  ;;  %v13403_v13 = vld [vmem:[#allocation8 + $0xc] sm:$0xf]  ;;  %v9934_v15 = vld [vmem:[#allocation8 + $0x2c] sm:$0xf0]  ;;  %v13444_v57 = vld [vmem:[#allocation8 + $0x150] sm:$0xf0] }
  0xe1   :  { %v9937_v28 = vor.u32 %v13403_v13, %v9934_v15  ;;  %v13440_v4 = vld [vmem:[#allocation8 + $0x134] sm:$0xf]  ;;  %v10661_v13 = vor.u32 %v13588_v3, %v10660_v63  ;;  %v10624_v17 = vld [vmem:[#allocation8 + $0x568] sm:$0xf]  ;;  %v13579_v18 = vld [vmem:[#allocation8 + $0x588] sm:$0xf0] }
  0xe2   :  { %v10089_v15 = vor.u32 %v13440_v4, %v10086_v5  ;;  %v13431_v19 = vld [vmem:[#allocation8 + $0xec] sm:$0xf]  ;;  %v10050_v20 = vld [vmem:[#allocation8 + $0x10c] sm:$0xf0]  ;;  %v13544_v3 = vld [vmem:[#allocation8 + $0x470] sm:$0xf0] }
  0xe3   :  { %1782 = vmatpush.bf16.msra.mxu0 %v10689_v21  ;;  %1796 = vmatpush.bf16.msra.mxu1 %v10117_v22  ;;  %v10192_v21 = vld [vmem:[#allocation8 + $0x208] sm:$0xf]  ;;  %v13471_v22 = vld [vmem:[#allocation8 + $0x228] sm:$0xf0]  ;;  %v10488_v63 = vld [vmem:[#allocation8 + $0x450] sm:$0xf] }
  0xe4   :  { %1810 = vmatpush.bf16.msra.mxu2 %v10405_v26  ;;  %1824 = vmatpush.bf16.msra.mxu3 %v10693_v27  ;;  %v10768_v26 = vld [vmem:[#allocation8 + $0x688] sm:$0xf]  ;;  %v10509_v27 = vor.u32 %v13551_v12, %v10508_v6  ;;  %v10085_v6 = vor.u32 %v13444_v57, %v10084_v56  ;;  %v13435_v12 = vld [vmem:[#allocation8 + $0x108] sm:$0xf0]  ;;  %v10770_v57 = vld [vmem:[#allocation8 + $0x6ac] sm:$0xf0] }
  0xe5   :  { %v13611_v56 = vld [vmem:[#allocation8 + $0x68c] sm:$0xf] }
  0xe7   :  { %1783 = vmatpush.bf16.msra.mxu0 %v10653_v30  ;;  %1797 = vmatpush.bf16.msra.mxu1 %v10081_v31  ;;  %v10193_v30 = vor.u32 %v13471_v22, %v10192_v21  ;;  %v10481_v31 = vor.u32 %v13543_v25, %v10480_v24  ;;  %v10012_v24 = vld [vmem:[#allocation8 + $0xa0] sm:$0xf]  ;;  %v13426_v25 = vld [vmem:[#allocation8 + $0xc0] sm:$0xf0] }
  0xe8   :  { %1811 = vmatpush.bf16.msra.mxu2 %v10369_v34  ;;  %1825 = vmatpush.bf16.msra.mxu3 %v10657_v35  ;;  %v10769_v34 = vor.u32 %v13615_v0, %v10768_v26  ;;  %v10197_v35 = vor.u32 %v13467_v1, %v10194_v29  ;;  %v10625_v26 = vor.u32 %v13579_v18, %v10624_v17  ;;  %v13498_v0 = vld [vmem:[#allocation8 + $0x300] sm:$0xf0]  ;;  %v10588_v1 = vld [vmem:[#allocation8 + $0x520] sm:$0xf]  ;;  %v10164_v17 = vld [vmem:[#allocation8 + $0x1c8] sm:$0xf] }
  0xe9   :  { %1732 = vmatmul.bf16.vlgmr.msrb.gmra.mxu0 %v14940_v53  ;;  %1746 = vmatmul.bf16.vlgmr.msrb.gmra.mxu1 %v14942_v54  ;;  %v13570_v29 = vld [vmem:[#allocation8 + $0x540] sm:$0xf0]  ;;  %v13463_v18 = vld [vmem:[#allocation8 + $0x1e8] sm:$0xf0] }
  0xea   :  { %1760 = vmatmul.bf16.vlgmr.msrb.gmra.mxu2 %v14938_v52  ;;  %1774 = vmatmul.bf16.vlgmr.msrb.gmra.mxu3 %v14940_v53 }
  0xeb   :  { %1784 = vmatpush.bf16.msra.mxu0 %v10617_v41  ;;  %1798 = vmatpush.bf16.msra.mxu1 %v10045_v42  ;;  %v10157_v41 = vor.u32 %v13462_v33, %v10156_v32  ;;  %v10445_v42 = vor.u32 %v13534_v37, %v10444_v36  ;;  %v9976_v32 = vld [vmem:[#allocation8 + $0x58] sm:$0xf]  ;;  %v13417_v33 = vld [vmem:[#allocation8 + $0x78] sm:$0xf0] }
  0xec   :  { %1812 = vmatpush.bf16.msra.mxu2 %v10333_v45  ;;  %1826 = vmatpush.bf16.msra.mxu3 %v10621_v9  ;;  %v10733_v45 = vor.u32 %v13606_v39, %v10732_v38  ;;  %v10161_v9 = vor.u32 %v13458_v40, %v10158_v7  ;;  %v10264_v36 = vld [vmem:[#allocation8 + $0x298] sm:$0xf]  ;;  %v13489_v37 = vld [vmem:[#allocation8 + $0x2b8] sm:$0xf0]  ;;  %v9978_v7 = vld [vmem:[#allocation8 + $0x7c] sm:$0xf0] }
  0xed   :  { %v10552_v38 = vld [vmem:[#allocation8 + $0x4d8] sm:$0xf]  ;;  %v13561_v39 = vld [vmem:[#allocation8 + $0x4f8] sm:$0xf0] }
  0xee   :  { %v13413_v40 = vld [vmem:[#allocation8 + $0x5c] sm:$0xf] }
  0xef   :  { %1785 = vmatpush.bf16.msra.mxu0 %v10581_v51  ;;  %1799 = vmatpush.bf16.msra.mxu1 %v10009_v55  ;;  %v10121_v51 = vor.u32 %v13453_v43, %v10120_v8  ;;  %v10409_v55 = vor.u32 %v13525_v46, %v10408_v44  ;;  %v10265_v8 = vor.u32 %v13489_v37, %v10264_v36  ;;  %v13408_v43 = vld [vmem:[#allocation8 + $0x30] sm:$0xf0]  ;;  %v10662_v37 = vld [vmem:[#allocation8 + $0x5d4] sm:$0xf0] }
  0xf0   :  { %1813 = vmatpush.bf16.msra.mxu2 %v10297_v58  ;;  %1827 = vmatpush.bf16.msra.mxu3 %v10585_v59  ;;  %v10697_v58 = vor.u32 %v13597_v49, %v10696_v48  ;;  %v10125_v59 = vor.u32 %v13449_v50, %v10122_v47  ;;  %v10553_v44 = vor.u32 %v13561_v39, %v10552_v38  ;;  %v10516_v48 = vld [vmem:[#allocation8 + $0x490] sm:$0xf]  ;;  %v13552_v49 = vld [vmem:[#allocation8 + $0x4b0] sm:$0xf0]  ;;  %v9942_v47 = vld [vmem:[#allocation8 + $0x34] sm:$0xf0] }
  0xf1   :  { %v9981_v46 = vor.u32 %v13413_v40, %v9978_v7  ;;  %v13404_v50 = vld [vmem:[#allocation8 + $0x14] sm:$0xf]  ;;  %v10517_v4 = vor.u32 %v13552_v49, %v10516_v48  ;;  %v10092_v38 = vld [vmem:[#allocation8 + $0x138] sm:$0xf]  ;;  %v13445_v39 = vld [vmem:[#allocation8 + $0x158] sm:$0xf0] }
  0xf2   :  { %v9945_v5 = vor.u32 %v13404_v50, %v9942_v47  ;;  %v13584_v36 = vld [vmem:[#allocation8 + $0x5b4] sm:$0xf]  ;;  %v10380_v40 = vld [vmem:[#allocation8 + $0x378] sm:$0xf]  ;;  %v13517_v7 = vld [vmem:[#allocation8 + $0x398] sm:$0xf0] }
  0xf3   :  { %1786 = vmatpush.bf16.msra.mxu0 %v10545_v10  ;;  %1800 = vmatpush.bf16.msra.mxu1 %v9973_v11  ;;  %v10373_v10 = vor.u32 %v13516_v61, %v10372_v60  ;;  %v10048_v11 = vld [vmem:[#allocation8 + $0xe8] sm:$0xf]  ;;  %v13472_v61 = vld [vmem:[#allocation8 + $0x230] sm:$0xf0]  ;;  %v10056_v48 = vld [vmem:[#allocation8 + $0xf0] sm:$0xf] }
  0xf4   :  { %1814 = vmatpush.bf16.msra.mxu2 %v10261_v16  ;;  %1828 = vmatpush.bf16.msra.mxu3 %v10549_v23  ;;  %v10336_v16 = vld [vmem:[#allocation8 + $0x328] sm:$0xf]  ;;  %v13507_v23 = vld [vmem:[#allocation8 + $0x348] sm:$0xf0]  ;;  %v10049_v21 = vor.u32 %v13435_v12, %v10048_v11  ;;  %v13530_v11 = vld [vmem:[#allocation8 + $0x404] sm:$0xf] }
  0xf5   :  { %v10337_v22 = vor.u32 %v13507_v23, %v10336_v16  ;;  %v10446_v12 = vld [vmem:[#allocation8 + $0x424] sm:$0xf0]  ;;  %v13602_v16 = vld [vmem:[#allocation8 + $0x644] sm:$0xf]  ;;  %v13436_v49 = vld [vmem:[#allocation8 + $0x110] sm:$0xf0] }
  0xf6   :  { %v10734_v23 = vld [vmem:[#allocation8 + $0x664] sm:$0xf0]  ;;  %v10344_v50 = vld [vmem:[#allocation8 + $0x330] sm:$0xf]  ;;  %v13508_v47 = vld [vmem:[#allocation8 + $0x350] sm:$0xf0] }
  0xf7   :  { %1787 = vmatpush.bf16.msra.mxu0 %v10509_v27  ;;  %1801 = vmatpush.bf16.msra.mxu1 %v9937_v28  ;;  %v10053_v27 = vor.u32 %v13431_v19, %v10050_v20  ;;  %v10300_v28 = vld [vmem:[#allocation8 + $0x2e0] sm:$0xf]  ;;  %v10452_v19 = vld [vmem:[#allocation8 + $0x408] sm:$0xf]  ;;  %v13535_v20 = vld [vmem:[#allocation8 + $0x428] sm:$0xf0] }
  0xf8   :  { %1815 = vmatpush.bf16.msra.mxu2 %v10225_v2  ;;  %1829 = vmatpush.bf16.msra.mxu3 %v10513_v14  ;;  %v13422_v2 = vld [vmem:[#allocation8 + $0xa4] sm:$0xf]  ;;  %v10014_v14 = vld [vmem:[#allocation8 + $0xc4] sm:$0xf0] }
  0xfa   :  { %1788 = vmatmul.bf16.vlgmr.msra.gmra.mxu0 %v14942_v54  ;;  %1802 = vmatmul.bf16.vlgmr.msra.gmra.mxu1 %v14938_v52 }
  0xfb   :  { %1836 = vmatpush.bf16.msrb.mxu0 %v10193_v30  ;;  %1850 = vmatpush.bf16.msrb.mxu1 %v10481_v31  ;;  %v10013_v30 = vor.u32 %v13426_v25, %v10012_v24  ;;  %v10301_v31 = vor.u32 %v13498_v0, %v10300_v28  ;;  %v13521_v24 = vld [vmem:[#allocation8 + $0x3bc] sm:$0xf]  ;;  %v10410_v25 = vld [vmem:[#allocation8 + $0x3dc] sm:$0xf0] }
  0xfc   :  { %1864 = vmatpush.bf16.msrb.mxu2 %v10769_v34  ;;  %1878 = vmatpush.bf16.msrb.mxu3 %v10197_v35  ;;  %v10589_v34 = vor.u32 %v13570_v29, %v10588_v1  ;;  %v10017_v35 = vor.u32 %v13422_v2, %v10014_v14  ;;  %v13593_v28 = vld [vmem:[#allocation8 + $0x5fc] sm:$0xf]  ;;  %v10698_v0 = vld [vmem:[#allocation8 + $0x61c] sm:$0xf0]  ;;  %v13454_v29 = vld [vmem:[#allocation8 + $0x1a0] sm:$0xf0] }
  0xfd   :  { %1816 = vmatmul.bf16.vlgmr.msra.gmra.mxu2 %v14940_v53  ;;  %1830 = vmatmul.bf16.vlgmr.msra.gmra.mxu3 %v14942_v54  ;;  %v10128_v1 = vld [vmem:[#allocation8 + $0x180] sm:$0xf]  ;;  %v13526_v14 = vld [vmem:[#allocation8 + $0x3e0] sm:$0xf0] }
  0xfe   :  { %v10416_v2 = vld [vmem:[#allocation8 + $0x3c0] sm:$0xf] }
  0xff   :  { %1837 = vmatpush.bf16.msrb.mxu0 %v10157_v41  ;;  %1851 = vmatpush.bf16.msrb.mxu1 %v10445_v42  ;;  %v9940_v41 = vld [vmem:[#allocation8 + $0x10] sm:$0xf]  ;;  %v9977_v42 = vor.u32 %v13417_v33, %v9976_v32  ;;  %v13512_v32 = vld [vmem:[#allocation8 + $0x374] sm:$0xf]  ;;  %v10374_v33 = vld [vmem:[#allocation8 + $0x394] sm:$0xf0] }
 0x100   :  { %1865 = vmatpush.bf16.msrb.mxu2 %v10733_v45  ;;  %1879 = vmatpush.bf16.msrb.mxu3 %v10161_v9  ;;  %v10228_v45 = vld [vmem:[#allocation8 + $0x250] sm:$0xf]  ;;  %v13480_v9 = vld [vmem:[#allocation8 + $0x270] sm:$0xf0] }
 0x101   :  { %v10229_v60 = vor.u32 %v13480_v9, %v10228_v45  ;;  %v10093_v45 = vor.u32 %v13445_v39, %v10092_v38  ;;  %v10381_v9 = vor.u32 %v13517_v7, %v10380_v40  ;;  %v13612_v38 = vld [vmem:[#allocation8 + $0x694] sm:$0xf]  ;;  %v10778_v39 = vld [vmem:[#allocation8 + $0x6b4] sm:$0xf0] }
 0x103   :  { %1838 = vmatpush.bf16.msrb.mxu0 %v10121_v51  ;;  %1852 = vmatpush.bf16.msrb.mxu1 %v10409_v55  ;;  %v13539_v51 = vld [vmem:[#allocation8 + $0x44c] sm:$0xf]  ;;  %v10482_v55 = vld [vmem:[#allocation8 + $0x46c] sm:$0xf0] }
 0x104   :  { %1866 = vmatpush.bf16.msrb.mxu2 %v10697_v58  ;;  %1880 = vmatpush.bf16.msrb.mxu3 %v10125_v59  ;;  %v10200_v58 = vld [vmem:[#allocation8 + $0x210] sm:$0xf]  ;;  %v9941_v59 = vor.u32 %v13408_v43, %v9940_v41  ;;  %v10377_v41 = vor.u32 %v13512_v32, %v10374_v33  ;;  %v13468_v32 = vld [vmem:[#allocation8 + $0x214] sm:$0xf]  ;;  %v10202_v33 = vld [vmem:[#allocation8 + $0x234] sm:$0xf0] }
 0x105   :  { %v10338_v43 = vld [vmem:[#allocation8 + $0x34c] sm:$0xf0] }
 0x107   :  { %1839 = vmatpush.bf16.msrb.mxu0 %v10085_v6  ;;  %1853 = vmatpush.bf16.msrb.mxu1 %v10373_v10  ;;  %v10485_v6 = vor.u32 %v13539_v51, %v10482_v55  ;;  %v10773_v10 = vor.u32 %v13611_v56, %v10770_v57  ;;  %v13494_v56 = vld [vmem:[#allocation8 + $0x2e4] sm:$0xf]  ;;  %v10302_v57 = vld [vmem:[#allocation8 + $0x304] sm:$0xf0] }
 0x108   :  { %1867 = vmatpush.bf16.msrb.mxu2 %v10661_v13  ;;  %1881 = vmatpush.bf16.msrb.mxu3 %v10089_v15  ;;  %v10201_v13 = vor.u32 %v13472_v61, %v10200_v58  ;;  %v10489_v15 = vor.u32 %v13544_v3, %v10488_v63  ;;  %v10057_v58 = vor.u32 %v13436_v49, %v10056_v48  ;;  %v10590_v61 = vld [vmem:[#allocation8 + $0x544] sm:$0xf0]  ;;  %v13427_v3 = vld [vmem:[#allocation8 + $0xc8] sm:$0xf0]  ;;  %v10454_v49 = vld [vmem:[#allocation8 + $0x42c] sm:$0xf0] }
 0x109   :  { %v10020_v63 = vld [vmem:[#allocation8 + $0xa8] sm:$0xf]  ;;  %v13531_v48 = vld [vmem:[#allocation8 + $0x40c] sm:$0xf] }
 0x10b   :  { %1840 = vmatpush.bf16.msrb.mxu0 %v10049_v21  ;;  %1854 = vmatpush.bf16.msrb.mxu1 %v10337_v22  ;;  %v10449_v21 = vor.u32 %v13530_v11, %v10446_v12  ;;  %v10737_v22 = vor.u32 %v13602_v16, %v10734_v23  ;;  %v13485_v11 = vld [vmem:[#allocation8 + $0x29c] sm:$0xf]  ;;  %v10266_v12 = vld [vmem:[#allocation8 + $0x2bc] sm:$0xf0] }
 0x10c   :  { %1868 = vmatpush.bf16.msrb.mxu2 %v10625_v26  ;;  %1882 = vmatpush.bf16.msrb.mxu3 %v10053_v27  ;;  %v10165_v26 = vor.u32 %v13463_v18, %v10164_v17  ;;  %v10453_v27 = vor.u32 %v13535_v20, %v10452_v19  ;;  %v13557_v16 = vld [vmem:[#allocation8 + $0x4dc] sm:$0xf]  ;;  %v10554_v23 = vld [vmem:[#allocation8 + $0x4fc] sm:$0xf0]  ;;  %v13418_v18 = vld [vmem:[#allocation8 + $0x80] sm:$0xf0] }
 0x10d   :  { %v9984_v17 = vld [vmem:[#allocation8 + $0x60] sm:$0xf]  ;;  %v13490_v20 = vld [vmem:[#allocation8 + $0x2c0] sm:$0xf0] }
 0x10e   :  { %v10272_v19 = vld [vmem:[#allocation8 + $0x2a0] sm:$0xf] }
 0x10f   :  { %1841 = vmatpush.bf16.msrb.mxu0 %v10013_v30  ;;  %1855 = vmatpush.bf16.msrb.mxu1 %v10301_v31  ;;  %v10413_v30 = vor.u32 %v13521_v24, %v10410_v25  ;;  %v10701_v31 = vor.u32 %v13593_v28, %v10698_v0  ;;  %v10557_v24 = vor.u32 %v13557_v16, %v10554_v23  ;;  %v10230_v25 = vld [vmem:[#allocation8 + $0x274] sm:$0xf0]  ;;  %v13441_v16 = vld [vmem:[#allocation8 + $0x13c] sm:$0xf]  ;;  %v10094_v23 = vld [vmem:[#allocation8 + $0x15c] sm:$0xf0] }
 0x110   :  { %1869 = vmatpush.bf16.msrb.mxu2 %v10589_v34  ;;  %1883 = vmatpush.bf16.msrb.mxu3 %v10017_v35  ;;  %v10129_v34 = vor.u32 %v13454_v29, %v10128_v1  ;;  %v10417_v35 = vor.u32 %v13526_v14, %v10416_v2  ;;  %v9985_v28 = vor.u32 %v13418_v18, %v9984_v17  ;;  %v9948_v1 = vld [vmem:[#allocation8 + $0x18] sm:$0xf]  ;;  %v13409_v29 = vld [vmem:[#allocation8 + $0x38] sm:$0xf0]  ;;  %v10382_v18 = vld [vmem:[#allocation8 + $0x39c] sm:$0xf0] }
 0x111   :  { %v10273_v0 = vor.u32 %v13490_v20, %v10272_v19  ;;  %v10236_v2 = vld [vmem:[#allocation8 + $0x258] sm:$0xf]  ;;  %v13481_v14 = vld [vmem:[#allocation8 + $0x278] sm:$0xf0]  ;;  %v9949_v40 = vor.u32 %v13409_v29, %v9948_v1  ;;  %v10670_v20 = vld [vmem:[#allocation8 + $0x5dc] sm:$0xf0] }
 0x112   :  { %v10237_v7 = vor.u32 %v13481_v14, %v10236_v2  ;;  %v13513_v17 = vld [vmem:[#allocation8 + $0x37c] sm:$0xf]  ;;  %v13504_v1 = vld [vmem:[#allocation8 + $0x334] sm:$0xf]  ;;  %v10346_v29 = vld [vmem:[#allocation8 + $0x354] sm:$0xf0] }
 0x113   :  { %1842 = vmatpush.bf16.msrb.mxu0 %v9977_v42  ;;  %1856 = vmatpush.bf16.msrb.mxu1 %v10265_v8  ;;  %v10665_v42 = vor.u32 %v13584_v36, %v10662_v37  ;;  %v13503_v8 = vld [vmem:[#allocation8 + $0x32c] sm:$0xf]  ;;  %v10490_v37 = vld [vmem:[#allocation8 + $0x474] sm:$0xf0]  ;;  %v13585_v19 = vld [vmem:[#allocation8 + $0x5bc] sm:$0xf] }
 0x114   :  { %1870 = vmatpush.bf16.msrb.mxu2 %v10553_v44  ;;  %1884 = vmatpush.bf16.msrb.mxu3 %v9981_v46  ;;  %v13575_v44 = vld [vmem:[#allocation8 + $0x56c] sm:$0xf]  ;;  %v10626_v46 = vld [vmem:[#allocation8 + $0x58c] sm:$0xf0]  ;;  %v10341_v51 = vor.u32 %v13503_v8, %v10338_v43  ;;  %v10740_v8 = vld [vmem:[#allocation8 + $0x648] sm:$0xf] }
 0x115   :  { %v10629_v55 = vor.u32 %v13575_v44, %v10626_v46  ;;  %v13607_v43 = vld [vmem:[#allocation8 + $0x668] sm:$0xf0]  ;;  %v10166_v46 = vld [vmem:[#allocation8 + $0x1ec] sm:$0xf0]  ;;  %v13576_v2 = vld [vmem:[#allocation8 + $0x574] sm:$0xf] }
 0x116   :  { %v13459_v44 = vld [vmem:[#allocation8 + $0x1cc] sm:$0xf]  ;;  %v10634_v14 = vld [vmem:[#allocation8 + $0x594] sm:$0xf0] }
 0x117   :  { %1843 = vmatpush.bf16.msrb.mxu0 %v9941_v59  ;;  %1857 = vmatpush.bf16.msrb.mxu1 %v10229_v60  ;;  %v10345_v59 = vor.u32 %v13508_v47, %v10344_v50  ;;  %v13566_v60 = vld [vmem:[#allocation8 + $0x524] sm:$0xf]  ;;  %v13603_v50 = vld [vmem:[#allocation8 + $0x64c] sm:$0xf]  ;;  %v10742_v47 = vld [vmem:[#allocation8 + $0x66c] sm:$0xf0] }
 0x118   :  { %1871 = vmatpush.bf16.msrb.mxu2 %v10517_v4  ;;  %1885 = vmatpush.bf16.msrb.mxu3 %v9945_v5  ;;  %v10308_v4 = vld [vmem:[#allocation8 + $0x2e8] sm:$0xf]  ;;  %v13499_v5 = vld [vmem:[#allocation8 + $0x308] sm:$0xf0] }
 0x11a   :  { %1844 = vmatmul.bf16.vlgmr.msrb.gmra.mxu0 %v14938_v52  ;;  %1858 = vmatmul.bf16.vlgmr.msrb.gmra.mxu1 %v14940_v53 }
 0x11b   :  { %1892 = vmatpush.bf16.msra.mxu0 %v10485_v6  ;;  %1906 = vmatpush.bf16.msra.mxu1 %v10773_v10  ;;  %v10305_v6 = vor.u32 %v13494_v56, %v10302_v57  ;;  %v10593_v10 = vor.u32 %v13566_v60, %v10590_v61  ;;  %v10704_v56 = vld [vmem:[#allocation8 + $0x600] sm:$0xf]  ;;  %v13598_v57 = vld [vmem:[#allocation8 + $0x620] sm:$0xf0]  ;;  %v10130_v61 = vld [vmem:[#allocation8 + $0x1a4] sm:$0xf0] }
 0x11c   :  { %1920 = vmatpush.bf16.msra.mxu2 %v10201_v13  ;;  %1934 = vmatpush.bf16.msra.mxu3 %v10489_v15  ;;  %v10021_v13 = vor.u32 %v13427_v3, %v10020_v63  ;;  %v10309_v15 = vor.u32 %v13499_v5, %v10308_v4  ;;  %v13450_v60 = vld [vmem:[#allocation8 + $0x184] sm:$0xf]  ;;  %v10418_v3 = vld [vmem:[#allocation8 + $0x3e4] sm:$0xf0] }
 0x11d   :  { %1872 = vmatmul.bf16.vlgmr.msrb.gmra.mxu2 %v14942_v54  ;;  %1886 = vmatmul.bf16.vlgmr.msrb.gmra.mxu3 %v14938_v52  ;;  %v13522_v63 = vld [vmem:[#allocation8 + $0x3c4] sm:$0xf]  ;;  %v10706_v5 = vld [vmem:[#allocation8 + $0x624] sm:$0xf0] }
 0x11e   :  { %v13594_v4 = vld [vmem:[#allocation8 + $0x604] sm:$0xf] }
 0x11f   :  { %1893 = vmatpush.bf16.msra.mxu0 %v10449_v21  ;;  %1907 = vmatpush.bf16.msra.mxu1 %v10737_v22  ;;  %v13476_v21 = vld [vmem:[#allocation8 + $0x254] sm:$0xf]  ;;  %v10269_v22 = vor.u32 %v13485_v11, %v10266_v12  ;;  %v10668_v11 = vld [vmem:[#allocation8 + $0x5b8] sm:$0xf]  ;;  %v13589_v12 = vld [vmem:[#allocation8 + $0x5d8] sm:$0xf0] }
 0x120   :  { %1921 = vmatpush.bf16.msra.mxu2 %v10165_v26  ;;  %1935 = vmatpush.bf16.msra.mxu3 %v10453_v27  ;;  %v13548_v26 = vld [vmem:[#allocation8 + $0x494] sm:$0xf]  ;;  %v10518_v27 = vld [vmem:[#allocation8 + $0x4b4] sm:$0xf0] }
 0x121   :  { %v10521_v36 = vor.u32 %v13548_v26, %v10518_v27  ;;  %v10385_v26 = vor.u32 %v13513_v17, %v10382_v18  ;;  %v10673_v27 = vor.u32 %v13585_v19, %v10670_v20 }
 0x123   :  { %1894 = vmatpush.bf16.msra.mxu0 %v10413_v30  ;;  %1908 = vmatpush.bf16.msra.mxu1 %v10701_v31  ;;  %v10776_v30 = vld [vmem:[#allocation8 + $0x690] sm:$0xf]  ;;  %v13616_v31 = vld [vmem:[#allocation8 + $0x6b0] sm:$0xf0] }
 0x124   :  { %1922 = vmatpush.bf16.msra.mxu2 %v10129_v34  ;;  %1936 = vmatpush.bf16.msra.mxu3 %v10417_v35  ;;  %v13540_v34 = vld [vmem:[#allocation8 + $0x454] sm:$0xf]  ;;  %v10233_v35 = vor.u32 %v13476_v21, %v10230_v25  ;;  %v10669_v21 = vor.u32 %v13589_v12, %v10668_v11  ;;  %v10496_v11 = vld [vmem:[#allocation8 + $0x458] sm:$0xf]  ;;  %v13545_v12 = vld [vmem:[#allocation8 + $0x478] sm:$0xf0] }
 0x125   :  { %v13580_v25 = vld [vmem:[#allocation8 + $0x590] sm:$0xf0]  ;;  %v10497_v20 = vor.u32 %v13545_v12, %v10496_v11 }
 0x126   :  { %v13572_v11 = vld [vmem:[#allocation8 + $0x550] sm:$0xf0] }
 0x127   :  { %1895 = vmatpush.bf16.msra.mxu0 %v10377_v41  ;;  %1909 = vmatpush.bf16.msra.mxu1 %v10665_v42  ;;  %v10777_v41 = vor.u32 %v13616_v31, %v10776_v30  ;;  %v10205_v42 = vor.u32 %v13468_v32, %v10202_v33  ;;  %v10596_v32 = vld [vmem:[#allocation8 + $0x528] sm:$0xf]  ;;  %v13571_v33 = vld [vmem:[#allocation8 + $0x548] sm:$0xf0] }
 0x128   :  { %1923 = vmatpush.bf16.msra.mxu2 %v10093_v45  ;;  %1937 = vmatpush.bf16.msra.mxu3 %v10381_v9  ;;  %v10493_v45 = vor.u32 %v13540_v34, %v10490_v37  ;;  %v10781_v9 = vor.u32 %v13612_v38, %v10778_v39  ;;  %v10349_v34 = vor.u32 %v13504_v1, %v10346_v29  ;;  %v10022_v37 = vld [vmem:[#allocation8 + $0xcc] sm:$0xf0]  ;;  %v13495_v38 = vld [vmem:[#allocation8 + $0x2ec] sm:$0xf]  ;;  %v10136_v29 = vld [vmem:[#allocation8 + $0x188] sm:$0xf] }
 0x129   :  { %v10310_v39 = vld [vmem:[#allocation8 + $0x30c] sm:$0xf0] }
 0x12b   :  { %1896 = vmatpush.bf16.msra.mxu0 %v10341_v51  ;;  %1910 = vmatpush.bf16.msra.mxu1 %v10629_v55  ;;  %v10741_v51 = vor.u32 %v13607_v43, %v10740_v8  ;;  %v10169_v55 = vor.u32 %v13459_v44, %v10166_v46  ;;  %v10560_v8 = vld [vmem:[#allocation8 + $0x4e0] sm:$0xf]  ;;  %v13562_v43 = vld [vmem:[#allocation8 + $0x500] sm:$0xf0]  ;;  %v9986_v46 = vld [vmem:[#allocation8 + $0x84] sm:$0xf0] }
 0x12c   :  { %1924 = vmatpush.bf16.msra.mxu2 %v10057_v58  ;;  %1938 = vmatpush.bf16.msra.mxu3 %v10345_v59  ;;  %v10457_v58 = vor.u32 %v13531_v48, %v10454_v49  ;;  %v10745_v59 = vor.u32 %v13603_v50, %v10742_v47  ;;  %v13414_v44 = vld [vmem:[#allocation8 + $0x64] sm:$0xf]  ;;  %v10274_v49 = vld [vmem:[#allocation8 + $0x2c4] sm:$0xf0] }
 0x12d   :  { %v13486_v48 = vld [vmem:[#allocation8 + $0x2a4] sm:$0xf]  ;;  %v10562_v47 = vld [vmem:[#allocation8 + $0x504] sm:$0xf0] }
 0x12e   :  { %v13558_v50 = vld [vmem:[#allocation8 + $0x4e4] sm:$0xf] }
 0x12f   :  { %1897 = vmatpush.bf16.msra.mxu0 %v10305_v6  ;;  %1911 = vmatpush.bf16.msra.mxu1 %v10593_v10  ;;  %v10705_v6 = vor.u32 %v13598_v57, %v10704_v56  ;;  %v10133_v10 = vor.u32 %v13450_v60, %v10130_v61  ;;  %v10524_v56 = vld [vmem:[#allocation8 + $0x498] sm:$0xf]  ;;  %v13553_v57 = vld [vmem:[#allocation8 + $0x4b8] sm:$0xf0]  ;;  %v10565_v60 = vor.u32 %v13558_v50, %v10562_v47  ;;  %v9950_v61 = vld [vmem:[#allocation8 + $0x3c] sm:$0xf0] }
 0x130   :  { %1925 = vmatpush.bf16.msra.mxu2 %v10021_v13  ;;  %1939 = vmatpush.bf16.msra.mxu3 %v10309_v15  ;;  %v10421_v13 = vor.u32 %v13522_v63, %v10418_v3  ;;  %v10709_v15 = vor.u32 %v13594_v4, %v10706_v5  ;;  %v13477_v63 = vld [vmem:[#allocation8 + $0x25c] sm:$0xf]  ;;  %v10238_v3 = vld [vmem:[#allocation8 + $0x27c] sm:$0xf0] }
 0x131   :  { %v13549_v4 = vld [vmem:[#allocation8 + $0x49c] sm:$0xf]  ;;  %v10526_v5 = vld [vmem:[#allocation8 + $0x4bc] sm:$0xf0]  ;;  %v10241_v17 = vor.u32 %v13477_v63, %v10238_v3 }
 0x132   :  { %v10529_v18 = vor.u32 %v13549_v4, %v10526_v5  ;;  %v13509_v50 = vld [vmem:[#allocation8 + $0x358] sm:$0xf0]  ;;  %v13428_v4 = vld [vmem:[#allocation8 + $0xd0] sm:$0xf0]  ;;  %v10316_v5 = vld [vmem:[#allocation8 + $0x2f0] sm:$0xf] }
 0x133   :  { %1898 = vmatpush.bf16.msra.mxu0 %v10269_v22  ;;  %1912 = vmatpush.bf16.msra.mxu1 %v10557_v24  ;;  %v10097_v22 = vor.u32 %v13441_v16, %v10094_v23  ;;  %v10632_v24 = vld [vmem:[#allocation8 + $0x570] sm:$0xf]  ;;  %v10784_v16 = vld [vmem:[#allocation8 + $0x698] sm:$0xf]  ;;  %v13617_v23 = vld [vmem:[#allocation8 + $0x6b8] sm:$0xf0] }
 0x134   :  { %1926 = vmatpush.bf16.msra.mxu2 %v9985_v28  ;;  %1940 = vmatpush.bf16.msra.mxu3 %v10273_v0  ;;  %v13432_v28 = vld [vmem:[#allocation8 + $0xf4] sm:$0xf]  ;;  %v10058_v0 = vld [vmem:[#allocation8 + $0x114] sm:$0xf0]  ;;  %v10633_v30 = vor.u32 %v13580_v25, %v10632_v24  ;;  %v10460_v25 = vld [vmem:[#allocation8 + $0x410] sm:$0xf] }
 0x135   :  { %v10061_v31 = vor.u32 %v13432_v28, %v10058_v0  ;;  %v13464_v24 = vld [vmem:[#allocation8 + $0x1f0] sm:$0xf0] }
 0x136   :  { %v13608_v28 = vld [vmem:[#allocation8 + $0x670] sm:$0xf0] }
 0x137   :  { %1899 = vmatpush.bf16.msra.mxu0 %v10233_v35  ;;  %1913 = vmatpush.bf16.msra.mxu1 %v10521_v36  ;;  %v10637_v35 = vor.u32 %v13576_v2, %v10634_v14  ;;  %v13423_v36 = vld [vmem:[#allocation8 + $0xac] sm:$0xf] }
 0x138   :  { %1927 = vmatpush.bf16.msra.mxu2 %v9949_v40  ;;  %1941 = vmatpush.bf16.msra.mxu3 %v10237_v7  ;;  %v13567_v40 = vld [vmem:[#allocation8 + $0x52c] sm:$0xf]  ;;  %v10598_v7 = vld [vmem:[#allocation8 + $0x54c] sm:$0xf0] }
 0x139   :  { %v13455_v14 = vld [vmem:[#allocation8 + $0x1a8] sm:$0xf0] }
 0x13a   :  { %1900 = vmatmul.bf16.vlgmr.msra.gmra.mxu0 %v14940_v53  ;;  %1914 = vmatmul.bf16.vlgmr.msra.gmra.mxu1 %v14942_v54 }
 0x13b   :  { %1948 = vmatpush.bf16.msrb.mxu0 %v10777_v41  ;;  %1962 = vmatpush.bf16.msrb.mxu1 %v10205_v42  ;;  %v10597_v41 = vor.u32 %v13571_v33, %v10596_v32  ;;  %v10025_v42 = vor.u32 %v13423_v36, %v10022_v37  ;;  %v10712_v32 = vld [vmem:[#allocation8 + $0x608] sm:$0xf]  ;;  %v13599_v33 = vld [vmem:[#allocation8 + $0x628] sm:$0xf0]  ;;  %v10137_v36 = vor.u32 %v13455_v14, %v10136_v29  ;;  %v10532_v29 = vld [vmem:[#allocation8 + $0x4a0] sm:$0xf] }
 0x13c   :  { %1976 = vmatpush.bf16.msrb.mxu2 %v10493_v45  ;;  %1990 = vmatpush.bf16.msrb.mxu3 %v10781_v9  ;;  %v10313_v45 = vor.u32 %v13495_v38, %v10310_v39  ;;  %v10601_v9 = vor.u32 %v13567_v40, %v10598_v7  ;;  %v10100_v39 = vld [vmem:[#allocation8 + $0x140] sm:$0xf]  ;;  %v10713_v40 = vor.u32 %v13599_v33, %v10712_v32  ;;  %v13446_v7 = vld [vmem:[#allocation8 + $0x160] sm:$0xf0] }
 0x13d   :  { %1928 = vmatmul.bf16.vlgmr.msra.gmra.mxu2 %v14938_v52  ;;  %1942 = vmatmul.bf16.vlgmr.msra.gmra.mxu3 %v14940_v53 }
 0x13f   :  { %1949 = vmatpush.bf16.msrb.mxu0 %v10741_v51  ;;  %1963 = vmatpush.bf16.msrb.mxu1 %v10169_v55  ;;  %v10561_v51 = vor.u32 %v13562_v43, %v10560_v8  ;;  %v9989_v55 = vor.u32 %v13414_v44, %v9986_v46  ;;  %v10676_v8 = vld [vmem:[#allocation8 + $0x5c0] sm:$0xf]  ;;  %v13590_v43 = vld [vmem:[#allocation8 + $0x5e0] sm:$0xf0]  ;;  %v10064_v44 = vld [vmem:[#allocation8 + $0xf8] sm:$0xf] }
 0x140   :  { %1977 = vmatpush.bf16.msrb.mxu2 %v10457_v58  ;;  %1991 = vmatpush.bf16.msrb.mxu3 %v10745_v59  ;;  %v13405_v58 = vld [vmem:[#allocation8 + $0x1c] sm:$0xf]  ;;  %v10277_v59 = vor.u32 %v13486_v48, %v10274_v49  ;;  %v10677_v46 = vor.u32 %v13590_v43, %v10676_v8  ;;  %v10352_v49 = vld [vmem:[#allocation8 + $0x338] sm:$0xf] }
 0x141   :  { %v13437_v48 = vld [vmem:[#allocation8 + $0x118] sm:$0xf0] }
 0x143   :  { %1950 = vmatpush.bf16.msrb.mxu0 %v10705_v6  ;;  %1964 = vmatpush.bf16.msrb.mxu1 %v10133_v10  ;;  %v10208_v6 = vld [vmem:[#allocation8 + $0x218] sm:$0xf]  ;;  %v13473_v10 = vld [vmem:[#allocation8 + $0x238] sm:$0xf0] }
 0x144   :  { %1978 = vmatpush.bf16.msrb.mxu2 %v10421_v13  ;;  %1992 = vmatpush.bf16.msrb.mxu3 %v10709_v15  ;;  %v10525_v13 = vor.u32 %v13553_v57, %v10524_v56  ;;  %v9953_v15 = vor.u32 %v13405_v58, %v9950_v61  ;;  %v10209_v19 = vor.u32 %v13473_v10, %v10208_v6  ;;  %v10028_v61 = vld [vmem:[#allocation8 + $0xb0] sm:$0xf]  ;;  %v13500_v6 = vld [vmem:[#allocation8 + $0x310] sm:$0xf0] }
 0x145   :  { %v10604_v10 = vld [vmem:[#allocation8 + $0x530] sm:$0xf]  ;;  %v10029_v12 = vor.u32 %v13428_v4, %v10028_v61 }
 0x147   :  { %1951 = vmatpush.bf16.msrb.mxu0 %v10669_v21  ;;  %1965 = vmatpush.bf16.msrb.mxu1 %v10097_v22  ;;  %v10172_v21 = vld [vmem:[#allocation8 + $0x1d0] sm:$0xf]  ;;  %v10785_v22 = vor.u32 %v13617_v23, %v10784_v16  ;;  %v10605_v16 = vor.u32 %v13572_v11, %v10604_v10  ;;  %v13419_v23 = vld [vmem:[#allocation8 + $0x88] sm:$0xf0] }
 0x148   :  { %1979 = vmatpush.bf16.msrb.mxu2 %v10385_v26  ;;  %1993 = vmatpush.bf16.msrb.mxu3 %v10673_v27  ;;  %v13536_v26 = vld [vmem:[#allocation8 + $0x430] sm:$0xf0]  ;;  %v10748_v27 = vld [vmem:[#allocation8 + $0x650] sm:$0xf]  ;;  %v10173_v0 = vor.u32 %v13464_v24, %v10172_v21 }
 0x149   :  { %v10461_v1 = vor.u32 %v13536_v26, %v10460_v25  ;;  %v10749_v2 = vor.u32 %v13608_v28, %v10748_v27  ;;  %v9956_v26 = vld [vmem:[#allocation8 + $0x20] sm:$0xf]  ;;  %v13410_v28 = vld [vmem:[#allocation8 + $0x40] sm:$0xf0] }
 0x14a   :  { %v9957_v32 = vor.u32 %v13410_v28, %v9956_v26 }
 0x14b   :  { %1952 = vmatpush.bf16.msrb.mxu0 %v10633_v30  ;;  %1966 = vmatpush.bf16.msrb.mxu1 %v10061_v31  ;;  %v10424_v30 = vld [vmem:[#allocation8 + $0x3c8] sm:$0xf]  ;;  %v13527_v31 = vld [vmem:[#allocation8 + $0x3e8] sm:$0xf0] }
 0x14c   :  { %1980 = vmatpush.bf16.msrb.mxu2 %v10349_v34  ;;  %1994 = vmatpush.bf16.msrb.mxu3 %v10637_v35  ;;  %v10425_v37 = vor.u32 %v13527_v31, %v10424_v30 }
 0x14f   :  { %1953 = vmatpush.bf16.msrb.mxu0 %v10597_v41  ;;  %1967 = vmatpush.bf16.msrb.mxu1 %v10025_v42  ;;  %v10388_v41 = vld [vmem:[#allocation8 + $0x380] sm:$0xf]  ;;  %v13518_v42 = vld [vmem:[#allocation8 + $0x3a0] sm:$0xf0] }
 0x150   :  { %1981 = vmatpush.bf16.msrb.mxu2 %v10313_v45  ;;  %1995 = vmatpush.bf16.msrb.mxu3 %v10601_v9  ;;  %v10101_v45 = vor.u32 %v13446_v7, %v10100_v39  ;;  %v10389_v9 = vor.u32 %v13518_v42, %v10388_v41 }
 0x153   :  { %1954 = vmatpush.bf16.msrb.mxu0 %v10561_v51  ;;  %1968 = vmatpush.bf16.msrb.mxu1 %v9989_v55  ;;  %v10640_v51 = vld [vmem:[#allocation8 + $0x578] sm:$0xf]  ;;  %v13581_v55 = vld [vmem:[#allocation8 + $0x598] sm:$0xf0] }
 0x154   :  { %1982 = vmatpush.bf16.msrb.mxu2 %v10277_v59  ;;  %1996 = vmatpush.bf16.msrb.mxu3 %v10565_v60  ;;  %v10065_v59 = vor.u32 %v13437_v48, %v10064_v44  ;;  %v10353_v60 = vor.u32 %v13509_v50, %v10352_v49  ;;  %v10641_v3 = vor.u32 %v13581_v55, %v10640_v51 }
 0x156   :  { %v1677_v34 = vpop.f32.mrf.mxu0  ;;  %v1691_v35 = vpop.f32.mrf.mxu1 }
 0x157   :  { %1955 = vmatpush.bf16.msrb.mxu0 %v10525_v13  ;;  %1969 = vmatpush.bf16.msrb.mxu1 %v9953_v15  ;;  %v1692_v38 = vadd.f32 %v1691_v35, %v1677_v34  ;;  %v10317_v13 = vor.u32 %v13500_v6, %v10316_v5  ;;  %v9992_v15 = vld [vmem:[#allocation8 + $0x68] sm:$0xf] }
 0x158   :  { %1983 = vmatpush.bf16.msrb.mxu2 %v10241_v17  ;;  %1997 = vmatpush.bf16.msrb.mxu3 %v10529_v18  ;;  %v10280_v17 = vld [vmem:[#allocation8 + $0x2a8] sm:$0xf]  ;;  %v13491_v18 = vld [vmem:[#allocation8 + $0x2c8] sm:$0xf0]  ;;  %v9993_v24 = vor.u32 %v13419_v23, %v9992_v15 }
 0x159   :  { %v10281_v25 = vor.u32 %v13491_v18, %v10280_v17 }
 0x15a   :  { %1956 = vmatmul.bf16.vlgmr.msrb.gmra.mxu0 %v14942_v54  ;;  %1970 = vmatmul.bf16.vlgmr.msrb.gmra.mxu1 %v14938_v52 }
 0x15b   :  { %2004 = vmatpush.bf16.msra.mxu0 %v10209_v19  ;;  %2018 = vmatpush.bf16.msra.mxu1 %v10497_v20  ;;  %v10568_v19 = vld [vmem:[#allocation8 + $0x4e8] sm:$0xf]  ;;  %v13563_v20 = vld [vmem:[#allocation8 + $0x508] sm:$0xf0] }
 0x15c   :  { %2032 = vmatpush.bf16.msra.mxu2 %v10785_v22  ;;  %1998 = vmatmul.bf16.vlgmr.msrb.gmra.mxu3 %v14942_v54  ;;  %v10569_v27 = vor.u32 %v13563_v20, %v10568_v19 }
 0x15d   :  { %1984 = vmatmul.bf16.vlgmr.msrb.gmra.mxu2 %v14940_v53  ;;  %v1705_v47 = vpop.f32.mrf.mxu2  ;;  %v1719_v63 = vpop.f32.mrf.mxu3 }
 0x15e   :  { %v14968_v56 = vadd.f32 %v1705_v47, %v1692_v38  ;;  %v1679_v57 = vpop.f32.mrf.mxu0  ;;  %v1693_v58 = vpop.f32.mrf.mxu1 }
 0x15f   :  { %2005 = vmatpush.bf16.msra.mxu0 %v10173_v0  ;;  %2019 = vmatpush.bf16.msra.mxu1 %v10461_v1  ;;  %v10244_v0 = vld [vmem:[#allocation8 + $0x260] sm:$0xf]  ;;  %v13482_v1 = vld [vmem:[#allocation8 + $0x280] sm:$0xf0]  ;;  %v1694_v31 = vadd.f32 %v1693_v58, %v1679_v57 }
 0x160   :  { %2033 = vmatpush.bf16.msra.mxu2 %v10749_v2  ;;  %v13554_v2 = vld [vmem:[#allocation8 + $0x4c0] sm:$0xf0]  ;;  %v10245_v33 = vor.u32 %v13482_v1, %v10244_v0 }
 0x161   :  { %v10533_v34 = vor.u32 %v13554_v2, %v10532_v29 }
 0x163   :  { %2006 = vmatpush.bf16.msra.mxu0 %v10137_v36  ;;  %2020 = vmatpush.bf16.msra.mxu1 %v10425_v37 }
 0x164   :  { %2034 = vmatpush.bf16.msra.mxu2 %v10713_v40 }
 0x165   :  { %v1707_v14 = vpop.f32.mrf.mxu2  ;;  %v1721_v30 = vpop.f32.mrf.mxu3 }
 0x166   :  { %v1733_v21 = vpop.f32.mrf.mxu0  ;;  %v1747_v22 = vpop.f32.mrf.mxu1  ;;  %v14970_v35 = vadd.f32 %v1707_v14, %v1694_v31 }
 0x167   :  { %2007 = vmatpush.bf16.msra.mxu0 %v10101_v45  ;;  %2021 = vmatpush.bf16.msra.mxu1 %v10389_v9  ;;  %v1734_v43 = vadd.f32 %v1733_v21, %v1719_v63 }
 0x168   :  { %2035 = vmatpush.bf16.msra.mxu2 %v10677_v46  ;;  %v2181_v39 = vrot.slane %v14970_v35, 4 }
 0x16b   :  { %2008 = vmatpush.bf16.msra.mxu0 %v10065_v59  ;;  %2022 = vmatpush.bf16.msra.mxu1 %v10353_v60 }
 0x16c   :  { %2036 = vmatpush.bf16.msra.mxu2 %v10641_v3 }
 0x16d   :  { %v1761_v42 = vpop.f32.mrf.mxu2  ;;  %v1775_v8 = vpop.f32.mrf.mxu3 }
 0x16e   :  { %v1735_v36 = vpop.f32.mrf.mxu0  ;;  %v1749_v38 = vpop.f32.mrf.mxu1  ;;  %v1776_v9 = vadd.f32 %v1775_v8, %v1761_v42 }
 0x16f   :  { %2009 = vmatpush.bf16.msra.mxu0 %v10029_v12  ;;  %2023 = vmatpush.bf16.msra.mxu1 %v10317_v13  ;;  %v1736_v37 = vadd.f32 %v1735_v36, %v1721_v30 }
 0x170   :  { %2037 = vmatpush.bf16.msra.mxu2 %v10605_v16 }
 0x171   :  { %v14973_v40 = vadd.f32 %v1749_v38, %v1736_v37 }
 0x173   :  { %2010 = vmatpush.bf16.msra.mxu0 %v9993_v24  ;;  %2024 = vmatpush.bf16.msra.mxu1 %v10281_v25  ;;  %v2179_v7 = vrot.slane %v14973_v40, 4  ;;  %v14981_v41 = vsel %vm2071_vm7, %v14973_v40, %v2181_v39 }
 0x174   :  { %2038 = vmatpush.bf16.msra.mxu2 %v10569_v27 }
 0x175   :  { %v14985_v45 = vsel %vm2071_vm7, %v2179_v7, %v14970_v35  ;;  %v1763_v46 = vpop.f32.mrf.mxu2  ;;  %v1777_v50 = vpop.f32.mrf.mxu3 }
 0x176   :  { %v1778_v36 = vadd.f32 %v1777_v50, %v1763_v46 }
 0x177   :  { %2011 = vmatpush.bf16.msra.mxu0 %v9957_v32  ;;  %2025 = vmatpush.bf16.msra.mxu1 %v10245_v33  ;;  %v1789_v44 = vpop.f32.mrf.mxu0  ;;  %v1803_v48 = vpop.f32.mrf.mxu1 }
 0x178   :  { %2039 = vmatpush.bf16.msra.mxu2 %v10533_v34 }
 0x17a   :  { %2012 = vmatmul.bf16.vlgmr.msra.gmra.mxu0 %v14938_v52  ;;  %2026 = vmatmul.bf16.vlgmr.msra.gmra.mxu1 %v14940_v53  ;;  %v14987_v52 = vadd.f32 %v1747_v22, %v1734_v43  ;;  %v14989_v53 = vadd.f32 %v1789_v44, %v1776_v9 }
 0x17b   :  { %2040 = vmatmul.bf16.vlgmr.msra.gmra.mxu2 %v14942_v54 }
 0x17c   :  { %v14301_v54 = vpack.i.bf16 %v14989_v53, %v14987_v52 }
 0x17e   :  { %14302 = vrot.lane.b32.xlu0 %v14301_v54, %s14764_s10 }
 0x17f   :  { %v1791_v47 = vpop.f32.mrf.mxu0  ;;  %v1805_v51 = vpop.f32.mrf.mxu1 }
 0x180   :  { %v1817_v49 = vpop.f32.mrf.mxu2  ;;  %v1831_v58 = vpop.f32.mrf.mxu3  ;;  %v1792_v37 = vadd.f32 %v1791_v47, %v1778_v36 }
 0x181   :  { %v1818_v57 = vadd.f32 %v1817_v49, %v1803_v48 }
 0x182   :  { %v14316_v7 = vpack.i.bf16 %v14973_v40, %v1792_v37 }
 0x183   :  { %v1832_v61 = vadd.f32 %v1831_v58, %v1818_v57 }
 0x185   :  { %v2517_v4 = vrot.slane %v1832_v61, 4 }
 0x188   :  { %v1819_v55 = vpop.f32.mrf.mxu2  ;;  %v1833_v10 = vpop.f32.mrf.mxu3 }
 0x189   :  { %v1820_v5 = vadd.f32 %v1819_v55, %v1805_v51 }
 0x18b   :  { %v1834_v23 = vadd.f32 %v1833_v10, %v1820_v5  ;;  %v2070_v5 = vrot.slane %v14987_v52, 4  ;;  %v2095_v10 = vrot.slane %v14989_v53, 4 }
 0x18d   :  { %v2625_v20 = vrot.slane %v1834_v23, 4 }
 0x197   :  { %v1845_v59 = vpop.f32.mrf.mxu0  ;;  %v1859_v60 = vpop.f32.mrf.mxu1 }
 0x198   :  { %v1860_v63 = vadd.f32 %v1859_v60, %v1845_v59 }
 0x19f   :  { %v1847_v15 = vpop.f32.mrf.mxu0  ;;  %v1861_v16 = vpop.f32.mrf.mxu1 }
 0x1a0   :  { %v1873_v3 = vpop.f32.mrf.mxu2  ;;  %v1862_v18 = vadd.f32 %v1861_v16, %v1847_v15  ;;  %v1887_v26 = vpop.f32.mrf.mxu3  ;;  %v2072_v16 = vsel %vm2071_vm7, %v2070_v5, %v14968_v56 }
 0x1a1   :  { %v1874_v6 = vadd.f32 %v1873_v3, %v1860_v63  ;;  %v14765_v63 = vmov 1983009808  }
 0x1a2   :  { %v2076_v3 = vunpack.c.l.s4 %v14765_v63 }
 0x1a3   :  { %v2515_v11 = vrot.slane %v1874_v6, 4  ;;  %v14995_v12 = vsel %vm2071_vm7, %v1874_v6, %v2517_v4  ;;  %v14291_v13 = vpack.i.bf16 %v1874_v6, %v1832_v61  ;;  %v2073_v6 = vrot.slane %v14968_v56, 4 }
 0x1a5   :  { %v14998_v17 = vsel %vm2071_vm7, %v2515_v11, %v1832_v61  ;;  %14292 = vrot.lane.b32.xlu2 %v14291_v13, %s14764_s10  ;;  %v15050_v13 = vunpack.c.0.s8 %v2076_v3 }
 0x1a8   :  { %v1875_v19 = vpop.f32.mrf.mxu2  ;;  %v1889_v2 = vpop.f32.mrf.mxu3 }
 0x1a9   :  { %v1876_v21 = vadd.f32 %v1875_v19, %v1862_v18  ;;  %v2096_v19 = vsel %vm2071_vm7, 0.0, %v2095_v10 }
 0x1ab   :  { %v2623_v22 = vrot.slane %v1876_v21, 4  ;;  %v15002_v24 = vsel %vm2071_vm7, %v1876_v21, %v2625_v20  ;;  %v14311_v34 = vpack.i.bf16 %v14970_v35, %v1876_v21  ;;  %v2203_v20 = vrot.slane %v1792_v37, 4 }
 0x1ac   :  { %v15058_v21 = vperm.slane %v2072_v16, %v15050_v13  ;;  %v15101_v63 = vperm.slane %v15002_v24, %v15050_v13 }
 0x1ad   :  { %v15005_v25 = vsel %vm2071_vm7, %v2623_v22, %v1834_v23 }
 0x1b7   :  { %v1901_v27 = vpop.f32.mrf.mxu0  ;;  %v1915_v28 = vpop.f32.mrf.mxu1 }
 0x1b8   :  { %v1902_v0 = vadd.f32 %v1901_v27, %v1887_v26  ;;  %v15065_v26 = vperm.slane %v14981_v41, %v15050_v13 }
 0x1ba   :  { %v15007_v1 = vadd.f32 %v1915_v28, %v1902_v0  ;;  %v2104_v0 = vperm.slane %v2096_v19, %v15050_v13 }
 0x1bc   :  { %v14296_v29 = vpack.i.bf16 %v14968_v56, %v15007_v1  ;;  %v15070_v56 = vperm.slane %v14985_v45, %v15050_v13 }
 0x1be   :  { %14297 = vrot.lane.b32.xlu2 %v14296_v29, %s14764_s10  ;;  %v15076_v29 = vperm.slane %v1792_v37, %v15050_v13  ;;  %v2225_v37 = vrot.slane %v15070_v56, 4 }
 0x1bf   :  { %v1903_v14 = vpop.f32.mrf.mxu0  ;;  %v1917_v31 = vpop.f32.mrf.mxu1 }
 0x1c0   :  { %v1904_v30 = vadd.f32 %v1903_v14, %v1889_v2  ;;  %v1929_v38 = vpop.f32.mrf.mxu2  ;;  %v1943_v39 = vpop.f32.mrf.mxu3  ;;  %v2204_v14 = vsel %vm2071_vm7, 0.0, %v2203_v20 }
 0x1c1   :  { %v1944_v42 = vadd.f32 %v1943_v39, %v1929_v38  ;;  %v2237_v38 = vrot.slane %v15065_v26, 4 }
 0x1c2   :  { %v15012_v32 = vadd.f32 %v1917_v31, %v1904_v30  ;;  %v2539_v30 = vrot.slane %v15007_v1, 4 }
 0x1c4   :  { %v14306_v33 = vpack.i.bf16 %v15012_v32, %v1834_v23  ;;  %v2074_v23 = vsel %vm2071_vm7, %v14987_v52, %v2073_v6  ;;  %v2100_v52 = vperm.slane %v14989_v53, %v15050_v13  ;;  %v2117_v53 = vrot.slane %v15058_v21, 4 }
 0x1c5   :  { %v15061_v22 = vperm.slane %v2074_v23, %v15050_v13  ;;  %v2647_v39 = vrot.slane %v15012_v32, 4 }
 0x1c6   :  { %14307 = vrot.lane.b32.xlu1 %v14306_v33, %s14764_s10  ;;  %14312 = vrot.lane.b32.xlu2 %v14311_v34, %s14764_s10  ;;  %v14766_v34 = vmov 1934713408  }
 0x1c7   :  { %v2129_v33 = vrot.slane %v15061_v22, 4  ;;  %v2120_v36 = vunpack.c.l.s4 %v14766_v34 }
 0x1c8   :  { %v15020_v8 = vpop.f32.mrf.mxu2  ;;  %v15022_v9 = vpop.f32.mrf.mxu3 }
 0x1c9   :  { %v15103_v3 = vunpack.c.0.s8 %v2120_v36 }
 0x1ce   :  { %14317 = vrot.lane.b32.xlu2 %v14316_v7, %s14764_s10 }
 0x1d7   :  { %v1957_v43 = vpop.f32.mrf.mxu0  ;;  %v1971_v35 = vpop.f32.mrf.mxu1 }
 0x1d8   :  { %v15024_v44 = vadd.f32 %v1957_v43, %v1944_v42  ;;  %v2141_v42 = vrot.slane %v2100_v52, 4  ;;  %v2153_v43 = vrot.slane %v2104_v0, 4 }
 0x1da   :  { %v2961_v49 = vrot.slane %v15024_v44, 4 }
 0x1df   :  { %v1999_v48 = vpop.f32.mrf.mxu3  ;;  %v15038_v55 = vpop.f32.mrf.mxu0 }
 0x1e0   :  { %v1985_v54 = vpop.f32.mrf.mxu2  ;;  %v15040_v57 = vpop.f32.mrf.mxu1 }
 0x1e1   :  { %v1986_v46 = vadd.f32 %v1985_v54, %v1971_v35  ;;  %v15090_v35 = vperm.slane %v2204_v14, %v15050_v13 }
 0x1e3   :  { %v15027_v50 = vadd.f32 %v1999_v48, %v1986_v46  ;;  %v2249_v46 = vrot.slane %v15076_v29, 4  ;;  %v2540_v48 = vsel %vm2071_vm7, 0.0, %v2539_v30 }
 0x1e4   :  { %v15117_v24 = vperm.slane %v2540_v48, %v15050_v13 }
 0x1e5   :  { %v2959_v40 = vrot.slane %v15027_v50, 4  ;;  %v15032_v47 = vsel %vm2071_vm7, %v15027_v50, %v2961_v49 }
 0x1e7   :  { %v15036_v51 = vsel %vm2071_vm7, %v2959_v40, %v15024_v44 }
 0x1f0   :  { %v15044_v61 = vpop.permute.xlu0 %14302 }
 0x1f1   :  { %v14305_v4 = vunpack.i.h.bf16 %v15044_v61 }
 0x1f3   :  { %v2105_v15 = vrot.slane %v14305_v4, 4  ;;  %v2110_v45 = vperm.slane %v14305_v4, %v15050_v13  ;;  %v2648_v4 = vsel %vm2071_vm7, 0.0, %v2647_v39 }
 0x1f4   :  { %v15127_v19 = vperm.slane %v2648_v4, %v15050_v13 }
 0x1f5   :  { %v2106_v27 = vsel %vm2071_vm7, 0.0, %v2105_v15  ;;  %v2139_v49 = vrot.slane %v2110_v45, 4  ;;  %v2142_v5 = vsel %vm2071_vm7, %v2110_v45, %v2141_v42  ;;  %v15121_v15 = vperm.slane %v15012_v32, %v15050_v13 }
 0x1f6   :  { %v2114_v31 = vperm.slane %v2106_v27, %v15050_v13 }
 0x1f7   :  { %v2013_v58 = vpop.f32.mrf.mxu0  ;;  %v2027_v59 = vpop.f32.mrf.mxu1  ;;  %v2140_v16 = vsel %vm2071_vm7, %v2139_v49, %v2100_v52 }
 0x1f8   :  { %v15042_v60 = vadd.f32 %v2027_v59, %v2013_v58  ;;  %v2151_v40 = vrot.slane %v2114_v31, 4  ;;  %v2522_v58 = vperm.slane %v14998_v17, %v15050_v13  ;;  %v2526_v59 = vperm.slane %v14995_v12, %v15050_v13 }
 0x1f9   :  { %v15112_v17 = vperm.slane %v15005_v25, %v15050_v13  ;;  %v2544_v12 = vperm.slane %v15007_v1, %v15050_v13  ;;  %v15130_v25 = vperm.slane %v2142_v5, %v15103_v3  ;;  %v14304_v1 = vunpack.i.l.bf16 %v15044_v61 }
 0x1fa   :  { %v2152_v23 = vsel %vm2071_vm7, %v2151_v40, %v2104_v0  ;;  %v2561_v27 = vrot.slane %v2522_v58, 4  ;;  %v2146_v0 = vperm.slane %v2140_v16, %v15103_v3  ;;  %v2597_v61 = vrot.slane %v15117_v24, 4 }
 0x1fb   :  { %v15138_v14 = vperm.slane %v2152_v23, %v15103_v3  ;;  %v2585_v45 = vrot.slane %v2544_v12, 4  ;;  %v2167_v39 = vrot.slane %v15130_v25, 4 }
 0x1fc   :  { %v2163_v4 = vrot.slane %v2146_v0, 4 }
 0x1fd   :  { %v2171_v5 = vrot.slane %v15138_v14, 4 }
 0x1ff   :  { %v14293_v11 = vpop.permute.xlu2 %14292 }
 0x200   :  { %v14295_v18 = vunpack.i.h.bf16 %v14293_v11  ;;  %v14294_v28 = vunpack.i.l.bf16 %v14293_v11  ;;  %v2261_v11 = vrot.slane %v15090_v35, 4 }
 0x202   :  { %v2527_v2 = vrot.slane %v14295_v18, 4  ;;  %v2529_v7 = vrot.slane %v14294_v28, 4 }
 0x204   :  { %v2528_v54 = vsel %vm2071_vm7, %v2527_v2, %v14294_v28  ;;  %v2530_v6 = vsel %vm2071_vm7, %v14295_v18, %v2529_v7  ;;  %v2154_v18 = vsel %vm2071_vm7, %v2114_v31, %v2153_v43  ;;  %v2573_v28 = vrot.slane %v2526_v59, 4 }
 0x205   :  { %v2534_v10 = vperm.slane %v2528_v54, %v15050_v13  ;;  %v2538_v20 = vperm.slane %v2530_v6, %v15050_v13  ;;  %v15141_v30 = vperm.slane %v2154_v18, %v15103_v3  ;;  %v2083_v7 = vrot.slane %v14304_v1, 4 }
 0x207   :  { %v2559_v2 = vrot.slane %v2534_v10, 4  ;;  %v2562_v34 = vsel %vm2071_vm7, %v2534_v10, %v2561_v27  ;;  %v2571_v42 = vrot.slane %v2538_v20, 4  ;;  %v2574_v48 = vsel %vm2071_vm7, %v2538_v20, %v2573_v28 }
 0x208   :  { %v2175_v6 = vrot.slane %v15141_v30, 4  ;;  %v15153_v10 = vperm.slane %v2562_v34, %v15103_v3  ;;  %v15162_v28 = vperm.slane %v2574_v48, %v15103_v3 }
 0x209   :  { %v2560_v54 = vsel %vm2071_vm7, %v2559_v2, %v2522_v58  ;;  %v2572_v20 = vsel %vm2071_vm7, %v2571_v42, %v2526_v59 }
 0x20a   :  { %v15158_v58 = vperm.slane %v2560_v54, %v15103_v3  ;;  %v15174_v42 = vperm.slane %v2572_v20, %v15103_v3  ;;  %v2613_v48 = vrot.slane %v15153_v10, 4 }
 0x218   :  { %v14298_v43 = vpop.permute.xlu2 %14297 }
 0x219   :  { %v14300_v49 = vunpack.i.h.bf16 %v14298_v43  ;;  %v14299_v40 = vunpack.i.l.bf16 %v14298_v43 }
 0x21b   :  { %v2085_v16 = vrot.slane %v14300_v49, 4  ;;  %v2084_v23 = vsel %vm2071_vm7, %v2083_v7, %v14300_v49  ;;  %v2549_v18 = vrot.slane %v14299_v40, 4  ;;  %v2554_v27 = vperm.slane %v14299_v40, %v15050_v13 }
 0x21c   :  { %v2090_v2 = vperm.slane %v2084_v23, %v15050_v13 }
 0x21d   :  { %v2086_v43 = vsel %vm2071_vm7, %v14304_v1, %v2085_v16  ;;  %v2550_v34 = vsel %vm2071_vm7, 0.0, %v2549_v18  ;;  %v2583_v41 = vrot.slane %v2554_v27, 4  ;;  %v2586_v7 = vsel %vm2071_vm7, %v2554_v27, %v2585_v45 }
 0x21e   :  { %v2094_v49 = vperm.slane %v2086_v43, %v15050_v13  ;;  %v2115_v40 = vrot.slane %v2090_v2, 4  ;;  %v2118_v54 = vsel %vm2071_vm7, %v2090_v2, %v2117_v53  ;;  %v2558_v59 = vperm.slane %v2550_v34, %v15050_v13 }
 0x21f   :  { %v2126_v1 = vperm.slane %v2118_v54, %v15103_v3  ;;  %v2584_v16 = vsel %vm2071_vm7, %v2583_v41, %v2544_v12  ;;  %v2594_v53 = vperm.slane %v2586_v7, %v15103_v3 }
 0x220   :  { %v2116_v45 = vsel %vm2071_vm7, %v2115_v40, %v15058_v21  ;;  %v2127_v23 = vrot.slane %v2094_v49, 4  ;;  %v2130_v18 = vsel %vm2071_vm7, %v2094_v49, %v2129_v33  ;;  %v2595_v34 = vrot.slane %v2558_v59, 4 }
 0x221   :  { %v2122_v27 = vperm.slane %v2116_v45, %v15103_v3  ;;  %v2138_v20 = vperm.slane %v2130_v18, %v15103_v3  ;;  %v2168_v2 = vsel %vm2071_vm7, %v2167_v39, %v2126_v1  ;;  %v2169_v43 = vrot.slane %v2126_v1, 4 }
 0x222   :  { %v2128_v41 = vsel %vm2071_vm7, %v2127_v23, %v15061_v22  ;;  %v2287_v12 = vrot.slane %v2168_v2, 4  ;;  %v2598_v21 = vsel %vm2071_vm7, %v2558_v59, %v2597_v61  ;;  %v15199_v22 = vpop.permute.xlu2 %14312 }
 0x223   :  { %v2134_v40 = vperm.slane %v2128_v41, %v15103_v3  ;;  %v2164_v33 = vsel %vm2071_vm7, %v2163_v4, %v2122_v27  ;;  %v2165_v49 = vrot.slane %v2122_v27, 4  ;;  %v2170_v7 = vsel %vm2071_vm7, %v15130_v25, %v2169_v43 }
 0x224   :  { %v2176_v54 = vsel %vm2071_vm7, %v2175_v6, %v2138_v20  ;;  %v2177_v45 = vrot.slane %v2138_v20, 4  ;;  %v15197_v39 = vsel %vm2071_vm7, %v2287_v12, %v2164_v33  ;;  %v2289_v1 = vrot.slane %v2164_v33, 4 }
 0x225   :  { %v2166_v23 = vsel %vm2071_vm7, %v2146_v0, %v2165_v49  ;;  %v2172_v61 = vsel %vm2071_vm7, %v2171_v5, %v2134_v40  ;;  %v2173_v59 = vrot.slane %v2134_v40, 4  ;;  %v2299_v18 = vrot.slane %v2170_v7, 4 }
 0x226   :  { %v2178_v4 = vsel %vm2071_vm7, %v15141_v30, %v2177_v45  ;;  %v15206_v25 = vsel %vm2071_vm7, %v2168_v2, %v2289_v1  ;;  %v2301_v6 = vrot.slane %v2166_v23, 4  ;;  %v2311_v27 = vrot.slane %v2176_v54, 4 }
 0x227   :  { %v2174_v20 = vsel %vm2071_vm7, %v15138_v14, %v2173_v59  ;;  %v15211_v43 = vsel %vm2071_vm7, %v2299_v18, %v2166_v23  ;;  %v2313_v41 = vrot.slane %v2172_v61, 4  ;;  %v2590_v0 = vperm.slane %v2584_v16, %v15103_v3 }
 0x228   :  { %v15215_v5 = vsel %vm2071_vm7, %v2170_v7, %v2301_v6  ;;  %v15218_v12 = vsel %vm2071_vm7, %v2311_v27, %v2172_v61  ;;  %v2323_v30 = vrot.slane %v2178_v4, 4  ;;  %v2325_v2 = vrot.slane %v2174_v20, 4 }
 0x229   :  { %v2609_v40 = vrot.slane %v15158_v58, 4  ;;  %v15222_v33 = vsel %vm2071_vm7, %v2176_v54, %v2313_v41  ;;  %v2596_v14 = vsel %vm2071_vm7, %v2595_v34, %v15117_v24  ;;  %v2606_v49 = vperm.slane %v2598_v21, %v15103_v3 }
 0x22a   :  { %v2617_v16 = vrot.slane %v15174_v42, 4  ;;  %v15229_v7 = vsel %vm2071_vm7, %v2323_v30, %v2174_v20  ;;  %v15232_v45 = vsel %vm2071_vm7, %v2178_v4, %v2325_v2  ;;  %v2602_v1 = vperm.slane %v2596_v14, %v15103_v3 }
 0x22b   :  { %v2621_v23 = vrot.slane %v15162_v28, 4  ;;  %v2607_v61 = vrot.slane %v2590_v0, 4  ;;  %v2610_v54 = vsel %vm2071_vm7, %v2590_v0, %v2609_v40  ;;  %v2611_v59 = vrot.slane %v2594_v53, 4  ;;  %v14318_v0 = vpop.permute.xlu2 %14317 }
 0x22c   :  { %v2614_v24 = vsel %vm2071_vm7, %v2594_v53, %v2613_v48  ;;  %v2615_v34 = vrot.slane %v2602_v1, 4  ;;  %v2618_v21 = vsel %vm2071_vm7, %v2602_v1, %v2617_v16  ;;  %v2619_v18 = vrot.slane %v2606_v49, 4 }
 0x22d   :  { %v15241_v6 = vsel %vm2071_vm7, %v2607_v61, %v15158_v58  ;;  %v15245_v4 = vsel %vm2071_vm7, %v2611_v59, %v15153_v10  ;;  %v2622_v27 = vsel %vm2071_vm7, %v2606_v49, %v2621_v23  ;;  %v2743_v20 = vrot.slane %v2614_v24, 4 }
 0x22e   :  { %v15252_v48 = vsel %vm2071_vm7, %v2615_v34, %v15174_v42  ;;  %v15256_v53 = vsel %vm2071_vm7, %v2619_v18, %v15162_v28  ;;  %v2731_v58 = vrot.slane %v15245_v4, 4  ;;  %v2745_v40 = vrot.slane %v2610_v54, 4 }
 0x22f   :  { %v2744_v2 = vsel %vm2071_vm7, %v2743_v20, %v2610_v54  ;;  %v2755_v14 = vrot.slane %v15256_v53, 4  ;;  %v2767_v42 = vrot.slane %v2622_v27, 4  ;;  %v2769_v49 = vrot.slane %v2618_v21, 4 }
 0x230   :  { %v14315_v16 = vunpack.i.h.bf16 %v15199_v22  ;;  %v15267_v28 = vsel %vm2071_vm7, %v2614_v24, %v2745_v40  ;;  %v14320_v1 = vunpack.i.h.bf16 %v14318_v0  ;;  %v14319_v23 = vunpack.i.l.bf16 %v14318_v0 }
 0x231   :  { %v2732_v61 = vsel %vm2071_vm7, %v2731_v58, %v15241_v6  ;;  %v15275_v54 = vsel %vm2071_vm7, %v2622_v27, %v2769_v49  ;;  %v14314_v20 = vunpack.i.l.bf16 %v15199_v22  ;;  %v2756_v58 = vsel %vm2071_vm7, %v2755_v14, %v15252_v48 }
 0x232   :  { %v2193_v18 = vrot.slane %v14315_v16, 4  ;;  %v2191_v30 = vrot.slane %v14320_v1, 4  ;;  %v2213_v41 = vrot.slane %v14319_v23, 4  ;;  %v2218_v24 = vperm.slane %v14319_v23, %v15050_v13 }
 0x233   :  { %v15281_v40 = vperm.slane %v2732_v61, %v15050_v13  ;;  %v15286_v59 = vsel %vm2071_vm7, %v2767_v42, %v2618_v21  ;;  %v15297_v14 = vperm.slane %v2744_v2, %v15050_v13 }
 0x234   :  { %v2194_v0 = vsel %vm2071_vm7, %v14320_v1, %v2193_v18  ;;  %v2192_v27 = vsel %vm2071_vm7, %v2191_v30, %v14315_v16  ;;  %v2214_v10 = vsel %vm2071_vm7, 0.0, %v2213_v41  ;;  %v2247_v34 = vrot.slane %v2218_v24, 4 }
 0x235   :  { %v2202_v49 = vperm.slane %v2194_v0, %v15050_v13  ;;  %v2198_v23 = vperm.slane %v2192_v27, %v15050_v13  ;;  %v2222_v1 = vperm.slane %v2214_v10, %v15050_v13  ;;  %v2250_v61 = vsel %vm2071_vm7, %v2218_v24, %v2249_v46 }
 0x236   :  { %v2248_v41 = vsel %vm2071_vm7, %v2247_v34, %v15076_v29  ;;  %v2258_v42 = vperm.slane %v2250_v61, %v15103_v3 }
 0x237   :  { %v2235_v21 = vrot.slane %v2202_v49, 4  ;;  %v2238_v30 = vsel %vm2071_vm7, %v2202_v49, %v2237_v38  ;;  %v2223_v16 = vrot.slane %v2198_v23, 4  ;;  %v2226_v10 = vsel %vm2071_vm7, %v2198_v23, %v2225_v37 }
 0x238   :  { %v2246_v46 = vperm.slane %v2238_v30, %v15103_v3  ;;  %v2254_v2 = vperm.slane %v2248_v41, %v15103_v3  ;;  %v2234_v18 = vperm.slane %v2226_v10, %v15103_v3  ;;  %v2259_v38 = vrot.slane %v2222_v1, 4 }
 0x239   :  { %v2236_v24 = vsel %vm2071_vm7, %v2235_v21, %v15065_v26  ;;  %v2262_v29 = vsel %vm2071_vm7, %v2222_v1, %v2261_v11  ;;  %v2224_v34 = vsel %vm2071_vm7, %v2223_v16, %v15070_v56  ;;  %v2275_v61 = vrot.slane %v2258_v42, 4 }
 0x23a   :  { %v2242_v0 = vperm.slane %v2236_v24, %v15103_v3  ;;  %v2270_v37 = vperm.slane %v2262_v29, %v15103_v3  ;;  %v2271_v27 = vrot.slane %v2254_v2, 4  ;;  %v2230_v49 = vperm.slane %v2224_v34, %v15103_v3 }
 0x23b   :  { %v2260_v23 = vsel %vm2071_vm7, %v2259_v38, %v15090_v35  ;;  %v2277_v26 = vrot.slane %v2234_v18, 4  ;;  %v2285_v11 = vrot.slane %v2246_v46, 4  ;;  %v2276_v16 = vsel %vm2071_vm7, %v2275_v61, %v2234_v18 }
 0x23c   :  { %v2266_v21 = vperm.slane %v2260_v23, %v15103_v3  ;;  %v2281_v30 = vrot.slane %v2242_v0, 4  ;;  %v2283_v41 = vrot.slane %v2270_v37, 4  ;;  %v2272_v1 = vsel %vm2071_vm7, %v2271_v27, %v2230_v49 }
 0x23d   :  { %v2273_v56 = vrot.slane %v2230_v49, 4  ;;  %v2278_v10 = vsel %vm2071_vm7, %v2258_v42, %v2277_v26  ;;  %v2286_v35 = vsel %vm2071_vm7, %v2270_v37, %v2285_v11  ;;  %v2383_v23 = vrot.slane %v2276_v16, 4 }
 0x23e   :  { %v2279_v24 = vrot.slane %v2266_v21, 4  ;;  %v2282_v29 = vsel %vm2071_vm7, %v2266_v21, %v2281_v30  ;;  %v2284_v34 = vsel %vm2071_vm7, %v2283_v41, %v2246_v46  ;;  %v2385_v36 = vrot.slane %v2272_v1, 4  ;;  %v14308_v41 = vpop.permute.xlu1 %14307 }
 0x23f   :  { %v2274_v38 = vsel %vm2071_vm7, %v2254_v2, %v2273_v56  ;;  %v2395_v31 = vrot.slane %v2278_v10, 4  ;;  %v2407_v49 = vrot.slane %v2284_v34, 4  ;;  %v2419_v52 = vrot.slane %v2286_v35, 4 }
 0x240   :  { %v2280_v32 = vsel %vm2071_vm7, %v2279_v24, %v2242_v0  ;;  %v2397_v27 = vrot.slane %v2274_v38, 4  ;;  %v2384_v18 = vsel %vm2071_vm7, %v2383_v23, %v2272_v1  ;;  %v15334_v42 = vsel %vm2071_vm7, %v2276_v16, %v2385_v36 }
 0x241   :  { %v2396_v61 = vsel %vm2071_vm7, %v2395_v31, %v2274_v38  ;;  %v2409_v46 = vrot.slane %v2280_v32, 4  ;;  %v2762_v0 = vperm.slane %v2756_v58, %v15050_v13  ;;  %v2635_v21 = vrot.slane %v14314_v20, 4 }
 0x242   :  { %v2398_v2 = vsel %vm2071_vm7, %v2278_v10, %v2397_v27  ;;  %v15340_v26 = vperm.slane %v2396_v61, %v15050_v13  ;;  %v15346_v30 = vsel %vm2071_vm7, %v2407_v49, %v2280_v32  ;;  %v2420_v31 = vsel %vm2071_vm7, %v2419_v52, %v2282_v29 }
 0x243   :  { %v15349_v36 = vsel %vm2071_vm7, %v2284_v34, %v2409_v46  ;;  %v15353_v11 = vperm.slane %v2384_v18, %v15050_v13  ;;  %v2406_v1 = vperm.slane %v2398_v2, %v15050_v13  ;;  %v2421_v56 = vrot.slane %v2282_v29, 4 }
 0x244   :  { %v15359_v16 = vperm.slane %v2420_v31, %v15050_v13  ;;  %v2774_v32 = vperm.slane %v15286_v59, %v15050_v13  ;;  %v2779_v10 = vrot.slane %v15297_v14, 4  ;;  %v2781_v52 = vrot.slane %v15281_v40, 4 }
 0x245   :  { %v15366_v24 = vsel %vm2071_vm7, %v2286_v35, %v2421_v56  ;;  %v2799_v38 = vrot.slane %v2762_v0, 4  ;;  %v14310_v23 = vunpack.i.h.bf16 %v14308_v41  ;;  %v14309_v18 = vunpack.i.l.bf16 %v14308_v41 }
 0x246   :  { %v2780_v29 = vsel %vm2071_vm7, %v2779_v10, %v15281_v40  ;;  %v2797_v27 = vrot.slane %v2774_v32, 4  ;;  %v2782_v49 = vsel %vm2071_vm7, %v15297_v14, %v2781_v52  ;;  %v15376_v2 = vrot.slane %v2406_v1, 4 }
 0x247   :  { %v2786_v59 = vperm.slane %v2780_v29, %v15103_v3  ;;  %v2790_v61 = vperm.slane %v2782_v49, %v15103_v3  ;;  %v2800_v46 = vsel %vm2071_vm7, %v2774_v32, %v2799_v38  ;;  %v2657_v35 = vrot.slane %v14310_v23, 4 }
 0x248   :  { %v2798_v31 = vsel %vm2071_vm7, %v2797_v27, %v2762_v0  ;;  %v2808_v56 = vperm.slane %v2800_v46, %v15103_v3  ;;  %v2662_v40 = vperm.slane %v14310_v23, %v15050_v13  ;;  %v2636_v32 = vsel %vm2071_vm7, %v2635_v21, %v14309_v18 }
 0x249   :  { %v2804_v10 = vperm.slane %v2798_v31, %v15103_v3  ;;  %v2821_v58 = vrot.slane %v2790_v61, 4  ;;  %v2817_v14 = vrot.slane %v2786_v59, 4  ;;  %v2658_v41 = vsel %vm2071_vm7, 0.0, %v2657_v35 }
 0x24a   :  { %v2819_v52 = vrot.slane %v2808_v56, 4  ;;  %v2666_v29 = vperm.slane %v2658_v41, %v15050_v13  ;;  %v2691_v49 = vrot.slane %v2662_v40, 4  ;;  %v2637_v27 = vrot.slane %v14309_v18, 4 }
 0x24b   :  { %v2815_v1 = vrot.slane %v2804_v10, 4  ;;  %v2822_v38 = vsel %vm2071_vm7, %v2808_v56, %v2821_v58  ;;  %v2818_v0 = vsel %vm2071_vm7, %v2804_v10, %v2817_v14  ;;  %v2642_v21 = vperm.slane %v2636_v32, %v15050_v13 }
 0x24c   :  { %v2926_v46 = vpack.c.bf16 %v2822_v38, %v2822_v38  ;;  %v2924_v23 = vpack.c.bf16 %v2818_v0, %v2818_v0  ;;  %v2820_v31 = vsel %vm2071_vm7, %v2819_v52, %v2790_v61  ;;  %v2703_v34 = vrot.slane %v2666_v29, 4 }
 0x24d   :  { %v2816_v37 = vsel %vm2071_vm7, %v2815_v1, %v2786_v59  ;;  %v2925_v35 = vpack.c.bf16 %v2820_v31, %v2820_v31  ;;  %v2638_v41 = vsel %vm2071_vm7, %v14314_v20, %v2637_v27  ;;  %v2667_v10 = vrot.slane %v2642_v21, 4 }
 0x24e   :  { %v2923_v62 = vpack.c.bf16 %v2816_v37, %v2816_v37  ;;  %v3441_v58 = vsel %vm3379_vm8, %v2926_v46, 0  ;;  %v3403_v56 = vsel %vm3379_vm8, %v2924_v23, 0  ;;  %v2646_v18 = vperm.slane %v2638_v41, %v15050_v13 }
 0x24f   :  { %3450 = vmatpush.bf16.xpose.msrb.mxu1 %v3441_v58  ;;  %v3422_v61 = vsel %vm3379_vm8, %v2925_v35, 0  ;;  %v16730_v59 = vrot.slane %v15112_v17, 4  ;;  %v2692_v22 = vsel %vm2071_vm7, %v2691_v49, %v15121_v15  ;;  %v16731_v32 = vrot.slane %v15101_v63, 4 }
 0x250   :  { %v3384_v20 = vsel %vm3379_vm8, %v2923_v62, 0  ;;  %3431 = vmatpush.bf16.xpose.msrb.mxu0 %v3422_v61  ;;  %v2679_v52 = vrot.slane %v2646_v18, 4  ;;  %v2668_v38 = vsel %vm2071_vm7, %v2667_v10, %v15112_v17  ;;  %v16732_v27 = vrot.slane %v15121_v15, 4 }
 0x251   :  { %v2670_v14 = vsel %vm2071_vm7, %v2642_v21, %v16730_v59  ;;  %v2682_v1 = vsel %vm2071_vm7, %v2646_v18, %v16731_v32  ;;  %3393 = vmatpush.bf16.xpose.msra.mxu3 %v3384_v20  ;;  %v2698_v62 = vperm.slane %v2692_v22, %v15103_v3  ;;  %v2674_v46 = vperm.slane %v2668_v38, %v15103_v3 }
 0x252   :  { %v2678_v37 = vperm.slane %v2670_v14, %v15103_v3  ;;  %v2690_v0 = vperm.slane %v2682_v1, %v15103_v3  ;;  %v2694_v49 = vsel %vm2071_vm7, %v2662_v40, %v16732_v27  ;;  %v2680_v23 = vsel %vm2071_vm7, %v2679_v52, %v15101_v63 }
 0x253   :  { %v2702_v31 = vperm.slane %v2694_v49, %v15103_v3  ;;  %v2704_v35 = vsel %vm2071_vm7, %v2703_v34, %v15127_v19  ;;  %v2686_v17 = vperm.slane %v2680_v23, %v15103_v3  ;;  %v16733_v41 = vrot.slane %v15127_v19, 4 }
 0x254   :  { %v2710_v40 = vperm.slane %v2704_v35, %v15103_v3  ;;  %v2715_v21 = vrot.slane %v2698_v62, 4  ;;  %v2721_v61 = vrot.slane %v2678_v37, 4  ;;  %v2430_v63 = vperm.slane %v15366_v24, %v15050_v13 }
 0x255   :  { %v2706_v15 = vsel %vm2071_vm7, %v2666_v29, %v16733_v41  ;;  %v2719_v18 = vrot.slane %v2702_v31, 4  ;;  %v2725_v34 = vrot.slane %v2686_v17, 4  ;;  %v2729_v59 = vrot.slane %v2690_v0, 4 }
 0x256   :  { %v2714_v58 = vperm.slane %v2706_v15, %v15103_v3  ;;  %v2716_v10 = vsel %vm2071_vm7, %v2715_v21, %v2674_v46  ;;  %v2722_v29 = vsel %vm2071_vm7, %v2702_v31, %v2721_v61  ;;  %v2723_v20 = vrot.slane %v2710_v40, 4 }
 0x257   :  { %v2720_v19 = vsel %vm2071_vm7, %v2719_v18, %v2678_v37  ;;  %v15433_v52 = vsel %vm2071_vm7, %v2710_v40, %v2725_v34  ;;  %v2829_v1 = vrot.slane %v2716_v10, 4  ;;  %v2839_v49 = vrot.slane %v2722_v29, 4 }
 0x258   :  { %v2727_v22 = vrot.slane %v2714_v58, 4  ;;  %v15436_v32 = vsel %vm2071_vm7, %v2714_v58, %v2729_v59  ;;  %v2827_v27 = vrot.slane %v2720_v19, 4  ;;  %v2294_v31 = vperm.slane %v15197_v39, %v15050_v13 }
 0x259   :  { %3412 = vmatpush.bf16.xpose.msrb.mxu3 %v3403_v56  ;;  %v2717_v56 = vrot.slane %v2674_v46, 4  ;;  %v2863_v23 = vrot.slane %v15436_v32, 4  ;;  %v2318_v15 = vperm.slane %v15218_v12, %v15050_v13  ;;  %v2865_v21 = vrot.slane %v15433_v52, 4 }
 0x25a   :  { %v15439_v38 = vsel %vm2071_vm7, %v2727_v22, %v2690_v0  ;;  %v2306_v0 = vperm.slane %v15211_v43, %v15050_v13  ;;  %v2330_v58 = vperm.slane %v15229_v7, %v15050_v13  ;;  %v16734_v61 = vrot.slane %v15241_v6, 4 }
 0x25b   :  { %v2718_v14 = vsel %vm2071_vm7, %v2698_v62, %v2717_v56  ;;  %v15442_v62 = vsel %vm2071_vm7, %v2720_v19, %v2829_v1  ;;  %v2851_v37 = vrot.slane %v15439_v38, 4  ;;  %v2337_v56 = vrot.slane %v2294_v31, 4 }
 0x25c   :  { %v2841_v46 = vrot.slane %v2718_v14, 4  ;;  %v2840_v35 = vsel %vm2071_vm7, %v2839_v49, %v2718_v14  ;;  %v2335_v39 = vrot.slane %v2306_v0, 4  ;;  %v2355_v18 = vrot.slane %v2318_v15, 4 }
 0x25d   :  { %v15455_v40 = vperm.slane %v2840_v35, %v15050_v13  ;;  %v2734_v34 = vsel %vm2071_vm7, %v15245_v4, %v16734_v61  ;;  %v2754_v43 = vperm.slane %v15267_v28, %v15050_v13  ;;  %v2353_v59 = vrot.slane %v2330_v58, 4 }
 0x25e   :  { %v2842_v41 = vsel %vm2071_vm7, %v2722_v29, %v2841_v46  ;;  %v2338_v14 = vsel %vm2071_vm7, %v2306_v0, %v2337_v56  ;;  %v2742_v19 = vperm.slane %v2734_v34, %v15050_v13  ;;  %v2336_v7 = vsel %vm2071_vm7, %v2335_v39, %v2294_v31 }
 0x25f   :  { %v2850_v12 = vperm.slane %v2842_v41, %v15050_v13  ;;  %v2346_v29 = vperm.slane %v2338_v14, %v15103_v3  ;;  %v2356_v22 = vsel %vm2071_vm7, %v2330_v58, %v2355_v18  ;;  %v16735_v6 = vrot.slane %v15252_v48, 4 }
 0x260   :  { %v2342_v28 = vperm.slane %v2336_v7, %v15103_v3  ;;  %v2354_v1 = vsel %vm2071_vm7, %v2353_v59, %v2318_v15  ;;  %v2364_v49 = vperm.slane %v2356_v22, %v15103_v3  ;;  %v2778_v41 = vperm.slane %v15275_v54, %v15050_v13 }
 0x261   :  { %v2758_v4 = vsel %vm2071_vm7, %v15256_v53, %v16735_v6  ;;  %v2360_v35 = vperm.slane %v2354_v1, %v15103_v3  ;;  %v2377_v31 = vrot.slane %v2346_v29, 4  ;;  %v2791_v0 = vrot.slane %v2754_v43, 4 }
 0x262   :  { %v2766_v46 = vperm.slane %v2758_v4, %v15050_v13  ;;  %v2375_v58 = vrot.slane %v2364_v49, 4  ;;  %v2373_v48 = vrot.slane %v2342_v28, 4  ;;  %v2724_v56 = vsel %vm2071_vm7, %v2723_v20, %v2686_v17 }
 0x263   :  { %v2828_v53 = vsel %vm2071_vm7, %v2827_v27, %v2716_v10  ;;  %v2371_v39 = vrot.slane %v2360_v35, 4  ;;  %v2378_v15 = vsel %vm2071_vm7, %v2364_v49, %v2377_v31  ;;  %v2792_v18 = vsel %vm2071_vm7, %v2791_v0, %v2742_v19 }
 0x264   :  { %v2809_v61 = vrot.slane %v2778_v41, 4  ;;  %v2482_v34 = vpack.c.bf16 %v2378_v15, %v2378_v15  ;;  %v2796_v59 = vperm.slane %v2792_v18, %v15103_v3  ;;  %v2376_v14 = vsel %vm2071_vm7, %v2375_v58, %v2346_v29 }
 0x265   :  { %v15490_v54 = vsel %vm2071_vm7, %v2360_v35, %v2373_v48  ;;  %v2887_v43 = vrot.slane %v2850_v12, 4  ;;  %v2372_v7 = vsel %vm2071_vm7, %v2371_v39, %v2342_v28  ;;  %v2481_v10 = vpack.c.bf16 %v2376_v14, %v2376_v14 }
 0x266   :  { %v2810_v17 = vsel %vm2071_vm7, %v2809_v61, %v2766_v46  ;;  %v2479_v20 = vpack.c.bf16 %v2372_v7, %v2372_v7  ;;  %10789 = vmatmul.msk.bf16.vlgmr.msrb.gmra.mxu1 %vm3379_vm8, %v2482_v34  ;;  %v2825_v19 = vrot.slane %v2796_v59, 4  ;;  %v2834_v22 = vperm.slane %v2828_v53, %v15050_v13 }
 0x267   :  { %v2814_v27 = vperm.slane %v2810_v17, %v15103_v3  ;;  %10788 = vmatmul.msk.bf16.vlgmr.msrb.gmra.mxu0 %vm3379_vm8, %v2481_v10  ;;  %v2852_v29 = vsel %vm2071_vm7, %v2851_v37, %v2724_v56  ;;  %v2853_v6 = vrot.slane %v2724_v56, 4  ;;  %v2864_v12 = vsel %vm2071_vm7, %v2863_v23, %v15433_v52 }
 0x268   :  { %v2875_v4 = vrot.slane %v15455_v40, 4  ;;  %10786 = vmatmul.msk.bf16.vlgmr.msra.gmra.mxu3 %vm3379_vm8, %v2479_v20  ;;  %v2858_v49 = vperm.slane %v2852_v29, %v15050_v13  ;;  %v2870_v46 = vperm.slane %v2864_v12, %v15050_v13  ;;  %v2480_v35 = vpack.c.bf16 %v15490_v54, %v15490_v54 }
 0x269   :  { %v2823_v28 = vrot.slane %v2814_v27, 4  ;;  %v15504_v1 = vsel %vm2071_vm7, %v2814_v27, %v2825_v19  ;;  %v2877_v31 = vrot.slane %v2834_v22, 4  ;;  %v2838_v39 = vperm.slane %v15442_v62, %v15050_v13 }
 0x26a   :  { %v2928_v37 = vpack.c.bf16 %v15504_v1, %v15504_v1  ;;  %v2876_v23 = vsel %vm2071_vm7, %v2875_v4, %v2834_v22  ;;  %v2893_v58 = vrot.slane %v2870_v46, 4  ;;  %v2895_v48 = vrot.slane %v2858_v49, 4 }
 0x26b   :  { %v2824_v41 = vsel %vm2071_vm7, %v2823_v28, %v2796_v59  ;;  %v2882_v0 = vperm.slane %v2876_v23, %v15103_v3  ;;  %v2878_v53 = vsel %vm2071_vm7, %v15455_v40, %v2877_v31  ;;  %v2854_v15 = vsel %vm2071_vm7, %v15439_v38, %v2853_v6 }
 0x26c   :  { %v2927_v56 = vpack.c.bf16 %v2824_v41, %v2824_v41  ;;  %v2894_v18 = vsel %vm2071_vm7, %v2893_v58, %v2858_v49  ;;  %v2886_v34 = vperm.slane %v2878_v53, %v15103_v3  ;;  %v2896_v59 = vsel %vm2071_vm7, %v2870_v46, %v2895_v48 }
 0x26d   :  { %v2913_v61 = vrot.slane %v2882_v0, 4  ;;  %v2900_v7 = vperm.slane %v2894_v18, %v15103_v3  ;;  %v2904_v17 = vperm.slane %v2896_v59, %v15103_v3  ;;  %v2862_v40 = vperm.slane %v2854_v15, %v15050_v13 }
 0x26e   :  { %v3460_v14 = vsel %vm3379_vm8, %v2927_v56, 0  ;;  %v2866_v38 = vsel %vm2071_vm7, %v15436_v32, %v2865_v21  ;;  %v2888_v62 = vsel %vm2071_vm7, %v2887_v43, %v2838_v39  ;;  %v16736_v10 = vperm.slane %v15215_v5, %v15050_v13 }
 0x26f   :  { %3469 = vmatpush.bf16.xpose.msra.mxu3 %v3460_v14  ;;  %v16737_v27 = vperm.slane %v15232_v45, %v15050_v13  ;;  %v2914_v22 = vsel %vm2071_vm7, %v2900_v7, %v2913_v61  ;;  %v2911_v29 = vrot.slane %v2900_v7, 4  ;;  %v2915_v6 = vrot.slane %v2904_v17, 4 }
 0x270   :  { %v2347_v20 = vrot.slane %v16736_v10, 4  ;;  %v2874_v12 = vperm.slane %v2866_v38, %v15050_v13  ;;  %v2930_v52 = vpack.c.bf16 %v2914_v22, %v2914_v22  ;;  %v2892_v4 = vperm.slane %v2888_v62, %v15103_v3 }
 0x271   :  { %v2365_v19 = vrot.slane %v16737_v27, 4  ;;  %v16738_v32 = vperm.slane %v15206_v25, %v15050_v13  ;;  %v16739_v5 = vperm.slane %v15222_v33, %v15050_v13  ;;  %v2912_v43 = vsel %vm2071_vm7, %v2911_v29, %v2882_v0 }
 0x272   :  { %v2916_v28 = vsel %vm2071_vm7, %v2915_v6, %v2886_v34  ;;  %v2905_v49 = vrot.slane %v2874_v12, 4  ;;  %v3517_v23 = vsel %vm3379_vm8, %v2930_v52, 0  ;;  %v2929_v31 = vpack.c.bf16 %v2912_v43, %v2912_v43 }
 0x273   :  { %v2348_v21 = vsel %vm2071_vm7, %v2347_v20, %v16738_v32  ;;  %v2366_v45 = vsel %vm2071_vm7, %v2365_v19, %v16739_v5  ;;  %v2931_v41 = vpack.c.bf16 %v2916_v28, %v2916_v28  ;;  %v2921_v58 = vrot.slane %v2892_v4, 4  ;;  %3526 = vmatpush.bf16.xpose.msra.mxu1 %v3517_v23 }
 0x274   :  { %v2352_v46 = vperm.slane %v2348_v21, %v15103_v3  ;;  %v2906_v25 = vsel %vm2071_vm7, %v2905_v49, %v2862_v40  ;;  %v2370_v48 = vperm.slane %v2366_v45, %v15103_v3  ;;  %v2414_v33 = vperm.slane %v15346_v30, %v15050_v13 }
 0x275   :  { %v16740_v0 = vrot.slane %v15340_v26, 4  ;;  %v3498_v53 = vsel %vm3379_vm8, %v2929_v31, 0  ;;  %v3536_v39 = vsel %vm3379_vm8, %v2931_v41, 0  ;;  %v2910_v15 = vperm.slane %v2906_v25, %v15103_v3 }
 0x276   :  { %3507 = vmatpush.bf16.xpose.msra.mxu0 %v3498_v53  ;;  %3545 = vmatpush.bf16.xpose.msrb.mxu2 %v3536_v39  ;;  %v2379_v61 = vrot.slane %v2370_v48, 4  ;;  %v2449_v59 = vrot.slane %v15359_v16, 4  ;;  %v2917_v14 = vrot.slane %v2886_v34, 4  ;;  %v2433_v30 = vrot.slane %v15353_v11, 4 }
 0x277   :  { %v2432_v56 = vsel %vm2071_vm7, %v16740_v0, %v15353_v11  ;;  %v2922_v7 = vsel %vm2071_vm7, %v2910_v15, %v2921_v58  ;;  %v2919_v40 = vrot.slane %v2910_v15, 4  ;;  %v2451_v62 = vrot.slane %v2414_v33, 4 }
 0x278   :  { %v2438_v18 = vperm.slane %v2432_v56, %v15103_v3  ;;  %v2934_v10 = vpack.c.bf16 %v2922_v7, %v2922_v7  ;;  %v2380_v20 = vsel %vm2071_vm7, %v2379_v61, %v2352_v46  ;;  %v2450_v27 = vsel %vm2071_vm7, %v2449_v59, %v2414_v33  ;;  %10787 = vmatmul.msk.bf16.vlgmr.msrb.gmra.mxu3 %vm3379_vm8, %v2480_v35  ;;  %v15619_v61 = vpop.f32.mrf.mxu1  ;;  %v15621_v59 = vpop.f32.mrf.mxu0 }
 0x279   :  { %v2918_v19 = vsel %vm2071_vm7, %v2904_v17, %v2917_v14  ;;  %v2461_v22 = vrot.slane %v2430_v63, 4  ;;  %v3479_v11 = vsel %vm3379_vm8, %v2928_v37, 0  ;;  %v2920_v34 = vsel %vm2071_vm7, %v2919_v40, %v2892_v4  ;;  %v15627_v40 = vpop.f32.mrf.mxu3 }
 0x27a   :  { %v2469_v38 = vrot.slane %v2438_v18, 4  ;;  %v2456_v29 = vperm.slane %v2450_v27, %v15103_v3  ;;  %3488 = vmatpush.bf16.xpose.msrb.mxu3 %v3479_v11  ;;  %v3593_v17 = vsel %vm3379_vm8, %v2934_v10, 0  ;;  %v2933_v6 = vpack.c.bf16 %v2920_v34, %v2920_v34 }
 0x27b   :  { %v2434_v24 = vsel %vm2071_vm7, %v15340_v26, %v2433_v30  ;;  %v2452_v63 = vsel %vm2071_vm7, %v15359_v16, %v2451_v62  ;;  %v2394_v54 = vperm.slane %v15334_v42, %v15050_v13  ;;  %3602 = vmatpush.bf16.xpose.msrb.mxu1 %v3593_v17  ;;  %v2381_v32 = vrot.slane %v2352_v46, 4 }
 0x27c   :  { %v2470_v1 = vsel %vm2071_vm7, %v2456_v29, %v2469_v38  ;;  %v2467_v35 = vrot.slane %v2456_v29, 4  ;;  %v2442_v37 = vperm.slane %v2434_v24, %v15103_v3  ;;  %v3574_v12 = vsel %vm3379_vm8, %v2933_v6, 0 }
 0x27d   :  { %v2486_v52 = vpack.c.bf16 %v2470_v1, %v2470_v1  ;;  %v2460_v4 = vperm.slane %v2452_v63, %v15103_v3  ;;  %v2444_v16 = vsel %vm2071_vm7, %v15376_v2, %v2394_v54  ;;  %v16741_v42 = vperm.slane %v15349_v36, %v15050_v13 }
 0x27e   :  { %3583 = vmatpush.bf16.xpose.msrb.mxu0 %v3574_v12  ;;  %v2468_v26 = vsel %vm2071_vm7, %v2467_v35, %v2438_v18  ;;  %v2473_v5 = vrot.slane %v2442_v37, 4  ;;  %v2382_v28 = vsel %vm2071_vm7, %v2370_v48, %v2381_v32  ;;  %v2448_v49 = vperm.slane %v2444_v16, %v15103_v3 }
 0x27f   :  { %v2462_v21 = vsel %vm2071_vm7, %v2461_v22, %v16741_v42  ;;  %10793 = vmatmul.msk.bf16.vlgmr.msra.gmra.mxu1 %vm3379_vm8, %v2486_v52  ;;  %v2485_v45 = vpack.c.bf16 %v2468_v26, %v2468_v26  ;;  %v2471_v43 = vrot.slane %v2460_v4, 4  ;;  %v2932_v48 = vpack.c.bf16 %v2918_v19, %v2918_v19  ;;  %v1987_v22 = vpop.f32.mrf.mxu2 }
 0x280   :  { %v2466_v46 = vperm.slane %v2462_v21, %v15103_v3  ;;  %v2474_v23 = vsel %vm2071_vm7, %v2460_v4, %v2473_v5  ;;  %v2477_v36 = vrot.slane %v2448_v49, 4  ;;  %v2483_v33 = vpack.c.bf16 %v2380_v20, %v2380_v20 }
 0x281   :  { %10792 = vmatmul.msk.bf16.vlgmr.msra.gmra.mxu0 %vm3379_vm8, %v2485_v45  ;;  %v2472_v2 = vsel %vm2071_vm7, %v2471_v43, %v2442_v37  ;;  %v3555_v0 = vsel %vm3379_vm8, %v2932_v48, 0  ;;  %v2484_v39 = vpack.c.bf16 %v2382_v28, %v2382_v28  ;;  %v2488_v15 = vpack.c.bf16 %v2474_v23, %v2474_v23 }
 0x282   :  { %v2487_v31 = vpack.c.bf16 %v2472_v2, %v2472_v2  ;;  %v2475_v41 = vrot.slane %v2466_v46, 4  ;;  %v2478_v58 = vsel %vm2071_vm7, %v2466_v46, %v2477_v36  ;;  %v3608_v18 = vlaneseq }
 0x283   :  { %v2490_v56 = vpack.c.bf16 %v2478_v58, %v2478_v58 }
 0x284   :  { %10794 = vmatmul.msk.bf16.vlgmr.msrb.gmra.mxu2 %vm3379_vm8, %v2487_v31  ;;  %v2476_v25 = vsel %vm2071_vm7, %v2475_v41, %v2448_v49  ;;  %v3609_v14 = vshrl.u32 %v3608_v18, 7  ;;  %v3611_v30 = vand.u32 127, %v3608_v18 }
 0x285   :  { %v2489_v53 = vpack.c.bf16 %v2476_v25, %v2476_v25 }
 0x286   :  { %vm15623_vm9 = vcmp.le.s32.totalorder %v3611_v30, %v3609_v14 }
 0x287   :  { %v2041_v24 = vpop.f32.mrf.mxu2 }
 0x288   :  { %10790 = vmatmul.msk.bf16.vlgmr.msra.gmra.mxu3 %vm3379_vm8, %v2483_v33 }
 0x289   :  { %3564 = vmatpush.bf16.xpose.msra.mxu3 %v3555_v0  ;;  %v16744_v0 = vpack.i.bf16 %v15027_v50, %v15024_v44 }
 0x28f   :  { %10797 = vmatmul.msk.bf16.vlgmr.msrb.gmra.mxu1 %vm3379_vm8, %v2490_v56  ;;  %v2043_v52 = vpop.f32.mrf.mxu2  ;;  %v1946_v56 = vadd.f32 %v15022_v9, %v15020_v8 }
 0x291   :  { %10796 = vmatmul.msk.bf16.vlgmr.msrb.gmra.mxu0 %vm3379_vm8, %v2489_v53  ;;  %v15690_v53 = vadd.f32 %v2041_v24, %v15042_v60  ;;  %v15697_v18 = vadd.f32 %v15038_v55, %v1946_v56 }
 0x293   :  { %v14326_v14 = vpack.i.bf16 %v15697_v18, %v15690_v53 }
 0x298   :  { %10791 = vmatmul.msk.bf16.vlgmr.msrb.gmra.mxu3 %vm3379_vm8, %v2484_v39 }
 0x2a8   :  { %10795 = vmatmul.msk.bf16.vlgmr.msra.gmra.mxu3 %vm3379_vm8, %v2488_v15 }
 0x2e3   :  { %v3452_v38 = vpop.f32.mrf.mxu1 }
 0x2e4   :  { %v15631_v62 = vsel %vm15623_vm9, %v3452_v38, -inf  ;;  %v3433_v10 = vpop.f32.mrf.mxu0 }
 0x2e5   :  { %v15635_v20 = vsel %vm15623_vm9, %v3433_v10, -inf  ;;  %v3637_v27 = vsel %vm3627_vm10, %v15631_v62, -inf  ;;  %v1988_v10 = vadd.f32 %v1987_v22, %v15040_v57 }
 0x2e6   :  { %3638 = vmax.xlane.f32.xlu2 %v3637_v27  ;;  %v3634_v19 = vsel %vm3627_vm10, %v15635_v20, -inf  ;;  %v2030_v27 = vadd.f32 %v15619_v61, %v15621_v59 }
 0x2e7   :  { %3635 = vmax.xlane.f32.xlu1 %v3634_v19 }
 0x2eb   :  { %v3395_v11 = vpop.f32.mrf.mxu3  ;;  %v3454_v34 = vpop.f32.mrf.mxu1 }
 0x2ec   :  { %v15643_v29 = vsel %vm15623_vm9, %v3395_v11, -inf  ;;  %v3435_v17 = vpop.f32.mrf.mxu0  ;;  %v15719_v34 = vadd.f32 %v2043_v52, %v2030_v27  ;;  %v2970_v27 = vperm.slane %v15032_v47, %v15050_v13 }
 0x2ed   :  { %v3628_v6 = vsel %vm3627_vm10, %v15643_v29, -inf }
 0x2ee   :  { %3629 = vmax.xlane.f32.xlu2 %v3628_v6  ;;  %v15723_v6 = vadd.f32 %v15627_v40, %v1988_v10  ;;  %v2966_v10 = vperm.slane %v15036_v51, %v15050_v13 }
 0x2f0   :  { %v14331_v24 = vpack.i.bf16 %v15719_v34, %v15723_v6 }
 0x2f3   :  { %v3397_v63 = vpop.f32.mrf.mxu3 }
 0x2fb   :  { %v3414_v1 = vpop.f32.mrf.mxu3 }
 0x2fc   :  { %v3528_v54 = vpop.f32.mrf.mxu1  ;;  %v15661_v26 = vsel %vm15623_vm9, %v3414_v1, -inf }
 0x2fd   :  { %v15649_v35 = vsel %vm15623_vm9, %v3528_v54, -inf  ;;  %v3631_v5 = vsel %vm3627_vm10, %v15661_v26, -inf }
 0x2fe   :  { %v3509_v37 = vpop.f32.mrf.mxu0  ;;  %v3649_v12 = vsel %vm3627_vm10, %v15649_v35, -inf }
 0x2ff   :  { %v15655_v4 = vsel %vm15623_vm9, %v3509_v37, -inf  ;;  %3650 = vmax.xlane.f32.xlu0 %v3649_v12 }
 0x300   :  { %v3646_v32 = vsel %vm3627_vm10, %v15655_v4, -inf }
 0x301   :  { %3647 = vmax.xlane.f32.xlu1 %v3646_v32 }
 0x303   :  { %v3416_v42 = vpop.f32.mrf.mxu3 }
 0x304   :  { %v3530_v16 = vpop.f32.mrf.mxu1 }
 0x306   :  { %v3511_v21 = vpop.f32.mrf.mxu0 }
 0x307   :  { %v3547_v45 = vpop.f32.mrf.mxu2  ;;  %3632 = vmax.xlane.f32.xlu0 %v3631_v5 }
 0x308   :  { %v15667_v43 = vsel %vm15623_vm9, %v3547_v45, -inf }
 0x309   :  { %v3652_v28 = vsel %vm3627_vm10, %v15667_v43, -inf }
 0x30a   :  { %3653 = vmax.xlane.f32.xlu2 %v3652_v28 }
 0x30b   :  { %v3471_v46 = vpop.f32.mrf.mxu3 }
 0x30c   :  { %v3604_v49 = vpop.f32.mrf.mxu1  ;;  %v15679_v58 = vsel %vm15623_vm9, %v3471_v46, -inf }
 0x30d   :  { %v3640_v33 = vsel %vm3627_vm10, %v15679_v58, -inf  ;;  %v15694_v39 = vsel %vm15623_vm9, %v3604_v49, -inf }
 0x30e   :  { %v3585_v23 = vpop.f32.mrf.mxu0  ;;  %v3661_v44 = vsel %vm3627_vm10, %v15694_v39, -inf }
 0x30f   :  { %v3549_v2 = vpop.f32.mrf.mxu2  ;;  %v15673_v36 = vsel %vm15623_vm9, %v3585_v23, -inf }
 0x310   :  { %v3658_v31 = vsel %vm3627_vm10, %v15673_v36, -inf }
 0x311   :  { %3659 = vmax.xlane.f32.xlu0 %v3658_v31 }
 0x313   :  { %v3473_v25 = vpop.f32.mrf.mxu3 }
 0x314   :  { %v3606_v41 = vpop.f32.mrf.mxu1 }
 0x316   :  { %v3587_v48 = vpop.f32.mrf.mxu0 }
 0x319   :  { %3641 = vmax.xlane.f32.xlu0 %v3640_v33 }
 0x31a   :  { %14322 = vrot.lane.b32.xlu1 %v16744_v0, %s14764_s10 }
 0x31b   :  { %v3490_v15 = vpop.f32.mrf.mxu3 }
 0x31c   :  { %v15712_v30 = vsel %vm15623_vm9, %v3490_v15, -inf }
 0x31d   :  { %v3643_v38 = vsel %vm3627_vm10, %v15712_v30, -inf }
 0x321   :  { %3662 = vmax.xlane.f32.xlu0 %v3661_v44 }
 0x322   :  { %14327 = vrot.lane.b32.xlu2 %v14326_v14, %s14764_s10 }
 0x323   :  { %v3492_v8 = vpop.f32.mrf.mxu3 }
 0x32b   :  { %v3566_v9 = vpop.f32.mrf.mxu3 }
 0x32c   :  { %v15706_v50 = vsel %vm15623_vm9, %v3566_v9, -inf }
 0x32d   :  { %v3655_v60 = vsel %vm3627_vm10, %v15706_v50, -inf }
 0x32e   :  { %3656 = vmax.xlane.f32.xlu0 %v3655_v60 }
 0x333   :  { %v3568_v55 = vpop.f32.mrf.mxu3 }
 0x34b   :  { %3644 = vmax.xlane.f32.xlu2 %v3643_v38 }
 0x359   :  { %v3639_v19 = vpop.xlane.xlu2 %3638 }
 0x35a   :  { %v3636_v11 = vpop.xlane.xlu1 %3635  ;;  %v3667_v12 = vsub.f32 %v15631_v62, %v3639_v19  ;;  %v2983_v62 = vrot.slane %v15690_v53, 4 }
 0x35b   :  { %v3666_v17 = vsub.f32 %v15635_v20, %v3636_v11 }
 0x35c   :  { %v3682_v16 = vmul.f32 1.442695, %v3667_v12  ;;  %v2984_v41 = vsel %vm2071_vm7, 0.0, %v2983_v62  ;;  %v3005_v12 = vrot.slane %v2966_v10, 4 }
 0x35d   :  { %v3680_v7 = vmul.f32 1.442695, %v3666_v17 }
 0x35f   :  { %14357 = vpow2.f32 %v3680_v7 }
 0x361   :  { %v3630_v63 = vpop.xlane.xlu2 %3629 }
 0x362   :  { %v3664_v57 = vsub.f32 %v15643_v29, %v3630_v63 }
 0x363   :  { %14332 = vrot.lane.b32.xlu2 %v14331_v24, %s14764_s10 }
 0x364   :  { %v3676_v61 = vmul.f32 1.442695, %v3664_v57 }
 0x365   :  { %v15729_v59 = vpop.eup %14357 }
 0x366   :  { %14359 = vpow2.f32 %v3676_v61  ;;  %v3706_v20 = vsel %vm3627_vm10, %v15729_v59, 0.0 }
 0x367   :  { %3707 = vadd.xlane.f32.xlu0 %v3706_v20 }
 0x36c   :  { %v15733_v40 = vpop.eup %14359 }
 0x36d   :  { %v3700_v22 = vsel %vm3627_vm10, %v15733_v40, 0.0 }
 0x36e   :  { %3701 = vadd.xlane.f32.xlu1 %v3700_v22 }
 0x372   :  { %v15737_v54 = vpop.xlane.xlu0 %3650 }
 0x374   :  { %v3648_v1 = vpop.xlane.xlu1 %3647 }
 0x375   :  { %v3670_v37 = vsub.f32 %v15655_v4, %v3648_v1 }
 0x377   :  { %v3688_v29 = vmul.f32 1.442695, %v3670_v37  ;;  %v3017_v37 = vrot.slane %v2970_v27, 4 }
 0x379   :  { %14361 = vpow2.f32 %v3688_v29 }
 0x37a   :  { %v3633_v52 = vpop.xlane.xlu0 %3632 }
 0x37b   :  { %v3665_v32 = vsub.f32 %v15661_v26, %v3633_v52 }
 0x37d   :  { %v3654_v42 = vpop.xlane.xlu2 %3653  ;;  %v3678_v21 = vmul.f32 1.442695, %v3665_v32 }
 0x37e   :  { %v3672_v5 = vsub.f32 %v15667_v43, %v3654_v42  ;;  %v2988_v43 = vperm.slane %v15690_v53, %v15050_v13  ;;  %v2992_v53 = vperm.slane %v2984_v41, %v15050_v13 }
 0x37f   :  { %v15743_v45 = vpop.eup %14361  ;;  %14363 = vpow2.f32 %v3678_v21 }
 0x380   :  { %v3692_v28 = vmul.f32 1.442695, %v3672_v5  ;;  %v3718_v49 = vsel %vm3627_vm10, %v15743_v45, 0.0  ;;  %14365 = vpow2.f32 %v3682_v16  ;;  %v3029_v15 = vrot.slane %v2988_v43, 4 }
 0x381   :  { %3719 = vadd.xlane.f32.xlu0 %v3718_v49  ;;  %v3041_v11 = vrot.slane %v2992_v53, 4 }
 0x382   :  { %14367 = vpow2.f32 %v3692_v28 }
 0x384   :  { %v3660_v4 = vpop.xlane.xlu0 %3659 }
 0x385   :  { %v15748_v46 = vpop.eup %14363  ;;  %v15750_v26 = vpop.permute.xlu2 %14327  ;;  %v3674_v23 = vsub.f32 %v15673_v36, %v3660_v4 }
 0x386   :  { %v14329_v2 = vunpack.i.l.bf16 %v15750_v26  ;;  %v15756_v31 = vpop.eup %14365  ;;  %v3703_v56 = vsel %vm3627_vm10, %v15748_v46, 0.0 }
 0x387   :  { %v3696_v25 = vmul.f32 1.442695, %v3674_v23  ;;  %v3709_v9 = vsel %vm3627_vm10, %v15756_v31, 0.0 }
 0x388   :  { %v15759_v48 = vpop.eup %14367  ;;  %v2993_v33 = vrot.slane %v14329_v2, 4  ;;  %v2998_v0 = vperm.slane %v14329_v2, %v15050_v13 }
 0x389   :  { %14369 = vpow2.f32 %v3696_v25  ;;  %v3724_v36 = vsel %vm3627_vm10, %v15759_v48, 0.0  ;;  %3704 = vadd.xlane.f32.xlu0 %v3703_v56 }
 0x38a   :  { %v2994_v14 = vsel %vm2071_vm7, 0.0, %v2993_v33  ;;  %3725 = vadd.xlane.f32.xlu1 %v3724_v36  ;;  %v3027_v8 = vrot.slane %v2998_v0, 4  ;;  %v3030_v60 = vsel %vm2071_vm7, %v2998_v0, %v3029_v15 }
 0x38b   :  { %v3002_v44 = vperm.slane %v2994_v14, %v15050_v13  ;;  %v3038_v61 = vperm.slane %v3030_v60, %v15103_v3 }
 0x38c   :  { %3710 = vadd.xlane.f32.xlu2 %v3709_v9  ;;  %v14323_v55 = vpop.permute.xlu1 %14322  ;;  %v3642_v38 = vpop.xlane.xlu0 %3641  ;;  %v3028_v57 = vsel %vm2071_vm7, %v3027_v8, %v2988_v43 }
 0x38d   :  { %v3039_v19 = vrot.slane %v3002_v44, 4  ;;  %v14325_v17 = vunpack.i.h.bf16 %v14323_v55  ;;  %v14324_v7 = vunpack.i.l.bf16 %v14323_v55  ;;  %v3668_v24 = vsub.f32 %v15679_v58, %v3642_v38 }
 0x38e   :  { %v3042_v22 = vsel %vm2071_vm7, %v3002_v44, %v3041_v11  ;;  %v3034_v58 = vperm.slane %v3028_v57, %v15103_v3  ;;  %v3055_v28 = vrot.slane %v3038_v61, 4 }
 0x38f   :  { %v15777_v63 = vpop.eup %14369  ;;  %v3040_v20 = vsel %vm2071_vm7, %v3039_v19, %v2992_v53  ;;  %v2971_v51 = vrot.slane %v14325_v17, 4  ;;  %v2973_v1 = vrot.slane %v14324_v7, 4  ;;  %v3684_v47 = vmul.f32 1.442695, %v3668_v24 }
 0x390   :  { %v3730_v29 = vsel %vm3627_vm10, %v15777_v63, 0.0  ;;  %v3046_v16 = vperm.slane %v3040_v20, %v15103_v3  ;;  %v3050_v42 = vperm.slane %v3042_v22, %v15103_v3  ;;  %v3051_v2 = vrot.slane %v3034_v58, 4 }
 0x391   :  { %v2972_v52 = vsel %vm2071_vm7, %v2971_v51, %v14324_v7  ;;  %v2974_v32 = vsel %vm2071_vm7, %v14325_v17, %v2973_v1  ;;  %14371 = vpow2.f32 %v3684_v47 }
 0x392   :  { %3731 = vadd.xlane.f32.xlu1 %v3730_v29  ;;  %v2978_v21 = vperm.slane %v2972_v52, %v15050_v13  ;;  %v2982_v5 = vperm.slane %v2974_v32, %v15050_v13  ;;  %v3059_v0 = vrot.slane %v3046_v16, 4  ;;  %v3063_v56 = vrot.slane %v3050_v42, 4 }
 0x394   :  { %v3663_v49 = vpop.xlane.xlu0 %3662  ;;  %v3003_v62 = vrot.slane %v2978_v21, 4  ;;  %v3006_v4 = vsel %vm2071_vm7, %v2978_v21, %v3005_v12  ;;  %v3015_v23 = vrot.slane %v2982_v5, 4  ;;  %v3018_v43 = vsel %vm2071_vm7, %v2982_v5, %v3017_v37 }
 0x395   :  { %v3014_v41 = vperm.slane %v3006_v4, %v15103_v3  ;;  %v3026_v25 = vperm.slane %v3018_v43, %v15103_v3  ;;  %v3675_v33 = vsub.f32 %v15694_v39, %v3663_v49 }
 0x396   :  { %v3004_v36 = vsel %vm2071_vm7, %v3003_v62, %v2966_v10  ;;  %v3016_v53 = vsel %vm2071_vm7, %v3015_v23, %v2970_v27 }
 0x397   :  { %v3010_v15 = vperm.slane %v3004_v36, %v15103_v3  ;;  %v3022_v14 = vperm.slane %v3016_v53, %v15103_v3  ;;  %v3056_v44 = vsel %vm2071_vm7, %v3055_v28, %v3014_v41  ;;  %v3057_v8 = vrot.slane %v3014_v41, 4  ;;  %v15803_v19 = vpop.eup %14371 }
 0x398   :  { %v3064_v9 = vsel %vm2071_vm7, %v3063_v56, %v3026_v25  ;;  %v3065_v60 = vrot.slane %v3026_v25, 4  ;;  %v3175_v55 = vrot.slane %v3056_v44, 4  ;;  %v3698_v38 = vmul.f32 1.442695, %v3675_v33 }
 0x399   :  { %v3052_v39 = vsel %vm2071_vm7, %v3051_v2, %v3010_v15  ;;  %v3053_v11 = vrot.slane %v3010_v15, 4  ;;  %v3058_v10 = vsel %vm2071_vm7, %v3038_v61, %v3057_v8  ;;  %v3060_v27 = vsel %vm2071_vm7, %v3059_v0, %v3022_v14 }
 0x39a   :  { %v3061_v17 = vrot.slane %v3022_v14, 4  ;;  %v3066_v7 = vsel %vm2071_vm7, %v3050_v42, %v3065_v60  ;;  %v3187_v24 = vrot.slane %v3058_v10, 4  ;;  %v3199_v57 = vrot.slane %v3064_v9, 4 }
 0x39b   :  { %v3211_v20 = vrot.slane %v3066_v7, 4  ;;  %14373 = vpow2.f32 %v3698_v38  ;;  %v3712_v22 = vsel %vm3627_vm10, %v15803_v19, 0.0  ;;  %v3054_v51 = vsel %vm2071_vm7, %v3034_v58, %v3053_v11 }
 0x39c   :  { %v3062_v1 = vsel %vm2071_vm7, %v3046_v16, %v3061_v17  ;;  %v3176_v37 = vsel %vm2071_vm7, %v3175_v55, %v3052_v39  ;;  %3713 = vadd.xlane.f32.xlu0 %v3712_v22  ;;  %v3188_v47 = vsel %vm2071_vm7, %v3187_v24, %v3054_v51  ;;  %v3189_v29 = vrot.slane %v3054_v51, 4 }
 0x39d   :  { %v3182_v61 = vperm.slane %v3176_v37, %v15050_v13  ;;  %v3200_v12 = vsel %vm2071_vm7, %v3199_v57, %v3060_v27  ;;  %v3194_v52 = vperm.slane %v3188_v47, %v15050_v13  ;;  %v3212_v42 = vsel %vm2071_vm7, %v3211_v20, %v3062_v1 }
 0x39e   :  { %v3206_v32 = vperm.slane %v3200_v12, %v15050_v13  ;;  %v3213_v21 = vrot.slane %v3062_v1, 4  ;;  %v3177_v58 = vrot.slane %v3052_v39, 4  ;;  %v3218_v16 = vperm.slane %v3212_v42, %v15050_v13 }
 0x39f   :  { %v3225_v5 = vrot.slane %v3182_v61, 4  ;;  %v3190_v28 = vsel %vm2071_vm7, %v3058_v10, %v3189_v29  ;;  %v3201_v49 = vrot.slane %v3060_v27, 4  ;;  %v3223_v4 = vrot.slane %v3194_v52, 4 }
 0x3a0   :  { %v3243_v62 = vrot.slane %v3206_v32, 4  ;;  %v3241_v2 = vrot.slane %v3218_v16, 4  ;;  %v3198_v41 = vperm.slane %v3190_v28, %v15050_v13  ;;  %v3214_v25 = vsel %vm2071_vm7, %v3066_v7, %v3213_v21 }
 0x3a1   :  { %v15822_v23 = vpop.eup %14373  ;;  %v3226_v43 = vsel %vm2071_vm7, %v3194_v52, %v3225_v5  ;;  %v3224_v36 = vsel %vm2071_vm7, %v3223_v4, %v3182_v61  ;;  %v3178_v8 = vsel %vm2071_vm7, %v3056_v44, %v3177_v58  ;;  %v3202_v38 = vsel %vm2071_vm7, %v3064_v9, %v3201_v49 }
 0x3a2   :  { %v3733_v33 = vsel %vm3627_vm10, %v15822_v23, 0.0  ;;  %v3234_v0 = vperm.slane %v3226_v43, %v15103_v3  ;;  %v3244_v56 = vsel %vm2071_vm7, %v3218_v16, %v3243_v62  ;;  %v3230_v15 = vperm.slane %v3224_v36, %v15103_v3 }
 0x3a3   :  { %3734 = vadd.xlane.f32.xlu2 %v3733_v33  ;;  %v3252_v53 = vperm.slane %v3244_v56, %v15103_v3  ;;  %v3242_v14 = vsel %vm2071_vm7, %v3241_v2, %v3206_v32  ;;  %v3222_v39 = vperm.slane %v3214_v25, %v15050_v13  ;;  %v3235_v27 = vrot.slane %v3198_v41, 4  ;;  %v3657_v41 = vpop.xlane.xlu0 %3656 }
 0x3a4   :  { %v3265_v60 = vrot.slane %v3234_v0, 4  ;;  %v3248_v55 = vperm.slane %v3242_v14, %v15103_v3  ;;  %v3261_v10 = vrot.slane %v3230_v15, 4  ;;  %v3186_v24 = vperm.slane %v3178_v8, %v15050_v13 }
 0x3a5   :  { %v3263_v11 = vrot.slane %v3252_v53, 4  ;;  %v3253_v57 = vrot.slane %v3222_v39, 4  ;;  %v3210_v51 = vperm.slane %v3202_v38, %v15050_v13  ;;  %v3671_v25 = vsub.f32 %v15649_v35, %v15737_v54 }
 0x3a6   :  { %v3266_v17 = vsel %vm2071_vm7, %v3252_v53, %v3265_v60  ;;  %v3259_v7 = vrot.slane %v3248_v55, 4  ;;  %v3262_v22 = vsel %vm2071_vm7, %v3248_v55, %v3261_v10  ;;  %v3236_v61 = vsel %vm2071_vm7, %v3235_v27, %v3186_v24 }
 0x3a7   :  { %v3264_v20 = vsel %vm2071_vm7, %v3263_v11, %v3234_v0  ;;  %v3370_v44 = vpack.c.bf16 %v3266_v17, %v3266_v17  ;;  %v3368_v37 = vpack.c.bf16 %v3262_v22, %v3262_v22  ;;  %v3240_v12 = vperm.slane %v3236_v61, %v15103_v3 }
 0x3a8   :  { %v3369_v9 = vpack.c.bf16 %v3264_v20, %v3264_v20  ;;  %v3260_v1 = vsel %vm2071_vm7, %v3259_v7, %v3230_v15  ;;  %v3254_v52 = vsel %vm2071_vm7, %v3253_v57, %v3210_v51  ;;  %v3673_v33 = vsub.f32 %v15706_v50, %v3657_v41 }
 0x3a9   :  { %v3834_v47 = vsel %vm3775_vm11, %v3370_v44, 0  ;;  %v3367_v29 = vpack.c.bf16 %v3260_v1, %v3260_v1  ;;  %v3796_v42 = vsel %vm3775_vm11, %v3368_v37, 0  ;;  %v3258_v21 = vperm.slane %v3254_v52, %v15103_v3 }
 0x3aa   :  { %v3815_v32 = vsel %vm3775_vm11, %v3369_v9, 0  ;;  %3843 = vmatpush.bf16.msra.mxu1 %v3834_v47  ;;  %3805 = vmatpush.bf16.msrb.mxu3 %v3796_v42  ;;  %v3269_v16 = vrot.slane %v3240_v12, 4  ;;  %v3690_v0 = vmul.f32 1.442695, %v3671_v25  ;;  %v3069_v36 = vrot.slane %v15697_v18, 4 }
 0x3ab   :  { %3824 = vmatpush.bf16.msra.mxu0 %v3815_v32  ;;  %v3777_v58 = vsel %vm3775_vm11, %v3367_v29, 0  ;;  %v3267_v5 = vrot.slane %v3258_v21, 4  ;;  %v3067_v53 = vrot.slane %v15723_v6, 4  ;;  %v3091_v15 = vrot.slane %v15719_v34, 4 }
 0x3ac   :  { %3786 = vmatpush.bf16.msra.mxu2 %v3777_v58  ;;  %v3270_v28 = vsel %vm2071_vm7, %v3258_v21, %v3269_v16  ;;  %v3694_v8 = vmul.f32 1.442695, %v3673_v33  ;;  %v3070_v60 = vsel %vm2071_vm7, %v15723_v6, %v3069_v36  ;;  %14375 = vpow2.f32 %v3690_v0 }
 0x3ad   :  { %v3268_v49 = vsel %vm2071_vm7, %v3267_v5, %v3240_v12  ;;  %v3372_v62 = vpack.c.bf16 %v3270_v28, %v3270_v28  ;;  %v3068_v35 = vsel %vm2071_vm7, %v3067_v53, %v15697_v18  ;;  %v3092_v50 = vsel %vm2071_vm7, 0.0, %v3091_v15 }
 0x3ae   :  { %v3371_v4 = vpack.c.bf16 %v3268_v49, %v3268_v49  ;;  %v14330_v54 = vunpack.i.h.bf16 %v15750_v26  ;;  %v3078_v38 = vperm.slane %v3070_v60, %v15050_v13  ;;  %v3096_v39 = vperm.slane %v15719_v34, %v15050_v13 }
 0x3af   :  { %v3872_v43 = vsel %vm3775_vm11, %v3372_v62, 0  ;;  %v3100_v6 = vperm.slane %v3092_v50, %v15050_v13 }
 0x3b0   :  { %v3853_v2 = vsel %vm3775_vm11, %v3371_v4, 0  ;;  %3881 = vmatpush.bf16.msra.mxu3 %v3872_v43  ;;  %v3081_v10 = vrot.slane %v14330_v54, 4  ;;  %v3125_v7 = vrot.slane %v3078_v38, 4  ;;  %v3137_v24 = vrot.slane %v3096_v39, 4 }
 0x3b1   :  { %3862 = vmatpush.bf16.msrb.mxu2 %v3853_v2  ;;  %v3149_v9 = vrot.slane %v3100_v6, 4 }
 0x3b2   :  { %v15875_v18 = vpop.eup %14375 }
 0x3b3   :  { %v3721_v5 = vsel %vm3627_vm10, %v15875_v18, 0.0 }
 0x3be   :  { %v3645_v56 = vpop.xlane.xlu2 %3644 }
 0x3bf   :  { %v3669_v14 = vsub.f32 %v15712_v30, %v3645_v56  ;;  %v3074_v30 = vperm.slane %v3068_v35, %v15050_v13 }
 0x3c1   :  { %v3686_v55 = vmul.f32 1.442695, %v3669_v14  ;;  %v3113_v51 = vrot.slane %v3074_v30, 4 }
 0x3c3   :  { %14377 = vpow2.f32 %v3686_v55 }
 0x3c4   :  { %14379 = vpow2.f32 %v3694_v8 }
 0x3c6   :  { %v14333_v11 = vpop.permute.xlu2 %14332 }
 0x3c7   :  { %v14335_v27 = vunpack.i.h.bf16 %v14333_v11  ;;  %v14334_v17 = vunpack.i.l.bf16 %v14333_v11 }
 0x3c9   :  { %v15877_v26 = vpop.eup %14377  ;;  %v3101_v57 = vrot.slane %v14335_v27, 4  ;;  %v3106_v20 = vperm.slane %v14335_v27, %v15050_v13  ;;  %v3079_v44 = vrot.slane %v14334_v17, 4  ;;  %v3082_v34 = vsel %vm2071_vm7, %v14334_v17, %v3081_v10 }
 0x3ca   :  { %v15881_v22 = vpop.eup %14379  ;;  %v3090_v1 = vperm.slane %v3082_v34, %v15050_v13  ;;  %v3715_v37 = vsel %vm3627_vm10, %v15877_v26, 0.0 }
 0x3cb   :  { %v3102_v61 = vsel %vm2071_vm7, 0.0, %v3101_v57  ;;  %v3135_v47 = vrot.slane %v3106_v20, 4  ;;  %v3138_v29 = vsel %vm2071_vm7, %v3106_v20, %v3137_v24  ;;  %v3080_v12 = vsel %vm2071_vm7, %v3079_v44, %v14330_v54  ;;  %3716 = vadd.xlane.f32.xlu0 %v3715_v37 }
 0x3cc   :  { %v3110_v52 = vperm.slane %v3102_v61, %v15050_v13  ;;  %v3146_v32 = vperm.slane %v3138_v29, %v15103_v3  ;;  %v3086_v42 = vperm.slane %v3080_v12, %v15050_v13  ;;  %v3123_v21 = vrot.slane %v3090_v1, 4 }
 0x3cd   :  { %v3136_v58 = vsel %vm2071_vm7, %v3135_v47, %v3096_v39  ;;  %v3126_v16 = vsel %vm2071_vm7, %v3090_v1, %v3125_v7  ;;  %v3727_v28 = vsel %vm3627_vm10, %v15881_v22, 0.0 }
 0x3ce   :  { %v3142_v49 = vperm.slane %v3136_v58, %v15103_v3  ;;  %v3147_v62 = vrot.slane %v3110_v52, 4  ;;  %v3150_v4 = vsel %vm2071_vm7, %v3110_v52, %v3149_v9  ;;  %v3163_v43 = vrot.slane %v3146_v32, 4 }
 0x3cf   :  { %v3158_v2 = vperm.slane %v3150_v4, %v15103_v3  ;;  %v3111_v41 = vrot.slane %v3086_v42, 4  ;;  %v3114_v25 = vsel %vm2071_vm7, %v3086_v42, %v3113_v51  ;;  %v3124_v33 = vsel %vm2071_vm7, %v3123_v21, %v3078_v38 }
 0x3d0   :  { %v3148_v0 = vsel %vm2071_vm7, %v3147_v62, %v3100_v6  ;;  %v3159_v56 = vrot.slane %v3142_v49, 4  ;;  %v3122_v36 = vperm.slane %v3114_v25, %v15103_v3  ;;  %v3130_v53 = vperm.slane %v3124_v33, %v15103_v3 }
 0x3d1   :  { %v3154_v15 = vperm.slane %v3148_v0, %v15103_v3  ;;  %v3171_v14 = vrot.slane %v3158_v2, 4  ;;  %v3112_v8 = vsel %vm2071_vm7, %v3111_v41, %v3074_v30  ;;  %v3134_v60 = vperm.slane %v3126_v16, %v15103_v3 }
 0x3d2   :  { %v3118_v55 = vperm.slane %v3112_v8, %v15103_v3  ;;  %v3164_v35 = vsel %vm2071_vm7, %v3163_v43, %v3122_v36  ;;  %v3165_v50 = vrot.slane %v3122_v36, 4  ;;  %v3169_v54 = vrot.slane %v3130_v53, 4 }
 0x3d3   :  { %v3167_v38 = vrot.slane %v3154_v15, 4  ;;  %v3172_v39 = vsel %vm2071_vm7, %v3171_v14, %v3134_v60  ;;  %v3173_v6 = vrot.slane %v3134_v60, 4  ;;  %v3271_v11 = vrot.slane %v3164_v35, 4  ;;  %3722 = vadd.xlane.f32.xlu0 %v3721_v5 }
 0x3d4   :  { %v3160_v10 = vsel %vm2071_vm7, %v3159_v56, %v3118_v55  ;;  %v3161_v27 = vrot.slane %v3118_v55, 4  ;;  %v3166_v17 = vsel %vm2071_vm7, %v3146_v32, %v3165_v50  ;;  %v3170_v30 = vsel %vm2071_vm7, %v3154_v15, %v3169_v54 }
 0x3d5   :  { %v3168_v7 = vsel %vm2071_vm7, %v3167_v38, %v3130_v53  ;;  %v3174_v24 = vsel %vm2071_vm7, %v3158_v2, %v3173_v6  ;;  %v3273_v57 = vrot.slane %v3160_v10, 4  ;;  %v3283_v20 = vrot.slane %v3166_v17, 4 }
 0x3d6   :  { %v3162_v44 = vsel %vm2071_vm7, %v3142_v49, %v3161_v27  ;;  %v3295_v34 = vrot.slane %v3172_v39, 4  ;;  %v3297_v51 = vrot.slane %v3168_v7, 4  ;;  %v3307_v9 = vrot.slane %v3174_v24, 4 }
 0x3d7   :  { %v3284_v1 = vsel %vm2071_vm7, %v3283_v20, %v3162_v44  ;;  %v3285_v37 = vrot.slane %v3162_v44, 4  ;;  %v3309_v61 = vrot.slane %v3170_v30, 4  ;;  %v3272_v47 = vsel %vm2071_vm7, %v3271_v11, %v3160_v10 }
 0x3d8   :  { %v3278_v29 = vperm.slane %v3272_v47, %v15050_v13  ;;  %v3290_v12 = vperm.slane %v3284_v1, %v15050_v13  ;;  %v3296_v52 = vsel %vm2071_vm7, %v3295_v34, %v3168_v7  ;;  %v3308_v32 = vsel %vm2071_vm7, %v3307_v9, %v3170_v30 }
 0x3d9   :  { %v3286_v42 = vsel %vm2071_vm7, %v3166_v17, %v3285_v37  ;;  %v3310_v21 = vsel %vm2071_vm7, %v3174_v24, %v3309_v61  ;;  %v3302_v58 = vperm.slane %v3296_v52, %v15050_v13  ;;  %v3314_v16 = vperm.slane %v3308_v32, %v15050_v13 }
 0x3da   :  { %v3319_v5 = vrot.slane %v3290_v12, 4  ;;  %v3274_v49 = vsel %vm2071_vm7, %v3164_v35, %v3273_v57  ;;  %v3294_v62 = vperm.slane %v3286_v42, %v15050_v13  ;;  %v3298_v4 = vsel %vm2071_vm7, %v3172_v39, %v3297_v51  ;;  %v3708_v25 = vpop.xlane.xlu0 %3707 }
 0x3db   :  { %3728 = vadd.xlane.f32.xlu0 %v3727_v28  ;;  %v3337_v43 = vrot.slane %v3314_v16, 4  ;;  %v3306_v2 = vperm.slane %v3298_v4, %v15050_v13  ;;  %v3318_v41 = vperm.slane %v3310_v21, %v15050_v13  ;;  %v3282_v0 = vperm.slane %v3274_v49, %v15050_v13 }
 0x3dc   :  { %v3320_v33 = vsel %vm2071_vm7, %v3319_v5, %v3278_v29  ;;  %v3331_v56 = vrot.slane %v3294_v62, 4  ;;  %v3339_v36 = vrot.slane %v3302_v58, 4  ;;  %14381 = vrcp.f32 %v3708_v25 }
 0x3dd   :  { %v3326_v53 = vperm.slane %v3320_v33, %v15103_v3  ;;  %v3338_v15 = vsel %vm2071_vm7, %v3337_v43, %v3302_v58  ;;  %v3349_v14 = vrot.slane %v3318_v41, 4  ;;  %v3321_v50 = vrot.slane %v3278_v29, 4 }
 0x3de   :  { %v3344_v28 = vperm.slane %v3338_v15, %v15103_v3  ;;  %v3332_v8 = vsel %vm2071_vm7, %v3331_v56, %v3282_v0  ;;  %v3340_v60 = vsel %vm2071_vm7, %v3314_v16, %v3339_v36 }
 0x3df   :  { %v3357_v55 = vrot.slane %v3326_v53, 4  ;;  %v3350_v35 = vsel %vm2071_vm7, %v3349_v14, %v3306_v2  ;;  %v3336_v38 = vperm.slane %v3332_v8, %v15103_v3  ;;  %v3348_v6 = vperm.slane %v3340_v60, %v15103_v3 }
 0x3e0   :  { %v3355_v54 = vrot.slane %v3344_v28, 4  ;;  %v3354_v39 = vperm.slane %v3350_v35, %v15103_v3  ;;  %v3322_v57 = vsel %vm2071_vm7, %v3290_v12, %v3321_v50 }
 0x3e1   :  { %v3358_v11 = vsel %vm2071_vm7, %v3344_v28, %v3357_v55  ;;  %v3702_v7 = vpop.xlane.xlu1 %3701  ;;  %v3359_v20 = vrot.slane %v3348_v6, 4  ;;  %v3330_v61 = vperm.slane %v3322_v57, %v15103_v3 }
 0x3e2   :  { %v3356_v10 = vsel %vm2071_vm7, %v3355_v54, %v3326_v53  ;;  %v3374_v27 = vpack.c.bf16 %v3358_v11, %v3358_v11  ;;  %v3363_v17 = vrot.slane %v3354_v39, 4  ;;  %v14382_v30 = vpop.eup %14381  ;;  %14383 = vrcp.f32 %v3702_v7 }
 0x3e3   :  { %v3373_v24 = vpack.c.bf16 %v3356_v10, %v3356_v10  ;;  %v3750_v44 = vmul.f32 %v14382_v30, %v15729_v59  ;;  %v3360_v29 = vsel %vm2071_vm7, %v3359_v20, %v3330_v61  ;;  %v3361_v62 = vrot.slane %v3330_v61, 4 }
 0x3e4   :  { %v3910_v34 = vsel %vm3775_vm11, %v3374_v27, 0  ;;  %v3364_v51 = vsel %vm2071_vm7, %v3363_v17, %v3336_v38  ;;  %v3375_v52 = vpack.c.bf16 %v3360_v29, %v3360_v29 }
 0x3e5   :  { %v3891_v9 = vsel %vm3775_vm11, %v3373_v24, 0  ;;  %3919 = vmatpush.bf16.msrb.mxu1 %v3910_v34  ;;  %v3377_v1 = vpack.c.bf16 %v3364_v51, %v3364_v51  ;;  %v3762_v37 = vpack.c.bf16 %v3750_v44, %v3750_v44  ;;  %v3362_v2 = vsel %vm2071_vm7, %v3348_v6, %v3361_v62 }
 0x3e6   :  { %3900 = vmatpush.bf16.msrb.mxu0 %v3891_v9  ;;  %v3929_v42 = vsel %vm3775_vm11, %v3375_v52, 0  ;;  %v3376_v33 = vpack.c.bf16 %v3362_v2, %v3362_v2 }
 0x3e7   :  { %v3967_v47 = vsel %vm3775_vm11, %v3377_v1, 0  ;;  %10800 = vmatmul.msk.bf16.vlgmr.msra.gmra.mxu0 %vm3627_vm10, %v3762_v37 }
 0x3e8   :  { %v14384_v59 = vpop.eup %14383  ;;  %v3948_v14 = vsel %vm3775_vm11, %v3376_v33, 0 }
 0x3e9   :  { %v3748_v12 = vmul.f32 %v14384_v59, %v15733_v40  ;;  %v3365_v40 = vrot.slane %v3336_v38, 4 }
 0x3ea   :  { %3976 = vmatpush.bf16.msra.mxu0 %v3967_v47 }
 0x3eb   :  { %v3760_v32 = vpack.c.bf16 %v3748_v12, %v3748_v12  ;;  %v3366_v0 = vsel %vm2071_vm7, %v3354_v39, %v3365_v40 }
 0x3ec   :  { %v3378_v15 = vpack.c.bf16 %v3366_v0, %v3366_v0 }
 0x3ed   :  { %10798 = vmatmul.msk.bf16.vlgmr.msra.gmra.mxu2 %vm3627_vm10, %v3760_v32 }
 0x3ee   :  { %3938 = vmatpush.bf16.msra.mxu2 %v3929_v42 }
 0x3f4   :  { %v3720_v21 = vpop.xlane.xlu0 %3719 }
 0x3f5   :  { %14385 = vrcp.f32 %v3720_v21 }
 0x3fb   :  { %v14386_v58 = vpop.eup %14385 }
 0x3fc   :  { %v3754_v16 = vmul.f32 %v14386_v58, %v15743_v45  ;;  %v3705_v5 = vpop.xlane.xlu0 %3704 }
 0x3fd   :  { %v3726_v49 = vpop.xlane.xlu1 %3725  ;;  %14387 = vrcp.f32 %v3705_v5 }
 0x3fe   :  { %v3766_v4 = vpack.c.bf16 %v3754_v16, %v3754_v16 }
 0x3ff   :  { %v3711_v43 = vpop.xlane.xlu2 %3710 }
 0x400   :  { %14389 = vrcp.f32 %v3711_v43  ;;  %10804 = vmatmul.msk.bf16.vlgmr.msrb.gmra.mxu0 %vm3627_vm10, %v3766_v4 }
 0x403   :  { %v14388_v41 = vpop.eup %14387 }
 0x404   :  { %v3749_v25 = vmul.f32 %v14388_v41, %v15748_v46  ;;  %v3986_v46 = vsel %vm3775_vm11, %v3378_v15, 0 }
 0x405   :  { %v3732_v56 = vpop.xlane.xlu1 %3731 }
 0x406   :  { %v14390_v45 = vpop.eup %14389  ;;  %v3761_v36 = vpack.c.bf16 %v3749_v25, %v3749_v25  ;;  %14391 = vrcp.f32 %v3732_v56 }
 0x407   :  { %v3751_v53 = vmul.f32 %v14390_v45, %v15756_v31 }
 0x408   :  { %10799 = vmatmul.msk.bf16.vlgmr.msrb.gmra.mxu3 %vm3627_vm10, %v3761_v36 }
 0x409   :  { %v3763_v28 = vpack.c.bf16 %v3751_v53, %v3751_v53  ;;  %3957 = vmatpush.bf16.msrb.mxu3 %v3948_v14 }
 0x40b   :  { %10801 = vmatmul.msk.bf16.vlgmr.msra.gmra.mxu1 %vm3627_vm10, %v3763_v28 }
 0x40c   :  { %v14392_v8 = vpop.eup %14391  ;;  %3995 = vmatpush.bf16.msra.mxu1 %v3986_v46 }
 0x40d   :  { %v3758_v60 = vmul.f32 %v14392_v8, %v15777_v63 }
 0x40f   :  { %v3770_v55 = vpack.c.bf16 %v3758_v60, %v3758_v60  ;;  %v3714_v35 = vpop.xlane.xlu0 %3713 }
 0x410   :  { %14393 = vrcp.f32 %v3714_v35 }
 0x411   :  { %10808 = vmatmul.msk.bf16.vlgmr.msra.gmra.mxu0 %vm3627_vm10, %v3770_v55  ;;  %14395 = vrcp.f32 %v3726_v49 }
 0x416   :  { %v14394_v31 = vpop.eup %14393  ;;  %v3735_v24 = vpop.xlane.xlu2 %3734 }
 0x417   :  { %v3752_v50 = vmul.f32 %v14394_v31, %v15803_v19  ;;  %v14396_v38 = vpop.eup %14395 }
 0x418   :  { %v3756_v39 = vmul.f32 %v14396_v38, %v15759_v48 }
 0x419   :  { %v3764_v54 = vpack.c.bf16 %v3752_v50, %v3752_v50 }
 0x41a   :  { %v3768_v6 = vpack.c.bf16 %v3756_v39, %v3756_v39 }
 0x41b   :  { %10802 = vmatmul.msk.bf16.vlgmr.msrb.gmra.mxu2 %vm3627_vm10, %v3764_v54 }
 0x42b   :  { %10806 = vmatmul.msk.bf16.vlgmr.msra.gmra.mxu2 %vm3627_vm10, %v3768_v6 }
 0x43e   :  { %v3717_v11 = vpop.xlane.xlu0 %3716 }
 0x43f   :  { %14397 = vrcp.f32 %v3717_v11 }
 0x445   :  { %v14398_v63 = vpop.eup %14397 }
 0x446   :  { %v3753_v10 = vmul.f32 %v14398_v63, %v15877_v26  ;;  %v3723_v27 = vpop.xlane.xlu0 %3722 }
 0x447   :  { %14399 = vrcp.f32 %v3723_v27 }
 0x448   :  { %v3765_v17 = vpack.c.bf16 %v3753_v10, %v3753_v10 }
 0x44a   :  { %10803 = vmatmul.msk.bf16.vlgmr.msra.gmra.mxu3 %vm3627_vm10, %v3765_v17 }
 0x44d   :  { %v14400_v19 = vpop.eup %14399 }
 0x44e   :  { %v3755_v30 = vmul.f32 %v14400_v19, %v15875_v18  ;;  %v3729_v7 = vpop.xlane.xlu0 %3728 }
 0x44f   :  { %14401 = vrcp.f32 %v3729_v7 }
 0x450   :  { %v3767_v48 = vpack.c.bf16 %v3755_v30, %v3755_v30  ;;  %14403 = vrcp.f32 %v3735_v24 }
 0x452   :  { %10805 = vmatmul.msk.bf16.vlgmr.msrb.gmra.mxu1 %vm3627_vm10, %v3767_v48 }
 0x455   :  { %v14402_v57 = vpop.eup %14401 }
 0x456   :  { %v3757_v20 = vmul.f32 %v14402_v57, %v15881_v22  ;;  %v14404_v26 = vpop.eup %14403 }
 0x457   :  { %v3759_v34 = vmul.f32 %v14404_v26, %v15822_v23 }
 0x458   :  { %v3769_v44 = vpack.c.bf16 %v3757_v20, %v3757_v20 }
 0x459   :  { %v3771_v51 = vpack.c.bf16 %v3759_v34, %v3759_v34 }
 0x45a   :  { %10807 = vmatmul.msk.bf16.vlgmr.msrb.gmra.mxu3 %vm3627_vm10, %v3769_v44 }
 0x462   :  { %10809 = vmatmul.msk.bf16.vlgmr.msra.gmra.mxu1 %vm3627_vm10, %v3771_v51 }
 0x464   :  { %v3826_v18 = vpop.f32.mrf.mxu0 }
 0x465   :  { %v4001_v1 = vrot.slane %v3826_v18, 4 }
 0x46c   :  { %v3828_v9 = vpop.f32.mrf.mxu0 }
 0x470   :  { %v3788_v37 = vpop.f32.mrf.mxu2 }
 0x471   :  { %v4002_v61 = vsel %vm2071_vm7, %v4001_v1, %v3788_v37  ;;  %v4003_v47 = vrot.slane %v3788_v37, 4 }
 0x472   :  { %v4008_v32 = vperm.slane %v4002_v61, %v15050_v13 }
 0x473   :  { %v4004_v29 = vsel %vm2071_vm7, %v3826_v18, %v4003_v47 }
 0x474   :  { %v4012_v23 = vperm.slane %v4004_v29, %v15050_v13  ;;  %v4047_v5 = vrot.slane %v4008_v32, 4 }
 0x476   :  { %v4059_v43 = vrot.slane %v4012_v23, 4 }
 0x478   :  { %v3790_v59 = vpop.f32.mrf.mxu2 }
 0x47d   :  { %v3902_v22 = vpop.f32.mrf.mxu0 }
 0x47e   :  { %v4111_v7 = vrot.slane %v3902_v22, 4 }
 0x485   :  { %v3904_v12 = vpop.f32.mrf.mxu0 }
 0x488   :  { %v3845_v52 = vpop.f32.mrf.mxu1 }
 0x489   :  { %v4013_v42 = vrot.slane %v3845_v52, 4 }
 0x48b   :  { %v3807_v21 = vpop.f32.mrf.mxu3 }
 0x48c   :  { %v4014_v58 = vsel %vm2071_vm7, %v4013_v42, %v3807_v21  ;;  %v4015_v16 = vrot.slane %v3807_v21, 4 }
 0x48d   :  { %v4020_v49 = vperm.slane %v4014_v58, %v15050_v13 }
 0x48e   :  { %v4016_v62 = vsel %vm2071_vm7, %v3845_v52, %v4015_v16  ;;  %v3978_v4 = vpop.f32.mrf.mxu0 }
 0x48f   :  { %v4024_v40 = vperm.slane %v4016_v62, %v15050_v13  ;;  %v4045_v2 = vrot.slane %v4020_v49, 4  ;;  %v4048_v41 = vsel %vm2071_vm7, %v4020_v49, %v4047_v5  ;;  %v4133_v60 = vrot.slane %v3978_v4, 4 }
 0x490   :  { %v3847_v25 = vpop.f32.mrf.mxu1  ;;  %v4056_v54 = vperm.slane %v4048_v41, %v15103_v3  ;;  %v16000_v38 = vperm.slane %v3978_v4, %v15050_v13 }
 0x491   :  { %v4046_v33 = vsel %vm2071_vm7, %v4045_v2, %v4008_v32  ;;  %v4057_v0 = vrot.slane %v4024_v40, 4  ;;  %v4060_v56 = vsel %vm2071_vm7, %v4024_v40, %v4059_v43  ;;  %v4134_v35 = vsel %vm2071_vm7, 0.0, %v4133_v60 }
 0x492   :  { %v4052_v50 = vperm.slane %v4046_v33, %v15103_v3  ;;  %v4068_v6 = vperm.slane %v4060_v56, %v15103_v3  ;;  %v16005_v11 = vperm.slane %v4134_v35, %v15050_v13  ;;  %v4099_v48 = vrot.slane %v4056_v54, 4 }
 0x493   :  { %v4058_v45 = vsel %vm2071_vm7, %v4057_v0, %v4012_v23  ;;  %v3809_v36 = vpop.f32.mrf.mxu3  ;;  %v4179_v57 = vrot.slane %v16000_v38, 4 }
 0x494   :  { %v4064_v27 = vperm.slane %v4058_v45, %v15103_v3  ;;  %v4095_v24 = vrot.slane %v4052_v50, 4  ;;  %v4107_v47 = vrot.slane %v4068_v6, 4  ;;  %v4191_v29 = vrot.slane %v16005_v11, 4 }
 0x496   :  { %v3980_v53 = vpop.f32.mrf.mxu0  ;;  %v4103_v61 = vrot.slane %v4064_v27, 4 }
 0x49e   :  { %v3864_v15 = vpop.f32.mrf.mxu2 }
 0x49f   :  { %v4025_v8 = vrot.slane %v3864_v15, 4  ;;  %v4030_v31 = vperm.slane %v3864_v15, %v15050_v13 }
 0x4a1   :  { %v4026_v55 = vsel %vm2071_vm7, 0.0, %v4025_v8  ;;  %v4071_v17 = vrot.slane %v4030_v31, 4 }
 0x4a2   :  { %v4034_v39 = vperm.slane %v4026_v55, %v15050_v13 }
 0x4a4   :  { %v4083_v44 = vrot.slane %v4034_v39, 4 }
 0x4a6   :  { %v3866_v14 = vpop.f32.mrf.mxu2 }
 0x4ae   :  { %v3940_v28 = vpop.f32.mrf.mxu2 }
 0x4af   :  { %v4109_v63 = vrot.slane %v3940_v28, 4  ;;  %v4112_v9 = vsel %vm2071_vm7, %v3940_v28, %v4111_v7 }
 0x4b0   :  { %v16026_v23 = vperm.slane %v4112_v9, %v15050_v13 }
 0x4b1   :  { %v4110_v18 = vsel %vm2071_vm7, %v4109_v63, %v3902_v22 }
 0x4b2   :  { %v16023_v22 = vperm.slane %v4110_v18, %v15050_v13  ;;  %v4167_v55 = vrot.slane %v16026_v23, 4 }
 0x4b6   :  { %v3942_v46 = vpop.f32.mrf.mxu2 }
 0x4cd   :  { %v3883_v10 = vpop.f32.mrf.mxu3 }
 0x4ce   :  { %v4035_v19 = vrot.slane %v3883_v10, 4  ;;  %v4040_v30 = vperm.slane %v3883_v10, %v15050_v13 }
 0x4cf   :  { %v16010_v20 = vpop.f32.mrf.mxu1 }
 0x4d0   :  { %v4036_v26 = vsel %vm2071_vm7, 0.0, %v4035_v19  ;;  %v4069_v34 = vrot.slane %v4040_v30, 4  ;;  %v4072_v51 = vsel %vm2071_vm7, %v4040_v30, %v4071_v17  ;;  %v4123_v10 = vrot.slane %v16010_v20, 4 }
 0x4d1   :  { %v4044_v1 = vperm.slane %v4036_v26, %v15050_v13  ;;  %v4080_v37 = vperm.slane %v4072_v51, %v15103_v3  ;;  %v4155_v30 = vrot.slane %v16023_v22, 4 }
 0x4d2   :  { %v4070_v59 = vsel %vm2071_vm7, %v4069_v34, %v4030_v31 }
 0x4d3   :  { %v4076_v12 = vperm.slane %v4070_v59, %v15103_v3  ;;  %v4081_v52 = vrot.slane %v4044_v1, 4  ;;  %v4084_v32 = vsel %vm2071_vm7, %v4044_v1, %v4083_v44  ;;  %v4097_v42 = vrot.slane %v4080_v37, 4 }
 0x4d4   :  { %v4092_v21 = vperm.slane %v4084_v32, %v15103_v3  ;;  %v4100_v58 = vsel %vm2071_vm7, %v4080_v37, %v4099_v48 }
 0x4d5   :  { %v4082_v16 = vsel %vm2071_vm7, %v4081_v52, %v4034_v39  ;;  %v4093_v5 = vrot.slane %v4076_v12, 4  ;;  %v4096_v49 = vsel %vm2071_vm7, %v4076_v12, %v4095_v24  ;;  %v4098_v62 = vsel %vm2071_vm7, %v4097_v42, %v4056_v54  ;;  %v3885_v4 = vpop.f32.mrf.mxu3 }
 0x4d6   :  { %v4088_v43 = vperm.slane %v4082_v16, %v15103_v3  ;;  %v4105_v40 = vrot.slane %v4092_v21, 4  ;;  %v16035_v2 = vsel %vm2071_vm7, %v4092_v21, %v4107_v47  ;;  %v4217_v41 = vrot.slane %v4098_v62, 4 }
 0x4d7   :  { %v4094_v25 = vsel %vm2071_vm7, %v4093_v5, %v4052_v50  ;;  %v4229_v33 = vrot.slane %v4100_v58, 4  ;;  %v4231_v0 = vrot.slane %v4096_v49, 4  ;;  %v4253_v56 = vrot.slane %v16035_v2, 4  ;;  %v3923_v45 = vpop.f32.mrf.mxu1 }
 0x4d8   :  { %v4101_v36 = vrot.slane %v4088_v43, 4  ;;  %v16040_v53 = vsel %vm2071_vm7, %v4088_v43, %v4103_v61  ;;  %v4106_v15 = vsel %vm2071_vm7, %v4105_v40, %v4068_v6  ;;  %v4218_v14 = vsel %vm2071_vm7, %v4217_v41, %v4094_v25 }
 0x4d9   :  { %v4219_v28 = vrot.slane %v4094_v25, 4  ;;  %v4230_v46 = vsel %vm2071_vm7, %v4229_v33, %v4096_v49  ;;  %v4232_v8 = vsel %vm2071_vm7, %v4100_v58, %v4231_v0  ;;  %v4241_v60 = vrot.slane %v4106_v15, 4 }
 0x4da   :  { %v4102_v35 = vsel %vm2071_vm7, %v4101_v36, %v4064_v27  ;;  %v4240_v31 = vperm.slane %v4232_v8, %v15050_v13  ;;  %v4224_v50 = vperm.slane %v4218_v14, %v15050_v13  ;;  %v4236_v6 = vperm.slane %v4230_v46, %v15050_v13 }
 0x4db   :  { %v16051_v54 = vsel %vm2071_vm7, %v4098_v62, %v4219_v28  ;;  %v4243_v39 = vrot.slane %v4102_v35, 4  ;;  %v4242_v63 = vsel %vm2071_vm7, %v4241_v60, %v4102_v35  ;;  %v4254_v27 = vsel %vm2071_vm7, %v4253_v56, %v16040_v53 }
 0x4dc   :  { %v16057_v17 = vperm.slane %v4242_v63, %v15050_v13  ;;  %v4267_v19 = vrot.slane %v4224_v50, 4  ;;  %v16063_v24 = vperm.slane %v4254_v27, %v15050_v13  ;;  %v4265_v48 = vrot.slane %v4236_v6, 4 }
 0x4dd   :  { %v3959_v7 = vpop.f32.mrf.mxu3  ;;  %v16066_v44 = vsel %vm2071_vm7, %v4106_v15, %v4243_v39  ;;  %v4255_v9 = vrot.slane %v16040_v53, 4  ;;  %v16072_v1 = vrot.slane %v4240_v31, 4 }
 0x4de   :  { %v4121_v26 = vrot.slane %v3959_v7, 4  ;;  %v4124_v34 = vsel %vm2071_vm7, %v3959_v7, %v4123_v10  ;;  %v4268_v51 = vsel %vm2071_vm7, %v4236_v6, %v4267_v19  ;;  %v4285_v18 = vrot.slane %v16057_v17, 4 }
 0x4df   :  { %v4132_v37 = vperm.slane %v4124_v34, %v15050_v13  ;;  %v3997_v61 = vpop.f32.mrf.mxu1  ;;  %v16076_v47 = vsel %vm2071_vm7, %v4265_v48, %v4224_v50  ;;  %v16086_v16 = vperm.slane %v4268_v51, %v15103_v3 }
 0x4e0   :  { %v4122_v59 = vsel %vm2071_vm7, %v4121_v26, %v16010_v20  ;;  %v4143_v12 = vrot.slane %v3997_v61, 4  ;;  %v4148_v52 = vperm.slane %v3997_v61, %v15050_v13  ;;  %v4286_v32 = vsel %vm2071_vm7, %v16063_v24, %v4285_v18 }
 0x4e1   :  { %v4128_v42 = vperm.slane %v4122_v59, %v15050_v13  ;;  %v4165_v21 = vrot.slane %v4132_v37, 4  ;;  %v4168_v58 = vsel %vm2071_vm7, %v4132_v37, %v4167_v55  ;;  %v16102_v56 = vperm.slane %v4286_v32, %v15103_v3 }
 0x4e2   :  { %v4176_v5 = vperm.slane %v4168_v58, %v15103_v3  ;;  %v4144_v49 = vsel %vm2071_vm7, 0.0, %v4143_v12  ;;  %v4177_v62 = vrot.slane %v4148_v52, 4  ;;  %v4180_v20 = vsel %vm2071_vm7, %v4148_v52, %v4179_v57 }
 0x4e3   :  { %v4153_v4 = vrot.slane %v4128_v42, 4  ;;  %v4156_v43 = vsel %vm2071_vm7, %v4128_v42, %v4155_v30  ;;  %v4166_v40 = vsel %vm2071_vm7, %v4165_v21, %v16026_v23  ;;  %v4152_v41 = vperm.slane %v4144_v49, %v15050_v13 }
 0x4e4   :  { %v4164_v25 = vperm.slane %v4156_v43, %v15103_v3  ;;  %v4172_v33 = vperm.slane %v4166_v40, %v15103_v3  ;;  %v4178_v0 = vsel %vm2071_vm7, %v4177_v62, %v16000_v38  ;;  %v4188_v36 = vperm.slane %v4180_v20, %v15103_v3 }
 0x4e5   :  { %v4154_v57 = vsel %vm2071_vm7, %v4153_v4, %v16023_v22  ;;  %v4184_v45 = vperm.slane %v4178_v0, %v15103_v3  ;;  %v4189_v23 = vrot.slane %v4152_v41, 4  ;;  %v3961_v15 = vpop.f32.mrf.mxu3  ;;  %v4215_v46 = vrot.slane %v4176_v5, 4 }
 0x4e6   :  { %v4160_v14 = vperm.slane %v4154_v57, %v15103_v3  ;;  %v4207_v28 = vrot.slane %v4164_v25, 4  ;;  %v4192_v38 = vsel %vm2071_vm7, %v4152_v41, %v4191_v29  ;;  %v4205_v55 = vrot.slane %v4188_v36, 4 }
 0x4e7   :  { %v4190_v8 = vsel %vm2071_vm7, %v4189_v23, %v16005_v11  ;;  %v4200_v60 = vperm.slane %v4192_v38, %v15103_v3  ;;  %v4201_v22 = vrot.slane %v4184_v45, 4  ;;  %v3999_v35 = vpop.f32.mrf.mxu1  ;;  %v4211_v50 = vrot.slane %v4172_v33, 4 }
 0x4e8   :  { %v4203_v31 = vrot.slane %v4160_v14, 4  ;;  %v4196_v39 = vperm.slane %v4190_v8, %v15103_v3  ;;  %v4208_v6 = vsel %vm2071_vm7, %v4188_v36, %v4207_v28  ;;  %v4206_v10 = vsel %vm2071_vm7, %v4205_v55, %v4164_v25 }
 0x4e9   :  { %v4202_v63 = vsel %vm2071_vm7, %v4201_v22, %v4160_v14  ;;  %v4213_v27 = vrot.slane %v4200_v60, 4  ;;  %v16120_v29 = vsel %vm2071_vm7, %v4200_v60, %v4215_v46  ;;  %v4313_v7 = vrot.slane %v4206_v10, 4 }
 0x4ea   :  { %v4204_v11 = vsel %vm2071_vm7, %v4184_v45, %v4203_v31  ;;  %v4209_v19 = vrot.slane %v4196_v39, 4  ;;  %v16124_v30 = vsel %vm2071_vm7, %v4196_v39, %v4211_v50  ;;  %v4315_v26 = vrot.slane %v4202_v63, 4 }
 0x4eb   :  { %v4214_v48 = vsel %vm2071_vm7, %v4213_v27, %v4176_v5  ;;  %v4325_v34 = vrot.slane %v4208_v6, 4  ;;  %v4327_v51 = vrot.slane %v4204_v11, 4  ;;  %v4314_v37 = vsel %vm2071_vm7, %v4313_v7, %v4202_v63  ;;  %v13688_v63 = vld [vmem:[#allocation10 + $0x230] sm:$0xf0] }
 0x4ec   :  { %v4210_v18 = vsel %vm2071_vm7, %v4209_v19, %v4172_v33  ;;  %v4337_v61 = vrot.slane %v4214_v48, 4  ;;  %v4349_v59 = vrot.slane %v16120_v29, 4  ;;  %v4316_v12 = vsel %vm2071_vm7, %v4206_v10, %v4315_v26  ;;  %v13640_v7 = vld [vmem:[#allocation10 + $0xb0] sm:$0xf0] }
 0x4ed   :  { %v4326_v52 = vsel %vm2071_vm7, %v4325_v34, %v4204_v11  ;;  %v4328_v32 = vsel %vm2071_vm7, %v4208_v6, %v4327_v51  ;;  %v4283_v42 = vrot.slane %v16063_v24, 4  ;;  %v4339_v21 = vrot.slane %v4210_v18, 4  ;;  %v11088_v6 = vld [vmem:[#allocation10 + $0x228] sm:$0xf] }
 0x4ee   :  { %v4307_v58 = vrot.slane %v16086_v16, 4  ;;  %v4320_v5 = vperm.slane %v4314_v37, %v15050_v13  ;;  %v4228_v49 = vperm.slane %v16051_v54, %v15050_v13  ;;  %v4332_v62 = vperm.slane %v4326_v52, %v15050_v13  ;;  %v13685_v52 = vld [vmem:[#allocation10 + $0x218] sm:$0xf0] }
 0x4ef   :  { %v4338_v20 = vsel %vm2071_vm7, %v4337_v61, %v4210_v18  ;;  %v4350_v4 = vsel %vm2071_vm7, %v4349_v59, %v16124_v30  ;;  %v16144_v43 = vperm.slane %v16076_v47, %v15103_v3  ;;  %v4336_v24 = vperm.slane %v4328_v32, %v15050_v13  ;;  %v11076_v18 = vld [vmem:[#allocation10 + $0x210] sm:$0xf] }
 0x4f0   :  { %v4308_v40 = vsel %vm2071_vm7, %v16102_v56, %v4307_v58  ;;  %v4344_v41 = vperm.slane %v4338_v20, %v15050_v13  ;;  %v4356_v54 = vperm.slane %v4350_v4, %v15050_v13  ;;  %v4363_v25 = vrot.slane %v4320_v5, 4  ;;  %v10884_v32 = vld [vmem:[#allocation10 + $0x90] sm:$0xf]  ;;  %v13639_v4 = vld [vmem:[#allocation10 + $0xac] sm:$0xf] }
 0x4f1   :  { %v4284_v33 = vsel %vm2071_vm7, %v4283_v42, %v16057_v17  ;;  %v4303_v0 = vrot.slane %v16144_v43, 4  ;;  %v4361_v57 = vrot.slane %v4332_v62, 4  ;;  %v4351_v45 = vrot.slane %v16124_v30, 4  ;;  %v10896_v30 = vld [vmem:[#allocation10 + $0xa8] sm:$0xf] }
 0x4f2   :  { %v4381_v47 = vrot.slane %v4344_v41, 4  ;;  %v16156_v36 = vperm.slane %v4284_v33, %v15103_v3  ;;  %v4379_v23 = vrot.slane %v4356_v54, 4  ;;  %v4364_v15 = vsel %vm2071_vm7, %v4332_v62, %v4363_v25  ;;  %v13637_v42 = vld [vmem:[#allocation10 + $0x98] sm:$0xf0]  ;;  %v10980_v25 = vld [vmem:[#allocation10 + $0x150] sm:$0xf] }
 0x4f3   :  { %v4362_v14 = vsel %vm2071_vm7, %v4361_v57, %v4320_v5  ;;  %v4256_v28 = vsel %vm2071_vm7, %v16035_v2, %v4255_v9  ;;  %v4278_v17 = vsel %vm2071_vm7, %v16072_v1, %v4228_v49  ;;  %v16167_v46 = vperm.slane %v4364_v15, %v15103_v3  ;;  %v10992_v49 = vld [vmem:[#allocation10 + $0x168] sm:$0xf]  ;;  %v13661_v33 = vld [vmem:[#allocation10 + $0x158] sm:$0xf0]  ;;  %v13682_v57 = vld [vmem:[#allocation10 + $0x200] sm:$0xf0] }
 0x4f4   :  { %v4382_v38 = vsel %vm2071_vm7, %v4356_v54, %v4381_v47  ;;  %v4304_v8 = vsel %vm2071_vm7, %v16156_v36, %v4303_v0  ;;  %v4252_v60 = vperm.slane %v16066_v44, %v15050_v13  ;;  %v16178_v53 = vperm.slane %v4362_v14, %v15103_v3  ;;  %v13634_v47 = vld [vmem:[#allocation10 + $0x80] sm:$0xf0] }
 0x4f5   :  { %v16175_v22 = vperm.slane %v4382_v38, %v15103_v3  ;;  %v4380_v2 = vsel %vm2071_vm7, %v4379_v23, %v4344_v41  ;;  %v4264_v9 = vperm.slane %v4256_v28, %v15050_v13  ;;  %v4373_v1 = vrot.slane %v4336_v24, 4  ;;  %v10898_v24 = vld [vmem:[#allocation10 + $0xb4] sm:$0xf0]  ;;  %v13636_v28 = vld [vmem:[#allocation10 + $0x94] sm:$0xf] }
 0x4f6   :  { %v4403_v55 = vrot.slane %v16167_v46, 4  ;;  %v16184_v35 = vperm.slane %v4278_v17, %v15103_v3  ;;  %v16187_v31 = vperm.slane %v4380_v2, %v15103_v3  ;;  %v4399_v44 = vrot.slane %v16178_v53, 4  ;;  %v10886_v17 = vld [vmem:[#allocation10 + $0x9c] sm:$0xf0] }
 0x4f7   :  { %v4295_v50 = vrot.slane %v4264_v9, 4  ;;  %v4340_v39 = vsel %vm2071_vm7, %v4214_v48, %v4339_v21  ;;  %v4324_v11 = vperm.slane %v4316_v12, %v15050_v13  ;;  %v4352_v48 = vsel %vm2071_vm7, %v16120_v29, %v4351_v45  ;;  %v13664_v29 = vld [vmem:[#allocation10 + $0x170] sm:$0xf0]  ;;  %v10872_v45 = vld [vmem:[#allocation10 + $0x78] sm:$0xf] }
 0x4f8   :  { %v4404_v10 = vsel %vm2071_vm7, %v16175_v22, %v4403_v55  ;;  %v4311_v27 = vrot.slane %v16184_v35, 4  ;;  %v4348_v19 = vperm.slane %v4340_v39, %v15050_v13  ;;  %v4400_v34 = vsel %vm2071_vm7, %v16187_v31, %v4399_v44  ;;  %v10968_v55 = vld [vmem:[#allocation10 + $0x138] sm:$0xf]  ;;  %v13658_v44 = vld [vmem:[#allocation10 + $0x140] sm:$0xf0] }
 0x4f9   :  { %v14341_v26 = vpack.i.bf16 %v4404_v10, %v4308_v40  ;;  %v4296_v51 = vsel %vm2071_vm7, %v4295_v50, %v4252_v60  ;;  %v14336_v37 = vpack.i.bf16 %v4400_v34, %v4304_v8  ;;  %v4360_v59 = vperm.slane %v4352_v48, %v15050_v13  ;;  %v11064_v13 = vld [vmem:[#allocation10 + $0x1f8] sm:$0xf]  ;;  %v13679_v39 = vld [vmem:[#allocation10 + $0x1e8] sm:$0xf0]  ;;  %v13633_v10 = vld [vmem:[#allocation10 + $0x7c] sm:$0xf] }
 0x4fa   :  { %v4300_v61 = vperm.slane %v4296_v51, %v15103_v3  ;;  %v4374_v12 = vsel %vm2071_vm7, %v4373_v1, %v4324_v11  ;;  %v11089_v58 = vor.u32 %v13688_v63, %v11088_v6  ;;  %v10897_v5 = vor.u32 %v13640_v7, %v10896_v30  ;;  %v11052_v1 = vld [vmem:[#allocation10 + $0x1e0] sm:$0xf]  ;;  %v13631_v6 = vld [vmem:[#allocation10 + $0x68] sm:$0xf0]  ;;  %v13676_v48 = vld [vmem:[#allocation10 + $0x1d0] sm:$0xf0] }
 0x4fb   :  { %14342 = vrot.lane.b32.xlu1 %v14341_v26, %s14764_s10  ;;  %v16206_v21 = vperm.slane %v4374_v12, %v15103_v3  ;;  %14337 = vrot.lane.b32.xlu0 %v14336_v37, %s14764_s10  ;;  %v4391_v20 = vrot.slane %v4360_v59, 4  ;;  %v11077_v41 = vor.u32 %v13685_v52, %v11076_v18  ;;  %v10885_v54 = vor.u32 %v13637_v42, %v10884_v32  ;;  %v11040_v26 = vld [vmem:[#allocation10 + $0x1c8] sm:$0xf]  ;;  %v10956_v34 = vld [vmem:[#allocation10 + $0x120] sm:$0xf] }
 0x4fc   :  { %v4312_v62 = vsel %vm2071_vm7, %v4300_v61, %v4311_v27  ;;  %4958 = vmatpush.bf16.msrb.mxu0 %v11089_v58  ;;  %4930 = vmatpush.bf16.msrb.mxu2 %v10897_v5  ;;  %v10993_v23 = vor.u32 %v13664_v29, %v10992_v49  ;;  %v10901_v14 = vor.u32 %v13639_v4, %v10898_v24  ;;  %v4309_v38 = vrot.slane %v4300_v61, 4  ;;  %v10874_v27 = vld [vmem:[#allocation10 + $0x84] sm:$0xf0]  ;;  %v13655_v51 = vld [vmem:[#allocation10 + $0x128] sm:$0xf0] }
 0x4fd   :  { %v4407_v40 = vrot.slane %v16206_v21, 4  ;;  %v4392_v0 = vsel %vm2071_vm7, %v4391_v20, %v4348_v19  ;;  %v10981_v8 = vor.u32 %v13661_v33, %v10980_v25  ;;  %v11065_v2 = vor.u32 %v13682_v57, %v11064_v13  ;;  %v10848_v18 = vld [vmem:[#allocation10 + $0x48] sm:$0xf]  ;;  %v13628_v37 = vld [vmem:[#allocation10 + $0x50] sm:$0xf0] }
 0x4fe   :  { %v16213_v15 = vperm.slane %v4392_v0, %v15103_v3  ;;  %4944 = vmatpush.bf16.msra.mxu3 %v10993_v23  ;;  %v10873_v9 = vor.u32 %v13634_v47, %v10872_v45  ;;  %v10860_v3 = vld [vmem:[#allocation10 + $0x60] sm:$0xf]  ;;  %4972 = vmatpush.bf16.msrb.mxu1 %v10901_v14  ;;  %v10889_v63 = vor.u32 %v13636_v28, %v10886_v17  ;;  %v13630_v59 = vld [vmem:[#allocation10 + $0x64] sm:$0xf]  ;;  %v10862_v12 = vld [vmem:[#allocation10 + $0x6c] sm:$0xf0] }
 0x4ff   :  { %v10969_v11 = vor.u32 %v13658_v44, %v10968_v55  ;;  %v16220_v19 = vsel %vm2071_vm7, %v4309_v38, %v16184_v35  ;;  %v11053_v30 = vor.u32 %v13679_v39, %v11052_v1  ;;  %v10861_v7 = vor.u32 %v13631_v6, %v10860_v3  ;;  %v11028_v42 = vld [vmem:[#allocation10 + $0x1b0] sm:$0xf]  ;;  %v10944_v58 = vld [vmem:[#allocation10 + $0x108] sm:$0xf]  ;;  %v13652_v5 = vld [vmem:[#allocation10 + $0x110] sm:$0xf0] }
 0x500   :  { %v4408_v60 = vsel %vm2071_vm7, %v16213_v15, %v4407_v40  ;;  %4959 = vmatpush.bf16.msrb.mxu0 %v11077_v41  ;;  %4931 = vmatpush.bf16.msrb.mxu2 %v10885_v54  ;;  %v10877_v61 = vor.u32 %v13633_v10, %v10874_v27  ;;  %v10957_v52 = vor.u32 %v13655_v51, %v10956_v34  ;;  %v13673_v49 = vld [vmem:[#allocation10 + $0x1b8] sm:$0xf0]  ;;  %v10836_v29 = vld [vmem:[#allocation10 + $0x30] sm:$0xf]  ;;  %v13627_v13 = vld [vmem:[#allocation10 + $0x4c] sm:$0xf] }
 0x501   :  { %v14346_v50 = vpack.i.bf16 %v4408_v60, %v4312_v62  ;;  %v11041_v35 = vor.u32 %v13676_v48, %v11040_v26  ;;  %v10849_v32 = vor.u32 %v13628_v37, %v10848_v18  ;;  %v13625_v62 = vld [vmem:[#allocation10 + $0x38] sm:$0xf0]  ;;  %v10865_v20 = vor.u32 %v13630_v59, %v10862_v12  ;;  %v10850_v4 = vld [vmem:[#allocation10 + $0x54] sm:$0xf0]  ;;  %v13670_v25 = vld [vmem:[#allocation10 + $0x1a0] sm:$0xf0] }
 0x502   :  { %4945 = vmatpush.bf16.msra.mxu3 %v10981_v8  ;;  %4973 = vmatpush.bf16.msrb.mxu1 %v10889_v63  ;;  %v10945_v24 = vor.u32 %v13652_v5, %v10944_v58  ;;  %v11029_v40 = vor.u32 %v13673_v49, %v11028_v42  ;;  %v10837_v41 = vor.u32 %v13625_v62, %v10836_v29  ;;  %v11016_v54 = vld [vmem:[#allocation10 + $0x198] sm:$0xf]  ;;  %v13622_v0 = vld [vmem:[#allocation10 + $0x20] sm:$0xf0]  ;;  %v11004_v23 = vld [vmem:[#allocation10 + $0x180] sm:$0xf] }
 0x503   :  { %14347 = vrot.lane.b32.xlu2 %v14346_v50, %s14764_s10  ;;  %v10824_v33 = vld [vmem:[#allocation10 + $0x18] sm:$0xf]  ;;  %v10853_v57 = vor.u32 %v13627_v13, %v10850_v4  ;;  %v11017_v45 = vor.u32 %v13670_v25, %v11016_v54  ;;  %v13667_v14 = vld [vmem:[#allocation10 + $0x188] sm:$0xf0]  ;;  %v10904_v28 = vld [vmem:[#allocation10 + $0xb0] sm:$0xf] }
 0x504   :  { %4960 = vmatpush.bf16.msrb.mxu0 %v11065_v2  ;;  %4932 = vmatpush.bf16.msrb.mxu2 %v10873_v9  ;;  %v10825_v47 = vor.u32 %v13622_v0, %v10824_v33  ;;  %v10812_v17 = vld [vmem:[#allocation10] sm:$0xf]  ;;  %v13619_v38 = vld [vmem:[#allocation10 + $0x8] sm:$0xf0]  ;;  %v13641_v8 = vld [vmem:[#allocation10 + $0xb8] sm:$0xf0]  ;;  %v11005_v9 = vor.u32 %v13667_v14, %v11004_v23 }
 0x505   :  { %v13663_v60 = vld [vmem:[#allocation10 + $0x16c] sm:$0xf]  ;;  %v10994_v2 = vld [vmem:[#allocation10 + $0x174] sm:$0xf0]  ;;  %v10813_v1 = vor.u32 %v13619_v38, %v10812_v17  ;;  %v10905_v55 = vor.u32 %v13641_v8, %v10904_v28  ;;  %v4301_v50 = vrot.slane %v16156_v36, 4  ;;  %v4305_v39 = vrot.slane %v16102_v56, 4 }
 0x506   :  { %4946 = vmatpush.bf16.msra.mxu3 %v10969_v11  ;;  %4974 = vmatpush.bf16.msrb.mxu1 %v10877_v61  ;;  %v10997_v44 = vor.u32 %v13663_v60, %v10994_v2  ;;  %v4397_v63 = vrot.slane %v16187_v31, 4  ;;  %v4401_v10 = vrot.slane %v16175_v22, 4  ;;  %v4405_v27 = vrot.slane %v16213_v15, 4  ;;  %v13638_v36 = vld [vmem:[#allocation10 + $0xa0] sm:$0xf0] }
 0x507   :  { %v16226_v3 = vsel %vm2071_vm7, %v4301_v50, %v16144_v43  ;;  %v16230_v6 = vsel %vm2071_vm7, %v4305_v39, %v16086_v16  ;;  %v10892_v16 = vld [vmem:[#allocation10 + $0x98] sm:$0xf]  ;;  %v13624_v22 = vld [vmem:[#allocation10 + $0x34] sm:$0xf]  ;;  %v10838_v26 = vld [vmem:[#allocation10 + $0x3c] sm:$0xf0] }
 0x508   :  { %4961 = vmatpush.bf16.msrb.mxu0 %v11053_v30  ;;  %4933 = vmatpush.bf16.msrb.mxu2 %v10861_v7  ;;  %v16237_v11 = vsel %vm2071_vm7, %v4397_v63, %v16178_v53  ;;  %v16241_v56 = vsel %vm2071_vm7, %v4405_v27, %v16206_v21  ;;  %v16245_v43 = vsel %vm2071_vm7, %v4401_v10, %v16167_v46  ;;  %v10932_v30 = vld [vmem:[#allocation10 + $0xf0] sm:$0xf]  ;;  %v13649_v7 = vld [vmem:[#allocation10 + $0xf8] sm:$0xf0]  ;;  %v13660_v51 = vld [vmem:[#allocation10 + $0x154] sm:$0xf] }
 0x509   :  { %v10893_v31 = vor.u32 %v13638_v36, %v10892_v16  ;;  %v10933_v15 = vor.u32 %v13649_v7, %v10932_v30  ;;  %v10841_v34 = vor.u32 %v13624_v22, %v10838_v26  ;;  %v10982_v53 = vld [vmem:[#allocation10 + $0x15c] sm:$0xf0]  ;;  %v13635_v21 = vld [vmem:[#allocation10 + $0x88] sm:$0xf0]  ;;  %v10920_v37 = vld [vmem:[#allocation10 + $0xd8] sm:$0xf] }
 0x50a   :  { %4947 = vmatpush.bf16.msra.mxu3 %v10957_v52  ;;  %4975 = vmatpush.bf16.msrb.mxu1 %v10865_v20  ;;  %v10880_v48 = vld [vmem:[#allocation10 + $0x80] sm:$0xf]  ;;  %v10985_v18 = vor.u32 %v13660_v51, %v10982_v53  ;;  %v13646_v61 = vld [vmem:[#allocation10 + $0xe0] sm:$0xf0]  ;;  %v13621_v12 = vld [vmem:[#allocation10 + $0x1c] sm:$0xf] }
 0x50b   :  { %v10881_v46 = vor.u32 %v13635_v21, %v10880_v48  ;;  %v10921_v59 = vor.u32 %v13646_v61, %v10920_v37  ;;  %v10826_v52 = vld [vmem:[#allocation10 + $0x24] sm:$0xf0]  ;;  %v13632_v5 = vld [vmem:[#allocation10 + $0x70] sm:$0xf0]  ;;  %v10908_v29 = vld [vmem:[#allocation10 + $0xc0] sm:$0xf] }
 0x50c   :  { %4962 = vmatpush.bf16.msrb.mxu0 %v11041_v35  ;;  %4934 = vmatpush.bf16.msrb.mxu2 %v10849_v32  ;;  %v13657_v35 = vld [vmem:[#allocation10 + $0x13c] sm:$0xf]  ;;  %v10829_v32 = vor.u32 %v13621_v12, %v10826_v52  ;;  %v10970_v42 = vld [vmem:[#allocation10 + $0x144] sm:$0xf0]  ;;  %v13643_v62 = vld [vmem:[#allocation10 + $0xc8] sm:$0xf0] }
 0x50d   :  { %v10868_v58 = vld [vmem:[#allocation10 + $0x68] sm:$0xf]  ;;  %v10973_v49 = vor.u32 %v13657_v35, %v10970_v42  ;;  %v13618_v20 = vld [vmem:[#allocation10 + $0x4] sm:$0xf]  ;;  %v10814_v4 = vld [vmem:[#allocation10 + $0xc] sm:$0xf0] }
 0x50e   :  { %4948 = vmatpush.bf16.msra.mxu3 %v10945_v24  ;;  %4976 = vmatpush.bf16.msrb.mxu1 %v10853_v57  ;;  %v10869_v13 = vor.u32 %v13632_v5, %v10868_v58  ;;  %v13654_v24 = vld [vmem:[#allocation10 + $0x124] sm:$0xf]  ;;  %v10817_v54 = vor.u32 %v13618_v20, %v10814_v4  ;;  %v13687_v25 = vld [vmem:[#allocation10 + $0x22c] sm:$0xf]  ;;  %v11090_v33 = vld [vmem:[#allocation10 + $0x234] sm:$0xf0] }
 0x50f   :  { %v10856_v0 = vld [vmem:[#allocation10 + $0x50] sm:$0xf]  ;;  %v13665_v14 = vld [vmem:[#allocation10 + $0x178] sm:$0xf0]  ;;  %v13651_v17 = vld [vmem:[#allocation10 + $0x10c] sm:$0xf] }
 0x510   :  { %4963 = vmatpush.bf16.msrb.mxu0 %v11029_v40  ;;  %4935 = vmatpush.bf16.msrb.mxu2 %v10837_v41  ;;  %v10958_v40 = vld [vmem:[#allocation10 + $0x12c] sm:$0xf0]  ;;  %v10909_v41 = vor.u32 %v13643_v62, %v10908_v29  ;;  %v10946_v38 = vld [vmem:[#allocation10 + $0x114] sm:$0xf0]  ;;  %v13684_v8 = vld [vmem:[#allocation10 + $0x214] sm:$0xf] }
 0x511   :  { %v10961_v57 = vor.u32 %v13654_v24, %v10958_v40  ;;  %v11000_v23 = vld [vmem:[#allocation10 + $0x170] sm:$0xf]  ;;  %v11078_v2 = vld [vmem:[#allocation10 + $0x21c] sm:$0xf0]  ;;  %v10949_v50 = vor.u32 %v13651_v17, %v10946_v38  ;;  %v13648_v63 = vld [vmem:[#allocation10 + $0xf4] sm:$0xf] }
 0x512   :  { %4949 = vmatpush.bf16.msra.mxu3 %v10933_v15  ;;  %4977 = vmatpush.bf16.msrb.mxu1 %v10841_v34  ;;  %v11001_v28 = vor.u32 %v13665_v14, %v11000_v23  ;;  %v11081_v39 = vor.u32 %v13684_v8, %v11078_v2  ;;  %v10934_v27 = vld [vmem:[#allocation10 + $0xfc] sm:$0xf0]  ;;  %v13681_v16 = vld [vmem:[#allocation10 + $0x1fc] sm:$0xf]  ;;  %v11066_v36 = vld [vmem:[#allocation10 + $0x204] sm:$0xf0] }
 0x513   :  { %v13659_v7 = vld [vmem:[#allocation10 + $0x148] sm:$0xf0]  ;;  %v10832_v22 = vld [vmem:[#allocation10 + $0x20] sm:$0xf]  ;;  %v10937_v15 = vor.u32 %v13648_v63, %v10934_v27  ;;  %v11069_v34 = vor.u32 %v13681_v16, %v11066_v36  ;;  %v13645_v51 = vld [vmem:[#allocation10 + $0xdc] sm:$0xf] }
 0x514   :  { %4964 = vmatpush.bf16.msrb.mxu0 %v11017_v45  ;;  %4936 = vmatpush.bf16.msrb.mxu2 %v10825_v47  ;;  %v11093_v45 = vor.u32 %v13687_v25, %v11090_v33  ;;  %v13629_v47 = vld [vmem:[#allocation10 + $0x58] sm:$0xf0]  ;;  %v13623_v26 = vld [vmem:[#allocation10 + $0x28] sm:$0xf0]  ;;  %v10922_v48 = vld [vmem:[#allocation10 + $0xe4] sm:$0xf0] }
 0x515   :  { %v10857_v60 = vor.u32 %v13629_v47, %v10856_v0  ;;  %v11054_v21 = vld [vmem:[#allocation10 + $0x1ec] sm:$0xf0]  ;;  %v10833_v37 = vor.u32 %v13623_v26, %v10832_v22  ;;  %v10964_v61 = vld [vmem:[#allocation10 + $0x128] sm:$0xf]  ;;  %v13620_v12 = vld [vmem:[#allocation10 + $0x10] sm:$0xf0]  ;;  %v10925_v52 = vor.u32 %v13645_v51, %v10922_v48 }
 0x516   :  { %4950 = vmatpush.bf16.msra.mxu3 %v10921_v59  ;;  %4978 = vmatpush.bf16.msrb.mxu1 %v10829_v32  ;;  %v10820_v59 = vld [vmem:[#allocation10 + $0x8] sm:$0xf]  ;;  %v13642_v32 = vld [vmem:[#allocation10 + $0xc4] sm:$0xf]  ;;  %v10910_v58 = vld [vmem:[#allocation10 + $0xcc] sm:$0xf0] }
 0x517   :  { %v13675_v5 = vld [vmem:[#allocation10 + $0x1cc] sm:$0xf]  ;;  %v10821_v29 = vor.u32 %v13620_v12, %v10820_v59  ;;  %v10952_v62 = vld [vmem:[#allocation10 + $0x110] sm:$0xf]  ;;  %v13653_v20 = vld [vmem:[#allocation10 + $0x118] sm:$0xf0] }
 0x518   :  { %4965 = vmatpush.bf16.msrb.mxu0 %v11005_v9  ;;  %4937 = vmatpush.bf16.msrb.mxu2 %v10813_v1  ;;  %v10844_v9 = vld [vmem:[#allocation10 + $0x38] sm:$0xf]  ;;  %v13626_v1 = vld [vmem:[#allocation10 + $0x40] sm:$0xf0]  ;;  %v10953_v24 = vor.u32 %v13653_v20, %v10952_v62  ;;  %v13672_v40 = vld [vmem:[#allocation10 + $0x1b4] sm:$0xf] }
 0x519   :  { %v10845_v30 = vor.u32 %v13626_v1, %v10844_v9  ;;  %v13650_v25 = vld [vmem:[#allocation10 + $0x100] sm:$0xf0]  ;;  %v13669_v23 = vld [vmem:[#allocation10 + $0x19c] sm:$0xf]  ;;  %v11018_v14 = vld [vmem:[#allocation10 + $0x1a4] sm:$0xf0] }
 0x51a   :  { %4951 = vmatpush.bf16.msra.mxu3 %v10909_v41  ;;  %4979 = vmatpush.bf16.msrb.mxu1 %v10817_v54  ;;  %v11030_v41 = vld [vmem:[#allocation10 + $0x1bc] sm:$0xf0]  ;;  %v10940_v54 = vld [vmem:[#allocation10 + $0xf8] sm:$0xf]  ;;  %v13647_v8 = vld [vmem:[#allocation10 + $0xe8] sm:$0xf0]  ;;  %v11021_v2 = vor.u32 %v13669_v23, %v11018_v14 }
 0x51b   :  { %v10941_v47 = vor.u32 %v13650_v25, %v10940_v54  ;;  %v10928_v38 = vld [vmem:[#allocation10 + $0xe0] sm:$0xf]  ;;  %v13666_v1 = vld [vmem:[#allocation10 + $0x184] sm:$0xf]  ;;  %v11096_v16 = vld [vmem:[#allocation10 + $0x230] sm:$0xf] }
 0x51c   :  { %5014 = vmatpush.bf16.msra.mxu0 %v10905_v55  ;;  %4986 = vmatpush.bf16.msra.mxu2 %v10997_v44  ;;  %v10988_v55 = vld [vmem:[#allocation10 + $0x158] sm:$0xf]  ;;  %v13662_v44 = vld [vmem:[#allocation10 + $0x160] sm:$0xf0]  ;;  %v10929_v9 = vor.u32 %v13647_v8, %v10928_v38  ;;  %v13689_v36 = vld [vmem:[#allocation10 + $0x238] sm:$0xf0] }
 0x51d   :  { %v10989_v10 = vor.u32 %v13662_v44, %v10988_v55  ;;  %v11006_v55 = vld [vmem:[#allocation10 + $0x18c] sm:$0xf0]  ;;  %v10916_v44 = vld [vmem:[#allocation10 + $0xc8] sm:$0xf]  ;;  %v11097_v51 = vor.u32 %v13689_v36, %v11096_v16  ;;  %v11084_v48 = vld [vmem:[#allocation10 + $0x218] sm:$0xf] }
 0x51e   :  { %5000 = vmatpush.bf16.msrb.mxu3 %v11093_v45  ;;  %5028 = vmatpush.bf16.msra.mxu1 %v11001_v28  ;;  %v11033_v45 = vor.u32 %v13672_v40, %v11030_v41  ;;  %v11048_v59 = vld [vmem:[#allocation10 + $0x1d0] sm:$0xf]  ;;  %v16268_v41 = vld [vmem:[#allocation11] sm:$0x7]  ;;  %v11436_v23 = vld [vmem:[#allocation16 + $0x2a0] sm:$0xf] }
 0x51f   :  { %v4541_v25 = vperm.slane %v16268_v41, 1  ;;  %v13780_v14 = vld [vmem:[#allocation16 + $0x2cc] sm:$0xf0] }
 0x520   :  { %5015 = vmatpush.bf16.msra.mxu0 %v10893_v31  ;;  %4987 = vmatpush.bf16.msra.mxu2 %v10985_v18  ;;  %v10976_v31 = vld [vmem:[#allocation10 + $0x140] sm:$0xf]  ;;  %v13678_v18 = vld [vmem:[#allocation10 + $0x1e4] sm:$0xf]  ;;  %v11437_v38 = vor.u32 %v13780_v14, %v11436_v23  ;;  %v13876_v8 = vld [vmem:[#allocation16 + $0x5cc] sm:$0xf0] }
 0x521   :  { %v10977_v53 = vor.u32 %v13659_v7, %v10976_v31  ;;  %v11057_v35 = vor.u32 %v13678_v18, %v11054_v21  ;;  %v13686_v18 = vld [vmem:[#allocation10 + $0x220] sm:$0xf0]  ;;  %v11072_v21 = vld [vmem:[#allocation10 + $0x200] sm:$0xf] }
 0x522   :  { %5001 = vmatpush.bf16.msrb.mxu3 %v11081_v39  ;;  %5029 = vmatpush.bf16.msra.mxu1 %v10989_v10  ;;  %v11009_v39 = vor.u32 %v13666_v1, %v11006_v55  ;;  %v11294_v23 = vld [vmem:[#allocation16 + $0x1b0] sm:$0xf0] }
 0x524   :  { %5016 = vmatpush.bf16.msra.mxu0 %v10881_v46  ;;  %4988 = vmatpush.bf16.msra.mxu2 %v10973_v49  ;;  %v13656_v46 = vld [vmem:[#allocation10 + $0x130] sm:$0xf0]  ;;  %v11042_v49 = vld [vmem:[#allocation10 + $0x1d4] sm:$0xf0] }
 0x525   :  { %v10965_v42 = vor.u32 %v13656_v46, %v10964_v61  ;;  %v11045_v4 = vor.u32 %v13675_v5, %v11042_v49  ;;  %v11060_v61 = vld [vmem:[#allocation10 + $0x1e8] sm:$0xf]  ;;  %v13680_v46 = vld [vmem:[#allocation10 + $0x1f0] sm:$0xf0] }
 0x526   :  { %5002 = vmatpush.bf16.msrb.mxu3 %v11069_v34  ;;  %5030 = vmatpush.bf16.msra.mxu1 %v10977_v53  ;;  %v11012_v49 = vld [vmem:[#allocation10 + $0x188] sm:$0xf] }
 0x528   :  { %5017 = vmatpush.bf16.msra.mxu0 %v10869_v13  ;;  %4989 = vmatpush.bf16.msra.mxu2 %v10961_v57  ;;  %v10913_v13 = vor.u32 %v13642_v32, %v10910_v58  ;;  %v13671_v58 = vld [vmem:[#allocation10 + $0x1a8] sm:$0xf0] }
 0x52a   :  { %5003 = vmatpush.bf16.msrb.mxu3 %v11057_v35  ;;  %5031 = vmatpush.bf16.msra.mxu1 %v10965_v42  ;;  %v13674_v35 = vld [vmem:[#allocation10 + $0x1c0] sm:$0xf0]  ;;  %v11024_v42 = vld [vmem:[#allocation10 + $0x1a0] sm:$0xf] }
 0x52b   :  { %v11025_v5 = vor.u32 %v13671_v58, %v11024_v42  ;;  %v11676_v42 = vld [vmem:[#allocation16 + $0x480] sm:$0xf] }
 0x52c   :  { %5018 = vmatpush.bf16.msra.mxu0 %v10857_v60  ;;  %4990 = vmatpush.bf16.msra.mxu2 %v10949_v50  ;;  %v13644_v50 = vld [vmem:[#allocation10 + $0xd0] sm:$0xf0] }
 0x52e   :  { %5004 = vmatpush.bf16.msrb.mxu3 %v11045_v4  ;;  %5032 = vmatpush.bf16.msra.mxu1 %v10953_v24 }
 0x530   :  { %5019 = vmatpush.bf16.msra.mxu0 %v10845_v30  ;;  %4991 = vmatpush.bf16.msra.mxu2 %v10937_v15 }
 0x532   :  { %5005 = vmatpush.bf16.msrb.mxu3 %v11033_v45  ;;  %5033 = vmatpush.bf16.msra.mxu1 %v10941_v47 }
 0x534   :  { %5020 = vmatpush.bf16.msra.mxu0 %v10833_v37  ;;  %4992 = vmatpush.bf16.msra.mxu2 %v10925_v52  ;;  %v13683_v37 = vld [vmem:[#allocation10 + $0x208] sm:$0xf0]  ;;  %v11036_v52 = vld [vmem:[#allocation10 + $0x1b8] sm:$0xf] }
 0x535   :  { %v11037_v32 = vor.u32 %v13674_v35, %v11036_v52  ;;  %v11292_v35 = vld [vmem:[#allocation16 + $0x180] sm:$0xf] }
 0x536   :  { %5006 = vmatpush.bf16.msrb.mxu3 %v11021_v2  ;;  %5034 = vmatpush.bf16.msra.mxu1 %v10929_v9  ;;  %v13972_v2 = vld [vmem:[#allocation16 + $0x8cc] sm:$0xf0] }
 0x538   :  { %5021 = vmatpush.bf16.msra.mxu0 %v10821_v29  ;;  %4993 = vmatpush.bf16.msra.mxu2 %v10913_v13  ;;  %v13668_v29 = vld [vmem:[#allocation10 + $0x190] sm:$0xf0] }
 0x539   :  { %v11013_v62 = vor.u32 %v13668_v29, %v11012_v49  ;;  %v13840_v49 = vld [vmem:[#allocation16 + $0x4ac] sm:$0xf0]  ;;  %v12060_v29 = vld [vmem:[#allocation16 + $0x780] sm:$0xf] }
 0x53a   :  { %5007 = vmatpush.bf16.msrb.mxu3 %v11009_v39  ;;  %v11388_v39 = vld [vmem:[#allocation16 + $0x240] sm:$0xf] }
 0x55d   :  { %v14348_v33 = vpop.permute.xlu2 %14347 }
 0x55e   :  { %v14350_v0 = vunpack.i.h.bf16 %v14348_v33  ;;  %v14349_v57 = vunpack.i.l.bf16 %v14348_v33 }
 0x560   :  { %v4437_v28 = vsel %vm3379_vm8, %v16220_v19, %v14349_v57  ;;  %v4438_v17 = vsel %vm3379_vm8, %v16241_v56, %v14350_v0  ;;  %v10917_v19 = vor.u32 %v13644_v50, %v10916_v44  ;;  %v4540_v0 = vperm.slane %v16268_v41, 0  ;;  %v13774_v44 = vld [vmem:[#allocation16 + $0x2a4] sm:$0xf]  ;;  %v11438_v50 = vld [vmem:[#allocation16 + $0x2d0] sm:$0xf0] }
 0x561   :  { %v16251_v60 = vpack.c.bf16 %v4438_v17, %v4437_v28  ;;  %v4542_v57 = vperm.slane %v16268_v41, 2  ;;  %v11820_v28 = vld [vmem:[#allocation16 + $0x5a0] sm:$0xf] }
 0x562   :  { %5035 = vmatpush.bf16.msra.mxu1 %v10917_v19  ;;  %v11821_v1 = vor.u32 %v13876_v8, %v11820_v28  ;;  %v14409_v28 = vld [vmem:[#allocation2 + $0x8] sm:$0xff] }
 0x563   :  { %4966 = vmatmul.bf16.vlgmr.msrb.gmra.mxu0 %v16251_v60 }
 0x564   :  { %6927 = vmatpush.bf16.msrb.mxu0 %v11821_v1 }
 0x56d   :  { %v14343_v56 = vpop.permute.xlu1 %14342  ;;  %v14338_v27 = vpop.permute.xlu0 %14337 }
 0x56e   :  { %v14345_v63 = vunpack.i.h.bf16 %v14343_v56  ;;  %v14344_v10 = vunpack.i.l.bf16 %v14343_v56  ;;  %v14340_v30 = vunpack.i.h.bf16 %v14338_v27  ;;  %v14339_v31 = vunpack.i.l.bf16 %v14338_v27  ;;  %v13864_v27 = vld [vmem:[#allocation16 + $0x56c] sm:$0xf0] }
 0x56f   :  { %v11441_v56 = vor.u32 %v13774_v44, %v11438_v50 }
 0x570   :  { %v4435_v7 = vsel %vm3379_vm8, %v16230_v6, %v14344_v10  ;;  %v4436_v22 = vsel %vm3379_vm8, %v16245_v43, %v14345_v63  ;;  %v4433_v15 = vsel %vm3379_vm8, %v16226_v3, %v14339_v31  ;;  %v4434_v34 = vsel %vm3379_vm8, %v16237_v11, %v14340_v30  ;;  %v13677_v11 = vld [vmem:[#allocation10 + $0x1d8] sm:$0xf0]  ;;  %v11772_v10 = vld [vmem:[#allocation16 + $0x540] sm:$0xf] }
 0x571   :  { %v4440_v26 = vpack.c.bf16 %v4436_v22, %v4435_v7  ;;  %v4439_v53 = vpack.c.bf16 %v4434_v34, %v4433_v15  ;;  %v11085_v6 = vor.u32 %v13686_v18, %v11084_v48  ;;  %v11073_v43 = vor.u32 %v13683_v37, %v11072_v21  ;;  %v13768_v63 = vld [vmem:[#allocation16 + $0x26c] sm:$0xf0]  ;;  %v12156_v30 = vld [vmem:[#allocation16 + $0x840] sm:$0xf]  ;;  %v13762_v7 = vld [vmem:[#allocation16 + $0x244] sm:$0xf] }
 0x572   :  { %v11061_v3 = vor.u32 %v13680_v46, %v11060_v61  ;;  %v11049_v12 = vor.u32 %v13677_v11, %v11048_v59  ;;  %v11389_v16 = vor.u32 %v13768_v63, %v11388_v39  ;;  %v11773_v36 = vor.u32 %v13864_v27, %v11772_v10  ;;  %v13960_v31 = vld [vmem:[#allocation16 + $0x86c] sm:$0xf0]  ;;  %v11390_v15 = vld [vmem:[#allocation16 + $0x270] sm:$0xf0]  ;;  %v11340_v34 = vld [vmem:[#allocation16 + $0x1e0] sm:$0xf] }
 0x573   :  { %4952 = vmatmul.bf16.vlgmr.msra.gmra.mxu3 %v4440_v26  ;;  %4938 = vmatmul.bf16.vlgmr.msrb.gmra.mxu2 %v4439_v53  ;;  %v11393_v18 = vor.u32 %v13762_v7, %v11390_v15  ;;  %v13852_v21 = vld [vmem:[#allocation16 + $0x50c] sm:$0xf0]  ;;  %v12108_v37 = vld [vmem:[#allocation16 + $0x7e0] sm:$0xf]  ;;  %v13750_v59 = vld [vmem:[#allocation16 + $0x1e4] sm:$0xf] }
 0x574   :  { %4980 = vmatmul.bf16.vlgmr.msrb.gmra.mxu1 %v4439_v53  ;;  %5022 = vmatmul.bf16.vlgmr.msra.gmra.mxu0 %v4439_v53  ;;  %v11342_v11 = vld [vmem:[#allocation16 + $0x210] sm:$0xf0] }
 0x575   :  { %5042 = vmatpush.bf16.msrb.mxu2 %v11097_v51  ;;  %6913 = vmatpush.bf16.msra.mxu3 %v11437_v38  ;;  %v13756_v51 = vld [vmem:[#allocation16 + $0x20c] sm:$0xf0] }
 0x576   :  { %v11341_v46 = vor.u32 %v13756_v51, %v11340_v34  ;;  %6928 = vmatpush.bf16.msrb.mxu0 %v11773_v36  ;;  %v14412_v36 = vld [vmem:[#allocation2 + $0x20] sm:$0xff] }
 0x579   :  { %5043 = vmatpush.bf16.msrb.mxu2 %v11085_v6  ;;  %v11724_v6 = vld [vmem:[#allocation16 + $0x4e0] sm:$0xf]  ;;  %6914 = vmatpush.bf16.msra.mxu3 %v11389_v16 }
 0x57d   :  { %5044 = vmatpush.bf16.msrb.mxu2 %v11073_v43  ;;  %6915 = vmatpush.bf16.msra.mxu3 %v11341_v46  ;;  %v11244_v46 = vld [vmem:[#allocation16 + $0x120] sm:$0xf] }
 0x581   :  { %5045 = vmatpush.bf16.msrb.mxu2 %v11061_v3  ;;  %v13948_v3 = vld [vmem:[#allocation16 + $0x80c] sm:$0xf0] }
 0x582   :  { %v12109_v52 = vor.u32 %v13948_v3, %v12108_v37  ;;  %v13732_v3 = vld [vmem:[#allocation16 + $0x14c] sm:$0xf0] }
 0x583   :  { %5008 = vmatmul.bf16.vlgmr.msrb.gmra.mxu3 %v16251_v60  ;;  %4994 = vmatmul.bf16.vlgmr.msra.gmra.mxu2 %v4440_v26 }
 0x584   :  { %5036 = vmatmul.bf16.vlgmr.msra.gmra.mxu1 %v4440_v26  ;;  %v12157_v26 = vor.u32 %v13960_v31, %v12156_v30 }
 0x585   :  { %5046 = vmatpush.bf16.msrb.mxu2 %v11049_v12  ;;  %v11725_v12 = vor.u32 %v13852_v21, %v11724_v6 }
 0x587   :  { %6929 = vmatpush.bf16.msrb.mxu0 %v11725_v12  ;;  %v13828_v12 = vld [vmem:[#allocation16 + $0x44c] sm:$0xf0] }
 0x589   :  { %5047 = vmatpush.bf16.msrb.mxu2 %v11037_v32  ;;  %v13744_v32 = vld [vmem:[#allocation16 + $0x1ac] sm:$0xf0] }
 0x58a   :  { %v11293_v38 = vor.u32 %v13744_v32, %v11292_v35  ;;  %v13924_v35 = vld [vmem:[#allocation16 + $0x74c] sm:$0xf0] }
 0x58c   :  { %6916 = vmatpush.bf16.msra.mxu3 %v11293_v38  ;;  %v13912_v38 = vld [vmem:[#allocation16 + $0x6ec] sm:$0xf0] }
 0x58d   :  { %5048 = vmatpush.bf16.msrb.mxu2 %v11025_v5  ;;  %v11345_v5 = vor.u32 %v13750_v59, %v11342_v11  ;;  %v11628_v59 = vld [vmem:[#allocation16 + $0x420] sm:$0xf]  ;;  %v11245_v11 = vor.u32 %v13732_v3, %v11244_v46  ;;  %v13690_v46 = vld [vmem:[#allocation16 + $0x4] sm:$0xf]  ;;  %v11102_v3 = vld [vmem:[#allocation16 + $0x30] sm:$0xf0] }
 0x58e   :  { %v11629_v32 = vor.u32 %v13828_v12, %v11628_v59  ;;  %v13870_v59 = vld [vmem:[#allocation16 + $0x5a4] sm:$0xf]  ;;  %v11822_v12 = vld [vmem:[#allocation16 + $0x5d0] sm:$0xf0] }
 0x590   :  { %6917 = vmatpush.bf16.msra.mxu3 %v11245_v11  ;;  %v11105_v11 = vor.u32 %v13690_v46, %v11102_v3 }
 0x591   :  { %5049 = vmatpush.bf16.msrb.mxu2 %v11013_v62  ;;  %v13936_v62 = vld [vmem:[#allocation16 + $0x7ac] sm:$0xf0] }
 0x594   :  { %5050 = vmatmul.bf16.vlgmr.msrb.gmra.mxu2 %v16251_v60  ;;  %v12204_v60 = vld [vmem:[#allocation16 + $0x8a0] sm:$0xf] }
 0x595   :  { %v12205_v55 = vor.u32 %v13972_v2, %v12204_v60  ;;  %6955 = vmatpush.bf16.msra.mxu2 %v11441_v56  ;;  %v12061_v60 = vor.u32 %v13936_v62, %v12060_v29  ;;  %v14411_v56 = vld [vmem:[#allocation2 + $0x10] sm:$0xff]  ;;  %v11196_v62 = vld [vmem:[#allocation16 + $0xc0] sm:$0xf] }
 0x597   :  { %6941 = vmatpush.bf16.msrb.mxu1 %v12205_v55 }
 0x599   :  { %6956 = vmatpush.bf16.msra.mxu2 %v11393_v18 }
 0x59b   :  { %6942 = vmatpush.bf16.msrb.mxu1 %v12157_v26 }
 0x59d   :  { %6957 = vmatpush.bf16.msra.mxu2 %v11345_v5  ;;  %v11246_v5 = vld [vmem:[#allocation16 + $0x150] sm:$0xf0] }
 0x59f   :  { %6943 = vmatpush.bf16.msrb.mxu1 %v12109_v52  ;;  %v12012_v52 = vld [vmem:[#allocation16 + $0x720] sm:$0xf] }
 0x5a3   :  { %6944 = vmatpush.bf16.msrb.mxu1 %v12061_v60 }
 0x5e0   :  { %v16264_v4 = vpop.f32.mrf.mxu0 }
 0x5e8   :  { %v16273_v33 = vpop.f32.mrf.mxu0 }
 0x5f1   :  { %v4981_v24 = vpop.f32.mrf.mxu1  ;;  %v5023_v53 = vpop.f32.mrf.mxu0 }
 0x5f2   :  { %v4982_v17 = vadd.f32 %v4981_v24, %v4541_v25  ;;  %v5024_v14 = vadd.f32 %v5023_v53, %v4542_v57 }
 0x5f6   :  { %v4939_v20 = vpop.f32.mrf.mxu2  ;;  %v4953_v13 = vpop.f32.mrf.mxu3 }
 0x5f7   :  { %v4940_v9 = vadd.f32 %v4939_v20, %v4540_v0 }
 0x5f9   :  { %v4983_v45 = vpop.f32.mrf.mxu1  ;;  %v4954_v48 = vadd.f32 %v4953_v13, %v4940_v9  ;;  %v5025_v55 = vpop.f32.mrf.mxu0 }
 0x5fa   :  { %v4984_v13 = vadd.f32 %v4983_v45, %v4541_v25  ;;  %v14410_v45 = vld [vmem:[#allocation2] sm:$0xff]  ;;  %v5026_v27 = vadd.f32 %v5025_v55, %v4542_v57  ;;  %v14414_v57 = vld [vmem:[#allocation2 + $0x28] sm:$0xff]  ;;  %v13804_v55 = vld [vmem:[#allocation16 + $0x38c] sm:$0xf0] }
 0x5fb   :  { %v4968_v20 = vadd.f32 %v16264_v4, %v4954_v48  ;;  %v11677_v4 = vor.u32 %v13840_v49, %v11676_v42  ;;  %v12013_v42 = vor.u32 %v13924_v35, %v12012_v52  ;;  %v13966_v52 = vld [vmem:[#allocation16 + $0x8a4] sm:$0xf]  ;;  %v12206_v35 = vld [vmem:[#allocation16 + $0x8d0] sm:$0xf0] }
 0x5fd   :  { %v16291_v2 = vadd.f32 %v14410_v45, %v4968_v20  ;;  %6930 = vmatpush.bf16.msrb.mxu0 %v11677_v4  ;;  %6945 = vmatpush.bf16.msrb.mxu1 %v12013_v42  ;;  %v13720_v20 = vld [vmem:[#allocation16 + $0xec] sm:$0xf0]  ;;  %v11198_v45 = vld [vmem:[#allocation16 + $0xf0] sm:$0xf0]  ;;  %v11825_v42 = vor.u32 %v13870_v59, %v11822_v12  ;;  %v11684_v59 = vld [vmem:[#allocation16 + $0x488] sm:$0xf] }
 0x5fe   :  { %v16266_v40 = vpop.f32.mrf.mxu2  ;;  %v16270_v54 = vpop.f32.mrf.mxu3  ;;  %v13822_v12 = vld [vmem:[#allocation16 + $0x424] sm:$0xf] }
 0x5ff   :  { %v4942_v24 = vadd.f32 %v16266_v40, %v4540_v0  ;;  %v5074_v10 = vmul.f32 %v16291_v2, %v16291_v2 }
 0x601   :  { %v5037_v58 = vpop.f32.mrf.mxu1  ;;  %v4956_v40 = vadd.f32 %v16270_v54, %v4942_v24  ;;  %6931 = vmatpush.bf16.msrb.mxu0 %v11629_v32  ;;  %v16745_v24 = vld [vmem:[#allocation31_spill] sm:$0xff] }
 0x602   :  { %v5038_v0 = vadd.f32 %v5037_v58, %v5024_v14  ;;  %v13726_v58 = vld [vmem:[#allocation16 + $0x124] sm:$0xf]  ;;  %v13816_v14 = vld [vmem:[#allocation16 + $0x3ec] sm:$0xf0] }
 0x603   :  { %v11249_v49 = vor.u32 %v13726_v58, %v11246_v5  ;;  %v12209_v58 = vor.u32 %v13966_v52, %v12206_v35  ;;  %v11444_v5 = vld [vmem:[#allocation16 + $0x2a8] sm:$0xf] }
 0x606   :  { %v4995_v47 = vpop.f32.mrf.mxu2  ;;  %v5009_v22 = vpop.f32.mrf.mxu3 }
 0x607   :  { %v4996_v19 = vadd.f32 %v4995_v47, %v4982_v17  ;;  %v13738_v47 = vld [vmem:[#allocation16 + $0x184] sm:$0xf] }
 0x608   :  { %v11297_v25 = vor.u32 %v13738_v47, %v11294_v23  ;;  %v11197_v23 = vor.u32 %v13720_v20, %v11196_v62  ;;  %v13877_v20 = vld [vmem:[#allocation16 + $0x5d4] sm:$0xf0] }
 0x609   :  { %v5010_v43 = vadd.f32 %v5009_v22, %v4996_v19  ;;  %v4970_v19 = vadd.f32 %v16273_v33, %v4956_v40  ;;  %v5039_v16 = vpop.f32.mrf.mxu1  ;;  %v14413_v22 = vld [vmem:[#allocation2 + $0x18] sm:$0xff]  ;;  %v11148_v40 = vld [vmem:[#allocation16 + $0x60] sm:$0xf] }
 0x60a   :  { %6958 = vmatpush.bf16.msra.mxu2 %v11297_v25  ;;  %v5040_v15 = vadd.f32 %v5039_v16, %v5026_v27  ;;  %v13714_v25 = vld [vmem:[#allocation16 + $0xc4] sm:$0xf]  ;;  %6918 = vmatpush.bf16.msra.mxu3 %v11197_v23  ;;  %v11150_v16 = vld [vmem:[#allocation16 + $0x90] sm:$0xf0] }
 0x60b   :  { %v16289_v17 = vadd.f32 %v14409_v28, %v5010_v43  ;;  %v16310_v26 = vadd.f32 %v14413_v22, %v4970_v19  ;;  %v11964_v28 = vld [vmem:[#allocation16 + $0x6c0] sm:$0xf] }
 0x60c   :  { %v11965_v60 = vor.u32 %v13912_v38, %v11964_v28  ;;  %v11916_v19 = vld [vmem:[#allocation16 + $0x660] sm:$0xf] }
 0x60d   :  { %v5075_v39 = vmul.f32 %v16289_v17, %v16289_v17  ;;  %v5064_v54 = vadd.f32 %v16289_v17, %v16291_v2  ;;  %v5077_v6 = vmul.f32 %v16310_v26, %v16310_v26 }
 0x60e   :  { %v4997_v61 = vpop.f32.mrf.mxu2  ;;  %v5011_v9 = vpop.f32.mrf.mxu3  ;;  %6959 = vmatpush.bf16.msra.mxu2 %v11249_v49  ;;  %6946 = vmatpush.bf16.msrb.mxu1 %v11965_v60  ;;  %v13781_v49 = vld [vmem:[#allocation16 + $0x2d4] sm:$0xf0] }
 0x60f   :  { %v4998_v8 = vadd.f32 %v4997_v61, %v4984_v13  ;;  %v5080_v7 = vadd.f32 %v5075_v39, %v5074_v10  ;;  %v11580_v13 = vld [vmem:[#allocation16 + $0x3c0] sm:$0xf]  ;;  %v11445_v62 = vor.u32 %v13781_v49, %v11444_v5  ;;  %v12014_v5 = vld [vmem:[#allocation16 + $0x750] sm:$0xf0] }
 0x610   :  { %v11581_v4 = vor.u32 %v13816_v14, %v11580_v13  ;;  %v13858_v13 = vld [vmem:[#allocation16 + $0x544] sm:$0xf] }
 0x611   :  { %v5012_v44 = vadd.f32 %v5011_v9, %v4998_v8  ;;  %v13708_v9 = vld [vmem:[#allocation16 + $0x8c] sm:$0xf0] }
 0x612   :  { %6932 = vmatpush.bf16.msrb.mxu0 %v11581_v4  ;;  %v11149_v39 = vor.u32 %v13708_v9, %v11148_v40  ;;  %v12158_v4 = vld [vmem:[#allocation16 + $0x870] sm:$0xf0]  ;;  %v13769_v40 = vld [vmem:[#allocation16 + $0x274] sm:$0xf0] }
 0x613   :  { %v16305_v30 = vadd.f32 %v14412_v36, %v5012_v44 }
 0x614   :  { %6919 = vmatpush.bf16.msra.mxu3 %v11149_v39  ;;  %v11726_v39 = vld [vmem:[#allocation16 + $0x510] sm:$0xf0] }
 0x615   :  { %v5078_v41 = vmul.f32 %v16305_v30, %v16305_v30  ;;  %v5068_v18 = vadd.f32 %v16305_v30, %v16310_v26 }
 0x617   :  { %v5051_v1 = vpop.f32.mrf.mxu2  ;;  %v5084_v43 = vadd.f32 %v5078_v41, %v5077_v6  ;;  %v13888_v6 = vld [vmem:[#allocation16 + $0x62c] sm:$0xf0] }
 0x618   :  { %v5052_v50 = vadd.f32 %v5051_v1, %v5038_v0  ;;  %v11532_v1 = vld [vmem:[#allocation16 + $0x360] sm:$0xf] }
 0x619   :  { %v11533_v10 = vor.u32 %v13804_v55, %v11532_v1  ;;  %v13865_v1 = vld [vmem:[#allocation16 + $0x574] sm:$0xf0]  ;;  %v13846_v55 = vld [vmem:[#allocation16 + $0x4e4] sm:$0xf] }
 0x61a   :  { %v16297_v63 = vadd.f32 %v14411_v56, %v5052_v50  ;;  %v11201_v50 = vor.u32 %v13714_v25, %v11198_v45  ;;  %v13900_v56 = vld [vmem:[#allocation16 + $0x68c] sm:$0xf0]  ;;  %v11396_v45 = vld [vmem:[#allocation16 + $0x248] sm:$0xf] }
 0x61b   :  { %v11917_v27 = vor.u32 %v13900_v56, %v11916_v19  ;;  %6933 = vmatpush.bf16.msrb.mxu0 %v11533_v10  ;;  %v11397_v9 = vor.u32 %v13769_v40, %v11396_v45  ;;  %v13942_v19 = vld [vmem:[#allocation16 + $0x7e4] sm:$0xf]  ;;  %v12110_v56 = vld [vmem:[#allocation16 + $0x810] sm:$0xf0] }
 0x61c   :  { %v5065_v31 = vadd.f32 %v5064_v54, %v16297_v63  ;;  %v5076_v33 = vmul.f32 %v16297_v63, %v16297_v63  ;;  %v13702_v54 = vld [vmem:[#allocation16 + $0x64] sm:$0xf]  ;;  %6960 = vmatpush.bf16.msra.mxu2 %v11201_v50  ;;  %v12113_v10 = vor.u32 %v13942_v19, %v12110_v56  ;;  %v11204_v56 = vld [vmem:[#allocation16 + $0xc8] sm:$0xf] }
 0x61d   :  { %6947 = vmatpush.bf16.msrb.mxu1 %v11917_v27  ;;  %v11348_v27 = vld [vmem:[#allocation16 + $0x1e8] sm:$0xf]  ;;  %v13810_v40 = vld [vmem:[#allocation16 + $0x3c4] sm:$0xf] }
 0x61e   :  { %5066 = vadd.xlane.f32.xlu0 %v5065_v31  ;;  %v5081_v34 = vadd.f32 %v5080_v7, %v5076_v33  ;;  %v11153_v31 = vor.u32 %v13702_v54, %v11150_v16  ;;  %v11729_v54 = vor.u32 %v13846_v55, %v11726_v39  ;;  %v13757_v16 = vld [vmem:[#allocation16 + $0x214] sm:$0xf0] }
 0x61f   :  { %v5053_v51 = vpop.f32.mrf.mxu2 }
 0x620   :  { %v5054_v53 = vadd.f32 %v5053_v51, %v5040_v15  ;;  %5082 = vadd.xlane.f32.xlu2 %v5081_v34  ;;  %6961 = vmatpush.bf16.msra.mxu2 %v11153_v31  ;;  %v11100_v34 = vld [vmem:[#allocation16] sm:$0xf]  ;;  %v13696_v51 = vld [vmem:[#allocation16 + $0x2c] sm:$0xf0]  ;;  %v16346_v31 = vld [vmem:[#allocation13] sm:$0x7] }
 0x621   :  { %v5129_v49 = vperm.slane %v16346_v31, 0 }
 0x622   :  { %v16314_v48 = vadd.f32 %v14414_v57, %v5054_v53  ;;  %v11484_v53 = vld [vmem:[#allocation16 + $0x300] sm:$0xf]  ;;  %v13792_v57 = vld [vmem:[#allocation16 + $0x32c] sm:$0xf0] }
 0x624   :  { %v5069_v21 = vadd.f32 %v5068_v18, %v16314_v48  ;;  %v5079_v37 = vmul.f32 %v16314_v48, %v16314_v48  ;;  %v11868_v18 = vld [vmem:[#allocation16 + $0x600] sm:$0xf]  ;;  %6962 = vmatpush.bf16.msra.mxu2 %v11105_v11  ;;  %v13841_v11 = vld [vmem:[#allocation16 + $0x4b4] sm:$0xf0] }
 0x626   :  { %5070 = vadd.xlane.f32.xlu1 %v5069_v21  ;;  %v5085_v61 = vadd.f32 %v5084_v43, %v5079_v37  ;;  %v11101_v37 = vor.u32 %v13696_v51, %v11100_v34  ;;  %v11485_v43 = vor.u32 %v13792_v57, %v11484_v53  ;;  %v13853_v34 = vld [vmem:[#allocation16 + $0x514] sm:$0xf0]  ;;  %v13834_v51 = vld [vmem:[#allocation16 + $0x484] sm:$0xf] }
 0x627   :  { %v13930_v57 = vld [vmem:[#allocation16 + $0x784] sm:$0xf] }
 0x628   :  { %5086 = vadd.xlane.f32.xlu0 %v5085_v61  ;;  %v11869_v61 = vor.u32 %v13888_v6, %v11868_v18  ;;  %6920 = vmatpush.bf16.msra.mxu3 %v11101_v37  ;;  %v12062_v18 = vld [vmem:[#allocation16 + $0x7b0] sm:$0xf0]  ;;  %v16348_v6 = vld [vmem:[#allocation14] sm:$0x7]  ;;  %v11300_v37 = vld [vmem:[#allocation16 + $0x188] sm:$0xf] }
 0x629   :  { %6934 = vmatpush.bf16.msrb.mxu0 %v11485_v43  ;;  %v13745_v43 = vld [vmem:[#allocation16 + $0x1b4] sm:$0xf0]  ;;  %v12065_v3 = vor.u32 %v13930_v57, %v12062_v18  ;;  %v13894_v57 = vld [vmem:[#allocation16 + $0x664] sm:$0xf]  ;;  %v11918_v18 = vld [vmem:[#allocation16 + $0x690] sm:$0xf0] }
 0x62a   :  { %6948 = vmatpush.bf16.msrb.mxu1 %v11869_v61 }
 0x62c   :  { %6969 = vmatpush.bf16.msrb.mxu3 %v11825_v42  ;;  %v11630_v42 = vld [vmem:[#allocation16 + $0x450] sm:$0xf0] }
 0x62d   :  { %6983 = vmatpush.bf16.msra.mxu0 %v12209_v58  ;;  %v13918_v58 = vld [vmem:[#allocation16 + $0x724] sm:$0xf] }
 0x62e   :  { %6997 = vmatpush.bf16.msra.mxu1 %v11445_v62  ;;  %v11252_v62 = vld [vmem:[#allocation16 + $0x128] sm:$0xf]  ;;  %v12017_v45 = vor.u32 %v13918_v58, %v12014_v5  ;;  %v13805_v58 = vld [vmem:[#allocation16 + $0x394] sm:$0xf0]  ;;  %v13786_v5 = vld [vmem:[#allocation16 + $0x304] sm:$0xf] }
 0x632   :  { %6998 = vmatpush.bf16.msra.mxu1 %v11397_v9 }
 0x691   :  { %v5067_v29 = vpop.xlane.xlu0 %5066 }
 0x692   :  { %v16324_v47 = vmul.f32 %v5067_v29, %v16745_v24  ;;  %v11828_v29 = vld [vmem:[#allocation16 + $0x5a8] sm:$0xf] }
 0x693   :  { %v5083_v8 = vpop.xlane.xlu2 %5082  ;;  %v11829_v28 = vor.u32 %v13877_v20, %v11828_v29  ;;  %v11685_v29 = vor.u32 %v13841_v11, %v11684_v59  ;;  %v13733_v20 = vld [vmem:[#allocation16 + $0x154] sm:$0xf0]  ;;  %v11156_v11 = vld [vmem:[#allocation16 + $0x68] sm:$0xf] }
 0x694   :  { %v5088_v0 = vmul.f32 %v5083_v8, %v16745_v24  ;;  %v5090_v44 = vmul.f32 %v16324_v47, %v16324_v47  ;;  %v13954_v8 = vld [vmem:[#allocation16 + $0x844] sm:$0xf]  ;;  %v5095_v9 = vsub.f32 %v16289_v17, %v16324_v47  ;;  %v11253_v55 = vor.u32 %v13733_v20, %v11252_v62  ;;  %v11486_v20 = vld [vmem:[#allocation16 + $0x330] sm:$0xf0] }
 0x695   :  { %v12161_v25 = vor.u32 %v13954_v8, %v12158_v4  ;;  %7011 = vmatpush.bf16.msrb.mxu2 %v11829_v28  ;;  %v13829_v8 = vld [vmem:[#allocation16 + $0x454] sm:$0xf0]  ;;  %v5094_v4 = vsub.f32 %v16291_v2, %v16324_v47 }
 0x696   :  { %v5092_v36 = vsub.f32 %v5088_v0, %v5090_v44  ;;  %v11780_v0 = vld [vmem:[#allocation16 + $0x548] sm:$0xf] }
 0x697   :  { %v11781_v50 = vor.u32 %v13865_v1, %v11780_v0  ;;  %6984 = vmatpush.bf16.msra.mxu0 %v12161_v25  ;;  %v11633_v25 = vor.u32 %v13822_v12, %v11630_v42  ;;  %v11582_v0 = vld [vmem:[#allocation16 + $0x3f0] sm:$0xf0]  ;;  %v13709_v12 = vld [vmem:[#allocation16 + $0x94] sm:$0xf0]  ;;  %v11540_v42 = vld [vmem:[#allocation16 + $0x368] sm:$0xf] }
 0x698   :  { %v16329_v33 = vadd.f32 1e-05, %v5092_v36  ;;  %v11732_v36 = vld [vmem:[#allocation16 + $0x4e8] sm:$0xf] }
 0x699   :  { %v5071_v7 = vpop.xlane.xlu1 %5070  ;;  %7012 = vmatpush.bf16.msrb.mxu2 %v11781_v50  ;;  %v11733_v53 = vor.u32 %v13853_v34, %v11732_v36  ;;  %v11966_v50 = vld [vmem:[#allocation16 + $0x6f0] sm:$0xf0] }
 0x69a   :  { %v16332_v22 = vmul.f32 %v5071_v7, %v16745_v24  ;;  %14405 = vrsqrt.f32 %v16329_v33  ;;  %vm5108_vm13 = vweird.f32 %v16329_v33 }
 0x69b   :  { %v5087_v15 = vpop.xlane.xlu0 %5086  ;;  %6985 = vmatpush.bf16.msra.mxu0 %v12113_v10  ;;  %v11588_v10 = vld [vmem:[#allocation16 + $0x3c8] sm:$0xf] }
 0x69c   :  { %v5091_v41 = vmul.f32 %v16332_v22, %v16332_v22  ;;  %v5089_v21 = vmul.f32 %v5087_v15, %v16745_v24  ;;  %v11774_v24 = vld [vmem:[#allocation16 + $0x570] sm:$0xf0]  ;;  %v11349_v15 = vor.u32 %v13757_v16, %v11348_v27  ;;  %v5096_v27 = vsub.f32 %v16297_v63, %v16324_v47 }
 0x69d   :  { %v11777_v38 = vor.u32 %v13858_v13, %v11774_v24  ;;  %7013 = vmatpush.bf16.msrb.mxu2 %v11733_v53  ;;  %v5130_v13 = vperm.slane %v16346_v31, 1  ;;  %v5097_v34 = vsub.f32 %v16310_v26, %v16332_v22 }
 0x69e   :  { %v5093_v32 = vsub.f32 %v5089_v21, %v5091_v41  ;;  %v11678_v41 = vld [vmem:[#allocation16 + $0x4b0] sm:$0xf0]  ;;  %6999 = vmatpush.bf16.msra.mxu1 %v11349_v15  ;;  %v13798_v15 = vld [vmem:[#allocation16 + $0x364] sm:$0xf] }
 0x69f   :  { %6970 = vmatpush.bf16.msrb.mxu3 %v11777_v38  ;;  %v11681_v46 = vor.u32 %v13834_v51, %v11678_v41  ;;  %v11636_v38 = vld [vmem:[#allocation16 + $0x428] sm:$0xf]  ;;  %6986 = vmatpush.bf16.msra.mxu0 %v12065_v3  ;;  %v11585_v51 = vor.u32 %v13810_v40, %v11582_v0  ;;  %v11534_v41 = vld [vmem:[#allocation16 + $0x390] sm:$0xf0]  ;;  %v5099_v3 = vsub.f32 %v16314_v48, %v16332_v22 }
 0x6a0   :  { %v16338_v23 = vpop.eup %14405  ;;  %v16340_v14 = vadd.f32 1e-05, %v5093_v32  ;;  %v11301_v32 = vor.u32 %v13745_v43, %v11300_v37  ;;  %v11637_v19 = vor.u32 %v13829_v8, %v11636_v38  ;;  %v5144_v38 = vperm.slane %v16348_v6, 2  ;;  %v11108_v0 = vld [vmem:[#allocation16 + $0x8] sm:$0xf] }
 0x6a1   :  { %v5103_v60 = vmul.f32 %v16338_v23, %v16329_v33  ;;  %vm5109_vm12 = vweird.f32 %v16338_v23  ;;  %v5131_v33 = vperm.slane %v16346_v31, 2  ;;  %7014 = vmatpush.bf16.msrb.mxu2 %v11685_v29  ;;  %v11541_v40 = vor.u32 %v13805_v58, %v11540_v42  ;;  %v13751_v58 = vld [vmem:[#allocation16 + $0x1ec] sm:$0xf] }
 0x6a2   :  { %14407 = vrsqrt.f32 %v16340_v14  ;;  %vm5110_vm14 = vmor %vm5108_vm13, %vm5109_vm12  ;;  %7000 = vmatpush.bf16.msra.mxu1 %v11301_v32  ;;  %vm5118_vm0 = vweird.f32 %v16340_v14  ;;  %v11921_v32 = vor.u32 %v13894_v57, %v11918_v18  ;;  %v12164_v57 = vld [vmem:[#allocation16 + $0x848] sm:$0xf]  ;;  %v13961_v18 = vld [vmem:[#allocation16 + $0x874] sm:$0xf0] }
 0x6a3   :  { %v5104_v44 = vmul.f32 %v16338_v23, %v5103_v60  ;;  %6971 = vmatpush.bf16.msrb.mxu3 %v11729_v54  ;;  %v5142_v60 = vperm.slane %v16348_v6, 0  ;;  %v13721_v54 = vld [vmem:[#allocation16 + $0xf4] sm:$0xf0]  ;;  %6987 = vmatpush.bf16.msra.mxu0 %v12017_v45 }
 0x6a4   :  { %v11205_v47 = vor.u32 %v13721_v54, %v11204_v56  ;;  %v13973_v56 = vld [vmem:[#allocation16 + $0x8d4] sm:$0xf0] }
 0x6a5   :  { %v5105_v7 = vmul.f32 0.5, %v5104_v44  ;;  %v13906_v44 = vld [vmem:[#allocation16 + $0x6c4] sm:$0xf]  ;;  %7015 = vmatpush.bf16.msrb.mxu2 %v11637_v19  ;;  %v12212_v19 = vld [vmem:[#allocation16 + $0x8a8] sm:$0xf] }
 0x6a6   :  { %v11969_v53 = vor.u32 %v13906_v44, %v11966_v50  ;;  %7001 = vmatpush.bf16.msra.mxu1 %v11253_v55  ;;  %v11489_v44 = vor.u32 %v13786_v5, %v11486_v20  ;;  %v11350_v5 = vld [vmem:[#allocation16 + $0x218] sm:$0xf0] }
 0x6a7   :  { %v5106_v21 = vsub.f32 1.5, %v5105_v7  ;;  %6972 = vmatpush.bf16.msrb.mxu3 %v11681_v46  ;;  %v13817_v7 = vld [vmem:[#allocation16 + $0x3f4] sm:$0xf0]  ;;  %v5098_v46 = vsub.f32 %v16305_v30, %v16332_v22  ;;  %v12118_v20 = vld [vmem:[#allocation16 + $0x818] sm:$0xf0] }
 0x6a8   :  { %v16351_v61 = vpop.eup %14407  ;;  %v11589_v59 = vor.u32 %v13817_v7, %v11588_v10  ;;  %6988 = vmatpush.bf16.msra.mxu0 %v11969_v53  ;;  %v12213_v53 = vor.u32 %v13973_v56, %v12212_v19  ;;  %v13823_v19 = vld [vmem:[#allocation16 + $0x42c] sm:$0xf]  ;;  %v11638_v56 = vld [vmem:[#allocation16 + $0x458] sm:$0xf0] }
 0x6a9   :  { %v5107_v52 = vmul.f32 %v16338_v23, %v5106_v21  ;;  %v5113_v35 = vmul.f32 %v16351_v61, %v16340_v14  ;;  %vm5119_vm15 = vweird.f32 %v16351_v61 }
 0x6aa   :  { %vm5120_vm1 = vmor %vm5118_vm0, %vm5119_vm15  ;;  %7002 = vmatpush.bf16.msra.mxu1 %v11205_v47  ;;  %7016 = vmatpush.bf16.msrb.mxu2 %v11589_v59  ;;  %v13763_v47 = vld [vmem:[#allocation16 + $0x24c] sm:$0xf] }
 0x6ab   :  { %v5111_v24 = vsel %vm5110_vm14, %v16338_v23, %v5107_v52  ;;  %v5114_v28 = vmul.f32 %v16351_v61, %v5113_v35  ;;  %v5143_v23 = vperm.slane %v16348_v6, 1  ;;  %6973 = vmatpush.bf16.msrb.mxu3 %v11633_v25  ;;  %v11537_v35 = vor.u32 %v13798_v15, %v11534_v41  ;;  %v13967_v6 = vld [vmem:[#allocation16 + $0x8ac] sm:$0xf] }
 0x6ac   :  { %v5122_v39 = vmul.f32 %v5111_v24, %v5094_v4  ;;  %v5123_v16 = vmul.f32 %v5111_v24, %v5095_v9  ;;  %v5124_v21 = vmul.f32 %v5111_v24, %v5096_v27  ;;  %v13882_v24 = vld [vmem:[#allocation16 + $0x604] sm:$0xf]  ;;  %v13697_v9 = vld [vmem:[#allocation16 + $0x34] sm:$0xf0]  ;;  %6989 = vmatpush.bf16.msra.mxu0 %v11921_v32  ;;  %v13775_v27 = vld [vmem:[#allocation16 + $0x2ac] sm:$0xf] }
 0x6ad   :  { %v5115_v1 = vmul.f32 0.5, %v5114_v28  ;;  %v11870_v28 = vld [vmem:[#allocation16 + $0x630] sm:$0xf0]  ;;  %v11109_v10 = vor.u32 %v13697_v9, %v11108_v0  ;;  %v13955_v59 = vld [vmem:[#allocation16 + $0x84c] sm:$0xf] }
 0x6ae   :  { %v5135_v43 = vmul.f32 %v5129_v49, %v5122_v39  ;;  %v5136_v14 = vmul.f32 %v5130_v13, %v5123_v16  ;;  %v5137_v8 = vmul.f32 %v5131_v33, %v5124_v21  ;;  %v11873_v50 = vor.u32 %v13882_v24, %v11870_v28  ;;  %v11492_v39 = vld [vmem:[#allocation16 + $0x308] sm:$0xf]  ;;  %v11446_v16 = vld [vmem:[#allocation16 + $0x2d8] sm:$0xf0]  ;;  %7017 = vmatpush.bf16.msrb.mxu2 %v11541_v40  ;;  %v13835_v40 = vld [vmem:[#allocation16 + $0x48c] sm:$0xf] }
 0x6af   :  { %v5116_v36 = vsub.f32 1.5, %v5115_v1  ;;  %6974 = vmatpush.bf16.msrb.mxu3 %v11585_v51  ;;  %v11449_v41 = vor.u32 %v13775_v27, %v11446_v16  ;;  %v11353_v28 = vor.u32 %v13751_v58, %v11350_v5  ;;  %v11686_v0 = vld [vmem:[#allocation16 + $0x4b8] sm:$0xf0]  ;;  %v13931_v9 = vld [vmem:[#allocation16 + $0x78c] sm:$0xf] }
 0x6b0   :  { %v5148_v1 = vadd.f32 %v5142_v60, %v5135_v43  ;;  %v5149_v55 = vadd.f32 %v5143_v23, %v5136_v14  ;;  %v5150_v54 = vadd.f32 %v5144_v38, %v5137_v8  ;;  %6990 = vmatpush.bf16.msra.mxu0 %v11873_v50  ;;  %v11398_v43 = vld [vmem:[#allocation16 + $0x278] sm:$0xf0]  ;;  %v13937_v8 = vld [vmem:[#allocation16 + $0x7b4] sm:$0xf0]  ;;  %v12020_v50 = vld [vmem:[#allocation16 + $0x728] sm:$0xf] }
 0x6b1   :  { %v5117_v37 = vmul.f32 %v16351_v61, %v5116_v36  ;;  %v13871_v36 = vld [vmem:[#allocation16 + $0x5ac] sm:$0xf]  ;;  %v11401_v14 = vor.u32 %v13763_v47, %v11398_v43  ;;  %v11924_v43 = vld [vmem:[#allocation16 + $0x668] sm:$0xf] }
 0x6b3   :  { %v5121_v52 = vsel %vm5120_vm1, %v16351_v61, %v5117_v37  ;;  %v11157_v61 = vor.u32 %v13709_v12, %v11156_v11  ;;  %6975 = vmatpush.bf16.msrb.mxu3 %v11537_v35  ;;  %v12166_v11 = vld [vmem:[#allocation16 + $0x878] sm:$0xf0]  ;;  %v12165_v12 = vor.u32 %v13961_v18, %v12164_v57  ;;  %v13949_v35 = vld [vmem:[#allocation16 + $0x814] sm:$0xf0]  ;;  %v13907_v18 = vld [vmem:[#allocation16 + $0x6cc] sm:$0xf] }
 0x6b4   :  { %v5125_v29 = vmul.f32 %v5121_v52, %v5097_v34  ;;  %v5126_v62 = vmul.f32 %v5121_v52, %v5098_v46  ;;  %v5127_v22 = vmul.f32 %v5121_v52, %v5099_v3  ;;  %v11830_v34 = vld [vmem:[#allocation16 + $0x5d8] sm:$0xf0]  ;;  %v13859_v46 = vld [vmem:[#allocation16 + $0x54c] sm:$0xf]  ;;  %v12116_v52 = vld [vmem:[#allocation16 + $0x7e8] sm:$0xf]  ;;  %v12169_v42 = vor.u32 %v13955_v59, %v12166_v11 }
 0x6b5   :  { %7003 = vmatpush.bf16.msra.mxu1 %v11157_v61  ;;  %v11833_v21 = vor.u32 %v13871_v36, %v11830_v34  ;;  %v11782_v3 = vld [vmem:[#allocation16 + $0x578] sm:$0xf0]  ;;  %v12117_v24 = vor.u32 %v13949_v35, %v12116_v52  ;;  %v11972_v36 = vld [vmem:[#allocation16 + $0x6c8] sm:$0xf]  ;;  %v11641_v34 = vor.u32 %v13823_v19, %v11638_v56  ;;  %v13703_v11 = vld [vmem:[#allocation16 + $0x6c] sm:$0xf] }
 0x6b6   :  { %v5138_v4 = vmul.f32 %v5129_v49, %v5125_v29  ;;  %v5139_v25 = vmul.f32 %v5130_v13, %v5126_v62  ;;  %v5140_v45 = vmul.f32 %v5131_v33, %v5127_v22  ;;  %v13793_v49 = vld [vmem:[#allocation16 + $0x334] sm:$0xf0]  ;;  %v11785_v32 = vor.u32 %v13859_v46, %v11782_v3  ;;  %v13847_v29 = vld [vmem:[#allocation16 + $0x4ec] sm:$0xf]  ;;  %v11734_v62 = vld [vmem:[#allocation16 + $0x518] sm:$0xf0] }
 0x6b7   :  { %6976 = vmatpush.bf16.msrb.mxu3 %v11489_v44  ;;  %v13943_v22 = vld [vmem:[#allocation16 + $0x7ec] sm:$0xf]  ;;  %v11737_v61 = vor.u32 %v13847_v29, %v11734_v62  ;;  %v11590_v57 = vld [vmem:[#allocation16 + $0x3f8] sm:$0xf0]  ;;  %v13901_v46 = vld [vmem:[#allocation16 + $0x694] sm:$0xf0] }
 0x6b8   :  { %v5151_v13 = vadd.f32 %v5142_v60, %v5138_v4  ;;  %v5152_v31 = vadd.f32 %v5143_v23, %v5139_v25  ;;  %v5153_v33 = vadd.f32 %v5144_v38, %v5140_v45  ;;  %v11493_v60 = vor.u32 %v13793_v49, %v11492_v39  ;;  %v12214_v23 = vld [vmem:[#allocation16 + $0x8d8] sm:$0xf0]  ;;  %v12068_v38 = vld [vmem:[#allocation16 + $0x788] sm:$0xf]  ;;  %v13739_v25 = vld [vmem:[#allocation16 + $0x18c] sm:$0xf] }
 0x6b9   :  { %7004 = vmatpush.bf16.msra.mxu1 %v11109_v10  ;;  %v12217_v37 = vor.u32 %v13967_v6, %v12214_v23  ;;  %v12121_v4 = vor.u32 %v13943_v22, %v12118_v20  ;;  %v11302_v45 = vld [vmem:[#allocation16 + $0x1b8] sm:$0xf0]  ;;  %v13925_v39 = vld [vmem:[#allocation16 + $0x754] sm:$0xf0]  ;;  %v11689_v49 = vor.u32 %v13835_v40, %v11686_v0  ;;  %v13715_v23 = vld [vmem:[#allocation16 + $0xcc] sm:$0xf]  ;;  %v11925_v58 = vor.u32 %v13901_v46, %v11924_v43 }
 0x6ba   :  { %v16405_v7 = vpack.c.bf16 %v5151_v13, %v5148_v1  ;;  %v16407_v15 = vpack.c.bf16 %v5152_v31, %v5149_v55  ;;  %v16409_v51 = vpack.c.bf16 %v5153_v33, %v5150_v54  ;;  %7018 = vmatpush.bf16.msrb.mxu2 %v11493_v60  ;;  %v12070_v1 = vld [vmem:[#allocation16 + $0x7b8] sm:$0xf0]  ;;  %v12069_v55 = vor.u32 %v13937_v8, %v12068_v38  ;;  %v13727_v31 = vld [vmem:[#allocation16 + $0x12c] sm:$0xf]  ;;  %v13913_v60 = vld [vmem:[#allocation16 + $0x6f4] sm:$0xf0] }
 0x6bb   :  { %v11305_v44 = vor.u32 %v13739_v25, %v11302_v45  ;;  %v12073_v13 = vor.u32 %v13931_v9, %v12070_v1  ;;  %v11254_v33 = vld [vmem:[#allocation16 + $0x158] sm:$0xf0]  ;;  %v13919_v54 = vld [vmem:[#allocation16 + $0x72c] sm:$0xf]  ;;  %v12021_v27 = vor.u32 %v13925_v39, %v12020_v50  ;;  %v13889_v29 = vld [vmem:[#allocation16 + $0x634] sm:$0xf0] }
 0x6bc   :  { %6921 = vmatmul.bf16.vlgmr.msra.gmra.mxu3 %v16405_v7  ;;  %6935 = vmatmul.bf16.vlgmr.msrb.gmra.mxu0 %v16407_v15  ;;  %v12022_v10 = vld [vmem:[#allocation16 + $0x758] sm:$0xf0]  ;;  %v11257_v16 = vor.u32 %v13727_v31, %v11254_v33  ;;  %v13895_v35 = vld [vmem:[#allocation16 + $0x66c] sm:$0xf]  ;;  %v13782_v25 = vld [vmem:[#allocation16 + $0x2dc] sm:$0xf0] }
 0x6bd   :  { %6949 = vmatmul.bf16.vlgmr.msrb.gmra.mxu1 %v16409_v51  ;;  %6963 = vmatmul.bf16.vlgmr.msra.gmra.mxu2 %v16405_v7  ;;  %v12025_v6 = vor.u32 %v13919_v54, %v12022_v10  ;;  %v11542_v52 = vld [vmem:[#allocation16 + $0x398] sm:$0xf0]  ;;  %v13691_v62 = vld [vmem:[#allocation16 + $0xc] sm:$0xf]  ;;  %v11836_v45 = vld [vmem:[#allocation16 + $0x5b0] sm:$0xf] }
 0x6be   :  { %7025 = vmatpush.bf16.msra.mxu3 %v12213_v53  ;;  %7039 = vmatpush.bf16.msrb.mxu0 %v11449_v41  ;;  %v11206_v53 = vld [vmem:[#allocation16 + $0xf8] sm:$0xf0]  ;;  %v13811_v41 = vld [vmem:[#allocation16 + $0x3cc] sm:$0xf]  ;;  %v13878_v40 = vld [vmem:[#allocation16 + $0x5dc] sm:$0xf0] }
 0x6bf   :  { %7053 = vmatpush.bf16.msrb.mxu1 %v11833_v21  ;;  %7067 = vmatpush.bf16.msra.mxu2 %v12217_v37  ;;  %v11974_v21 = vld [vmem:[#allocation16 + $0x6f8] sm:$0xf0]  ;;  %v11973_v37 = vor.u32 %v13913_v60, %v11972_v36  ;;  %v11209_v47 = vor.u32 %v13715_v23, %v11206_v53  ;;  %v11593_v3 = vor.u32 %v13811_v41, %v11590_v57  ;;  %v13883_v8 = vld [vmem:[#allocation16 + $0x60c] sm:$0xf]  ;;  %v12220_v0 = vld [vmem:[#allocation16 + $0x8b0] sm:$0xf] }
 0x6c0   :  { %v11977_v59 = vor.u32 %v13907_v18, %v11974_v21  ;;  %v11110_v22 = vld [vmem:[#allocation16 + $0x38] sm:$0xf0]  ;;  %v11454_v50 = vld [vmem:[#allocation16 + $0x2e0] sm:$0xf0]  ;;  %v11837_v31 = vor.u32 %v13878_v40, %v11836_v45  ;;  %v11404_v33 = vld [vmem:[#allocation16 + $0x250] sm:$0xf] }
 0x6c1   :  { %v11494_v38 = vld [vmem:[#allocation16 + $0x338] sm:$0xf0]  ;;  %v11113_v1 = vor.u32 %v13691_v62, %v11110_v22  ;;  %v13770_v19 = vld [vmem:[#allocation16 + $0x27c] sm:$0xf0]  ;;  %v11788_v10 = vld [vmem:[#allocation16 + $0x550] sm:$0xf] }
 0x6c2   :  { %7026 = vmatpush.bf16.msra.mxu3 %v12165_v12  ;;  %7040 = vmatpush.bf16.msrb.mxu0 %v11401_v14  ;;  %v11158_v12 = vld [vmem:[#allocation16 + $0x98] sm:$0xf0]  ;;  %v13799_v14 = vld [vmem:[#allocation16 + $0x36c] sm:$0xf]  ;;  %v13962_v36 = vld [vmem:[#allocation16 + $0x87c] sm:$0xf0] }
 0x6c3   :  { %7054 = vmatpush.bf16.msrb.mxu1 %v11785_v32  ;;  %7068 = vmatpush.bf16.msra.mxu2 %v12169_v42  ;;  %v11926_v32 = vld [vmem:[#allocation16 + $0x698] sm:$0xf0]  ;;  %v11876_v42 = vld [vmem:[#allocation16 + $0x608] sm:$0xf]  ;;  %v11161_v5 = vor.u32 %v13703_v11, %v11158_v12  ;;  %v11545_v20 = vor.u32 %v13799_v14, %v11542_v52  ;;  %v13764_v60 = vld [vmem:[#allocation16 + $0x254] sm:$0xf] }
 0x6c4   :  { %v11877_v9 = vor.u32 %v13889_v29, %v11876_v42  ;;  %v11356_v53 = vld [vmem:[#allocation16 + $0x1f0] sm:$0xf]  ;;  %v13758_v41 = vld [vmem:[#allocation16 + $0x21c] sm:$0xf0]  ;;  %v13752_v46 = vld [vmem:[#allocation16 + $0x1f4] sm:$0xf] }
 0x6c5   :  { %v11740_v21 = vld [vmem:[#allocation16 + $0x4f0] sm:$0xf]  ;;  %v13950_v43 = vld [vmem:[#allocation16 + $0x81c] sm:$0xf0]  ;;  %v13740_v29 = vld [vmem:[#allocation16 + $0x194] sm:$0xf] }
 0x6c6   :  { %7027 = vmatpush.bf16.msra.mxu3 %v12117_v24  ;;  %7041 = vmatpush.bf16.msrb.mxu0 %v11353_v28  ;;  %v11929_v24 = vor.u32 %v13895_v35, %v11926_v32  ;;  %v13787_v28 = vld [vmem:[#allocation16 + $0x30c] sm:$0xf]  ;;  %v11308_v12 = vld [vmem:[#allocation16 + $0x190] sm:$0xf]  ;;  %v13746_v14 = vld [vmem:[#allocation16 + $0x1bc] sm:$0xf0] }
 0x6c7   :  { %7055 = vmatpush.bf16.msrb.mxu1 %v11737_v61  ;;  %7069 = vmatpush.bf16.msra.mxu2 %v12121_v4  ;;  %v11878_v61 = vld [vmem:[#allocation16 + $0x638] sm:$0xf0]  ;;  %v11452_v4 = vld [vmem:[#allocation16 + $0x2b0] sm:$0xf]  ;;  %v11497_v39 = vor.u32 %v13787_v28, %v11494_v38  ;;  %v13842_v42 = vld [vmem:[#allocation16 + $0x4bc] sm:$0xf0]  ;;  %v11309_v22 = vor.u32 %v13746_v14, %v11308_v12 }
 0x6c8   :  { %v11692_v32 = vld [vmem:[#allocation16 + $0x490] sm:$0xf]  ;;  %v11310_v62 = vld [vmem:[#allocation16 + $0x1c0] sm:$0xf0]  ;;  %v13734_v28 = vld [vmem:[#allocation16 + $0x15c] sm:$0xf0] }
 0x6c9   :  { %v13926_v45 = vld [vmem:[#allocation16 + $0x75c] sm:$0xf0]  ;;  %v13728_v40 = vld [vmem:[#allocation16 + $0x134] sm:$0xf] }
 0x6ca   :  { %7028 = vmatpush.bf16.msra.mxu3 %v12069_v55  ;;  %7042 = vmatpush.bf16.msrb.mxu0 %v11305_v44  ;;  %v13974_v55 = vld [vmem:[#allocation16 + $0x8dc] sm:$0xf0]  ;;  %v13776_v44 = vld [vmem:[#allocation16 + $0x2b4] sm:$0xf] }
 0x6cb   :  { %7056 = vmatpush.bf16.msrb.mxu1 %v11689_v49  ;;  %7070 = vmatpush.bf16.msra.mxu2 %v12073_v13  ;;  %v11881_v49 = vor.u32 %v13883_v8, %v11878_v61  ;;  %v11453_v13 = vor.u32 %v13782_v25, %v11452_v4  ;;  %v12221_v56 = vor.u32 %v13974_v55, %v12220_v0  ;;  %v11644_v61 = vld [vmem:[#allocation16 + $0x430] sm:$0xf]  ;;  %v13830_v4 = vld [vmem:[#allocation16 + $0x45c] sm:$0xf0]  ;;  %v11262_v0 = vld [vmem:[#allocation16 + $0x160] sm:$0xf0] }
 0x6cc   :  { %6977 = vmatmul.bf16.vlgmr.msrb.gmra.mxu3 %v16407_v15  ;;  %6991 = vmatmul.bf16.vlgmr.msra.gmra.mxu0 %v16409_v51  ;;  %v11457_v54 = vor.u32 %v13776_v44, %v11454_v50  ;;  %v11313_v8 = vor.u32 %v13740_v29, %v11310_v62  ;;  %v12028_v25 = vld [vmem:[#allocation16 + $0x730] sm:$0xf]  ;;  %v13722_v44 = vld [vmem:[#allocation16 + $0xfc] sm:$0xf0]  ;;  %v13692_v14 = vld [vmem:[#allocation16 + $0x14] sm:$0xf] }
 0x6cd   :  { %7005 = vmatmul.bf16.vlgmr.msra.gmra.mxu1 %v16405_v7  ;;  %7019 = vmatmul.bf16.vlgmr.msrb.gmra.mxu2 %v16407_v15  ;;  %v11212_v55 = vld [vmem:[#allocation16 + $0xd0] sm:$0xf]  ;;  %v12029_v50 = vor.u32 %v13926_v45, %v12028_v25  ;;  %v13890_v12 = vld [vmem:[#allocation16 + $0x63c] sm:$0xf0]  ;;  %v11790_v25 = vld [vmem:[#allocation16 + $0x580] sm:$0xf0] }
 0x6ce   :  { %7029 = vmatpush.bf16.msra.mxu3 %v12021_v27  ;;  %7043 = vmatpush.bf16.msrb.mxu0 %v11257_v16  ;;  %v13866_v27 = vld [vmem:[#allocation16 + $0x57c] sm:$0xf0]  ;;  %v12172_v16 = vld [vmem:[#allocation16 + $0x850] sm:$0xf] }
 0x6cf   :  { %7057 = vmatpush.bf16.msrb.mxu1 %v11641_v34  ;;  %7071 = vmatpush.bf16.msra.mxu2 %v12025_v6  ;;  %v11406_v34 = vld [vmem:[#allocation16 + $0x280] sm:$0xf0]  ;;  %v11405_v6 = vor.u32 %v13770_v19, %v11404_v33  ;;  %v11789_v23 = vor.u32 %v13866_v27, %v11788_v10  ;;  %v12173_v57 = vor.u32 %v13962_v36, %v12172_v16  ;;  %v13914_v33 = vld [vmem:[#allocation16 + $0x6fc] sm:$0xf0]  ;;  %v13716_v19 = vld [vmem:[#allocation16 + $0xd4] sm:$0xf] }
 0x6d0   :  { %v11409_v18 = vor.u32 %v13764_v60, %v11406_v34  ;;  %v11164_v27 = vld [vmem:[#allocation16 + $0x70] sm:$0xf]  ;;  %v13710_v16 = vld [vmem:[#allocation16 + $0x9c] sm:$0xf0] }
 0x6d1   :  { %v11548_v34 = vld [vmem:[#allocation16 + $0x370] sm:$0xf] }
 0x6d2   :  { %7030 = vmatpush.bf16.msra.mxu3 %v11973_v37  ;;  %7044 = vmatpush.bf16.msrb.mxu0 %v11209_v47  ;;  %v13854_v37 = vld [vmem:[#allocation16 + $0x51c] sm:$0xf0]  ;;  %v12124_v47 = vld [vmem:[#allocation16 + $0x7f0] sm:$0xf] }
 0x6d3   :  { %7058 = vmatpush.bf16.msrb.mxu1 %v11593_v3  ;;  %7072 = vmatpush.bf16.msra.mxu2 %v11977_v59  ;;  %v11358_v3 = vld [vmem:[#allocation16 + $0x220] sm:$0xf0]  ;;  %v11357_v59 = vor.u32 %v13758_v41, %v11356_v53  ;;  %v11741_v11 = vor.u32 %v13854_v37, %v11740_v21  ;;  %v12125_v52 = vor.u32 %v13950_v43, %v12124_v47  ;;  %v13902_v53 = vld [vmem:[#allocation16 + $0x69c] sm:$0xf0]  ;;  %v13704_v41 = vld [vmem:[#allocation16 + $0x74] sm:$0xf] }
 0x6d4   :  { %v11361_v35 = vor.u32 %v13752_v46, %v11358_v3  ;;  %v11165_v21 = vor.u32 %v13710_v16, %v11164_v27  ;;  %v13698_v47 = vld [vmem:[#allocation16 + $0x3c] sm:$0xf0]  ;;  %v11500_v43 = vld [vmem:[#allocation16 + $0x310] sm:$0xf]  ;;  %v13759_v27 = vld [vmem:[#allocation16 + $0x224] sm:$0xf0] }
 0x6d5   :  { %v13794_v46 = vld [vmem:[#allocation16 + $0x33c] sm:$0xf0]  ;;  %v11748_v16 = vld [vmem:[#allocation16 + $0x4f8] sm:$0xf] }
 0x6d6   :  { %7031 = vmatpush.bf16.msra.mxu3 %v11925_v58  ;;  %7045 = vmatpush.bf16.msrb.mxu0 %v11161_v5  ;;  %v12076_v58 = vld [vmem:[#allocation16 + $0x790] sm:$0xf]  ;;  %v13938_v5 = vld [vmem:[#allocation16 + $0x7bc] sm:$0xf0]  ;;  %v11501_v62 = vor.u32 %v13794_v46, %v11500_v43  ;;  %v13843_v43 = vld [vmem:[#allocation16 + $0x4c4] sm:$0xf0] }
 0x6d7   :  { %7059 = vmatpush.bf16.msrb.mxu1 %v11545_v20  ;;  %7073 = vmatpush.bf16.msra.mxu2 %v11929_v24  ;;  %v11693_v20 = vor.u32 %v13842_v42, %v11692_v32  ;;  %v11260_v24 = vld [vmem:[#allocation16 + $0x130] sm:$0xf]  ;;  %v12077_v38 = vor.u32 %v13938_v5, %v12076_v58  ;;  %v11838_v32 = vld [vmem:[#allocation16 + $0x5e0] sm:$0xf0]  ;;  %v13968_v42 = vld [vmem:[#allocation16 + $0x8b4] sm:$0xf] }
 0x6d8   :  { %v12222_v58 = vld [vmem:[#allocation16 + $0x8e0] sm:$0xf0]  ;;  %v11460_v5 = vld [vmem:[#allocation16 + $0x2b8] sm:$0xf] }
 0x6da   :  { %7032 = vmatpush.bf16.msra.mxu3 %v11877_v9  ;;  %7046 = vmatpush.bf16.msrb.mxu0 %v11113_v1  ;;  %v11261_v9 = vor.u32 %v13734_v28, %v11260_v24  ;;  %v11645_v1 = vor.u32 %v13830_v4, %v11644_v61  ;;  %v13879_v24 = vld [vmem:[#allocation16 + $0x5e4] sm:$0xf0]  ;;  %v12225_v61 = vor.u32 %v13968_v42, %v12222_v58  ;;  %v13860_v4 = vld [vmem:[#allocation16 + $0x554] sm:$0xf]  ;;  %v11652_v58 = vld [vmem:[#allocation16 + $0x438] sm:$0xf] }
 0x6db   :  { %7060 = vmatpush.bf16.msrb.mxu1 %v11497_v39  ;;  %7074 = vmatpush.bf16.msra.mxu2 %v11881_v49  ;;  %v11265_v39 = vor.u32 %v13728_v40, %v11262_v0  ;;  %v11596_v49 = vld [vmem:[#allocation16 + $0x3d0] sm:$0xf]  ;;  %v13956_v0 = vld [vmem:[#allocation16 + $0x854] sm:$0xf]  ;;  %v13735_v42 = vld [vmem:[#allocation16 + $0x164] sm:$0xf0] }
 0x6dd   :  { %7033 = vmatmul.bf16.vlgmr.msra.gmra.mxu3 %v16409_v51  ;;  %7047 = vmatmul.bf16.vlgmr.msrb.gmra.mxu0 %v16405_v7 }
 0x6de   :  { %7081 = vmatpush.bf16.msrb.mxu3 %v11453_v13  ;;  %7095 = vmatpush.bf16.msra.mxu0 %v11837_v31  ;;  %v13818_v13 = vld [vmem:[#allocation16 + $0x3fc] sm:$0xf0]  ;;  %v11980_v31 = vld [vmem:[#allocation16 + $0x6d0] sm:$0xf] }
 0x6df   :  { %7109 = vmatpush.bf16.msra.mxu1 %v12221_v56  ;;  %7123 = vmatpush.bf16.msrb.mxu2 %v11457_v54  ;;  %v11214_v56 = vld [vmem:[#allocation16 + $0x100] sm:$0xf0]  ;;  %v11213_v54 = vor.u32 %v13722_v44, %v11212_v55  ;;  %v11597_v10 = vor.u32 %v13818_v13, %v11596_v49  ;;  %v11981_v36 = vor.u32 %v13914_v33, %v11980_v31  ;;  %v13771_v55 = vld [vmem:[#allocation16 + $0x284] sm:$0xf0]  ;;  %v11796_v44 = vld [vmem:[#allocation16 + $0x558] sm:$0xf] }
 0x6e0   :  { %7061 = vmatmul.bf16.vlgmr.msrb.gmra.mxu1 %v16407_v15  ;;  %7075 = vmatmul.bf16.vlgmr.msra.gmra.mxu2 %v16409_v51  ;;  %v11217_v60 = vor.u32 %v13716_v19, %v11214_v56  ;;  %v13848_v13 = vld [vmem:[#allocation16 + $0x4f4] sm:$0xf]  ;;  %v11742_v31 = vld [vmem:[#allocation16 + $0x520] sm:$0xf0] }
 0x6e1   :  { %v13944_v56 = vld [vmem:[#allocation16 + $0x7f4] sm:$0xf] }
 0x6e2   :  { %7082 = vmatpush.bf16.msrb.mxu3 %v11405_v6  ;;  %7096 = vmatpush.bf16.msra.mxu0 %v11789_v23  ;;  %v13806_v6 = vld [vmem:[#allocation16 + $0x39c] sm:$0xf0]  ;;  %v11932_v23 = vld [vmem:[#allocation16 + $0x670] sm:$0xf] }
 0x6e3   :  { %7110 = vmatpush.bf16.msra.mxu1 %v12173_v57  ;;  %7124 = vmatpush.bf16.msrb.mxu2 %v11409_v18  ;;  %v11166_v57 = vld [vmem:[#allocation16 + $0xa0] sm:$0xf0]  ;;  %v11116_v18 = vld [vmem:[#allocation16 + $0x10] sm:$0xf]  ;;  %v11549_v37 = vor.u32 %v13806_v6, %v11548_v34  ;;  %v11933_v3 = vor.u32 %v13902_v53, %v11932_v23  ;;  %v13836_v6 = vld [vmem:[#allocation16 + $0x494] sm:$0xf] }
 0x6e4   :  { %v11117_v29 = vor.u32 %v13698_v47, %v11116_v18  ;;  %v11694_v23 = vld [vmem:[#allocation16 + $0x4c0] sm:$0xf0]  ;;  %v11700_v47 = vld [vmem:[#allocation16 + $0x498] sm:$0xf] }
 0x6e5   :  { %v12078_v18 = vld [vmem:[#allocation16 + $0x7c0] sm:$0xf0]  ;;  %v11697_v46 = vor.u32 %v13836_v6, %v11694_v23  ;;  %v13699_v6 = vld [vmem:[#allocation16 + $0x44] sm:$0xf0]  ;;  %v11508_v23 = vld [vmem:[#allocation16 + $0x318] sm:$0xf] }
 0x6e6   :  { %7083 = vmatpush.bf16.msrb.mxu3 %v11357_v59  ;;  %7097 = vmatpush.bf16.msra.mxu0 %v11741_v11  ;;  %v11169_v59 = vor.u32 %v13704_v41, %v11166_v57  ;;  %v11884_v11 = vld [vmem:[#allocation16 + $0x610] sm:$0xf]  ;;  %v13932_v57 = vld [vmem:[#allocation16 + $0x794] sm:$0xf] }
 0x6e7   :  { %7111 = vmatpush.bf16.msra.mxu1 %v12125_v52  ;;  %7125 = vmatpush.bf16.msrb.mxu2 %v11361_v35  ;;  %v11118_v52 = vld [vmem:[#allocation16 + $0x40] sm:$0xf0]  ;;  %v13872_v35 = vld [vmem:[#allocation16 + $0x5b4] sm:$0xf]  ;;  %v11885_v28 = vor.u32 %v13890_v12, %v11884_v11 }
 0x6e8   :  { %v11646_v11 = vld [vmem:[#allocation16 + $0x460] sm:$0xf0] }
 0x6ea   :  { %7084 = vmatpush.bf16.msrb.mxu3 %v11309_v22  ;;  %7098 = vmatpush.bf16.msra.mxu0 %v11693_v20  ;;  %v13783_v22 = vld [vmem:[#allocation16 + $0x2e4] sm:$0xf0]  ;;  %v11844_v20 = vld [vmem:[#allocation16 + $0x5b8] sm:$0xf] }
 0x6eb   :  { %7112 = vmatpush.bf16.msra.mxu1 %v12077_v38  ;;  %7126 = vmatpush.bf16.msrb.mxu2 %v11313_v8  ;;  %v11121_v38 = vor.u32 %v13692_v14, %v11118_v52  ;;  %v11841_v8 = vor.u32 %v13872_v35, %v11838_v32  ;;  %v11461_v45 = vor.u32 %v13783_v22, %v11460_v5  ;;  %v13920_v52 = vld [vmem:[#allocation16 + $0x734] sm:$0xf]  ;;  %v12030_v35 = vld [vmem:[#allocation16 + $0x760] sm:$0xf0]  ;;  %v11268_v32 = vld [vmem:[#allocation16 + $0x138] sm:$0xf] }
 0x6ec   :  { %v11845_v40 = vor.u32 %v13879_v24, %v11844_v20  ;;  %v11701_v14 = vor.u32 %v13843_v43, %v11700_v47  ;;  %v13831_v5 = vld [vmem:[#allocation16 + $0x464] sm:$0xf0]  ;;  %v13812_v22 = vld [vmem:[#allocation16 + $0x3d4] sm:$0xf]  ;;  %v11598_v20 = vld [vmem:[#allocation16 + $0x400] sm:$0xf0]  ;;  %v11269_v24 = vor.u32 %v13735_v42, %v11268_v32 }
 0x6ed   :  { %v13963_v32 = vld [vmem:[#allocation16 + $0x884] sm:$0xf0] }
 0x6ee   :  { %7085 = vmatpush.bf16.msrb.mxu3 %v11261_v9  ;;  %7099 = vmatpush.bf16.msra.mxu0 %v11645_v1  ;;  %v12174_v9 = vld [vmem:[#allocation16 + $0x880] sm:$0xf0]  ;;  %v11412_v1 = vld [vmem:[#allocation16 + $0x258] sm:$0xf] }
 0x6ef   :  { %7113 = vmatpush.bf16.msra.mxu1 %v12029_v50  ;;  %7127 = vmatpush.bf16.msrb.mxu2 %v11265_v39  ;;  %v13867_v50 = vld [vmem:[#allocation16 + $0x584] sm:$0xf0]  ;;  %v11793_v39 = vor.u32 %v13860_v4, %v11790_v25  ;;  %v12177_v49 = vor.u32 %v13956_v0, %v12174_v9  ;;  %v11413_v33 = vor.u32 %v13771_v55, %v11412_v1  ;;  %v11604_v25 = vld [vmem:[#allocation16 + $0x3d8] sm:$0xf]  ;;  %v13800_v9 = vld [vmem:[#allocation16 + $0x374] sm:$0xf] }
 0x6f0   :  { %v11797_v19 = vor.u32 %v13867_v50, %v11796_v44  ;;  %v13723_v4 = vld [vmem:[#allocation16 + $0x104] sm:$0xf0]  ;;  %v11550_v1 = vld [vmem:[#allocation16 + $0x3a0] sm:$0xf0]  ;;  %v13896_v50 = vld [vmem:[#allocation16 + $0x674] sm:$0xf] }
 0x6f2   :  { %7086 = vmatpush.bf16.msrb.mxu3 %v11213_v54  ;;  %7100 = vmatpush.bf16.msra.mxu0 %v11597_v10  ;;  %v12126_v54 = vld [vmem:[#allocation16 + $0x820] sm:$0xf0]  ;;  %v11364_v10 = vld [vmem:[#allocation16 + $0x1f8] sm:$0xf] }
 0x6f3   :  { %7114 = vmatpush.bf16.msra.mxu1 %v11981_v36  ;;  %7128 = vmatpush.bf16.msrb.mxu2 %v11217_v60  ;;  %v13855_v36 = vld [vmem:[#allocation16 + $0x524] sm:$0xf0]  ;;  %v11745_v60 = vor.u32 %v13848_v13, %v11742_v31  ;;  %v12129_v34 = vor.u32 %v13944_v56, %v12126_v54  ;;  %v11365_v53 = vor.u32 %v13759_v27, %v11364_v10  ;;  %v11556_v31 = vld [vmem:[#allocation16 + $0x378] sm:$0xf]  ;;  %v11502_v10 = vld [vmem:[#allocation16 + $0x340] sm:$0xf0] }
 0x6f4   :  { %v11749_v41 = vor.u32 %v13855_v36, %v11748_v16  ;;  %v13711_v13 = vld [vmem:[#allocation16 + $0xa4] sm:$0xf0]  ;;  %v11553_v56 = vor.u32 %v13800_v9, %v11550_v1  ;;  %v13884_v27 = vld [vmem:[#allocation16 + $0x614] sm:$0xf]  ;;  %v11886_v16 = vld [vmem:[#allocation16 + $0x640] sm:$0xf0] }
 0x6f5   :  { %v11889_v43 = vor.u32 %v13884_v27, %v11886_v16  ;;  %v11750_v9 = vld [vmem:[#allocation16 + $0x528] sm:$0xf0]  ;;  %v13945_v1 = vld [vmem:[#allocation16 + $0x7fc] sm:$0xf] }
 0x6f6   :  { %7087 = vmatpush.bf16.msrb.mxu3 %v11165_v21  ;;  %7101 = vmatpush.bf16.msra.mxu0 %v11549_v37  ;;  %v11316_v21 = vld [vmem:[#allocation16 + $0x198] sm:$0xf]  ;;  %v13747_v37 = vld [vmem:[#allocation16 + $0x1c4] sm:$0xf0]  ;;  %v12086_v27 = vld [vmem:[#allocation16 + $0x7c8] sm:$0xf0] }
 0x6f7   :  { %7115 = vmatpush.bf16.msra.mxu1 %v11933_v3  ;;  %7129 = vmatpush.bf16.msrb.mxu2 %v11169_v59  ;;  %v12081_v3 = vor.u32 %v13932_v57, %v12078_v18  ;;  %v13824_v59 = vld [vmem:[#allocation16 + $0x434] sm:$0xf]  ;;  %v11317_v12 = vor.u32 %v13747_v37, %v11316_v21  ;;  %v13975_v57 = vld [vmem:[#allocation16 + $0x8e4] sm:$0xf0]  ;;  %v13777_v18 = vld [vmem:[#allocation16 + $0x2bc] sm:$0xf] }
 0x6f8   :  { %v11462_v21 = vld [vmem:[#allocation16 + $0x2e8] sm:$0xf0]  ;;  %v13873_v37 = vld [vmem:[#allocation16 + $0x5bc] sm:$0xf] }
 0x6fa   :  { %7088 = vmatpush.bf16.msrb.mxu3 %v11117_v29  ;;  %7102 = vmatpush.bf16.msra.mxu0 %v11501_v62  ;;  %v11649_v29 = vor.u32 %v13824_v59, %v11646_v11  ;;  %v12033_v62 = vor.u32 %v13920_v52, %v12030_v35  ;;  %v12230_v59 = vld [vmem:[#allocation16 + $0x8e8] sm:$0xf0]  ;;  %v11465_v52 = vor.u32 %v13777_v18, %v11462_v21  ;;  %v12180_v35 = vld [vmem:[#allocation16 + $0x858] sm:$0xf]  ;;  %v13921_v21 = vld [vmem:[#allocation16 + $0x73c] sm:$0xf] }
 0x6fb   :  { %7116 = vmatpush.bf16.msra.mxu1 %v11885_v28  ;;  %7130 = vmatpush.bf16.msrb.mxu2 %v11121_v38  ;;  %v11653_v28 = vor.u32 %v13831_v5, %v11652_v58  ;;  %v13908_v38 = vld [vmem:[#allocation16 + $0x6d4] sm:$0xf]  ;;  %v13765_v5 = vld [vmem:[#allocation16 + $0x25c] sm:$0xf]  ;;  %v11654_v18 = vld [vmem:[#allocation16 + $0x468] sm:$0xf0] }
 0x6fd   :  { %7089 = vmatmul.bf16.vlgmr.msrb.gmra.mxu3 %v16405_v7  ;;  %7103 = vmatmul.bf16.vlgmr.msra.gmra.mxu0 %v16407_v15 }
 0x6fe   :  { %7137 = vmatpush.bf16.msra.mxu3 %v11841_v8  ;;  %7151 = vmatpush.bf16.msrb.mxu0 %v12225_v61  ;;  %v11982_v8 = vld [vmem:[#allocation16 + $0x700] sm:$0xf0]  ;;  %v11220_v61 = vld [vmem:[#allocation16 + $0xd8] sm:$0xf] }
 0x6ff   :  { %7165 = vmatpush.bf16.msrb.mxu1 %v11461_v45  ;;  %7179 = vmatpush.bf16.msra.mxu2 %v11845_v40  ;;  %v13819_v45 = vld [vmem:[#allocation16 + $0x404] sm:$0xf0]  ;;  %v11601_v40 = vor.u32 %v13812_v22, %v11598_v20  ;;  %v11985_v0 = vor.u32 %v13908_v38, %v11982_v8  ;;  %v11221_v55 = vor.u32 %v13723_v4, %v11220_v61  ;;  %v11798_v22 = vld [vmem:[#allocation16 + $0x588] sm:$0xf0]  ;;  %v13957_v20 = vld [vmem:[#allocation16 + $0x85c] sm:$0xf] }
 0x700   :  { %7117 = vmatmul.bf16.vlgmr.msra.gmra.mxu1 %v16409_v51  ;;  %7131 = vmatmul.bf16.vlgmr.msrb.gmra.mxu2 %v16405_v7  ;;  %v11605_v44 = vor.u32 %v13819_v45, %v11604_v25  ;;  %v12132_v8 = vld [vmem:[#allocation16 + $0x7f8] sm:$0xf]  ;;  %v13951_v61 = vld [vmem:[#allocation16 + $0x824] sm:$0xf0]  ;;  %v13753_v45 = vld [vmem:[#allocation16 + $0x1fc] sm:$0xf] }
 0x702   :  { %7138 = vmatpush.bf16.msra.mxu3 %v11793_v39  ;;  %7152 = vmatpush.bf16.msrb.mxu0 %v12177_v49  ;;  %v11934_v39 = vld [vmem:[#allocation16 + $0x6a0] sm:$0xf0]  ;;  %v11172_v49 = vld [vmem:[#allocation16 + $0x78] sm:$0xf] }
 0x703   :  { %7166 = vmatpush.bf16.msrb.mxu1 %v11413_v33  ;;  %7180 = vmatpush.bf16.msra.mxu2 %v11797_v19  ;;  %v13807_v33 = vld [vmem:[#allocation16 + $0x3a4] sm:$0xf0]  ;;  %v13788_v19 = vld [vmem:[#allocation16 + $0x314] sm:$0xf]  ;;  %v11937_v54 = vor.u32 %v13896_v50, %v11934_v39  ;;  %v11173_v36 = vor.u32 %v13711_v13, %v11172_v49  ;;  %v12084_v39 = vld [vmem:[#allocation16 + $0x798] sm:$0xf] }
 0x704   :  { %v11505_v47 = vor.u32 %v13788_v19, %v11502_v10  ;;  %v13939_v49 = vld [vmem:[#allocation16 + $0x7c4] sm:$0xf0]  ;;  %v11318_v19 = vld [vmem:[#allocation16 + $0x1c8] sm:$0xf0]  ;;  %v13933_v10 = vld [vmem:[#allocation16 + $0x79c] sm:$0xf] }
 0x705   :  { %v12085_v16 = vor.u32 %v13939_v49, %v12084_v39  ;;  %v11510_v39 = vld [vmem:[#allocation16 + $0x348] sm:$0xf0]  ;;  %v13885_v49 = vld [vmem:[#allocation16 + $0x61c] sm:$0xf] }
 0x706   :  { %7139 = vmatpush.bf16.msra.mxu3 %v11745_v60  ;;  %7153 = vmatpush.bf16.msrb.mxu0 %v12129_v34  ;;  %v11557_v60 = vor.u32 %v13807_v33, %v11556_v31  ;;  %v11124_v34 = vld [vmem:[#allocation16 + $0x18] sm:$0xf]  ;;  %v13741_v33 = vld [vmem:[#allocation16 + $0x19c] sm:$0xf] }
 0x707   :  { %7167 = vmatpush.bf16.msrb.mxu1 %v11365_v53  ;;  %7181 = vmatpush.bf16.msra.mxu2 %v11749_v41  ;;  %v13795_v53 = vld [vmem:[#allocation16 + $0x344] sm:$0xf0]  ;;  %v12228_v41 = vld [vmem:[#allocation16 + $0x8b8] sm:$0xf]  ;;  %v11125_v11 = vor.u32 %v13699_v6, %v11124_v34 }
 0x708   :  { %v13927_v34 = vld [vmem:[#allocation16 + $0x764] sm:$0xf0] }
 0x70a   :  { %7140 = vmatpush.bf16.msra.mxu3 %v11697_v46  ;;  %7154 = vmatpush.bf16.msrb.mxu0 %v12081_v3  ;;  %v11846_v46 = vld [vmem:[#allocation16 + $0x5e8] sm:$0xf0]  ;;  %v13969_v3 = vld [vmem:[#allocation16 + $0x8bc] sm:$0xf] }
 0x70b   :  { %7168 = vmatpush.bf16.msrb.mxu1 %v11317_v12  ;;  %7182 = vmatpush.bf16.msra.mxu2 %v11701_v14  ;;  %v11509_v12 = vor.u32 %v13795_v53, %v11508_v23  ;;  %v12229_v14 = vor.u32 %v13975_v57, %v12228_v41  ;;  %v11849_v42 = vor.u32 %v13873_v37, %v11846_v46  ;;  %v13729_v53 = vld [vmem:[#allocation16 + $0x13c] sm:$0xf]  ;;  %v11270_v41 = vld [vmem:[#allocation16 + $0x168] sm:$0xf0]  ;;  %v11988_v46 = vld [vmem:[#allocation16 + $0x6d8] sm:$0xf] }
 0x70c   :  { %v12233_v58 = vor.u32 %v13969_v3, %v12230_v59  ;;  %v12089_v23 = vor.u32 %v13933_v10, %v12086_v27  ;;  %v13825_v57 = vld [vmem:[#allocation16 + $0x43c] sm:$0xf]  ;;  %v12038_v37 = vld [vmem:[#allocation16 + $0x768] sm:$0xf0]  ;;  %v13915_v3 = vld [vmem:[#allocation16 + $0x704] sm:$0xf0] }
 0x70d   :  { %v11657_v59 = vor.u32 %v13825_v57, %v11654_v18  ;;  %v13772_v57 = vld [vmem:[#allocation16 + $0x28c] sm:$0xf0] }
 0x70e   :  { %7141 = vmatpush.bf16.msra.mxu3 %v11649_v29  ;;  %7155 = vmatpush.bf16.msrb.mxu0 %v12033_v62  ;;  %v11414_v29 = vld [vmem:[#allocation16 + $0x288] sm:$0xf0]  ;;  %v13861_v62 = vld [vmem:[#allocation16 + $0x55c] sm:$0xf] }
 0x70f   :  { %7169 = vmatpush.bf16.msrb.mxu1 %v11269_v24  ;;  %7183 = vmatpush.bf16.msra.mxu2 %v11653_v28  ;;  %v12182_v24 = vld [vmem:[#allocation16 + $0x888] sm:$0xf0]  ;;  %v12181_v28 = vor.u32 %v13963_v32, %v12180_v35  ;;  %v11417_v38 = vor.u32 %v13765_v5, %v11414_v29  ;;  %v11801_v4 = vor.u32 %v13861_v62, %v11798_v22  ;;  %v13909_v32 = vld [vmem:[#allocation16 + $0x6dc] sm:$0xf]  ;;  %v11940_v29 = vld [vmem:[#allocation16 + $0x678] sm:$0xf] }
 0x710   :  { %v12185_v25 = vor.u32 %v13957_v20, %v12182_v24  ;;  %v11606_v35 = vld [vmem:[#allocation16 + $0x408] sm:$0xf0]  ;;  %v13903_v62 = vld [vmem:[#allocation16 + $0x6a4] sm:$0xf0]  ;;  %v13705_v24 = vld [vmem:[#allocation16 + $0x7c] sm:$0xf] }
 0x712   :  { %7142 = vmatpush.bf16.msra.mxu3 %v11601_v40  ;;  %7156 = vmatpush.bf16.msrb.mxu0 %v11985_v0  ;;  %v11366_v40 = vld [vmem:[#allocation16 + $0x228] sm:$0xf0]  ;;  %v13849_v0 = vld [vmem:[#allocation16 + $0x4fc] sm:$0xf] }
 0x713   :  { %7170 = vmatpush.bf16.msrb.mxu1 %v11221_v55  ;;  %7184 = vmatpush.bf16.msra.mxu2 %v11605_v44  ;;  %v12134_v55 = vld [vmem:[#allocation16 + $0x828] sm:$0xf0]  ;;  %v12133_v44 = vor.u32 %v13951_v61, %v12132_v8  ;;  %v11369_v50 = vor.u32 %v13753_v45, %v11366_v40  ;;  %v11753_v13 = vor.u32 %v13849_v0, %v11750_v9  ;;  %v13897_v61 = vld [vmem:[#allocation16 + $0x67c] sm:$0xf]  ;;  %v13891_v0 = vld [vmem:[#allocation16 + $0x644] sm:$0xf0] }
 0x714   :  { %v12137_v31 = vor.u32 %v13945_v1, %v12134_v55  ;;  %v11558_v8 = vld [vmem:[#allocation16 + $0x3a8] sm:$0xf0]  ;;  %v11941_v45 = vor.u32 %v13903_v62, %v11940_v29  ;;  %v13693_v9 = vld [vmem:[#allocation16 + $0x1c] sm:$0xf]  ;;  %v13952_v29 = vld [vmem:[#allocation16 + $0x82c] sm:$0xf0] }
 0x715   :  { %v11126_v1 = vld [vmem:[#allocation16 + $0x48] sm:$0xf0]  ;;  %v13754_v62 = vld [vmem:[#allocation16 + $0x204] sm:$0xf] }
 0x716   :  { %7143 = vmatpush.bf16.msra.mxu3 %v11553_v56  ;;  %7157 = vmatpush.bf16.msrb.mxu0 %v11937_v54  ;;  %v13837_v56 = vld [vmem:[#allocation16 + $0x49c] sm:$0xf]  ;;  %v11702_v54 = vld [vmem:[#allocation16 + $0x4c8] sm:$0xf0]  ;;  %v11129_v27 = vor.u32 %v13693_v9, %v11126_v1  ;;  %v11326_v9 = vld [vmem:[#allocation16 + $0x1d0] sm:$0xf0] }
 0x717   :  { %7171 = vmatpush.bf16.msrb.mxu1 %v11173_v36  ;;  %7185 = vmatpush.bf16.msra.mxu2 %v11557_v60  ;;  %v11321_v36 = vor.u32 %v13741_v33, %v11318_v19  ;;  %v12036_v60 = vld [vmem:[#allocation16 + $0x738] sm:$0xf]  ;;  %v11705_v6 = vor.u32 %v13837_v56, %v11702_v54  ;;  %v13784_v33 = vld [vmem:[#allocation16 + $0x2ec] sm:$0xf0]  ;;  %v11852_v19 = vld [vmem:[#allocation16 + $0x5c0] sm:$0xf] }
 0x718   :  { %v13880_v56 = vld [vmem:[#allocation16 + $0x5ec] sm:$0xf0]  ;;  %v12236_v54 = vld [vmem:[#allocation16 + $0x8c0] sm:$0xf] }
 0x71a   :  { %7144 = vmatpush.bf16.msra.mxu3 %v11505_v47  ;;  %7158 = vmatpush.bf16.msrb.mxu0 %v11889_v43  ;;  %v12037_v47 = vor.u32 %v13927_v34, %v12036_v60  ;;  %v11273_v43 = vor.u32 %v13729_v53, %v11270_v41  ;;  %v11470_v60 = vld [vmem:[#allocation16 + $0x2f0] sm:$0xf0]  ;;  %v11853_v53 = vor.u32 %v13880_v56, %v11852_v19  ;;  %v11420_v41 = vld [vmem:[#allocation16 + $0x260] sm:$0xf]  ;;  %v13928_v19 = vld [vmem:[#allocation16 + $0x76c] sm:$0xf0] }
 0x71b   :  { %7172 = vmatpush.bf16.msrb.mxu1 %v11125_v11  ;;  %7186 = vmatpush.bf16.msra.mxu2 %v11509_v12  ;;  %v12041_v11 = vor.u32 %v13921_v21, %v12038_v37  ;;  %v13717_v12 = vld [vmem:[#allocation16 + $0xdc] sm:$0xf]  ;;  %v11804_v37 = vld [vmem:[#allocation16 + $0x560] sm:$0xf]  ;;  %v13730_v56 = vld [vmem:[#allocation16 + $0x144] sm:$0xf] }
 0x71d   :  { %7145 = vmatmul.bf16.vlgmr.msra.gmra.mxu3 %v16407_v15  ;;  %7159 = vmatmul.bf16.vlgmr.msrb.gmra.mxu0 %v16409_v51 }
 0x71e   :  { %7193 = vmatpush.bf16.msrb.mxu3 %v12229_v14  ;;  %7207 = vmatpush.bf16.msra.mxu0 %v11465_v52  ;;  %v11222_v14 = vld [vmem:[#allocation16 + $0x108] sm:$0xf0]  ;;  %v13813_v52 = vld [vmem:[#allocation16 + $0x3dc] sm:$0xf] }
 0x71f   :  { %7221 = vmatpush.bf16.msra.mxu1 %v11849_v42  ;;  %7235 = vmatpush.bf16.msrb.mxu2 %v12233_v58  ;;  %v11990_v42 = vld [vmem:[#allocation16 + $0x708] sm:$0xf0]  ;;  %v11989_v58 = vor.u32 %v13915_v3, %v11988_v46  ;;  %v11225_v5 = vor.u32 %v13717_v12, %v11222_v14  ;;  %v11609_v22 = vor.u32 %v13813_v52, %v11606_v35  ;;  %v13964_v46 = vld [vmem:[#allocation16 + $0x88c] sm:$0xf0]  ;;  %v13766_v3 = vld [vmem:[#allocation16 + $0x264] sm:$0xf] }
 0x720   :  { %7173 = vmatmul.bf16.vlgmr.msrb.gmra.mxu1 %v16405_v7  ;;  %7187 = vmatmul.bf16.vlgmr.msra.gmra.mxu2 %v16407_v15  ;;  %v11993_v20 = vor.u32 %v13909_v32, %v11990_v42  ;;  %v11372_v14 = vld [vmem:[#allocation16 + $0x200] sm:$0xf]  ;;  %v13760_v52 = vld [vmem:[#allocation16 + $0x22c] sm:$0xf0] }
 0x721   :  { %v11756_v42 = vld [vmem:[#allocation16 + $0x500] sm:$0xf] }
 0x722   :  { %7194 = vmatpush.bf16.msrb.mxu3 %v12181_v28  ;;  %7208 = vmatpush.bf16.msra.mxu0 %v11417_v38  ;;  %v11174_v28 = vld [vmem:[#allocation16 + $0xa8] sm:$0xf0]  ;;  %v13801_v38 = vld [vmem:[#allocation16 + $0x37c] sm:$0xf] }
 0x723   :  { %7222 = vmatpush.bf16.msra.mxu1 %v11801_v4  ;;  %7236 = vmatpush.bf16.msrb.mxu2 %v12185_v25  ;;  %v11942_v4 = vld [vmem:[#allocation16 + $0x6a8] sm:$0xf0]  ;;  %v11892_v25 = vld [vmem:[#allocation16 + $0x618] sm:$0xf]  ;;  %v11177_v40 = vor.u32 %v13705_v24, %v11174_v28  ;;  %v11561_v55 = vor.u32 %v13801_v38, %v11558_v8  ;;  %v11324_v28 = vld [vmem:[#allocation16 + $0x1a0] sm:$0xf] }
 0x724   :  { %v11893_v10 = vor.u32 %v13891_v0, %v11892_v25  ;;  %v13748_v38 = vld [vmem:[#allocation16 + $0x1cc] sm:$0xf0]  ;;  %v13742_v0 = vld [vmem:[#allocation16 + $0x1a4] sm:$0xf] }
 0x725   :  { %v13844_v25 = vld [vmem:[#allocation16 + $0x4cc] sm:$0xf0]  ;;  %v11325_v1 = vor.u32 %v13748_v38, %v11324_v28  ;;  %v13694_v38 = vld [vmem:[#allocation16 + $0x24] sm:$0xf] }
 0x726   :  { %7195 = vmatpush.bf16.msrb.mxu3 %v12133_v44  ;;  %7209 = vmatpush.bf16.msra.mxu0 %v11369_v50  ;;  %v11945_v44 = vor.u32 %v13897_v61, %v11942_v4  ;;  %v13789_v50 = vld [vmem:[#allocation16 + $0x31c] sm:$0xf]  ;;  %v11708_v4 = vld [vmem:[#allocation16 + $0x4a0] sm:$0xf]  ;;  %v13892_v28 = vld [vmem:[#allocation16 + $0x64c] sm:$0xf0] }
 0x727   :  { %7223 = vmatpush.bf16.msra.mxu1 %v11753_v13  ;;  %7237 = vmatpush.bf16.msrb.mxu2 %v12137_v31  ;;  %v11894_v13 = vld [vmem:[#allocation16 + $0x648] sm:$0xf0]  ;;  %v11468_v31 = vld [vmem:[#allocation16 + $0x2c0] sm:$0xf]  ;;  %v11513_v34 = vor.u32 %v13789_v50, %v11510_v39  ;;  %v13736_v50 = vld [vmem:[#allocation16 + $0x16c] sm:$0xf0] }
 0x72a   :  { %7196 = vmatpush.bf16.msrb.mxu3 %v12085_v16  ;;  %7210 = vmatpush.bf16.msra.mxu0 %v11321_v36  ;;  %v13976_v16 = vld [vmem:[#allocation16 + $0x8ec] sm:$0xf0]  ;;  %v13778_v36 = vld [vmem:[#allocation16 + $0x2c4] sm:$0xf] }
 0x72b   :  { %7224 = vmatpush.bf16.msra.mxu1 %v11705_v6  ;;  %7238 = vmatpush.bf16.msrb.mxu2 %v12089_v23  ;;  %v11897_v6 = vor.u32 %v13885_v49, %v11894_v13  ;;  %v11469_v23 = vor.u32 %v13784_v33, %v11468_v31  ;;  %v12237_v18 = vor.u32 %v13976_v16, %v12236_v54  ;;  %v11660_v13 = vld [vmem:[#allocation16 + $0x440] sm:$0xf]  ;;  %v13832_v31 = vld [vmem:[#allocation16 + $0x46c] sm:$0xf0]  ;;  %v11278_v54 = vld [vmem:[#allocation16 + $0x170] sm:$0xf0] }
 0x72c   :  { %v11473_v21 = vor.u32 %v13778_v36, %v11470_v60  ;;  %v11329_v49 = vor.u32 %v13742_v0, %v11326_v9  ;;  %v12044_v33 = vld [vmem:[#allocation16 + $0x740] sm:$0xf]  ;;  %v13724_v36 = vld [vmem:[#allocation16 + $0x10c] sm:$0xf0] }
 0x72d   :  { %v11228_v16 = vld [vmem:[#allocation16 + $0xe0] sm:$0xf]  ;;  %v12045_v60 = vor.u32 %v13928_v19, %v12044_v33  ;;  %v11806_v33 = vld [vmem:[#allocation16 + $0x590] sm:$0xf0] }
 0x72e   :  { %7197 = vmatpush.bf16.msrb.mxu3 %v12037_v47  ;;  %7211 = vmatpush.bf16.msra.mxu0 %v11273_v43  ;;  %v13868_v47 = vld [vmem:[#allocation16 + $0x58c] sm:$0xf0]  ;;  %v12188_v43 = vld [vmem:[#allocation16 + $0x860] sm:$0xf] }
 0x72f   :  { %7225 = vmatpush.bf16.msra.mxu1 %v11657_v59  ;;  %7239 = vmatpush.bf16.msrb.mxu2 %v12041_v11  ;;  %v11422_v59 = vld [vmem:[#allocation16 + $0x290] sm:$0xf0]  ;;  %v11421_v11 = vor.u32 %v13772_v57, %v11420_v41  ;;  %v11805_v12 = vor.u32 %v13868_v47, %v11804_v37  ;;  %v12189_v35 = vor.u32 %v13964_v46, %v12188_v43  ;;  %v13916_v41 = vld [vmem:[#allocation16 + $0x70c] sm:$0xf0]  ;;  %v13718_v57 = vld [vmem:[#allocation16 + $0xe4] sm:$0xf] }
 0x730   :  { %v11425_v32 = vor.u32 %v13766_v3, %v11422_v59  ;;  %v11180_v47 = vld [vmem:[#allocation16 + $0x80] sm:$0xf]  ;;  %v13712_v43 = vld [vmem:[#allocation16 + $0xac] sm:$0xf0] }
 0x731   :  { %v11564_v59 = vld [vmem:[#allocation16 + $0x380] sm:$0xf] }
 0x732   :  { %7198 = vmatpush.bf16.msrb.mxu3 %v11989_v58  ;;  %7212 = vmatpush.bf16.msra.mxu0 %v11225_v5  ;;  %v13856_v58 = vld [vmem:[#allocation16 + $0x52c] sm:$0xf0]  ;;  %v12140_v5 = vld [vmem:[#allocation16 + $0x800] sm:$0xf] }
 0x733   :  { %7226 = vmatpush.bf16.msra.mxu1 %v11609_v22  ;;  %7240 = vmatpush.bf16.msrb.mxu2 %v11993_v20  ;;  %v11374_v22 = vld [vmem:[#allocation16 + $0x230] sm:$0xf0]  ;;  %v11373_v20 = vor.u32 %v13760_v52, %v11372_v14  ;;  %v11757_v24 = vor.u32 %v13856_v58, %v11756_v42  ;;  %v12141_v8 = vor.u32 %v13952_v29, %v12140_v5  ;;  %v13904_v14 = vld [vmem:[#allocation16 + $0x6ac] sm:$0xf0]  ;;  %v13706_v52 = vld [vmem:[#allocation16 + $0x84] sm:$0xf] }
 0x734   :  { %v11377_v61 = vor.u32 %v13754_v62, %v11374_v22  ;;  %v11181_v42 = vor.u32 %v13712_v43, %v11180_v47  ;;  %v13700_v5 = vld [vmem:[#allocation16 + $0x4c] sm:$0xf0]  ;;  %v11516_v29 = vld [vmem:[#allocation16 + $0x320] sm:$0xf]  ;;  %v13761_v47 = vld [vmem:[#allocation16 + $0x234] sm:$0xf0] }
 0x735   :  { %v13796_v62 = vld [vmem:[#allocation16 + $0x34c] sm:$0xf0]  ;;  %v11764_v43 = vld [vmem:[#allocation16 + $0x508] sm:$0xf] }
 0x736   :  { %7199 = vmatpush.bf16.msrb.mxu3 %v11941_v45  ;;  %7213 = vmatpush.bf16.msra.mxu0 %v11177_v40  ;;  %v12092_v45 = vld [vmem:[#allocation16 + $0x7a0] sm:$0xf]  ;;  %v13940_v40 = vld [vmem:[#allocation16 + $0x7cc] sm:$0xf0]  ;;  %v11517_v9 = vor.u32 %v13796_v62, %v11516_v29  ;;  %v13749_v29 = vld [vmem:[#allocation16 + $0x1d4] sm:$0xf0] }
 0x737   :  { %7227 = vmatpush.bf16.msra.mxu1 %v11561_v55  ;;  %7241 = vmatpush.bf16.msrb.mxu2 %v11945_v44  ;;  %v11709_v55 = vor.u32 %v13844_v25, %v11708_v4  ;;  %v11276_v44 = vld [vmem:[#allocation16 + $0x140] sm:$0xf]  ;;  %v12093_v39 = vor.u32 %v13940_v40, %v12092_v45  ;;  %v11854_v4 = vld [vmem:[#allocation16 + $0x5f0] sm:$0xf0]  ;;  %v13970_v25 = vld [vmem:[#allocation16 + $0x8c4] sm:$0xf] }
 0x738   :  { %v12238_v45 = vld [vmem:[#allocation16 + $0x8f0] sm:$0xf0]  ;;  %v11476_v40 = vld [vmem:[#allocation16 + $0x2c8] sm:$0xf] }
 0x739   :  { %v11716_v62 = vld [vmem:[#allocation16 + $0x4a8] sm:$0xf] }
 0x73a   :  { %7200 = vmatpush.bf16.msrb.mxu3 %v11893_v10  ;;  %7214 = vmatpush.bf16.msra.mxu0 %v11129_v27  ;;  %v11277_v10 = vor.u32 %v13736_v50, %v11276_v44  ;;  %v11661_v27 = vor.u32 %v13832_v31, %v11660_v13  ;;  %v13881_v44 = vld [vmem:[#allocation16 + $0x5f4] sm:$0xf0]  ;;  %v12241_v13 = vor.u32 %v13970_v25, %v12238_v45  ;;  %v13862_v31 = vld [vmem:[#allocation16 + $0x564] sm:$0xf]  ;;  %v12046_v45 = vld [vmem:[#allocation16 + $0x770] sm:$0xf0] }
 0x73b   :  { %7228 = vmatpush.bf16.msra.mxu1 %v11513_v34  ;;  %7242 = vmatpush.bf16.msrb.mxu2 %v11897_v6  ;;  %v11281_v34 = vor.u32 %v13730_v56, %v11278_v54  ;;  %v11612_v6 = vld [vmem:[#allocation16 + $0x3e0] sm:$0xf]  ;;  %v13958_v54 = vld [vmem:[#allocation16 + $0x864] sm:$0xf] }
 0x73c   :  { %v13922_v25 = vld [vmem:[#allocation16 + $0x744] sm:$0xf] }
 0x73d   :  { %7201 = vmatmul.bf16.vlgmr.msrb.gmra.mxu3 %v16409_v51  ;;  %7215 = vmatmul.bf16.vlgmr.msra.gmra.mxu0 %v16405_v7 }
 0x73e   :  { %7249 = vmatpush.bf16.msra.mxu3 %v11469_v23  ;;  %7263 = vmatpush.bf16.msrb.mxu0 %v11853_v53  ;;  %v13820_v23 = vld [vmem:[#allocation16 + $0x40c] sm:$0xf0]  ;;  %v11996_v53 = vld [vmem:[#allocation16 + $0x6e0] sm:$0xf] }
 0x73f   :  { %7277 = vmatpush.bf16.msrb.mxu1 %v12237_v18  ;;  %7291 = vmatpush.bf16.msra.mxu2 %v11473_v21  ;;  %v11230_v18 = vld [vmem:[#allocation16 + $0x110] sm:$0xf0]  ;;  %v11229_v21 = vor.u32 %v13724_v36, %v11228_v16  ;;  %v11613_v37 = vor.u32 %v13820_v23, %v11612_v6  ;;  %v11997_v46 = vor.u32 %v13916_v41, %v11996_v53  ;;  %v13773_v16 = vld [vmem:[#allocation16 + $0x294] sm:$0xf0]  ;;  %v11812_v36 = vld [vmem:[#allocation16 + $0x568] sm:$0xf] }
 0x740   :  { %7229 = vmatmul.bf16.vlgmr.msra.gmra.mxu1 %v16407_v15  ;;  %7243 = vmatmul.bf16.vlgmr.msrb.gmra.mxu2 %v16409_v51  ;;  %v11233_v3 = vor.u32 %v13718_v57, %v11230_v18  ;;  %v13850_v23 = vld [vmem:[#allocation16 + $0x504] sm:$0xf]  ;;  %v11758_v53 = vld [vmem:[#allocation16 + $0x530] sm:$0xf0] }
 0x741   :  { %v13946_v18 = vld [vmem:[#allocation16 + $0x804] sm:$0xf] }
 0x742   :  { %7250 = vmatpush.bf16.msra.mxu3 %v11421_v11  ;;  %7264 = vmatpush.bf16.msrb.mxu0 %v11805_v12  ;;  %v13808_v11 = vld [vmem:[#allocation16 + $0x3ac] sm:$0xf0]  ;;  %v11948_v12 = vld [vmem:[#allocation16 + $0x680] sm:$0xf] }
 0x743   :  { %7278 = vmatpush.bf16.msrb.mxu1 %v12189_v35  ;;  %7292 = vmatpush.bf16.msra.mxu2 %v11425_v32  ;;  %v11182_v35 = vld [vmem:[#allocation16 + $0xb0] sm:$0xf0]  ;;  %v11132_v32 = vld [vmem:[#allocation16 + $0x20] sm:$0xf]  ;;  %v11565_v58 = vor.u32 %v13808_v11, %v11564_v59  ;;  %v11949_v22 = vor.u32 %v13904_v14, %v11948_v12  ;;  %v11761_v59 = vor.u32 %v13850_v23, %v11758_v53  ;;  %v13838_v12 = vld [vmem:[#allocation16 + $0x4a4] sm:$0xf] }
 0x744   :  { %v11133_v0 = vor.u32 %v13700_v5, %v11132_v32  ;;  %v11710_v14 = vld [vmem:[#allocation16 + $0x4d0] sm:$0xf0]  ;;  %v13934_v32 = vld [vmem:[#allocation16 + $0x7a4] sm:$0xf]  ;;  %v16441_v5 = vpop.f32.mrf.mxu1 }
 0x745   :  { %v11566_v23 = vld [vmem:[#allocation16 + $0x3b0] sm:$0xf0] }
 0x746   :  { %7251 = vmatpush.bf16.msra.mxu3 %v11373_v20  ;;  %7265 = vmatpush.bf16.msrb.mxu0 %v11757_v24  ;;  %v11185_v20 = vor.u32 %v13706_v52, %v11182_v35  ;;  %v11900_v24 = vld [vmem:[#allocation16 + $0x620] sm:$0xf] }
 0x747   :  { %7279 = vmatpush.bf16.msrb.mxu1 %v12141_v8  ;;  %7293 = vmatpush.bf16.msra.mxu2 %v11377_v61  ;;  %v11134_v8 = vld [vmem:[#allocation16 + $0x50] sm:$0xf0]  ;;  %v13874_v61 = vld [vmem:[#allocation16 + $0x5c4] sm:$0xf]  ;;  %v11901_v50 = vor.u32 %v13892_v28, %v11900_v24 }
 0x748   :  { %v13826_v28 = vld [vmem:[#allocation16 + $0x444] sm:$0xf] }
 0x74a   :  { %7252 = vmatpush.bf16.msra.mxu3 %v11325_v1  ;;  %7266 = vmatpush.bf16.msrb.mxu0 %v11709_v55  ;;  %v13785_v1 = vld [vmem:[#allocation16 + $0x2f4] sm:$0xf0]  ;;  %v11860_v55 = vld [vmem:[#allocation16 + $0x5c8] sm:$0xf] }
 0x74b   :  { %7280 = vmatpush.bf16.msrb.mxu1 %v12093_v39  ;;  %7294 = vmatpush.bf16.msra.mxu2 %v11329_v49  ;;  %v11137_v39 = vor.u32 %v13694_v38, %v11134_v8  ;;  %v11857_v49 = vor.u32 %v13874_v61, %v11854_v4  ;;  %v11477_v19 = vor.u32 %v13785_v1, %v11476_v40  ;;  %v11662_v38 = vld [vmem:[#allocation16 + $0x470] sm:$0xf0]  ;;  %v16443_v8 = vpop.f32.mrf.mxu3  ;;  %v11284_v40 = vld [vmem:[#allocation16 + $0x148] sm:$0xf] }
 0x74c   :  { %v11861_v56 = vor.u32 %v13881_v44, %v11860_v55  ;;  %v11668_v1 = vld [vmem:[#allocation16 + $0x448] sm:$0xf]  ;;  %v13833_v55 = vld [vmem:[#allocation16 + $0x474] sm:$0xf0]  ;;  %v11665_v44 = vor.u32 %v13826_v28, %v11662_v38 }
 0x74d   :  { %v13977_v28 = vld [vmem:[#allocation16 + $0x8f4] sm:$0xf0] }
 0x74e   :  { %7253 = vmatpush.bf16.msra.mxu3 %v11277_v10  ;;  %7267 = vmatpush.bf16.msrb.mxu0 %v11661_v27  ;;  %v12190_v10 = vld [vmem:[#allocation16 + $0x890] sm:$0xf0]  ;;  %v11428_v27 = vld [vmem:[#allocation16 + $0x268] sm:$0xf] }
 0x74f   :  { %7281 = vmatpush.bf16.msrb.mxu1 %v12045_v60  ;;  %7295 = vmatpush.bf16.msra.mxu2 %v11281_v34  ;;  %v13869_v60 = vld [vmem:[#allocation16 + $0x594] sm:$0xf0]  ;;  %v11809_v34 = vor.u32 %v13862_v31, %v11806_v33  ;;  %v12193_v6 = vor.u32 %v13958_v54, %v12190_v10  ;;  %v11429_v41 = vor.u32 %v13773_v16, %v11428_v27  ;;  %v11236_v54 = vld [vmem:[#allocation16 + $0xe8] sm:$0xf] }
 0x750   :  { %v11813_v57 = vor.u32 %v13869_v60, %v11812_v36  ;;  %v11669_v33 = vor.u32 %v13833_v55, %v11668_v1  ;;  %v13725_v10 = vld [vmem:[#allocation16 + $0x114] sm:$0xf0]  ;;  %v11620_v27 = vld [vmem:[#allocation16 + $0x3e8] sm:$0xf]  ;;  %v16449_v36 = vpop.f32.mrf.mxu1  ;;  %v13971_v1 = vld [vmem:[#allocation16 + $0x8cc] sm:$0xf] }
 0x751   :  { %v13821_v16 = vld [vmem:[#allocation16 + $0x414] sm:$0xf0]  ;;  %v11237_v53 = vor.u32 %v13725_v10, %v11236_v54  ;;  %v12246_v55 = vld [vmem:[#allocation16 + $0x8f8] sm:$0xf0]  ;;  %v13767_v10 = vld [vmem:[#allocation16 + $0x26c] sm:$0xf] }
 0x752   :  { %7254 = vmatpush.bf16.msra.mxu3 %v11229_v21  ;;  %7268 = vmatpush.bf16.msrb.mxu0 %v11613_v37  ;;  %v12142_v21 = vld [vmem:[#allocation16 + $0x830] sm:$0xf0]  ;;  %v11380_v37 = vld [vmem:[#allocation16 + $0x208] sm:$0xf]  ;;  %v12249_v54 = vor.u32 %v13971_v1, %v12246_v55 }
 0x753   :  { %7282 = vmatpush.bf16.msrb.mxu1 %v11997_v46  ;;  %7296 = vmatpush.bf16.msra.mxu2 %v11233_v3  ;;  %v13857_v46 = vld [vmem:[#allocation16 + $0x534] sm:$0xf0]  ;;  %v16437_v3 = vpop.f32.mrf.mxu0  ;;  %v12145_v11 = vor.u32 %v13946_v18, %v12142_v21  ;;  %v11381_v52 = vor.u32 %v13761_v47, %v11380_v37  ;;  %v11950_v18 = vld [vmem:[#allocation16 + $0x6b0] sm:$0xf0]  ;;  %v11188_v21 = vld [vmem:[#allocation16 + $0x88] sm:$0xf] }
 0x754   :  { %v11765_v35 = vor.u32 %v13857_v46, %v11764_v43  ;;  %v13713_v37 = vld [vmem:[#allocation16 + $0xb4] sm:$0xf0]  ;;  %v11572_v47 = vld [vmem:[#allocation16 + $0x388] sm:$0xf]  ;;  %v16451_v46 = vpop.f32.mrf.mxu3 }
 0x755   :  { %v13809_v43 = vld [vmem:[#allocation16 + $0x3b4] sm:$0xf0]  ;;  %v12052_v55 = vld [vmem:[#allocation16 + $0x748] sm:$0xf] }
 0x756   :  { %7255 = vmatpush.bf16.msra.mxu3 %v11181_v42  ;;  %7269 = vmatpush.bf16.msrb.mxu0 %v11565_v58  ;;  %v12094_v42 = vld [vmem:[#allocation16 + $0x7d0] sm:$0xf0]  ;;  %v11332_v58 = vld [vmem:[#allocation16 + $0x1a8] sm:$0xf] }
 0x757   :  { %7283 = vmatpush.bf16.msrb.mxu1 %v11949_v22  ;;  %7297 = vmatpush.bf16.msra.mxu2 %v11185_v20  ;;  %v13845_v22 = vld [vmem:[#allocation16 + $0x4d4] sm:$0xf0]  ;;  %v11713_v20 = vor.u32 %v13838_v12, %v11710_v14  ;;  %v12097_v24 = vor.u32 %v13934_v32, %v12094_v42  ;;  %v11333_v61 = vor.u32 %v13749_v29, %v11332_v58  ;;  %v11902_v32 = vld [vmem:[#allocation16 + $0x650] sm:$0xf0]  ;;  %v11140_v29 = vld [vmem:[#allocation16 + $0x28] sm:$0xf] }
 0x758   :  { %v11717_v4 = vor.u32 %v13845_v22, %v11716_v62  ;;  %v11189_v42 = vor.u32 %v13713_v37, %v11188_v21  ;;  %v11573_v58 = vor.u32 %v13809_v43, %v11572_v47  ;;  %v13701_v62 = vld [vmem:[#allocation16 + $0x54] sm:$0xf0]  ;;  %v11524_v22 = vld [vmem:[#allocation16 + $0x328] sm:$0xf]  ;;  %v13755_v43 = vld [vmem:[#allocation16 + $0x20c] sm:$0xf] }
 0x759   :  { %v13953_v21 = vld [vmem:[#allocation16 + $0x834] sm:$0xf0] }
 0x75a   :  { %7256 = vmatpush.bf16.msra.mxu3 %v11133_v0  ;;  %7270 = vmatpush.bf16.msrb.mxu0 %v11517_v9  ;;  %v16445_v0 = vpop.f32.mrf.mxu2  ;;  %v13737_v9 = vld [vmem:[#allocation16 + $0x174] sm:$0xf0] }
 0x75b   :  { %7284 = vmatpush.bf16.msrb.mxu1 %v11901_v50  ;;  %7298 = vmatpush.bf16.msra.mxu2 %v11137_v39  ;;  %v12049_v50 = vor.u32 %v13922_v25, %v12046_v45  ;;  %v13814_v39 = vld [vmem:[#allocation16 + $0x3e4] sm:$0xf]  ;;  %v11285_v31 = vor.u32 %v13737_v9, %v11284_v40  ;;  %v13875_v25 = vld [vmem:[#allocation16 + $0x5cc] sm:$0xf]  ;;  %v11862_v9 = vld [vmem:[#allocation16 + $0x5f8] sm:$0xf0] }
 0x75d   :  { %7257 = vmatmul.bf16.vlgmr.msra.gmra.mxu3 %v16405_v7  ;;  %7271 = vmatmul.bf16.vlgmr.msrb.gmra.mxu0 %v16407_v15 }
 0x75e   :  { %7305 = vmatpush.bf16.msrb.mxu3 %v11857_v49  ;;  %7319 = vmatpush.bf16.msra.mxu0 %v12241_v13  ;;  %v11614_v49 = vld [vmem:[#allocation16 + $0x410] sm:$0xf0]  ;;  %v16447_v13 = vpop.f32.mrf.mxu0 }
 0x75f   :  { %7333 = vmatpush.bf16.msra.mxu1 %v11477_v19  ;;  %7347 = vmatpush.bf16.msrb.mxu2 %v11861_v56  ;;  %v13910_v19 = vld [vmem:[#allocation16 + $0x6e4] sm:$0xf]  ;;  %v11998_v56 = vld [vmem:[#allocation16 + $0x710] sm:$0xf0]  ;;  %v11617_v60 = vor.u32 %v13814_v39, %v11614_v49  ;;  %v16457_v39 = vpop.f32.mrf.mxu1 }
 0x760   :  { %7285 = vmatmul.bf16.vlgmr.msrb.gmra.mxu1 %v16409_v51  ;;  %7299 = vmatmul.bf16.vlgmr.msra.gmra.mxu2 %v16405_v7 }
 0x762   :  { %7306 = vmatpush.bf16.msrb.mxu3 %v11809_v34  ;;  %7320 = vmatpush.bf16.msra.mxu0 %v12193_v6  ;;  %v12001_v34 = vor.u32 %v13910_v19, %v11998_v56  ;;  %v13802_v6 = vld [vmem:[#allocation16 + $0x384] sm:$0xf]  ;;  %v13965_v19 = vld [vmem:[#allocation16 + $0x894] sm:$0xf0]  ;;  %v11865_v56 = vor.u32 %v13875_v25, %v11862_v9  ;;  %v11718_v25 = vld [vmem:[#allocation16 + $0x4d8] sm:$0xf0] }
 0x763   :  { %7334 = vmatpush.bf16.msra.mxu1 %v11429_v41  ;;  %7348 = vmatpush.bf16.msrb.mxu2 %v11813_v57  ;;  %v11621_v41 = vor.u32 %v13821_v16, %v11620_v27  ;;  %v13898_v57 = vld [vmem:[#allocation16 + $0x684] sm:$0xf]  ;;  %v11569_v12 = vor.u32 %v13802_v6, %v11566_v23  ;;  %v11430_v27 = vld [vmem:[#allocation16 + $0x298] sm:$0xf0]  ;;  %v13863_v16 = vld [vmem:[#allocation16 + $0x56c] sm:$0xf]  ;;  %v16459_v23 = vpop.f32.mrf.mxu3 }
 0x764   :  { %v11953_v14 = vor.u32 %v13898_v57, %v11950_v18  ;;  %v12198_v6 = vld [vmem:[#allocation16 + $0x898] sm:$0xf0]  ;;  %v11433_v57 = vor.u32 %v13767_v10, %v11430_v27  ;;  %v12148_v18 = vld [vmem:[#allocation16 + $0x808] sm:$0xf]  ;;  %v13923_v27 = vld [vmem:[#allocation16 + $0x74c] sm:$0xf] }
 0x765   :  { %v11670_v10 = vld [vmem:[#allocation16 + $0x478] sm:$0xf0] }
 0x766   :  { %7307 = vmatpush.bf16.msrb.mxu3 %v11761_v59  ;;  %7321 = vmatpush.bf16.msra.mxu0 %v12145_v11  ;;  %v13790_v59 = vld [vmem:[#allocation16 + $0x324] sm:$0xf]  ;;  %v16453_v11 = vpop.f32.mrf.mxu2  ;;  %v16455_v38 = vpop.f32.mrf.mxu0 }
 0x767   :  { %7335 = vmatpush.bf16.msra.mxu1 %v11381_v52  ;;  %7349 = vmatpush.bf16.msrb.mxu2 %v11765_v35  ;;  %v11518_v52 = vld [vmem:[#allocation16 + $0x350] sm:$0xf0]  ;;  %v13886_v35 = vld [vmem:[#allocation16 + $0x624] sm:$0xf] }
 0x768   :  { %v11521_v45 = vor.u32 %v13790_v59, %v11518_v52  ;;  %v11905_v40 = vor.u32 %v13886_v35, %v11902_v32  ;;  %v11382_v59 = vld [vmem:[#allocation16 + $0x238] sm:$0xf0]  ;;  %v13947_v52 = vld [vmem:[#allocation16 + $0x80c] sm:$0xf] }
 0x769   :  { %v12150_v35 = vld [vmem:[#allocation16 + $0x838] sm:$0xf0] }
 0x76a   :  { %7308 = vmatpush.bf16.msrb.mxu3 %v11713_v20  ;;  %7322 = vmatpush.bf16.msra.mxu0 %v12097_v24  ;;  %v13797_v20 = vld [vmem:[#allocation16 + $0x354] sm:$0xf0]  ;;  %v12244_v24 = vld [vmem:[#allocation16 + $0x8c8] sm:$0xf] }
 0x76b   :  { %7336 = vmatpush.bf16.msra.mxu1 %v11333_v61  ;;  %7350 = vmatpush.bf16.msrb.mxu2 %v11717_v4  ;;  %v13779_v61 = vld [vmem:[#allocation16 + $0x2cc] sm:$0xf]  ;;  %v11478_v4 = vld [vmem:[#allocation16 + $0x2f8] sm:$0xf0]  ;;  %v12245_v49 = vor.u32 %v13977_v28, %v12244_v24 }
 0x76c   :  { %v13743_v24 = vld [vmem:[#allocation16 + $0x1ac] sm:$0xf]  ;;  %v11334_v28 = vld [vmem:[#allocation16 + $0x1d8] sm:$0xf0] }
 0x76d   :  { %v11337_v1 = vor.u32 %v13743_v24, %v11334_v28  ;;  %v11190_v24 = vld [vmem:[#allocation16 + $0xb8] sm:$0xf0]  ;;  %v13803_v28 = vld [vmem:[#allocation16 + $0x38c] sm:$0xf] }
 0x76e   :  { %7309 = vmatpush.bf16.msrb.mxu3 %v11665_v44  ;;  %7323 = vmatpush.bf16.msra.mxu0 %v12049_v50  ;;  %v11141_v44 = vor.u32 %v13701_v62, %v11140_v29  ;;  %v11525_v50 = vor.u32 %v13797_v20, %v11524_v22  ;;  %v16465_v32 = vpop.f32.mrf.mxu0  ;;  %v12100_v29 = vld [vmem:[#allocation16 + $0x7a8] sm:$0xf]  ;;  %v13941_v62 = vld [vmem:[#allocation16 + $0x7d4] sm:$0xf0]  ;;  %v12153_v20 = vor.u32 %v13947_v52, %v12150_v35 }
 0x76f   :  { %7337 = vmatpush.bf16.msra.mxu1 %v11285_v31  ;;  %7351 = vmatpush.bf16.msrb.mxu2 %v11669_v33  ;;  %v11481_v31 = vor.u32 %v13779_v61, %v11478_v4  ;;  %v12196_v33 = vld [vmem:[#allocation16 + $0x868] sm:$0xf]  ;;  %v13839_v61 = vld [vmem:[#allocation16 + $0x4ac] sm:$0xf]  ;;  %v16469_v4 = vpop.f32.mrf.mxu1  ;;  %v12101_v9 = vor.u32 %v13941_v62, %v12100_v29  ;;  %v13905_v29 = vld [vmem:[#allocation16 + $0x6b4] sm:$0xf0] }
 0x772   :  { %7310 = vmatpush.bf16.msrb.mxu3 %v11617_v60  ;;  %7324 = vmatpush.bf16.msra.mxu0 %v12001_v34  ;;  %v11814_v60 = vld [vmem:[#allocation16 + $0x598] sm:$0xf0]  ;;  %v13959_v34 = vld [vmem:[#allocation16 + $0x86c] sm:$0xf] }
 0x773   :  { %7338 = vmatpush.bf16.msra.mxu1 %v11237_v53  ;;  %7352 = vmatpush.bf16.msrb.mxu2 %v11621_v41  ;;  %v16461_v53 = vpop.f32.mrf.mxu2  ;;  %v12197_v41 = vor.u32 %v13965_v19, %v12196_v33  ;;  %v11817_v37 = vor.u32 %v13863_v16, %v11814_v60  ;;  %v12201_v47 = vor.u32 %v13959_v34, %v12198_v6  ;;  %v13731_v33 = vld [vmem:[#allocation16 + $0x14c] sm:$0xf]  ;;  %v11286_v19 = vld [vmem:[#allocation16 + $0x178] sm:$0xf0]  ;;  %v12004_v6 = vld [vmem:[#allocation16 + $0x6e8] sm:$0xf] }
 0x774   :  { %v12054_v16 = vld [vmem:[#allocation16 + $0x778] sm:$0xf0]  ;;  %v11289_v34 = vor.u32 %v13731_v33, %v11286_v19 }
 0x775   :  { %v11142_v33 = vld [vmem:[#allocation16 + $0x58] sm:$0xf0] }
 0x776   :  { %7311 = vmatpush.bf16.msrb.mxu3 %v11569_v12  ;;  %7325 = vmatpush.bf16.msra.mxu0 %v11953_v14  ;;  %v13851_v12 = vld [vmem:[#allocation16 + $0x50c] sm:$0xf]  ;;  %v11766_v14 = vld [vmem:[#allocation16 + $0x538] sm:$0xf0] }
 0x777   :  { %7339 = vmatpush.bf16.msra.mxu1 %v11189_v42  ;;  %7353 = vmatpush.bf16.msrb.mxu2 %v11573_v58  ;;  %v12149_v42 = vor.u32 %v13953_v21, %v12148_v18  ;;  %v11385_v58 = vor.u32 %v13755_v43, %v11382_v59  ;;  %v11769_v22 = vor.u32 %v13851_v12, %v11766_v14  ;;  %v13815_v43 = vld [vmem:[#allocation16 + $0x3ec] sm:$0xf]  ;;  %v11622_v59 = vld [vmem:[#allocation16 + $0x418] sm:$0xf0]  ;;  %v16477_v52 = vpop.f32.mrf.mxu1 }
 0x778   :  { %v12057_v21 = vor.u32 %v13923_v27, %v12054_v16  ;;  %v13911_v12 = vld [vmem:[#allocation16 + $0x6ec] sm:$0xf]  ;;  %v12006_v14 = vld [vmem:[#allocation16 + $0x718] sm:$0xf0]  ;;  %v11625_v62 = vor.u32 %v13815_v43, %v11622_v59  ;;  %v14048_v59 = vld [vmem:[#allocation19 + $0x230] sm:$0xf0] }
 0x779   :  { %v11526_v27 = vld [vmem:[#allocation16 + $0x358] sm:$0xf0]  ;;  %v13887_v16 = vld [vmem:[#allocation16 + $0x62c] sm:$0xf] }
 0x77a   :  { %7312 = vmatpush.bf16.msrb.mxu3 %v11521_v45  ;;  %7326 = vmatpush.bf16.msra.mxu0 %v11905_v40  ;;  %v13935_v45 = vld [vmem:[#allocation16 + $0x7ac] sm:$0xf]  ;;  %v12102_v40 = vld [vmem:[#allocation16 + $0x7d8] sm:$0xf0] }
 0x77b   :  { %7340 = vmatpush.bf16.msra.mxu1 %v11141_v44  ;;  %7354 = vmatpush.bf16.msrb.mxu2 %v11525_v50  ;;  %v13929_v44 = vld [vmem:[#allocation16 + $0x774] sm:$0xf0]  ;;  %v16471_v50 = vpop.f32.mrf.mxu3 }
 0x77c   :  { %v12053_v60 = vor.u32 %v13929_v44, %v12052_v55 }
 0x77d   :  { %7313 = vmatmul.bf16.vlgmr.msrb.gmra.mxu3 %v16407_v15  ;;  %7327 = vmatmul.bf16.vlgmr.msra.gmra.mxu0 %v16409_v51 }
 0x77e   :  { %7361 = vmatpush.bf16.msra.mxu3 %v12245_v49  ;;  %7375 = vmatpush.bf16.msrb.mxu0 %v11481_v31  ;;  %v11721_v49 = vor.u32 %v13839_v61, %v11718_v25  ;;  %v12105_v31 = vor.u32 %v13935_v45, %v12102_v40  ;;  %v11574_v61 = vld [vmem:[#allocation16 + $0x3b8] sm:$0xf0]  ;;  %v13899_v25 = vld [vmem:[#allocation16 + $0x68c] sm:$0xf] }
 0x77f   :  { %7389 = vmatpush.bf16.msrb.mxu1 %v11865_v56  ;;  %7403 = vmatpush.bf16.msra.mxu2 %v12249_v54  ;;  %v13827_v56 = vld [vmem:[#allocation16 + $0x44c] sm:$0xf]  ;;  %v16473_v54 = vpop.f32.mrf.mxu2  ;;  %v11958_v45 = vld [vmem:[#allocation16 + $0x6b8] sm:$0xf0]  ;;  %v11577_v19 = vor.u32 %v13803_v28, %v11574_v61 }
 0x780   :  { %7341 = vmatmul.bf16.vlgmr.msra.gmra.mxu1 %v16405_v7  ;;  %7355 = vmatmul.bf16.vlgmr.msrb.gmra.mxu2 %v16407_v15  ;;  %v11673_v18 = vor.u32 %v13827_v56, %v11670_v10  ;;  %v11961_v56 = vor.u32 %v13899_v25, %v11958_v45  ;;  %v13791_v10 = vld [vmem:[#allocation16 + $0x32c] sm:$0xf]  ;;  %v12420_v25 = vld [vmem:[#allocation19 + $0x150] sm:$0xf]  ;;  %v14021_v45 = vld [vmem:[#allocation19 + $0x158] sm:$0xf0] }
 0x782   :  { %7362 = vmatpush.bf16.msra.mxu3 %v12197_v41  ;;  %7376 = vmatpush.bf16.msrb.mxu0 %v11433_v57  ;;  %v13917_v41 = vld [vmem:[#allocation16 + $0x714] sm:$0xf0]  ;;  %v16475_v57 = vpop.f32.mrf.mxu0 }
 0x783   :  { %7390 = vmatpush.bf16.msrb.mxu1 %v11817_v37  ;;  %7404 = vmatpush.bf16.msra.mxu2 %v12201_v47  ;;  %v13719_v37 = vld [vmem:[#allocation16 + $0xec] sm:$0xf]  ;;  %v11238_v47 = vld [vmem:[#allocation16 + $0x118] sm:$0xf0]  ;;  %v12005_v35 = vor.u32 %v13917_v41, %v12004_v6  ;;  %v16479_v40 = vpop.f32.mrf.mxu3  ;;  %v14000_v6 = vld [vmem:[#allocation19 + $0xb0] sm:$0xf0] }
 0x786   :  { %7363 = vmatpush.bf16.msra.mxu3 %v12149_v42  ;;  %7377 = vmatpush.bf16.msrb.mxu0 %v11385_v58  ;;  %v11241_v42 = vor.u32 %v13719_v37, %v11238_v47  ;;  %v11956_v58 = vld [vmem:[#allocation16 + $0x688] sm:$0xf]  ;;  %v12528_v37 = vld [vmem:[#allocation19 + $0x228] sm:$0xf] }
 0x787   :  { %7391 = vmatpush.bf16.msrb.mxu1 %v11769_v22  ;;  %7405 = vmatpush.bf16.msra.mxu2 %v12153_v20  ;;  %v12009_v22 = vor.u32 %v13911_v12, %v12006_v14  ;;  %v13707_v20 = vld [vmem:[#allocation16 + $0x8c] sm:$0xf]  ;;  %v11957_v55 = vor.u32 %v13905_v29, %v11956_v58  ;;  %v12624_v12 = vld [vmem:[#allocation19 + $0x2e8] sm:$0xf]  ;;  %v14072_v14 = vld [vmem:[#allocation19 + $0x2f0] sm:$0xf0]  ;;  %v16487_v29 = vpop.f32.mrf.mxu1  ;;  %v12529_v28 = vor.u32 %v14048_v59, %v12528_v37 }
 0x788   :  { %v11193_v44 = vor.u32 %v13707_v20, %v11190_v24  ;;  %v16485_v58 = vld [vmem:[#allocation17] sm:$0xff]  ;;  %v12324_v20 = vld [vmem:[#allocation19 + $0x90] sm:$0xf]  ;;  %v13997_v24 = vld [vmem:[#allocation19 + $0x98] sm:$0xf0]  ;;  %v12625_v61 = vor.u32 %v14072_v14, %v12624_v12 }
 0x789   :  { %v12504_v37 = vld [vmem:[#allocation19 + $0x1f8] sm:$0xf]  ;;  %v14066_v59 = vld [vmem:[#allocation19 + $0x2c0] sm:$0xf0]  ;;  %v5450_v14 = vperm.slane %v16485_v58, 1 }
 0x78a   :  { %7364 = vmatpush.bf16.msra.mxu3 %v12101_v9  ;;  %7378 = vmatpush.bf16.msrb.mxu0 %v11337_v1  ;;  %v11908_v9 = vld [vmem:[#allocation16 + $0x628] sm:$0xf]  ;;  %v16481_v1 = vpop.f32.mrf.mxu2  ;;  %v16483_v41 = vpop.f32.mrf.mxu0 }
 0x78b   :  { %7392 = vmatpush.bf16.msrb.mxu1 %v11721_v49  ;;  %7406 = vmatpush.bf16.msra.mxu2 %v12105_v31  ;;  %v13893_v49 = vld [vmem:[#allocation16 + $0x654] sm:$0xf0]  ;;  %v13695_v31 = vld [vmem:[#allocation16 + $0x2c] sm:$0xf] }
 0x78c   :  { %v11909_v47 = vor.u32 %v13893_v49, %v11908_v9  ;;  %v11145_v43 = vor.u32 %v13695_v31, %v11142_v33  ;;  %v12516_v9 = vld [vmem:[#allocation19 + $0x210] sm:$0xf]  ;;  %v14069_v49 = vld [vmem:[#allocation19 + $0x2d8] sm:$0xf0]  ;;  %v5449_v31 = vperm.slane %v16485_v58, 0  ;;  %v16490_v33 = vpop.f32.mrf.mxu3 }
 0x78e   :  { %7365 = vmatpush.bf16.msra.mxu3 %v12053_v60  ;;  %7379 = vmatpush.bf16.msrb.mxu0 %v11289_v34  ;;  %v11910_v60 = vld [vmem:[#allocation16 + $0x658] sm:$0xf0]  ;;  %v12336_v34 = vld [vmem:[#allocation19 + $0xa8] sm:$0xf]  ;;  %v6923_v12 = vadd.f32 %v16443_v8, %v5449_v31 }
 0x78f   :  { %7393 = vmatpush.bf16.msrb.mxu1 %v11673_v18  ;;  %7407 = vmatpush.bf16.msra.mxu2 %v12057_v21  ;;  %v12432_v18 = vld [vmem:[#allocation19 + $0x168] sm:$0xf]  ;;  %v14024_v21 = vld [vmem:[#allocation19 + $0x170] sm:$0xf0] }
 0x792   :  { %7366 = vmatpush.bf16.msra.mxu3 %v12005_v35  ;;  %7380 = vmatpush.bf16.msrb.mxu0 %v11241_v42  ;;  %v11529_v35 = vor.u32 %v13791_v10, %v11526_v27  ;;  %v11913_v42 = vor.u32 %v13887_v16, %v11910_v60  ;;  %v12421_v10 = vor.u32 %v14021_v45, %v12420_v25  ;;  %v12312_v27 = vld [vmem:[#allocation19 + $0x78] sm:$0xf]  ;;  %v13994_v16 = vld [vmem:[#allocation19 + $0x80] sm:$0xf0]  ;;  %v16494_v60 = vpop.f32.mrf.mxu0  ;;  %v12492_v25 = vld [vmem:[#allocation19 + $0x1e0] sm:$0xf] }
 0x793   :  { %7394 = vmatpush.bf16.msrb.mxu1 %v11625_v62  ;;  %7408 = vmatpush.bf16.msra.mxu2 %v12009_v22  ;;  %v12337_v62 = vor.u32 %v14000_v6, %v12336_v34  ;;  %v12433_v22 = vor.u32 %v14024_v21, %v12432_v18  ;;  %v12408_v18 = vld [vmem:[#allocation19 + $0x138] sm:$0xf]  ;;  %v14018_v21 = vld [vmem:[#allocation19 + $0x140] sm:$0xf0]  ;;  %v12588_v45 = vld [vmem:[#allocation19 + $0x2a0] sm:$0xf] }
 0x796   :  { %7367 = vmatpush.bf16.msra.mxu3 %v11957_v55  ;;  %7381 = vmatpush.bf16.msrb.mxu0 %v11193_v44  ;;  %v14045_v55 = vld [vmem:[#allocation19 + $0x218] sm:$0xf0]  ;;  %v12612_v44 = vld [vmem:[#allocation19 + $0x2d0] sm:$0xf] }
 0x797   :  { %7395 = vmatpush.bf16.msrb.mxu1 %v11577_v19  ;;  %7409 = vmatpush.bf16.msra.mxu2 %v11961_v56  ;;  %v16492_v19 = vpop.f32.mrf.mxu2  ;;  %v12325_v56 = vor.u32 %v13997_v24, %v12324_v20  ;;  %v12517_v34 = vor.u32 %v14045_v55, %v12516_v9  ;;  %v12613_v6 = vor.u32 %v14069_v49, %v12612_v44  ;;  %v13991_v20 = vld [vmem:[#allocation19 + $0x68] sm:$0xf0]  ;;  %v16507_v55 = vpop.f32.mrf.mxu3 }
 0x798   :  { %v6965_v9 = vadd.f32 %v16445_v0, %v5450_v14  ;;  %v14012_v0 = vld [vmem:[#allocation19 + $0x110] sm:$0xf0] }
 0x79a   :  { %7368 = vmatpush.bf16.msra.mxu3 %v11909_v47  ;;  %7382 = vmatpush.bf16.msrb.mxu0 %v11145_v43  ;;  %v14042_v47 = vld [vmem:[#allocation19 + $0x200] sm:$0xf0]  ;;  %v12600_v43 = vld [vmem:[#allocation19 + $0x2b8] sm:$0xf] }
 0x79b   :  { %7396 = vmatpush.bf16.msrb.mxu1 %v11529_v35  ;;  %7410 = vmatpush.bf16.msra.mxu2 %v11913_v42  ;;  %v6925_v35 = vadd.f32 %v16451_v46, %v5449_v31  ;;  %v16503_v42 = vpop.f32.mrf.mxu1  ;;  %v12505_v24 = vor.u32 %v14042_v47, %v12504_v37  ;;  %v12601_v8 = vor.u32 %v14066_v59, %v12600_v43  ;;  %v12576_v37 = vld [vmem:[#allocation19 + $0x288] sm:$0xf]  ;;  %v5451_v43 = vperm.slane %v16485_v58, 2 }
 0x79c   :  { %v6937_v46 = vadd.f32 %v16437_v3, %v6923_v12  ;;  %v6979_v59 = vadd.f32 %v16459_v23, %v6965_v9  ;;  %v12372_v23 = vld [vmem:[#allocation19 + $0xf0] sm:$0xf] }
 0x79d   :  { %7369 = vmatmul.bf16.vlgmr.msra.gmra.mxu3 %v16409_v51  ;;  %7383 = vmatmul.bf16.vlgmr.msrb.gmra.mxu0 %v16405_v7  ;;  %v12300_v7 = vld [vmem:[#allocation19 + $0x60] sm:$0xf]  ;;  %v6939_v44 = vadd.f32 %v16447_v13, %v6925_v35  ;;  %v14060_v13 = vld [vmem:[#allocation19 + $0x290] sm:$0xf0]  ;;  %v5452_v35 = vperm.slane %v16485_v58, 3 }
 0x79e   :  { %9381 = vmatpush.bf16.msrb.mxu3 %v12337_v62  ;;  %9395 = vmatpush.bf16.msra.mxu0 %v12433_v22  ;;  %v12313_v62 = vor.u32 %v13994_v16, %v12312_v27  ;;  %v12409_v22 = vor.u32 %v14018_v21, %v12408_v18  ;;  %v12301_v31 = vor.u32 %v13991_v20, %v12300_v7  ;;  %v13988_v27 = vld [vmem:[#allocation19 + $0x50] sm:$0xf0]  ;;  %v12480_v18 = vld [vmem:[#allocation19 + $0x1c8] sm:$0xf]  ;;  %v12276_v7 = vld [vmem:[#allocation19 + $0x30] sm:$0xf] }
 0x79f   :  { %9409 = vmatpush.bf16.msra.mxu1 %v12529_v28  ;;  %9423 = vmatpush.bf16.msrb.mxu2 %v12625_v61  ;;  %v12396_v28 = vld [vmem:[#allocation19 + $0x120] sm:$0xf]  ;;  %v14015_v61 = vld [vmem:[#allocation19 + $0x128] sm:$0xf0]  ;;  %v16510_v49 = vpop.f32.mrf.mxu2  ;;  %v6967_v16 = vadd.f32 %v16453_v11, %v5450_v14  ;;  %v14036_v21 = vld [vmem:[#allocation19 + $0x1d0] sm:$0xf0]  ;;  %v16514_v47 = vadd.f32 %v16441_v5, %v6937_v46  ;;  %v16519_v11 = vpop.f32.mrf.mxu0  ;;  %v16522_v14 = vadd.f32 %v16449_v36, %v6939_v44 }
 0x7a0   :  { %7397 = vmatmul.bf16.vlgmr.msrb.gmra.mxu1 %v16407_v15  ;;  %7411 = vmatmul.bf16.vlgmr.msra.gmra.mxu2 %v16409_v51  ;;  %v14039_v15 = vld [vmem:[#allocation19 + $0x1e8] sm:$0xf0]  ;;  %v13985_v5 = vld [vmem:[#allocation19 + $0x38] sm:$0xf0]  ;;  %v12481_v20 = vor.u32 %v14036_v21, %v12480_v18  ;;  %v12564_v36 = vld [vmem:[#allocation19 + $0x270] sm:$0xf]  ;;  %v7051_v44 = vadd.f32 %v16483_v41, %v5452_v35 }
 0x7a1   :  { %v14063_v51 = vld [vmem:[#allocation19 + $0x2a8] sm:$0xf0]  ;;  %v6981_v12 = vadd.f32 %v16471_v50, %v6967_v16  ;;  %v12468_v50 = vld [vmem:[#allocation19 + $0x1b0] sm:$0xf]  ;;  %v7429_v9 = vmax.f32 %v16522_v14, 0.0  ;;  %v7009_v16 = vadd.f32 %v16469_v4, %v5451_v43 }
 0x7a2   :  { %9382 = vmatpush.bf16.msrb.mxu3 %v12325_v56  ;;  %9396 = vmatpush.bf16.msra.mxu0 %v12421_v10  ;;  %v12397_v56 = vor.u32 %v14015_v61, %v12396_v28  ;;  %v12288_v10 = vld [vmem:[#allocation19 + $0x48] sm:$0xf]  ;;  %v12589_v3 = vor.u32 %v14063_v51, %v12588_v45  ;;  %v14033_v61 = vld [vmem:[#allocation19 + $0x1b8] sm:$0xf0]  ;;  %v7007_v45 = vadd.f32 %v16457_v39, %v5451_v43  ;;  %v14030_v18 = vld [vmem:[#allocation19 + $0x1a0] sm:$0xf0] }
 0x7a3   :  { %9410 = vmatpush.bf16.msra.mxu1 %v12517_v34  ;;  %9424 = vmatpush.bf16.msrb.mxu2 %v12613_v6  ;;  %v12493_v34 = vor.u32 %v14039_v15, %v12492_v25  ;;  %v12384_v6 = vld [vmem:[#allocation19 + $0x108] sm:$0xf]  ;;  %v16525_v28 = vpop.f32.mrf.mxu1  ;;  %v14057_v25 = vld [vmem:[#allocation19 + $0x278] sm:$0xf0]  ;;  %v7417_v15 = vmax.f32 %v16514_v47, 0.0  ;;  %v16530_v51 = vadd.f32 %v16455_v38, %v6979_v59  ;;  %v16533_v46 = vadd.f32 %v16465_v32, %v6981_v12 }
 0x7a4   :  { %v12469_v38 = vor.u32 %v14033_v61, %v12468_v50  ;;  %v12565_v39 = vor.u32 %v14057_v25, %v12564_v36  ;;  %v12360_v32 = vld [vmem:[#allocation19 + $0xd8] sm:$0xf]  ;;  %v7021_v4 = vadd.f32 %v16461_v53, %v7007_v45  ;;  %v7023_v59 = vadd.f32 %v16473_v54, %v7009_v16  ;;  %v14027_v54 = vld [vmem:[#allocation19 + $0x188] sm:$0xf0]  ;;  %v12540_v50 = vld [vmem:[#allocation19 + $0x240] sm:$0xf] }
 0x7a5   :  { %v12552_v21 = vld [vmem:[#allocation19 + $0x258] sm:$0xf]  ;;  %v7430_v43 = vmax.f32 %v16533_v46, 0.0  ;;  %v14051_v45 = vld [vmem:[#allocation19 + $0x248] sm:$0xf0] }
 0x7a6   :  { %9383 = vmatpush.bf16.msrb.mxu3 %v12313_v62  ;;  %9397 = vmatpush.bf16.msra.mxu0 %v12409_v22  ;;  %v12289_v62 = vor.u32 %v13988_v27, %v12288_v10  ;;  %v12385_v22 = vor.u32 %v14012_v0, %v12384_v6  ;;  %v12264_v10 = vld [vmem:[#allocation19 + $0x18] sm:$0xf]  ;;  %v13982_v27 = vld [vmem:[#allocation19 + $0x20] sm:$0xf0]  ;;  %v7049_v0 = vadd.f32 %v16475_v57, %v5452_v35 }
 0x7a7   :  { %9411 = vmatpush.bf16.msra.mxu1 %v12505_v24  ;;  %9425 = vmatpush.bf16.msrb.mxu2 %v12601_v8  ;;  %v12577_v24 = vor.u32 %v14060_v13, %v12576_v37  ;;  %v14009_v8 = vld [vmem:[#allocation19 + $0xf8] sm:$0xf0]  ;;  %v12456_v6 = vld [vmem:[#allocation19 + $0x198] sm:$0xf]  ;;  %v16541_v41 = vpop.f32.mrf.mxu2  ;;  %v14054_v37 = vld [vmem:[#allocation19 + $0x260] sm:$0xf0]  ;;  %v16547_v12 = vpop.f32.mrf.mxu0  ;;  %v12265_v57 = vor.u32 %v13982_v27, %v12264_v10 }
 0x7a8   :  { %v7418_v13 = vmax.f32 %v16530_v51, 0.0  ;;  %v12457_v53 = vor.u32 %v14030_v18, %v12456_v6  ;;  %v7063_v61 = vadd.f32 %v16477_v52, %v7049_v0  ;;  %v12912_v10 = vld [vmem:[#allocation19 + $0x528] sm:$0xf]  ;;  %v12541_v0 = vor.u32 %v14051_v45, %v12540_v50 }
 0x7a9   :  { %v13008_v52 = vld [vmem:[#allocation19 + $0x5e8] sm:$0xf] }
 0x7aa   :  { %9384 = vmatpush.bf16.msrb.mxu3 %v12301_v31  ;;  %9398 = vmatpush.bf16.msra.mxu0 %v12397_v56  ;;  %v12277_v31 = vor.u32 %v13985_v5, %v12276_v7  ;;  %v12373_v56 = vor.u32 %v14009_v8, %v12372_v23  ;;  %v13979_v7 = vld [vmem:[#allocation19 + $0x8] sm:$0xf0]  ;;  %v12348_v5 = vld [vmem:[#allocation19 + $0xc0] sm:$0xf]  ;;  %v12553_v23 = vor.u32 %v14054_v37, %v12552_v21 }
 0x7ab   :  { %9412 = vmatpush.bf16.msra.mxu1 %v12493_v34  ;;  %9426 = vmatpush.bf16.msrb.mxu2 %v12589_v3  ;;  %v16538_v34 = vpop.f32.mrf.mxu3  ;;  %v14006_v3 = vld [vmem:[#allocation19 + $0xe0] sm:$0xf0]  ;;  %v12444_v8 = vld [vmem:[#allocation19 + $0x180] sm:$0xf]  ;;  %v16554_v25 = vpop.f32.mrf.mxu1  ;;  %v7077_v27 = vadd.f32 %v16481_v1, %v7063_v61 }
 0x7ac   :  { %v12361_v35 = vor.u32 %v14006_v3, %v12360_v32  ;;  %v14168_v32 = vld [vmem:[#allocation19 + $0x5f0] sm:$0xf0]  ;;  %v12445_v6 = vor.u32 %v14027_v54, %v12444_v8  ;;  %v16572_v8 = vpack.c.bf16 %v7430_v43, %v7418_v13  ;;  %v12792_v43 = vld [vmem:[#allocation19 + $0x438] sm:$0xf] }
 0x7ad   :  { %v7420_v54 = vmax.f32 %v7077_v27, 0.0 }
 0x7ae   :  { %9385 = vmatpush.bf16.msrb.mxu3 %v12289_v62  ;;  %9399 = vmatpush.bf16.msra.mxu0 %v12385_v22  ;;  %v12252_v62 = vld [vmem:[#allocation19] sm:$0xf]  ;;  %v7065_v22 = vadd.f32 %v16487_v29, %v7051_v44  ;;  %v7037_v29 = vadd.f32 %v16490_v33, %v7023_v59  ;;  %v12720_v44 = vld [vmem:[#allocation19 + $0x3a8] sm:$0xf]  ;;  %v12708_v59 = vld [vmem:[#allocation19 + $0x390] sm:$0xf] }
 0x7af   :  { %9413 = vmatpush.bf16.msra.mxu1 %v12481_v20  ;;  %9427 = vmatpush.bf16.msrb.mxu2 %v12577_v24  ;;  %v14003_v20 = vld [vmem:[#allocation19 + $0xc8] sm:$0xf0]  ;;  %v7035_v24 = vadd.f32 %v16479_v40, %v7021_v4  ;;  %v14120_v40 = vld [vmem:[#allocation19 + $0x470] sm:$0xf0]  ;;  %v12253_v16 = vor.u32 %v13979_v7, %v12252_v62  ;;  %v16560_v37 = vpop.f32.mrf.mxu2  ;;  %v14093_v62 = vld [vmem:[#allocation19 + $0x398] sm:$0xf0]  ;;  %v16575_v61 = vpop.f32.mrf.mxu0 }
 0x7b0   :  { %v7079_v36 = vadd.f32 %v16492_v19, %v7065_v22  ;;  %v5453_v19 = vperm.slane %v16485_v58, 4  ;;  %v7431_v18 = vmax.f32 %v7037_v29, 0.0  ;;  %v14117_v7 = vld [vmem:[#allocation19 + $0x458] sm:$0xf0]  ;;  %v12709_v47 = vor.u32 %v14093_v62, %v12708_v59 }
 0x7b1   :  { %v7419_v33 = vmax.f32 %v7035_v24, 0.0  ;;  %v12996_v24 = vld [vmem:[#allocation19 + $0x5d0] sm:$0xf]  ;;  %v5454_v59 = vperm.slane %v16485_v58, 5 }
 0x7b2   :  { %9386 = vmatpush.bf16.msrb.mxu3 %v12277_v31  ;;  %9400 = vmatpush.bf16.msra.mxu0 %v12373_v56  ;;  %v14096_v31 = vld [vmem:[#allocation19 + $0x3b0] sm:$0xf0]  ;;  %v12816_v56 = vld [vmem:[#allocation19 + $0x468] sm:$0xf]  ;;  %v7432_v21 = vmax.f32 %v7079_v36, 0.0  ;;  %v7091_v50 = vadd.f32 %v16507_v55, %v5453_v19 }
 0x7b3   :  { %9414 = vmatpush.bf16.msra.mxu1 %v12469_v38  ;;  %9428 = vmatpush.bf16.msrb.mxu2 %v12565_v39  ;;  %v12349_v38 = vor.u32 %v14003_v20, %v12348_v5  ;;  %v14144_v39 = vld [vmem:[#allocation19 + $0x530] sm:$0xf0]  ;;  %v16558_v3 = vpop.f32.mrf.mxu3  ;;  %v12721_v1 = vor.u32 %v14096_v31, %v12720_v44  ;;  %v12817_v4 = vor.u32 %v14120_v40, %v12816_v56  ;;  %v12900_v5 = vld [vmem:[#allocation19 + $0x510] sm:$0xf]  ;;  %v14141_v20 = vld [vmem:[#allocation19 + $0x518] sm:$0xf0]  ;;  %v16581_v45 = vpop.f32.mrf.mxu1 }
 0x7b4   :  { %v12913_v22 = vor.u32 %v14144_v39, %v12912_v10  ;;  %v16577_v29 = vpack.c.bf16 %v7431_v18, %v7419_v33  ;;  %v16579_v51 = vpack.c.bf16 %v7432_v21, %v7420_v54  ;;  %v12901_v46 = vor.u32 %v14141_v20, %v12900_v5  ;;  %v14114_v55 = vld [vmem:[#allocation19 + $0x440] sm:$0xf0]  ;;  %v12888_v36 = vld [vmem:[#allocation19 + $0x4f8] sm:$0xf]  ;;  %v14087_v39 = vld [vmem:[#allocation19 + $0x368] sm:$0xf0] }
 0x7b5   :  { %v14138_v44 = vld [vmem:[#allocation19 + $0x500] sm:$0xf0]  ;;  %v12984_v31 = vld [vmem:[#allocation19 + $0x5b8] sm:$0xf]  ;;  %v7105_v40 = vadd.f32 %v16494_v60, %v7091_v50  ;;  %v7093_v10 = vadd.f32 %v16538_v34, %v5453_v19  ;;  %v14111_v60 = vld [vmem:[#allocation19 + $0x428] sm:$0xf0] }
 0x7b6   :  { %9387 = vmatpush.bf16.msrb.mxu3 %v12265_v57  ;;  %9401 = vmatpush.bf16.msra.mxu0 %v12361_v35  ;;  %v13009_v57 = vor.u32 %v14168_v32, %v13008_v52  ;;  %v12804_v35 = vld [vmem:[#allocation19 + $0x450] sm:$0xf]  ;;  %v14162_v56 = vld [vmem:[#allocation19 + $0x5c0] sm:$0xf0]  ;;  %v12889_v32 = vor.u32 %v14138_v44, %v12888_v36  ;;  %v14135_v21 = vld [vmem:[#allocation19 + $0x4e8] sm:$0xf0]  ;;  %v7133_v44 = vadd.f32 %v16510_v49, %v5454_v59 }
 0x7b7   :  { %9415 = vmatpush.bf16.msra.mxu1 %v12457_v53  ;;  %9429 = vmatpush.bf16.msrb.mxu2 %v12553_v23  ;;  %v14165_v53 = vld [vmem:[#allocation19 + $0x5d8] sm:$0xf0]  ;;  %v16566_v23 = vpack.c.bf16 %v7429_v9, %v7417_v15  ;;  %v12805_v14 = vor.u32 %v14117_v7, %v12804_v35  ;;  %v12696_v15 = vld [vmem:[#allocation19 + $0x378] sm:$0xf]  ;;  %v14090_v9 = vld [vmem:[#allocation19 + $0x380] sm:$0xf0]  ;;  %v12985_v33 = vor.u32 %v14162_v56, %v12984_v31  ;;  %v16591_v18 = vpop.f32.mrf.mxu2 }
 0x7b8   :  { %v12997_v13 = vor.u32 %v14165_v53, %v12996_v24  ;;  %v12697_v27 = vor.u32 %v14090_v9, %v12696_v15  ;;  %v14159_v34 = vld [vmem:[#allocation19 + $0x5a8] sm:$0xf0]  ;;  %v16594_v19 = vadd.f32 %v16503_v42, %v7105_v40  ;;  %v7107_v62 = vadd.f32 %v16519_v11, %v7093_v10  ;;  %v12672_v35 = vld [vmem:[#allocation19 + $0x348] sm:$0xf]  ;;  %v14084_v7 = vld [vmem:[#allocation19 + $0x350] sm:$0xf0] }
 0x7b9   :  { %v12768_v24 = vld [vmem:[#allocation19 + $0x408] sm:$0xf]  ;;  %v14108_v53 = vld [vmem:[#allocation19 + $0x410] sm:$0xf0]  ;;  %v5455_v11 = vperm.slane %v16485_v58, 6 }
 0x7ba   :  { %9388 = vmatpush.bf16.msrb.mxu3 %v12253_v16  ;;  %9402 = vmatpush.bf16.msra.mxu0 %v12349_v38  ;;  %v12793_v16 = vor.u32 %v14114_v55, %v12792_v43  ;;  %v12684_v38 = vld [vmem:[#allocation19 + $0x360] sm:$0xf]  ;;  %v12864_v54 = vld [vmem:[#allocation19 + $0x4c8] sm:$0xf]  ;;  %v14132_v50 = vld [vmem:[#allocation19 + $0x4d0] sm:$0xf0]  ;;  %v16601_v9 = vadd.f32 %v16525_v28, %v7107_v62  ;;  %v12769_v43 = vor.u32 %v14108_v53, %v12768_v24 }
 0x7bb   :  { %9416 = vmatpush.bf16.msra.mxu1 %v12445_v6  ;;  %9430 = vmatpush.bf16.msrb.mxu2 %v12541_v0  ;;  %v16589_v52 = vpop.f32.mrf.mxu3  ;;  %v12780_v6 = vld [vmem:[#allocation19 + $0x420] sm:$0xf]  ;;  %v7421_v15 = vmax.f32 %v16594_v19, 0.0  ;;  %v12660_v55 = vld [vmem:[#allocation19 + $0x330] sm:$0xf]  ;;  %v12865_v56 = vor.u32 %v14132_v50, %v12864_v54  ;;  %v7135_v28 = vadd.f32 %v16541_v41, %v5454_v59  ;;  %v7177_v49 = vadd.f32 %v16581_v45, %v5455_v11 }
 0x7bc   :  { %v12876_v0 = vld [vmem:[#allocation19 + $0x4e0] sm:$0xf]  ;;  %v14081_v36 = vld [vmem:[#allocation19 + $0x338] sm:$0xf0]  ;;  %v12756_v10 = vld [vmem:[#allocation19 + $0x3f0] sm:$0xf] }
 0x7bd   :  { %9389 = vmatmul.bf16.vlgmr.msrb.gmra.mxu3 %v16566_v23  ;;  %9403 = vmatmul.bf16.vlgmr.msra.gmra.mxu0 %v16572_v8  ;;  %v12877_v5 = vor.u32 %v14135_v21, %v12876_v0  ;;  %v7230_v42 = vpop.f32.mrf.mxu1  ;;  %v12661_v0 = vor.u32 %v14081_v36, %v12660_v55  ;;  %v7433_v21 = vmax.f32 %v16601_v9, 0.0  ;;  %v12648_v59 = vld [vmem:[#allocation19 + $0x318] sm:$0xf]  ;;  %v14078_v62 = vld [vmem:[#allocation19 + $0x320] sm:$0xf0] }
 0x7be   :  { %9437 = vmatpush.bf16.msra.mxu3 %v12721_v1  ;;  %9451 = vmatpush.bf16.msrb.mxu0 %v12817_v4  ;;  %v12972_v1 = vld [vmem:[#allocation19 + $0x5a0] sm:$0xf]  ;;  %v7216_v4 = vpop.f32.mrf.mxu0  ;;  %v12840_v45 = vld [vmem:[#allocation19 + $0x498] sm:$0xf]  ;;  %v12649_v53 = vor.u32 %v14078_v62, %v12648_v59  ;;  %v13092_v62 = vld [vmem:[#allocation19 + $0x690] sm:$0xf] }
 0x7bf   :  { %9465 = vmatpush.bf16.msrb.mxu1 %v12913_v22  ;;  %9479 = vmatpush.bf16.msra.mxu2 %v13009_v57  ;;  %v12685_v22 = vor.u32 %v14087_v39, %v12684_v38  ;;  %v12781_v57 = vor.u32 %v14111_v60, %v12780_v6  ;;  %v12973_v20 = vor.u32 %v14159_v34, %v12972_v1  ;;  %v12948_v39 = vld [vmem:[#allocation19 + $0x570] sm:$0xf]  ;;  %v14240_v19 = vld [vmem:[#allocation19 + $0x830] sm:$0xf0] }
 0x7c0   :  { %9417 = vmatmul.bf16.vlgmr.msra.gmra.mxu1 %v16577_v29  ;;  %9431 = vmatmul.bf16.vlgmr.msrb.gmra.mxu2 %v16579_v51  ;;  %v7147_v6 = vadd.f32 %v16558_v3, %v7133_v44  ;;  %v7149_v1 = vadd.f32 %v16589_v52, %v7135_v28  ;;  %v12744_v3 = vld [vmem:[#allocation19 + $0x3d8] sm:$0xf]  ;;  %v12828_v44 = vld [vmem:[#allocation19 + $0x480] sm:$0xf]  ;;  %v14264_v9 = vld [vmem:[#allocation19 + $0x8f0] sm:$0xf0] }
 0x7c2   :  { %9438 = vmatpush.bf16.msra.mxu3 %v12709_v47  ;;  %9452 = vmatpush.bf16.msrb.mxu0 %v12805_v14  ;;  %v12960_v47 = vld [vmem:[#allocation19 + $0x588] sm:$0xf]  ;;  %v14156_v14 = vld [vmem:[#allocation19 + $0x590] sm:$0xf0]  ;;  %v7161_v24 = vadd.f32 %v16547_v12, %v7147_v6  ;;  %v7163_v54 = vadd.f32 %v16575_v61, %v7149_v1 }
 0x7c3   :  { %9466 = vmatpush.bf16.msrb.mxu1 %v12901_v46  ;;  %9480 = vmatpush.bf16.msra.mxu2 %v12997_v13  ;;  %v5456_v46 = vperm.slane %v16485_v58, 7  ;;  %v12673_v13 = vor.u32 %v14084_v7, %v12672_v35  ;;  %v7202_v31 = vpop.f32.mrf.mxu3  ;;  %v12961_v40 = vor.u32 %v14156_v14, %v12960_v47  ;;  %v7244_v38 = vpop.f32.mrf.mxu2  ;;  %v14129_v58 = vld [vmem:[#allocation19 + $0x4b8] sm:$0xf0]  ;;  %v14102_v35 = vld [vmem:[#allocation19 + $0x3e0] sm:$0xf0] }
 0x7c4   :  { %v14126_v7 = vld [vmem:[#allocation19 + $0x4a0] sm:$0xf0]  ;;  %v12745_v14 = vor.u32 %v14102_v35, %v12744_v3  ;;  %v14213_v3 = vld [vmem:[#allocation19 + $0x758] sm:$0xf0] }
 0x7c5   :  { %v7217_v34 = vadd.f32 %v7216_v4, %v5456_v46  ;;  %v7191_v4 = vadd.f32 %v16591_v18, %v7177_v49  ;;  %v7232_v47 = vpop.f32.mrf.mxu1  ;;  %v12841_v12 = vor.u32 %v14126_v7, %v12840_v45  ;;  %v14123_v18 = vld [vmem:[#allocation19 + $0x488] sm:$0xf0]  ;;  %v16623_v7 = vpack.c.bf16 %v7433_v21, %v7421_v15  ;;  %v13392_v15 = vld [vmem:[#allocation19 + $0x8e8] sm:$0xf] }
 0x7c6   :  { %9439 = vmatpush.bf16.msra.mxu3 %v12697_v27  ;;  %9453 = vmatpush.bf16.msrb.mxu0 %v12793_v16  ;;  %v14105_v27 = vld [vmem:[#allocation19 + $0x3f8] sm:$0xf0]  ;;  %v12852_v16 = vld [vmem:[#allocation19 + $0x4b0] sm:$0xf]  ;;  %v7218_v60 = vpop.f32.mrf.mxu0 }
 0x7c7   :  { %9467 = vmatpush.bf16.msrb.mxu1 %v12889_v32  ;;  %9481 = vmatpush.bf16.msra.mxu2 %v12985_v33  ;;  %v14153_v32 = vld [vmem:[#allocation19 + $0x578] sm:$0xf0]  ;;  %v7175_v33 = vadd.f32 %v16554_v25, %v5455_v11  ;;  %v12757_v41 = vor.u32 %v14105_v27, %v12756_v10  ;;  %v12853_v25 = vor.u32 %v14129_v58, %v12852_v16  ;;  %v12636_v11 = vld [vmem:[#allocation19 + $0x300] sm:$0xf]  ;;  %v14147_v27 = vld [vmem:[#allocation19 + $0x548] sm:$0xf0] }
 0x7c8   :  { %v7231_v50 = vadd.f32 %v7230_v42, %v7217_v34  ;;  %v12924_v10 = vld [vmem:[#allocation19 + $0x540] sm:$0xf]  ;;  %v13104_v16 = vld [vmem:[#allocation19 + $0x6a8] sm:$0xf]  ;;  %v14192_v58 = vld [vmem:[#allocation19 + $0x6b0] sm:$0xf0] }
 0x7c9   :  { %v7189_v52 = vadd.f32 %v16560_v37, %v7175_v33  ;;  %v14099_v37 = vld [vmem:[#allocation19 + $0x3c8] sm:$0xf0]  ;;  %v7422_v33 = vmax.f32 %v7161_v24, 0.0  ;;  %v13105_v59 = vor.u32 %v14192_v58, %v13104_v16  ;;  %v14186_v24 = vld [vmem:[#allocation19 + $0x680] sm:$0xf0] }
 0x7ca   :  { %9440 = vmatpush.bf16.msra.mxu3 %v12685_v22  ;;  %9454 = vmatpush.bf16.msrb.mxu0 %v12781_v57  ;;  %v7219_v22 = vadd.f32 %v7218_v60, %v5456_v46  ;;  %v12949_v57 = vor.u32 %v14153_v32, %v12948_v39  ;;  %v14075_v46 = vld [vmem:[#allocation19 + $0x308] sm:$0xf0]  ;;  %v13200_v39 = vld [vmem:[#allocation19 + $0x768] sm:$0xf]  ;;  %v14216_v32 = vld [vmem:[#allocation19 + $0x770] sm:$0xf0] }
 0x7cb   :  { %9468 = vmatpush.bf16.msrb.mxu1 %v12877_v5  ;;  %9482 = vmatpush.bf16.msra.mxu2 %v12973_v20  ;;  %v12936_v5 = vld [vmem:[#allocation19 + $0x558] sm:$0xf]  ;;  %v14150_v20 = vld [vmem:[#allocation19 + $0x560] sm:$0xf0]  ;;  %v7204_v55 = vpop.f32.mrf.mxu3  ;;  %v7246_v42 = vpop.f32.mrf.mxu2  ;;  %v12637_v49 = vor.u32 %v14075_v46, %v12636_v11  ;;  %v14183_v11 = vld [vmem:[#allocation19 + $0x668] sm:$0xf0] }
 0x7cc   :  { %v12937_v36 = vor.u32 %v14150_v20, %v12936_v5  ;;  %v7205_v61 = vadd.f32 %v7204_v55, %v7191_v4  ;;  %v13080_v20 = vld [vmem:[#allocation19 + $0x678] sm:$0xf]  ;;  %v14237_v55 = vld [vmem:[#allocation19 + $0x818] sm:$0xf0]  ;;  %v14180_v16 = vld [vmem:[#allocation19 + $0x650] sm:$0xf0] }
 0x7cd   :  { %v13081_v46 = vor.u32 %v14186_v24, %v13080_v20 }
 0x7ce   :  { %9441 = vmatpush.bf16.msra.mxu3 %v12673_v13  ;;  %9455 = vmatpush.bf16.msrb.mxu0 %v12769_v43  ;;  %v12732_v13 = vld [vmem:[#allocation19 + $0x3c0] sm:$0xf]  ;;  %v7233_v43 = vadd.f32 %v7232_v47, %v7219_v22  ;;  %v7435_v6 = vmax.f32 %v7205_v61, 0.0  ;;  %v13201_v22 = vor.u32 %v14216_v32, %v13200_v39  ;;  %v13393_v47 = vor.u32 %v14264_v9, %v13392_v15  ;;  %v13272_v61 = vld [vmem:[#allocation19 + $0x7f8] sm:$0xf] }
 0x7cf   :  { %9469 = vmatpush.bf16.msrb.mxu1 %v12865_v56  ;;  %9483 = vmatpush.bf16.msra.mxu2 %v12961_v40  ;;  %v7203_v56 = vadd.f32 %v7202_v31, %v7189_v52  ;;  %v7245_v40 = vadd.f32 %v7244_v38, %v7231_v50  ;;  %v12733_v60 = vor.u32 %v14099_v37, %v12732_v13  ;;  %v13296_v50 = vld [vmem:[#allocation19 + $0x828] sm:$0xf]  ;;  %v14207_v37 = vld [vmem:[#allocation19 + $0x728] sm:$0xf0]  ;;  %v14258_v39 = vld [vmem:[#allocation19 + $0x8c0] sm:$0xf0] }
 0x7d0   :  { %v7247_v28 = vadd.f32 %v7246_v42, %v7233_v43  ;;  %v12829_v31 = vor.u32 %v14123_v18, %v12828_v44  ;;  %v12925_v38 = vor.u32 %v14147_v27, %v12924_v10  ;;  %v13297_v21 = vor.u32 %v14240_v19, %v13296_v50  ;;  %v13284_v43 = vld [vmem:[#allocation19 + $0x810] sm:$0xf]  ;;  %v14261_v18 = vld [vmem:[#allocation19 + $0x8d8] sm:$0xf0]  ;;  %v14234_v42 = vld [vmem:[#allocation19 + $0x800] sm:$0xf0] }
 0x7d1   :  { %v7423_v34 = vmax.f32 %v7203_v56, 0.0  ;;  %v13285_v44 = vor.u32 %v14237_v55, %v13284_v43  ;;  %v13368_v10 = vld [vmem:[#allocation19 + $0x8b8] sm:$0xf]  ;;  %v13152_v32 = vld [vmem:[#allocation19 + $0x708] sm:$0xf] }
 0x7d2   :  { %9442 = vmatpush.bf16.msra.mxu3 %v12661_v0  ;;  %9456 = vmatpush.bf16.msrb.mxu0 %v12757_v41  ;;  %v7434_v0 = vmax.f32 %v7163_v54, 0.0  ;;  %v7436_v1 = vmax.f32 %v7247_v28, 0.0  ;;  %v7424_v41 = vmax.f32 %v7245_v40, 0.0  ;;  %v14210_v54 = vld [vmem:[#allocation19 + $0x740] sm:$0xf0] }
 0x7d3   :  { %9470 = vmatpush.bf16.msrb.mxu1 %v12853_v25  ;;  %9484 = vmatpush.bf16.msra.mxu2 %v12949_v57  ;;  %v14189_v25 = vld [vmem:[#allocation19 + $0x698] sm:$0xf0]  ;;  %v13188_v57 = vld [vmem:[#allocation19 + $0x750] sm:$0xf]  ;;  %v16615_v35 = vpack.c.bf16 %v7435_v6, %v7423_v34  ;;  %v13056_v40 = vld [vmem:[#allocation19 + $0x648] sm:$0xf]  ;;  %v13273_v6 = vor.u32 %v14234_v42, %v13272_v61 }
 0x7d4   :  { %v16617_v45 = vpack.c.bf16 %v7436_v1, %v7424_v41  ;;  %v16625_v5 = vpack.c.bf16 %v7434_v0, %v7422_v33  ;;  %v13093_v52 = vor.u32 %v14189_v25, %v13092_v62  ;;  %v13189_v4 = vor.u32 %v14213_v3, %v13188_v57  ;;  %v16631_v28 = vld [vmem:[#allocation17 + $0x8] sm:$0xf]  ;;  %v14204_v33 = vld [vmem:[#allocation19 + $0x710] sm:$0xf0]  ;;  %v14231_v0 = vld [vmem:[#allocation19 + $0x7e8] sm:$0xf0] }
 0x7d5   :  { %v13356_v1 = vld [vmem:[#allocation19 + $0x8a0] sm:$0xf]  ;;  %v5457_v34 = vperm.slane %v16631_v28, 0  ;;  %v13044_v41 = vld [vmem:[#allocation19 + $0x630] sm:$0xf] }
 0x7d6   :  { %9443 = vmatpush.bf16.msra.mxu3 %v12649_v53  ;;  %9457 = vmatpush.bf16.msrb.mxu0 %v12745_v14  ;;  %v13176_v53 = vld [vmem:[#allocation19 + $0x738] sm:$0xf]  ;;  %v13068_v14 = vld [vmem:[#allocation19 + $0x660] sm:$0xf]  ;;  %v14177_v25 = vld [vmem:[#allocation19 + $0x638] sm:$0xf0] }
 0x7d7   :  { %9471 = vmatpush.bf16.msrb.mxu1 %v12841_v12  ;;  %9485 = vmatpush.bf16.msra.mxu2 %v12937_v36  ;;  %v13177_v13 = vor.u32 %v14210_v54, %v13176_v53  ;;  %v13380_v12 = vld [vmem:[#allocation19 + $0x8d0] sm:$0xf]  ;;  %v13164_v36 = vld [vmem:[#allocation19 + $0x720] sm:$0xf]  ;;  %v13069_v27 = vor.u32 %v14183_v11, %v13068_v14  ;;  %v14201_v3 = vld [vmem:[#allocation19 + $0x6f8] sm:$0xf0]  ;;  %v13045_v50 = vor.u32 %v14177_v25, %v13044_v41 }
 0x7d8   :  { %v13381_v56 = vor.u32 %v14261_v18, %v13380_v12  ;;  %v13165_v58 = vor.u32 %v14207_v37, %v13164_v36  ;;  %v13140_v57 = vld [vmem:[#allocation19 + $0x6f0] sm:$0xf]  ;;  %v14174_v53 = vld [vmem:[#allocation19 + $0x620] sm:$0xf0]  ;;  %v13128_v15 = vld [vmem:[#allocation19 + $0x6d8] sm:$0xf] }
 0x7d9   :  { %v13141_v19 = vor.u32 %v14201_v3, %v13140_v57  ;;  %v14198_v9 = vld [vmem:[#allocation19 + $0x6e0] sm:$0xf0]  ;;  %v13344_v14 = vld [vmem:[#allocation19 + $0x888] sm:$0xf]  ;;  %v14252_v11 = vld [vmem:[#allocation19 + $0x890] sm:$0xf0] }
 0x7da   :  { %9444 = vmatpush.bf16.msra.mxu3 %v12637_v49  ;;  %9458 = vmatpush.bf16.msrb.mxu0 %v12733_v60  ;;  %v13369_v49 = vor.u32 %v14258_v39, %v13368_v10  ;;  %v13260_v60 = vld [vmem:[#allocation19 + $0x7e0] sm:$0xf]  ;;  %v7272_v62 = vpop.f32.mrf.mxu0  ;;  %v13236_v55 = vld [vmem:[#allocation19 + $0x7b0] sm:$0xf]  ;;  %v14225_v12 = vld [vmem:[#allocation19 + $0x7b8] sm:$0xf0]  ;;  %v13129_v18 = vor.u32 %v14198_v9, %v13128_v15 }
 0x7db   :  { %9472 = vmatpush.bf16.msrb.mxu1 %v12829_v31  ;;  %9486 = vmatpush.bf16.msra.mxu2 %v12925_v38  ;;  %v14255_v31 = vld [vmem:[#allocation19 + $0x8a8] sm:$0xf0]  ;;  %v13057_v38 = vor.u32 %v14180_v16, %v13056_v40  ;;  %v13261_v20 = vor.u32 %v14231_v0, %v13260_v60  ;;  %v13020_v43 = vld [vmem:[#allocation19 + $0x600] sm:$0xf]  ;;  %v14249_v40 = vld [vmem:[#allocation19 + $0x878] sm:$0xf0]  ;;  %v13237_v16 = vor.u32 %v14225_v12, %v13236_v55 }
 0x7dc   :  { %v13357_v24 = vor.u32 %v14255_v31, %v13356_v1  ;;  %v13999_v42 = vld [vmem:[#allocation19 + $0xac] sm:$0xf]  ;;  %v13116_v10 = vld [vmem:[#allocation19 + $0x6c0] sm:$0xf]  ;;  %v14020_v57 = vld [vmem:[#allocation19 + $0x154] sm:$0xf] }
 0x7dd   :  { %9445 = vmatmul.bf16.vlgmr.msra.gmra.mxu3 %v16623_v7  ;;  %9459 = vmatmul.bf16.vlgmr.msrb.gmra.mxu0 %v16625_v5  ;;  %v13224_v3 = vld [vmem:[#allocation19 + $0x798] sm:$0xf]  ;;  %v13993_v15 = vld [vmem:[#allocation19 + $0x7c] sm:$0xf]  ;;  %v12314_v9 = vld [vmem:[#allocation19 + $0x84] sm:$0xf0] }
 0x7de   :  { %9493 = vmatpush.bf16.msrb.mxu3 %v13105_v59  ;;  %9507 = vmatpush.bf16.msra.mxu0 %v13201_v22  ;;  %v13153_v59 = vor.u32 %v14204_v33, %v13152_v32  ;;  %v12338_v32 = vld [vmem:[#allocation19 + $0xb4] sm:$0xf0]  ;;  %v14023_v33 = vld [vmem:[#allocation19 + $0x16c] sm:$0xf]  ;;  %v13308_v55 = vld [vmem:[#allocation19 + $0x840] sm:$0xf] }
 0x7df   :  { %9473 = vmatmul.bf16.vlgmr.msrb.gmra.mxu1 %v16615_v35  ;;  %9487 = vmatmul.bf16.vlgmr.msra.gmra.mxu2 %v16617_v45  ;;  %v12341_v41 = vor.u32 %v13999_v42, %v12338_v32  ;;  %v14243_v12 = vld [vmem:[#allocation19 + $0x848] sm:$0xf0]  ;;  %v14044_v32 = vld [vmem:[#allocation19 + $0x214] sm:$0xf] }
 0x7e0   :  { %9521 = vmatpush.bf16.msra.mxu1 %v13297_v21  ;;  %9535 = vmatpush.bf16.msrb.mxu2 %v13393_v47  ;;  %v7258_v22 = vpop.f32.mrf.mxu3  ;;  %v13248_v21 = vld [vmem:[#allocation19 + $0x7c8] sm:$0xf]  ;;  %v14228_v47 = vld [vmem:[#allocation19 + $0x7d0] sm:$0xf0] }
 0x7e1   :  { %v7259_v54 = vadd.f32 %v7258_v22, %v5457_v34 }
 0x7e2   :  { %9494 = vmatpush.bf16.msrb.mxu3 %v13093_v52  ;;  %9508 = vmatpush.bf16.msra.mxu0 %v13189_v4  ;;  %v7286_v52 = vpop.f32.mrf.mxu1  ;;  %v13032_v4 = vld [vmem:[#allocation19 + $0x618] sm:$0xf] }
 0x7e3   :  { %v7273_v36 = vadd.f32 %v7272_v62, %v7259_v54  ;;  %v13033_v37 = vor.u32 %v14174_v53, %v13032_v4  ;;  %v12326_v62 = vld [vmem:[#allocation19 + $0x9c] sm:$0xf0]  ;;  %v14246_v4 = vld [vmem:[#allocation19 + $0x860] sm:$0xf0] }
 0x7e4   :  { %9522 = vmatpush.bf16.msra.mxu1 %v13285_v44  ;;  %9536 = vmatpush.bf16.msrb.mxu2 %v13381_v56  ;;  %v14171_v44 = vld [vmem:[#allocation19 + $0x608] sm:$0xf0]  ;;  %v13332_v56 = vld [vmem:[#allocation19 + $0x870] sm:$0xf] }
 0x7e5   :  { %v13021_v60 = vor.u32 %v14171_v44, %v13020_v43  ;;  %v7287_v0 = vadd.f32 %v7286_v52, %v7273_v36  ;;  %v14047_v36 = vld [vmem:[#allocation19 + $0x22c] sm:$0xf]  ;;  %v13309_v44 = vor.u32 %v14243_v12, %v13308_v55  ;;  %v13981_v12 = vld [vmem:[#allocation19 + $0x1c] sm:$0xf] }
 0x7e6   :  { %9495 = vmatpush.bf16.msrb.mxu3 %v13081_v46  ;;  %9509 = vmatpush.bf16.msra.mxu0 %v13177_v13  ;;  %v13249_v46 = vor.u32 %v14228_v47, %v13248_v21  ;;  %v13345_v13 = vor.u32 %v14252_v11, %v13344_v14  ;;  %v14017_v47 = vld [vmem:[#allocation19 + $0x13c] sm:$0xf]  ;;  %v12410_v11 = vld [vmem:[#allocation19 + $0x144] sm:$0xf0] }
 0x7e7   :  { %v7425_v53 = vmax.f32 %v7287_v0, 0.0  ;;  %v12413_v42 = vor.u32 %v14017_v47, %v12410_v11  ;;  %v12614_v0 = vld [vmem:[#allocation19 + $0x2dc] sm:$0xf0]  ;;  %v14008_v47 = vld [vmem:[#allocation19 + $0xf4] sm:$0xf] }
 0x7e8   :  { %9523 = vmatpush.bf16.msra.mxu1 %v13273_v6  ;;  %9537 = vmatpush.bf16.msrb.mxu2 %v13369_v49  ;;  %v7260_v61 = vpop.f32.mrf.mxu3  ;;  %v12434_v6 = vld [vmem:[#allocation19 + $0x174] sm:$0xf0]  ;;  %v7274_v49 = vpop.f32.mrf.mxu0  ;;  %v12374_v11 = vld [vmem:[#allocation19 + $0xfc] sm:$0xf0] }
 0x7e9   :  { %v7261_v39 = vadd.f32 %v7260_v61, %v5457_v34  ;;  %v12437_v22 = vor.u32 %v14023_v33, %v12434_v6  ;;  %v12422_v34 = vld [vmem:[#allocation19 + $0x15c] sm:$0xf0]  ;;  %v13990_v61 = vld [vmem:[#allocation19 + $0x64] sm:$0xf]  ;;  %v14068_v6 = vld [vmem:[#allocation19 + $0x2d4] sm:$0xf] }
 0x7ea   :  { %9496 = vmatpush.bf16.msrb.mxu3 %v13069_v27  ;;  %9510 = vmatpush.bf16.msra.mxu0 %v13165_v58  ;;  %v14195_v27 = vld [vmem:[#allocation19 + $0x6c8] sm:$0xf0]  ;;  %v13333_v58 = vor.u32 %v14249_v40, %v13332_v56  ;;  %v12425_v21 = vor.u32 %v14020_v57, %v12422_v34  ;;  %v12626_v40 = vld [vmem:[#allocation19 + $0x2f4] sm:$0xf0]  ;;  %v12518_v33 = vld [vmem:[#allocation19 + $0x21c] sm:$0xf0] }
 0x7eb   :  { %v7275_v1 = vadd.f32 %v7274_v49, %v7261_v39  ;;  %v13117_v31 = vor.u32 %v14195_v27, %v13116_v10  ;;  %v14071_v56 = vld [vmem:[#allocation19 + $0x2ec] sm:$0xf]  ;;  %v12398_v39 = vld [vmem:[#allocation19 + $0x12c] sm:$0xf0]  ;;  %v12506_v57 = vld [vmem:[#allocation19 + $0x204] sm:$0xf0] }
 0x7ec   :  { %9524 = vmatpush.bf16.msra.mxu1 %v13261_v20  ;;  %9538 = vmatpush.bf16.msrb.mxu2 %v13357_v24  ;;  %v14222_v20 = vld [vmem:[#allocation19 + $0x7a0] sm:$0xf0]  ;;  %v13320_v24 = vld [vmem:[#allocation19 + $0x858] sm:$0xf]  ;;  %v12629_v27 = vor.u32 %v14071_v56, %v12626_v40  ;;  %v13987_v49 = vld [vmem:[#allocation19 + $0x4c] sm:$0xf] }
 0x7ed   :  { %v13225_v54 = vor.u32 %v14222_v20, %v13224_v3  ;;  %v14065_v34 = vld [vmem:[#allocation19 + $0x2bc] sm:$0xf]  ;;  %v12602_v20 = vld [vmem:[#allocation19 + $0x2c4] sm:$0xf0] }
 0x7ee   :  { %9497 = vmatpush.bf16.msrb.mxu3 %v13057_v38  ;;  %9511 = vmatpush.bf16.msra.mxu0 %v13153_v59  ;;  %v7288_v38 = vpop.f32.mrf.mxu1  ;;  %v13996_v59 = vld [vmem:[#allocation19 + $0x94] sm:$0xf]  ;;  %v12362_v56 = vld [vmem:[#allocation19 + $0xe4] sm:$0xf0] }
 0x7ef   :  { %v7289_v25 = vadd.f32 %v7288_v38, %v7275_v1  ;;  %v7300_v1 = vpop.f32.mrf.mxu2  ;;  %v12290_v38 = vld [vmem:[#allocation19 + $0x54] sm:$0xf0] }
 0x7f0   :  { %9525 = vmatpush.bf16.msra.mxu1 %v13249_v46  ;;  %9539 = vmatpush.bf16.msrb.mxu2 %v13345_v13  ;;  %v13212_v46 = vld [vmem:[#allocation19 + $0x780] sm:$0xf]  ;;  %v14219_v13 = vld [vmem:[#allocation19 + $0x788] sm:$0xf0] }
 0x7f1   :  { %v7437_v52 = vmax.f32 %v7289_v25, 0.0  ;;  %v13213_v43 = vor.u32 %v14219_v13, %v13212_v46  ;;  %v14041_v25 = vld [vmem:[#allocation19 + $0x1fc] sm:$0xf] }
 0x7f2   :  { %9498 = vmatpush.bf16.msrb.mxu3 %v13045_v50  ;;  %9512 = vmatpush.bf16.msra.mxu0 %v13141_v19  ;;  %v13321_v50 = vor.u32 %v14246_v4, %v13320_v24  ;;  %v12329_v19 = vor.u32 %v13996_v59, %v12326_v62  ;;  %v14011_v59 = vld [vmem:[#allocation19 + $0x10c] sm:$0xf]  ;;  %v12386_v62 = vld [vmem:[#allocation19 + $0x114] sm:$0xf0]  ;;  %v12509_v3 = vor.u32 %v14041_v25, %v12506_v57  ;;  %v5458_v24 = vperm.slane %v16631_v28, 1 }
 0x7f3   :  { %v16634_v14 = vpack.c.bf16 %v7437_v52, %v7425_v53  ;;  %v13984_v4 = vld [vmem:[#allocation19 + $0x34] sm:$0xf]  ;;  %v12605_v53 = vor.u32 %v14065_v34, %v12602_v20  ;;  %v14038_v52 = vld [vmem:[#allocation19 + $0x1e4] sm:$0xf]  ;;  %v14095_v25 = vld [vmem:[#allocation19 + $0x3ac] sm:$0xf] }
 0x7f4   :  { %9526 = vmatpush.bf16.msra.mxu1 %v13237_v16  ;;  %9540 = vmatpush.bf16.msrb.mxu2 %v13333_v58  ;;  %v12302_v16 = vld [vmem:[#allocation19 + $0x6c] sm:$0xf0]  ;;  %v14014_v58 = vld [vmem:[#allocation19 + $0x124] sm:$0xf]  ;;  %v7301_v40 = vadd.f32 %v7300_v1, %v5458_v24  ;;  %v12722_v57 = vld [vmem:[#allocation19 + $0x3b4] sm:$0xf0] }
 0x7f6   :  { %9499 = vmatpush.bf16.msrb.mxu3 %v13033_v37  ;;  %9513 = vmatpush.bf16.msra.mxu0 %v13129_v18  ;;  %v12317_v37 = vor.u32 %v13993_v15, %v12314_v9  ;;  %v12530_v18 = vld [vmem:[#allocation19 + $0x234] sm:$0xf0]  ;;  %v14062_v15 = vld [vmem:[#allocation19 + $0x2a4] sm:$0xf]  ;;  %v12590_v9 = vld [vmem:[#allocation19 + $0x2ac] sm:$0xf0] }
 0x7f7   :  { %v12533_v10 = vor.u32 %v14047_v36, %v12530_v18  ;;  %v12593_v55 = vor.u32 %v14062_v15, %v12590_v9  ;;  %v14005_v18 = vld [vmem:[#allocation19 + $0xdc] sm:$0xf]  ;;  %v14119_v15 = vld [vmem:[#allocation19 + $0x46c] sm:$0xf]  ;;  %v12818_v9 = vld [vmem:[#allocation19 + $0x474] sm:$0xf0] }
 0x7f8   :  { %9527 = vmatpush.bf16.msra.mxu1 %v13225_v54  ;;  %9541 = vmatpush.bf16.msrb.mxu2 %v13321_v50  ;;  %v12293_v54 = vor.u32 %v13987_v49, %v12290_v38  ;;  %v12389_v50 = vor.u32 %v14011_v59, %v12386_v62  ;;  %v14056_v38 = vld [vmem:[#allocation19 + $0x274] sm:$0xf]  ;;  %v12350_v59 = vld [vmem:[#allocation19 + $0xcc] sm:$0xf0]  ;;  %v12566_v62 = vld [vmem:[#allocation19 + $0x27c] sm:$0xf0] }
 0x7fa   :  { %9500 = vmatpush.bf16.msrb.mxu3 %v13021_v60  ;;  %9514 = vmatpush.bf16.msra.mxu0 %v13117_v31  ;;  %v12521_v60 = vor.u32 %v14044_v32, %v12518_v33  ;;  %v12305_v31 = vor.u32 %v13990_v61, %v12302_v16  ;;  %v7328_v46 = vpop.f32.mrf.mxu0  ;;  %v14035_v61 = vld [vmem:[#allocation19 + $0x1cc] sm:$0xf]  ;;  %v13978_v32 = vld [vmem:[#allocation19 + $0x4] sm:$0xf]  ;;  %v12254_v33 = vld [vmem:[#allocation19 + $0xc] sm:$0xf0] }
 0x7fc   :  { %9528 = vmatpush.bf16.msra.mxu1 %v13213_v43  ;;  %9542 = vmatpush.bf16.msrb.mxu2 %v13309_v44  ;;  %v12377_v44 = vor.u32 %v14008_v47, %v12374_v11  ;;  %v12710_v47 = vld [vmem:[#allocation19 + $0x39c] sm:$0xf0]  ;;  %v14029_v11 = vld [vmem:[#allocation19 + $0x19c] sm:$0xf] }
 0x7fd   :  { %9501 = vmatmul.bf16.vlgmr.msrb.gmra.mxu3 %v16634_v14  ;;  %v16638_v20 = vpop.f32.mrf.mxu1 }
 0x7fe   :  { %9549 = vmatpush.bf16.msra.mxu3 %v12341_v41  ;;  %9563 = vmatpush.bf16.msrb.mxu0 %v12437_v22  ;;  %v12401_v41 = vor.u32 %v14014_v58, %v12398_v39  ;;  %v12617_v22 = vor.u32 %v14068_v6, %v12614_v0  ;;  %v12578_v58 = vld [vmem:[#allocation19 + $0x294] sm:$0xf0]  ;;  %v14032_v0 = vld [vmem:[#allocation19 + $0x1b4] sm:$0xf] }
 0x800   :  { %9577 = vmatpush.bf16.msrb.mxu1 %v12533_v10  ;;  %9591 = vmatpush.bf16.msra.mxu2 %v12629_v27  ;;  %v7314_v13 = vpop.f32.mrf.mxu3  ;;  %v14059_v10 = vld [vmem:[#allocation19 + $0x28c] sm:$0xf]  ;;  %v7302_v27 = vpop.f32.mrf.mxu2 }
 0x801   :  { %v7315_v39 = vadd.f32 %v7314_v13, %v7301_v40  ;;  %v12581_v6 = vor.u32 %v14059_v10, %v12578_v58  ;;  %v7303_v1 = vadd.f32 %v7302_v27, %v5458_v24  ;;  %v14089_v40 = vld [vmem:[#allocation19 + $0x37c] sm:$0xf]  ;;  %v12698_v27 = vld [vmem:[#allocation19 + $0x384] sm:$0xf0]  ;;  %v12446_v58 = vld [vmem:[#allocation19 + $0x18c] sm:$0xf0] }
 0x802   :  { %9550 = vmatpush.bf16.msra.mxu3 %v12329_v19  ;;  %9564 = vmatpush.bf16.msrb.mxu0 %v12425_v21  ;;  %v12494_v19 = vld [vmem:[#allocation19 + $0x1ec] sm:$0xf0]  ;;  %v12278_v21 = vld [vmem:[#allocation19 + $0x3c] sm:$0xf0] }
 0x803   :  { %v12497_v43 = vor.u32 %v14038_v52, %v12494_v19  ;;  %v12281_v36 = vor.u32 %v13984_v4, %v12278_v21  ;;  %v7329_v4 = vadd.f32 %v7328_v46, %v7315_v39  ;;  %v7330_v52 = vpop.f32.mrf.mxu0  ;;  %v12725_v19 = vor.u32 %v14095_v25, %v12722_v57  ;;  %v14092_v21 = vld [vmem:[#allocation19 + $0x394] sm:$0xf]  ;;  %v12458_v46 = vld [vmem:[#allocation19 + $0x1a4] sm:$0xf0]  ;;  %v14110_v25 = vld [vmem:[#allocation19 + $0x424] sm:$0xf] }
 0x804   :  { %9578 = vmatpush.bf16.msrb.mxu1 %v12521_v60  ;;  %9592 = vmatpush.bf16.msra.mxu2 %v12617_v22  ;;  %v12365_v60 = vor.u32 %v14005_v18, %v12362_v56  ;;  %v12713_v56 = vor.u32 %v14092_v21, %v12710_v47  ;;  %v12782_v57 = vld [vmem:[#allocation19 + $0x42c] sm:$0xf0]  ;;  %v5459_v21 = vperm.slane %v16631_v28, 2 }
 0x805   :  { %v7426_v13 = vmax.f32 %v7329_v4, 0.0  ;;  %v12674_v4 = vld [vmem:[#allocation19 + $0x354] sm:$0xf0] }
 0x806   :  { %9551 = vmatpush.bf16.msra.mxu3 %v12317_v37  ;;  %9565 = vmatpush.bf16.msrb.mxu0 %v12413_v42  ;;  %v12266_v37 = vld [vmem:[#allocation19 + $0x24] sm:$0xf0]  ;;  %v12482_v42 = vld [vmem:[#allocation19 + $0x1d4] sm:$0xf0] }
 0x807   :  { %v12485_v16 = vor.u32 %v14035_v61, %v12482_v42  ;;  %v12269_v49 = vor.u32 %v13981_v12, %v12266_v37  ;;  %v14053_v12 = vld [vmem:[#allocation19 + $0x25c] sm:$0xf]  ;;  %v12461_v37 = vor.u32 %v14029_v11, %v12458_v46  ;;  %v14116_v61 = vld [vmem:[#allocation19 + $0x454] sm:$0xf]  ;;  %v12806_v42 = vld [vmem:[#allocation19 + $0x45c] sm:$0xf0] }
 0x808   :  { %9579 = vmatpush.bf16.msrb.mxu1 %v12509_v3  ;;  %9593 = vmatpush.bf16.msra.mxu2 %v12605_v53  ;;  %v7316_v22 = vpop.f32.mrf.mxu3  ;;  %v12569_v3 = vor.u32 %v14056_v38, %v12566_v62  ;;  %v12794_v38 = vld [vmem:[#allocation19 + $0x444] sm:$0xf0]  ;;  %v14104_v46 = vld [vmem:[#allocation19 + $0x3f4] sm:$0xf] }
 0x809   :  { %v7317_v53 = vadd.f32 %v7316_v22, %v7303_v1  ;;  %v14086_v1 = vld [vmem:[#allocation19 + $0x364] sm:$0xf] }
 0x80a   :  { %9552 = vmatpush.bf16.msra.mxu3 %v12305_v31  ;;  %9566 = vmatpush.bf16.msrb.mxu0 %v12401_v41  ;;  %v12470_v31 = vld [vmem:[#allocation19 + $0x1bc] sm:$0xf0]  ;;  %v14002_v41 = vld [vmem:[#allocation19 + $0xc4] sm:$0xf] }
 0x80b   :  { %v12473_v34 = vor.u32 %v14032_v0, %v12470_v31  ;;  %v7331_v24 = vadd.f32 %v7330_v52, %v7317_v53  ;;  %v12701_v0 = vor.u32 %v14089_v40, %v12698_v27  ;;  %v14113_v31 = vld [vmem:[#allocation19 + $0x43c] sm:$0xf]  ;;  %v12785_v53 = vor.u32 %v14110_v25, %v12782_v57  ;;  %v14143_v25 = vld [vmem:[#allocation19 + $0x52c] sm:$0xf]  ;;  %v12914_v57 = vld [vmem:[#allocation19 + $0x534] sm:$0xf0] }
 0x80c   :  { %9580 = vmatpush.bf16.msrb.mxu1 %v12497_v43  ;;  %9594 = vmatpush.bf16.msra.mxu2 %v12593_v55  ;;  %v16640_v43 = vpop.f32.mrf.mxu2  ;;  %v7343_v40 = vadd.f32 %v16638_v20, %v5459_v21  ;;  %v13106_v20 = vld [vmem:[#allocation19 + $0x6b4] sm:$0xf0] }
 0x80d   :  { %v7438_v55 = vmax.f32 %v7331_v24, 0.0  ;;  %v12770_v24 = vld [vmem:[#allocation19 + $0x414] sm:$0xf0] }
 0x80e   :  { %9553 = vmatpush.bf16.msra.mxu3 %v12293_v54  ;;  %9567 = vmatpush.bf16.msrb.mxu0 %v12389_v50  ;;  %v12257_v54 = vor.u32 %v13978_v32, %v12254_v33  ;;  %v12353_v50 = vor.u32 %v14002_v41, %v12350_v59  ;;  %v14050_v32 = vld [vmem:[#allocation19 + $0x244] sm:$0xf]  ;;  %v12542_v33 = vld [vmem:[#allocation19 + $0x24c] sm:$0xf0]  ;;  %v12797_v59 = vor.u32 %v14113_v31, %v12794_v38  ;;  %v14191_v31 = vld [vmem:[#allocation19 + $0x6ac] sm:$0xf] }
 0x80f   :  { %v16642_v18 = vpack.c.bf16 %v7438_v55, %v7426_v13  ;;  %v12686_v41 = vld [vmem:[#allocation19 + $0x36c] sm:$0xf0] }
 0x810   :  { %9581 = vmatpush.bf16.msrb.mxu1 %v12485_v16  ;;  %9595 = vmatpush.bf16.msra.mxu2 %v12581_v6  ;;  %v14026_v16 = vld [vmem:[#allocation19 + $0x184] sm:$0xf]  ;;  %v12809_v6 = vor.u32 %v14116_v61, %v12806_v42  ;;  %v12689_v22 = vor.u32 %v14086_v1, %v12686_v41 }
 0x811   :  { %9515 = vmatmul.bf16.vlgmr.msra.gmra.mxu0 %v16642_v18  ;;  %v12449_v39 = vor.u32 %v14026_v16, %v12446_v58  ;;  %v14101_v16 = vld [vmem:[#allocation19 + $0x3dc] sm:$0xf]  ;;  %v12746_v58 = vld [vmem:[#allocation19 + $0x3e4] sm:$0xf0] }
 0x812   :  { %9554 = vmatpush.bf16.msra.mxu3 %v12281_v36  ;;  %9568 = vmatpush.bf16.msrb.mxu0 %v12377_v44  ;;  %v12821_v36 = vor.u32 %v14119_v15, %v12818_v9  ;;  %v12554_v44 = vld [vmem:[#allocation19 + $0x264] sm:$0xf0]  ;;  %v14080_v15 = vld [vmem:[#allocation19 + $0x334] sm:$0xf]  ;;  %v12662_v9 = vld [vmem:[#allocation19 + $0x33c] sm:$0xf0] }
 0x813   :  { %v12557_v10 = vor.u32 %v14053_v12, %v12554_v44  ;;  %v12665_v55 = vor.u32 %v14080_v15, %v12662_v9  ;;  %v12758_v12 = vld [vmem:[#allocation19 + $0x3fc] sm:$0xf0]  ;;  %v14077_v44 = vld [vmem:[#allocation19 + $0x31c] sm:$0xf] }
 0x814   :  { %9582 = vmatpush.bf16.msrb.mxu1 %v12473_v34  ;;  %9596 = vmatpush.bf16.msra.mxu2 %v12569_v3  ;;  %v7358_v62 = vpop.f32.mrf.mxu2  ;;  %v14083_v3 = vld [vmem:[#allocation19 + $0x34c] sm:$0xf]  ;;  %v12761_v42 = vor.u32 %v14104_v46, %v12758_v12  ;;  %v14140_v46 = vld [vmem:[#allocation19 + $0x514] sm:$0xf] }
 0x816   :  { %9555 = vmatpush.bf16.msra.mxu3 %v12269_v49  ;;  %9569 = vmatpush.bf16.msrb.mxu0 %v12365_v60  ;;  %v12545_v49 = vor.u32 %v14050_v32, %v12542_v33  ;;  %v7344_v60 = vpop.f32.mrf.mxu1  ;;  %v14074_v32 = vld [vmem:[#allocation19 + $0x304] sm:$0xf]  ;;  %v12638_v33 = vld [vmem:[#allocation19 + $0x30c] sm:$0xf0] }
 0x818   :  { %9583 = vmatpush.bf16.msrb.mxu1 %v12461_v37  ;;  %9597 = vmatpush.bf16.msra.mxu2 %v12557_v10  ;;  %v7345_v10 = vadd.f32 %v7344_v60, %v5459_v21  ;;  %v14215_v21 = vld [vmem:[#allocation19 + $0x76c] sm:$0xf] }
 0x81a   :  { %9556 = vmatpush.bf16.msra.mxu3 %v12257_v54  ;;  %9570 = vmatpush.bf16.msrb.mxu0 %v12353_v50  ;;  %v7384_v34 = vpop.f32.mrf.mxu0  ;;  %v12677_v54 = vor.u32 %v14083_v3, %v12674_v4  ;;  %v14107_v50 = vld [vmem:[#allocation19 + $0x40c] sm:$0xf]  ;;  %v13109_v4 = vor.u32 %v14191_v31, %v13106_v20  ;;  %v14182_v31 = vld [vmem:[#allocation19 + $0x664] sm:$0xf]  ;;  %v13070_v20 = vld [vmem:[#allocation19 + $0x66c] sm:$0xf0] }
 0x81b   :  { %v12773_v11 = vor.u32 %v14107_v50, %v12770_v24  ;;  %v14188_v24 = vld [vmem:[#allocation19 + $0x694] sm:$0xf] }
 0x81c   :  { %9584 = vmatpush.bf16.msrb.mxu1 %v12449_v39  ;;  %9598 = vmatpush.bf16.msra.mxu2 %v12545_v49 }
 0x81d   :  { %9557 = vmatmul.bf16.vlgmr.msra.gmra.mxu3 %v16566_v23 }
 0x81e   :  { %9605 = vmatpush.bf16.msrb.mxu3 %v12725_v19  ;;  %9619 = vmatpush.bf16.msra.mxu0 %v12821_v36  ;;  %v7398_v52 = vpop.f32.mrf.mxu1  ;;  %v5460_v19 = vperm.slane %v16631_v28, 3  ;;  %v7357_v28 = vadd.f32 %v16640_v43, %v7343_v40  ;;  %v12998_v40 = vld [vmem:[#allocation19 + $0x5dc] sm:$0xf0] }
 0x820   :  { %v7370_v47 = vpop.f32.mrf.mxu3  ;;  %v7385_v36 = vadd.f32 %v7384_v34, %v5460_v19  ;;  %v14167_v34 = vld [vmem:[#allocation19 + $0x5ec] sm:$0xf] }
 0x821   :  { %9571 = vmatmul.bf16.vlgmr.msrb.gmra.mxu0 %v16572_v8  ;;  %v7371_v49 = vadd.f32 %v7370_v47, %v7357_v28  ;;  %v13202_v47 = vld [vmem:[#allocation19 + $0x774] sm:$0xf0]  ;;  %v13082_v28 = vld [vmem:[#allocation19 + $0x684] sm:$0xf0] }
 0x822   :  { %9606 = vmatpush.bf16.msrb.mxu3 %v12713_v56  ;;  %9620 = vmatpush.bf16.msra.mxu0 %v12809_v6  ;;  %v7386_v37 = vpop.f32.mrf.mxu0  ;;  %v12650_v56 = vld [vmem:[#allocation19 + $0x324] sm:$0xf0]  ;;  %v7399_v39 = vadd.f32 %v7398_v52, %v7385_v36  ;;  %v7359_v6 = vadd.f32 %v7358_v62, %v7345_v10  ;;  %v14098_v62 = vld [vmem:[#allocation19 + $0x3c4] sm:$0xf]  ;;  %v12734_v52 = vld [vmem:[#allocation19 + $0x3cc] sm:$0xf0] }
 0x823   :  { %v7412_v13 = vpop.f32.mrf.mxu2  ;;  %v7387_v61 = vadd.f32 %v7386_v37, %v5460_v19  ;;  %v12653_v27 = vor.u32 %v14077_v44, %v12650_v56  ;;  %v13094_v19 = vld [vmem:[#allocation19 + $0x69c] sm:$0xf0]  ;;  %v12737_v36 = vor.u32 %v14098_v62, %v12734_v52  ;;  %v14164_v56 = vld [vmem:[#allocation19 + $0x5d4] sm:$0xf]  ;;  %v13166_v62 = vld [vmem:[#allocation19 + $0x72c] sm:$0xf0] }
 0x824   :  { %v7413_v38 = vadd.f32 %v7412_v13, %v7399_v39  ;;  %v12917_v13 = vor.u32 %v14143_v25, %v12914_v57  ;;  %v13097_v37 = vor.u32 %v14188_v24, %v13094_v19  ;;  %v12902_v44 = vld [vmem:[#allocation19 + $0x51c] sm:$0xf0]  ;;  %v14212_v10 = vld [vmem:[#allocation19 + $0x754] sm:$0xf]  ;;  %v14137_v39 = vld [vmem:[#allocation19 + $0x4fc] sm:$0xf] }
 0x825   :  { %v14158_v25 = vld [vmem:[#allocation19 + $0x5a4] sm:$0xf]  ;;  %v12974_v57 = vld [vmem:[#allocation19 + $0x5ac] sm:$0xf0]  ;;  %v12866_v19 = vld [vmem:[#allocation19 + $0x4d4] sm:$0xf0] }
 0x826   :  { %9607 = vmatpush.bf16.msrb.mxu3 %v12701_v0  ;;  %9621 = vmatpush.bf16.msra.mxu0 %v12797_v59  ;;  %v7400_v0 = vpop.f32.mrf.mxu1  ;;  %v12749_v59 = vor.u32 %v14101_v16, %v12746_v58  ;;  %v7428_v15 = vmax.f32 %v7413_v38, 0.0  ;;  %v12905_v16 = vor.u32 %v14140_v46, %v12902_v44  ;;  %v13001_v58 = vor.u32 %v14164_v56, %v12998_v40  ;;  %v14209_v38 = vld [vmem:[#allocation19 + $0x73c] sm:$0xf]  ;;  %v13154_v46 = vld [vmem:[#allocation19 + $0x714] sm:$0xf0] }
 0x827   :  { %v7401_v1 = vadd.f32 %v7400_v0, %v7387_v61  ;;  %v13205_v61 = vor.u32 %v14215_v21, %v13202_v47  ;;  %v14176_v47 = vld [vmem:[#allocation19 + $0x634] sm:$0xf]  ;;  %v12854_v40 = vld [vmem:[#allocation19 + $0x4bc] sm:$0xf0] }
 0x828   :  { %v7372_v41 = vpop.f32.mrf.mxu3  ;;  %v14128_v44 = vld [vmem:[#allocation19 + $0x4b4] sm:$0xf] }
 0x829   :  { %v7373_v43 = vadd.f32 %v7372_v41, %v7359_v6  ;;  %v14161_v6 = vld [vmem:[#allocation19 + $0x5bc] sm:$0xf] }
 0x82a   :  { %9608 = vmatpush.bf16.msrb.mxu3 %v12689_v22  ;;  %9622 = vmatpush.bf16.msra.mxu0 %v12785_v53  ;;  %v12641_v22 = vor.u32 %v14074_v32, %v12638_v33  ;;  %v13010_v53 = vld [vmem:[#allocation19 + $0x5f4] sm:$0xf0]  ;;  %v12890_v33 = vld [vmem:[#allocation19 + $0x504] sm:$0xf0] }
 0x82b   :  { %v7414_v60 = vpop.f32.mrf.mxu2  ;;  %v7439_v50 = vmax.f32 %v7373_v43, 0.0  ;;  %v12893_v41 = vor.u32 %v14137_v39, %v12890_v33  ;;  %v14134_v43 = vld [vmem:[#allocation19 + $0x4e4] sm:$0xf]  ;;  %v12857_v39 = vor.u32 %v14128_v44, %v12854_v40  ;;  %v14125_v33 = vld [vmem:[#allocation19 + $0x49c] sm:$0xf] }
 0x82c   :  { %v7415_v3 = vadd.f32 %v7414_v60, %v7401_v1  ;;  %v13178_v1 = vld [vmem:[#allocation19 + $0x744] sm:$0xf0]  ;;  %v13073_v60 = vor.u32 %v14182_v31, %v13070_v20  ;;  %v14236_v40 = vld [vmem:[#allocation19 + $0x814] sm:$0xf] }
 0x82d   :  { %v12938_v31 = vld [vmem:[#allocation19 + $0x564] sm:$0xf0] }
 0x82e   :  { %9609 = vmatpush.bf16.msrb.mxu3 %v12677_v54  ;;  %9623 = vmatpush.bf16.msra.mxu0 %v12773_v11  ;;  %v7427_v54 = vmax.f32 %v7371_v49, 0.0  ;;  %v7440_v9 = vmax.f32 %v7415_v3, 0.0  ;;  %v12986_v49 = vld [vmem:[#allocation19 + $0x5c4] sm:$0xf0]  ;;  %v14179_v3 = vld [vmem:[#allocation19 + $0x64c] sm:$0xf] }
 0x830   :  { %v16651_v11 = vpack.c.bf16 %v7439_v50, %v7427_v54  ;;  %v16653_v12 = vpack.c.bf16 %v7440_v9, %v7428_v15  ;;  %v12977_v54 = vor.u32 %v14158_v25, %v12974_v57  ;;  %v14131_v50 = vld [vmem:[#allocation19 + $0x4cc] sm:$0xf]  ;;  %v12962_v9 = vld [vmem:[#allocation19 + $0x594] sm:$0xf0]  ;;  %v14122_v57 = vld [vmem:[#allocation19 + $0x484] sm:$0xf] }
 0x831   :  { %v14155_v15 = vld [vmem:[#allocation19 + $0x58c] sm:$0xf] }
 0x832   :  { %9610 = vmatpush.bf16.msrb.mxu3 %v12665_v55  ;;  %9624 = vmatpush.bf16.msra.mxu0 %v12761_v42  ;;  %v13013_v55 = vor.u32 %v14167_v34, %v13010_v53  ;;  %v14185_v42 = vld [vmem:[#allocation19 + $0x67c] sm:$0xf]  ;;  %v13181_v34 = vor.u32 %v14209_v38, %v13178_v1  ;;  %v14206_v53 = vld [vmem:[#allocation19 + $0x724] sm:$0xf]  ;;  %v13022_v1 = vld [vmem:[#allocation19 + $0x60c] sm:$0xf0] }
 0x833   :  { %9529 = vmatmul.bf16.vlgmr.msra.gmra.mxu1 %v16651_v11  ;;  %9543 = vmatmul.bf16.vlgmr.msrb.gmra.mxu2 %v16653_v12  ;;  %v13085_v32 = vor.u32 %v14185_v42, %v13082_v28  ;;  %v13169_v21 = vor.u32 %v14206_v53, %v13166_v62  ;;  %v12950_v42 = vld [vmem:[#allocation19 + $0x57c] sm:$0xf0]  ;;  %v14170_v38 = vld [vmem:[#allocation19 + $0x604] sm:$0xf]  ;;  %v12926_v53 = vld [vmem:[#allocation19 + $0x54c] sm:$0xf0] }
 0x834   :  { %9633 = vmatpush.bf16.msra.mxu1 %v12917_v13  ;;  %9647 = vmatpush.bf16.msrb.mxu2 %v13013_v55  ;;  %v13046_v13 = vld [vmem:[#allocation19 + $0x63c] sm:$0xf0]  ;;  %v14203_v55 = vld [vmem:[#allocation19 + $0x70c] sm:$0xf] }
 0x835   :  { %v13049_v56 = vor.u32 %v14176_v47, %v13046_v13  ;;  %v13157_v28 = vor.u32 %v14203_v55, %v13154_v46  ;;  %v14239_v62 = vld [vmem:[#allocation19 + $0x82c] sm:$0xf]  ;;  %v13998_v55 = vld [vmem:[#allocation19 + $0xa0] sm:$0xf0]  ;;  %v12440_v46 = vld [vmem:[#allocation19 + $0x170] sm:$0xf] }
 0x836   :  { %9611 = vmatpush.bf16.msrb.mxu3 %v12653_v27  ;;  %9625 = vmatpush.bf16.msra.mxu0 %v12749_v59  ;;  %v13190_v27 = vld [vmem:[#allocation19 + $0x75c] sm:$0xf0]  ;;  %v12989_v59 = vor.u32 %v14161_v6, %v12986_v49  ;;  %v12842_v49 = vld [vmem:[#allocation19 + $0x4a4] sm:$0xf0] }
 0x837   :  { %v13193_v0 = vor.u32 %v14212_v10, %v13190_v27  ;;  %v14173_v10 = vld [vmem:[#allocation19 + $0x61c] sm:$0xf]  ;;  %v13034_v27 = vld [vmem:[#allocation19 + $0x624] sm:$0xf0] }
 0x838   :  { %9634 = vmatpush.bf16.msra.mxu1 %v12905_v16  ;;  %9648 = vmatpush.bf16.msrb.mxu2 %v13001_v58  ;;  %v14200_v16 = vld [vmem:[#allocation19 + $0x6f4] sm:$0xf]  ;;  %v13142_v58 = vld [vmem:[#allocation19 + $0x6fc] sm:$0xf0]  ;;  %v13037_v6 = vor.u32 %v14173_v10, %v13034_v27 }
 0x839   :  { %v13145_v20 = vor.u32 %v14200_v16, %v13142_v58  ;;  %v14260_v10 = vld [vmem:[#allocation19 + $0x8d4] sm:$0xf]  ;;  %v13382_v27 = vld [vmem:[#allocation19 + $0x8dc] sm:$0xf0]  ;;  %v13995_v58 = vld [vmem:[#allocation19 + $0x88] sm:$0xf0] }
 0x83a   :  { %9612 = vmatpush.bf16.msrb.mxu3 %v12641_v22  ;;  %9626 = vmatpush.bf16.msra.mxu0 %v12737_v36  ;;  %v12878_v22 = vld [vmem:[#allocation19 + $0x4ec] sm:$0xf0]  ;;  %v12869_v36 = vor.u32 %v14131_v50, %v12866_v19  ;;  %v13298_v50 = vld [vmem:[#allocation19 + $0x834] sm:$0xf0]  ;;  %v12320_v16 = vld [vmem:[#allocation19 + $0x80] sm:$0xf] }
 0x83b   :  { %v12881_v52 = vor.u32 %v14134_v43, %v12878_v22  ;;  %v12344_v43 = vld [vmem:[#allocation19 + $0xb0] sm:$0xf]  ;;  %v12845_v22 = vor.u32 %v14125_v33, %v12842_v49  ;;  %v13394_v19 = vld [vmem:[#allocation19 + $0x8f4] sm:$0xf0]  ;;  %v14233_v49 = vld [vmem:[#allocation19 + $0x7fc] sm:$0xf] }
 0x83c   :  { %9635 = vmatpush.bf16.msra.mxu1 %v12893_v41  ;;  %9649 = vmatpush.bf16.msrb.mxu2 %v12989_v59  ;;  %v14197_v41 = vld [vmem:[#allocation19 + $0x6dc] sm:$0xf]  ;;  %v13130_v59 = vld [vmem:[#allocation19 + $0x6e4] sm:$0xf0] }
 0x83d   :  { %9613 = vmatmul.bf16.vlgmr.msrb.gmra.mxu3 %v16623_v7  ;;  %9627 = vmatmul.bf16.vlgmr.msra.gmra.mxu0 %v16625_v5 }
 0x83e   :  { %9661 = vmatpush.bf16.msra.mxu3 %v13109_v4  ;;  %9675 = vmatpush.bf16.msrb.mxu0 %v13205_v61  ;;  %v13058_v4 = vld [vmem:[#allocation19 + $0x654] sm:$0xf0]  ;;  %v14152_v61 = vld [vmem:[#allocation19 + $0x574] sm:$0xf] }
 0x83f   :  { %v13061_v24 = vor.u32 %v14179_v3, %v13058_v4  ;;  %v13025_v3 = vor.u32 %v14170_v38, %v13022_v1  ;;  %v14146_v4 = vld [vmem:[#allocation19 + $0x544] sm:$0xf]  ;;  %v14257_v38 = vld [vmem:[#allocation19 + $0x8bc] sm:$0xf]  ;;  %v13370_v1 = vld [vmem:[#allocation19 + $0x8c4] sm:$0xf0] }
 0x840   :  { %9636 = vmatpush.bf16.msra.mxu1 %v12881_v52  ;;  %9650 = vmatpush.bf16.msrb.mxu2 %v12977_v54  ;;  %v13133_v52 = vor.u32 %v14197_v41, %v13130_v59  ;;  %v12929_v13 = vor.u32 %v14146_v4, %v12926_v53  ;;  %v12308_v41 = vld [vmem:[#allocation19 + $0x68] sm:$0xf]  ;;  %v13992_v59 = vld [vmem:[#allocation19 + $0x70] sm:$0xf0]  ;;  %v14254_v53 = vld [vmem:[#allocation19 + $0x8a4] sm:$0xf] }
 0x842   :  { %9662 = vmatpush.bf16.msra.mxu3 %v13097_v37  ;;  %9676 = vmatpush.bf16.msrb.mxu0 %v13193_v0  ;;  %v12965_v37 = vor.u32 %v14155_v15, %v12962_v9  ;;  %v14149_v0 = vld [vmem:[#allocation19 + $0x55c] sm:$0xf]  ;;  %v14194_v15 = vld [vmem:[#allocation19 + $0x6c4] sm:$0xf]  ;;  %v13118_v9 = vld [vmem:[#allocation19 + $0x6cc] sm:$0xf0] }
 0x843   :  { %9585 = vmatmul.bf16.vlgmr.msrb.gmra.mxu1 %v16577_v29  ;;  %9599 = vmatmul.bf16.vlgmr.msra.gmra.mxu2 %v16579_v51  ;;  %v12941_v25 = vor.u32 %v14149_v0, %v12938_v31  ;;  %v13274_v0 = vld [vmem:[#allocation19 + $0x804] sm:$0xf0]  ;;  %v12321_v31 = vor.u32 %v13995_v58, %v12320_v16  ;;  %v14248_v16 = vld [vmem:[#allocation19 + $0x874] sm:$0xf]  ;;  %v13334_v58 = vld [vmem:[#allocation19 + $0x87c] sm:$0xf0] }
 0x844   :  { %9637 = vmatpush.bf16.msra.mxu1 %v12869_v36  ;;  %9651 = vmatpush.bf16.msrb.mxu2 %v12965_v37  ;;  %v14025_v36 = vld [vmem:[#allocation19 + $0x178] sm:$0xf0]  ;;  %v13301_v37 = vor.u32 %v14239_v62, %v13298_v50  ;;  %v13358_v62 = vld [vmem:[#allocation19 + $0x8ac] sm:$0xf0]  ;;  %v12404_v50 = vld [vmem:[#allocation19 + $0x128] sm:$0xf] }
 0x846   :  { %9663 = vmatpush.bf16.msra.mxu3 %v13085_v32  ;;  %9677 = vmatpush.bf16.msrb.mxu0 %v13181_v34  ;;  %v12953_v32 = vor.u32 %v14152_v61, %v12950_v42  ;;  %v12830_v34 = vld [vmem:[#allocation19 + $0x48c] sm:$0xf0]  ;;  %v13286_v61 = vld [vmem:[#allocation19 + $0x81c] sm:$0xf0] }
 0x847   :  { %v12833_v47 = vor.u32 %v14122_v57, %v12830_v34  ;;  %v13289_v33 = vor.u32 %v14236_v40, %v13286_v61  ;;  %v14230_v57 = vld [vmem:[#allocation19 + $0x7e4] sm:$0xf]  ;;  %v13262_v34 = vld [vmem:[#allocation19 + $0x7ec] sm:$0xf0] }
 0x848   :  { %9638 = vmatpush.bf16.msra.mxu1 %v12857_v39  ;;  %9652 = vmatpush.bf16.msrb.mxu2 %v12953_v32  ;;  %v12428_v39 = vld [vmem:[#allocation19 + $0x158] sm:$0xf]  ;;  %v14022_v32 = vld [vmem:[#allocation19 + $0x160] sm:$0xf0] }
 0x84a   :  { %9664 = vmatpush.bf16.msra.mxu3 %v13073_v60  ;;  %9678 = vmatpush.bf16.msrb.mxu0 %v13169_v21  ;;  %v14001_v60 = vld [vmem:[#allocation19 + $0xb8] sm:$0xf0]  ;;  %v12332_v21 = vld [vmem:[#allocation19 + $0x98] sm:$0xf] }
 0x84b   :  { %v12345_v54 = vor.u32 %v14001_v60, %v12344_v43  ;;  %v12333_v42 = vor.u32 %v13998_v55, %v12332_v21  ;;  %v12416_v43 = vld [vmem:[#allocation19 + $0x140] sm:$0xf]  ;;  %v14019_v60 = vld [vmem:[#allocation19 + $0x148] sm:$0xf0]  ;;  %v13250_v21 = vld [vmem:[#allocation19 + $0x7d4] sm:$0xf0] }
 0x84c   :  { %9639 = vmatpush.bf16.msra.mxu1 %v12845_v22  ;;  %9653 = vmatpush.bf16.msrb.mxu2 %v12941_v25  ;;  %v13277_v22 = vor.u32 %v14233_v49, %v13274_v0  ;;  %v13373_v25 = vor.u32 %v14257_v38, %v13370_v1  ;;  %v12417_v4 = vor.u32 %v14019_v60, %v12416_v43  ;;  %v14251_v55 = vld [vmem:[#allocation19 + $0x88c] sm:$0xf]  ;;  %v12260_v43 = vld [vmem:[#allocation19 + $0x8] sm:$0xf]  ;;  %v13980_v60 = vld [vmem:[#allocation19 + $0x10] sm:$0xf0] }
 0x84d   :  { %v13337_v0 = vor.u32 %v14248_v16, %v13334_v58  ;;  %v14046_v16 = vld [vmem:[#allocation19 + $0x220] sm:$0xf0]  ;;  %v12620_v58 = vld [vmem:[#allocation19 + $0x2d8] sm:$0xf] }
 0x84e   :  { %9665 = vmatpush.bf16.msra.mxu3 %v13061_v24  ;;  %9679 = vmatpush.bf16.msrb.mxu0 %v13157_v28  ;;  %v14263_v24 = vld [vmem:[#allocation19 + $0x8ec] sm:$0xf]  ;;  %v12441_v28 = vor.u32 %v14025_v36, %v12440_v46  ;;  %v13346_v46 = vld [vmem:[#allocation19 + $0x894] sm:$0xf0] }
 0x84f   :  { %v13397_v44 = vor.u32 %v14263_v24, %v13394_v19  ;;  %v14016_v24 = vld [vmem:[#allocation19 + $0x130] sm:$0xf0]  ;;  %v13265_v19 = vor.u32 %v14230_v57, %v13262_v34  ;;  %v12284_v36 = vld [vmem:[#allocation19 + $0x38] sm:$0xf]  ;;  %v13349_v61 = vor.u32 %v14251_v55, %v13346_v46  ;;  %v12728_v34 = vld [vmem:[#allocation19 + $0x3b0] sm:$0xf] }
 0x850   :  { %9640 = vmatpush.bf16.msra.mxu1 %v12833_v47  ;;  %9654 = vmatpush.bf16.msrb.mxu2 %v12929_v13  ;;  %v12405_v13 = vor.u32 %v14016_v24, %v12404_v50  ;;  %v13310_v24 = vld [vmem:[#allocation19 + $0x84c] sm:$0xf0]  ;;  %v14004_v46 = vld [vmem:[#allocation19 + $0xd0] sm:$0xf0] }
 0x852   :  { %9666 = vmatpush.bf16.msra.mxu3 %v13049_v56  ;;  %9680 = vmatpush.bf16.msrb.mxu0 %v13145_v20  ;;  %v13121_v56 = vor.u32 %v14194_v15, %v13118_v9  ;;  %v12429_v20 = vor.u32 %v14022_v32, %v12428_v39  ;;  %v13361_v15 = vor.u32 %v14254_v53, %v13358_v62  ;;  %v14227_v9 = vld [vmem:[#allocation19 + $0x7cc] sm:$0xf]  ;;  %v12272_v39 = vld [vmem:[#allocation19 + $0x20] sm:$0xf]  ;;  %v14218_v53 = vld [vmem:[#allocation19 + $0x784] sm:$0xf] }
 0x853   :  { %9641 = vmatmul.bf16.vlgmr.msra.gmra.mxu1 %v16615_v35  ;;  %9655 = vmatmul.bf16.vlgmr.msrb.gmra.mxu2 %v16617_v45  ;;  %v13253_v40 = vor.u32 %v14227_v9, %v13250_v21  ;;  %v13983_v32 = vld [vmem:[#allocation19 + $0x28] sm:$0xf0]  ;;  %v13214_v62 = vld [vmem:[#allocation19 + $0x78c] sm:$0xf0] }
 0x854   :  { %9689 = vmatpush.bf16.msrb.mxu1 %v13301_v37  ;;  %9703 = vmatpush.bf16.msra.mxu2 %v13397_v44  ;;  %v13986_v37 = vld [vmem:[#allocation19 + $0x40] sm:$0xf0]  ;;  %v12392_v44 = vld [vmem:[#allocation19 + $0x110] sm:$0xf]  ;;  %v12273_v38 = vor.u32 %v13983_v32, %v12272_v39  ;;  %v13217_v55 = vor.u32 %v14218_v53, %v13214_v62  ;;  %v12704_v32 = vld [vmem:[#allocation19 + $0x380] sm:$0xf] }
 0x855   :  { %v12632_v21 = vld [vmem:[#allocation19 + $0x2f0] sm:$0xf]  ;;  %v14070_v39 = vld [vmem:[#allocation19 + $0x2e0] sm:$0xf0]  ;;  %v12500_v53 = vld [vmem:[#allocation19 + $0x1e8] sm:$0xf] }
 0x856   :  { %9667 = vmatpush.bf16.msra.mxu3 %v13037_v6  ;;  %9681 = vmatpush.bf16.msrb.mxu0 %v13133_v52  ;;  %v13385_v6 = vor.u32 %v14260_v10, %v13382_v27  ;;  %v12296_v52 = vld [vmem:[#allocation19 + $0x50] sm:$0xf]  ;;  %v12285_v10 = vor.u32 %v13986_v37, %v12284_v36  ;;  %v12716_v36 = vld [vmem:[#allocation19 + $0x398] sm:$0xf]  ;;  %v14094_v37 = vld [vmem:[#allocation19 + $0x3a0] sm:$0xf0] }
 0x857   :  { %v14040_v62 = vld [vmem:[#allocation19 + $0x1f0] sm:$0xf0] }
 0x858   :  { %9690 = vmatpush.bf16.msrb.mxu1 %v13289_v33  ;;  %9704 = vmatpush.bf16.msra.mxu2 %v13385_v6  ;;  %v12380_v33 = vld [vmem:[#allocation19 + $0xf8] sm:$0xf]  ;;  %v14010_v6 = vld [vmem:[#allocation19 + $0x100] sm:$0xf0] }
 0x859   :  { %v12381_v1 = vor.u32 %v14010_v6, %v12380_v33  ;;  %v14091_v33 = vld [vmem:[#allocation19 + $0x388] sm:$0xf0] }
 0x85a   :  { %9668 = vmatpush.bf16.msra.mxu3 %v13025_v3  ;;  %9682 = vmatpush.bf16.msrb.mxu0 %v13121_v56  ;;  %v12309_v3 = vor.u32 %v13992_v59, %v12308_v41  ;;  %v14013_v56 = vld [vmem:[#allocation19 + $0x118] sm:$0xf0]  ;;  %v13322_v59 = vld [vmem:[#allocation19 + $0x864] sm:$0xf0] }
 0x85b   :  { %v12393_v27 = vor.u32 %v14013_v56, %v12392_v44  ;;  %v14245_v41 = vld [vmem:[#allocation19 + $0x85c] sm:$0xf] }
 0x85c   :  { %9691 = vmatpush.bf16.msrb.mxu1 %v13277_v22  ;;  %9705 = vmatpush.bf16.msra.mxu2 %v13373_v25  ;;  %v12368_v22 = vld [vmem:[#allocation19 + $0xe0] sm:$0xf]  ;;  %v14007_v25 = vld [vmem:[#allocation19 + $0xe8] sm:$0xf0] }
 0x85d   :  { %9669 = vmatmul.bf16.vlgmr.msra.gmra.mxu3 %v16634_v14  ;;  %9683 = vmatmul.bf16.vlgmr.msrb.gmra.mxu0 %v16642_v18  ;;  %v12369_v50 = vor.u32 %v14007_v25, %v12368_v22 }
 0x85e   :  { %9717 = vmatpush.bf16.msrb.mxu3 %v12345_v54  ;;  %9731 = vmatpush.bf16.msra.mxu0 %v12441_v28  ;;  %v13989_v54 = vld [vmem:[#allocation19 + $0x58] sm:$0xf0]  ;;  %v13238_v28 = vld [vmem:[#allocation19 + $0x7bc] sm:$0xf0] }
 0x85f   :  { %v12297_v47 = vor.u32 %v13989_v54, %v12296_v52  ;;  %v14242_v52 = vld [vmem:[#allocation19 + $0x844] sm:$0xf]  ;;  %v12261_v54 = vor.u32 %v13980_v60, %v12260_v43  ;;  %v14067_v43 = vld [vmem:[#allocation19 + $0x2c8] sm:$0xf0]  ;;  %v12692_v60 = vld [vmem:[#allocation19 + $0x368] sm:$0xf] }
 0x860   :  { %9692 = vmatpush.bf16.msrb.mxu1 %v13265_v19  ;;  %9706 = vmatpush.bf16.msra.mxu2 %v13361_v15  ;;  %v12536_v19 = vld [vmem:[#allocation19 + $0x230] sm:$0xf]  ;;  %v14049_v15 = vld [vmem:[#allocation19 + $0x238] sm:$0xf0]  ;;  %v13313_v44 = vor.u32 %v14242_v52, %v13310_v24  ;;  %v12596_v52 = vld [vmem:[#allocation19 + $0x2a8] sm:$0xf] }
 0x861   :  { %v12537_v56 = vor.u32 %v14049_v15, %v12536_v19  ;;  %v14085_v24 = vld [vmem:[#allocation19 + $0x358] sm:$0xf0]  ;;  %v12501_v15 = vor.u32 %v14040_v62, %v12500_v53  ;;  %v12452_v53 = vld [vmem:[#allocation19 + $0x188] sm:$0xf] }
 0x862   :  { %9718 = vmatpush.bf16.msrb.mxu3 %v12333_v42  ;;  %9732 = vmatpush.bf16.msra.mxu0 %v12429_v20  ;;  %v14224_v42 = vld [vmem:[#allocation19 + $0x7b4] sm:$0xf]  ;;  %v13226_v20 = vld [vmem:[#allocation19 + $0x7a4] sm:$0xf0] }
 0x863   :  { %v13241_v49 = vor.u32 %v14224_v42, %v13238_v28  ;;  %v14121_v42 = vld [vmem:[#allocation19 + $0x478] sm:$0xf0] }
 0x864   :  { %9693 = vmatpush.bf16.msrb.mxu1 %v13253_v40  ;;  %9707 = vmatpush.bf16.msra.mxu2 %v13349_v61  ;;  %v12824_v61 = vld [vmem:[#allocation19 + $0x470] sm:$0xf] }
 0x865   :  { %v12825_v6 = vor.u32 %v14121_v42, %v12824_v61  ;;  %v12776_v61 = vld [vmem:[#allocation19 + $0x410] sm:$0xf]  ;;  %v14109_v42 = vld [vmem:[#allocation19 + $0x418] sm:$0xf0] }
 0x866   :  { %9719 = vmatpush.bf16.msrb.mxu3 %v12321_v31  ;;  %9733 = vmatpush.bf16.msra.mxu0 %v12417_v4  ;;  %v14221_v31 = vld [vmem:[#allocation19 + $0x79c] sm:$0xf]  ;;  %v13325_v4 = vor.u32 %v14245_v41, %v13322_v59  ;;  %v14043_v41 = vld [vmem:[#allocation19 + $0x208] sm:$0xf0]  ;;  %v12608_v59 = vld [vmem:[#allocation19 + $0x2c0] sm:$0xf] }
 0x867   :  { %v13229_v57 = vor.u32 %v14221_v31, %v13226_v20  ;;  %v14118_v31 = vld [vmem:[#allocation19 + $0x460] sm:$0xf0]  ;;  %v12621_v20 = vor.u32 %v14070_v39, %v12620_v58  ;;  %v12572_v58 = vld [vmem:[#allocation19 + $0x278] sm:$0xf] }
 0x868   :  { %9694 = vmatpush.bf16.msrb.mxu1 %v13241_v49  ;;  %9708 = vmatpush.bf16.msra.mxu2 %v13337_v0  ;;  %v12812_v0 = vld [vmem:[#allocation19 + $0x458] sm:$0xf]  ;;  %v14058_v39 = vld [vmem:[#allocation19 + $0x280] sm:$0xf0] }
 0x869   :  { %v12813_v22 = vor.u32 %v14118_v31, %v12812_v0  ;;  %v12764_v0 = vld [vmem:[#allocation19 + $0x3f8] sm:$0xf]  ;;  %v14106_v31 = vld [vmem:[#allocation19 + $0x400] sm:$0xf0] }
 0x86a   :  { %9720 = vmatpush.bf16.msrb.mxu3 %v12309_v3  ;;  %9734 = vmatpush.bf16.msra.mxu0 %v12405_v13  ;;  %v14097_v3 = vld [vmem:[#allocation19 + $0x3b8] sm:$0xf0]  ;;  %v12356_v13 = vld [vmem:[#allocation19 + $0xc8] sm:$0xf] }
 0x86b   :  { %v12729_v9 = vor.u32 %v14097_v3, %v12728_v34  ;;  %v12357_v28 = vor.u32 %v14004_v46, %v12356_v13  ;;  %v14115_v34 = vld [vmem:[#allocation19 + $0x448] sm:$0xf0]  ;;  %v12609_v3 = vor.u32 %v14067_v43, %v12608_v59  ;;  %v12488_v13 = vld [vmem:[#allocation19 + $0x1d0] sm:$0xf]  ;;  %v12560_v59 = vld [vmem:[#allocation19 + $0x260] sm:$0xf] }
 0x86c   :  { %9695 = vmatpush.bf16.msrb.mxu1 %v13229_v57  ;;  %9709 = vmatpush.bf16.msra.mxu2 %v13325_v4  ;;  %v12800_v57 = vld [vmem:[#allocation19 + $0x440] sm:$0xf]  ;;  %v12584_v46 = vld [vmem:[#allocation19 + $0x290] sm:$0xf]  ;;  %v14055_v43 = vld [vmem:[#allocation19 + $0x268] sm:$0xf0] }
 0x86d   :  { %v12801_v19 = vor.u32 %v14115_v34, %v12800_v57  ;;  %v14193_v57 = vld [vmem:[#allocation19 + $0x6b8] sm:$0xf0]  ;;  %v12561_v62 = vor.u32 %v14055_v43, %v12560_v59  ;;  %v12896_v59 = vld [vmem:[#allocation19 + $0x500] sm:$0xf]  ;;  %v14139_v43 = vld [vmem:[#allocation19 + $0x508] sm:$0xf0] }
 0x86e   :  { %9721 = vmatpush.bf16.msrb.mxu3 %v12297_v47  ;;  %9735 = vmatpush.bf16.msra.mxu0 %v12393_v27  ;;  %v14073_v47 = vld [vmem:[#allocation19 + $0x2f8] sm:$0xf0]  ;;  %v12524_v27 = vld [vmem:[#allocation19 + $0x218] sm:$0xf] }
 0x86f   :  { %v12633_v40 = vor.u32 %v14073_v47, %v12632_v21  ;;  %v12525_v49 = vor.u32 %v14046_v16, %v12524_v27  ;;  %v12476_v27 = vld [vmem:[#allocation19 + $0x1b8] sm:$0xf]  ;;  %v14034_v16 = vld [vmem:[#allocation19 + $0x1c0] sm:$0xf0] }
 0x870   :  { %9696 = vmatpush.bf16.msrb.mxu1 %v13217_v55  ;;  %9710 = vmatpush.bf16.msra.mxu2 %v13313_v44  ;;  %v14037_v55 = vld [vmem:[#allocation19 + $0x1d8] sm:$0xf0]  ;;  %v14082_v44 = vld [vmem:[#allocation19 + $0x340] sm:$0xf0] }
 0x872   :  { %9722 = vmatpush.bf16.msrb.mxu3 %v12285_v10  ;;  %9736 = vmatpush.bf16.msra.mxu0 %v12381_v1  ;;  %v12717_v10 = vor.u32 %v14094_v37, %v12716_v36  ;;  %v12512_v1 = vld [vmem:[#allocation19 + $0x200] sm:$0xf]  ;;  %v14061_v36 = vld [vmem:[#allocation19 + $0x298] sm:$0xf0]  ;;  %v12668_v37 = vld [vmem:[#allocation19 + $0x338] sm:$0xf] }
 0x873   :  { %9697 = vmatmul.bf16.vlgmr.msrb.gmra.mxu1 %v16651_v11  ;;  %9711 = vmatmul.bf16.vlgmr.msra.gmra.mxu2 %v16653_v12  ;;  %v12513_v25 = vor.u32 %v14043_v41, %v12512_v1  ;;  %v12464_v1 = vld [vmem:[#allocation19 + $0x1a0] sm:$0xf]  ;;  %v14031_v41 = vld [vmem:[#allocation19 + $0x1a8] sm:$0xf0] }
 0x874   :  { %9745 = vmatpush.bf16.msra.mxu1 %v12537_v56  ;;  %9759 = vmatpush.bf16.msrb.mxu2 %v12633_v40  ;;  %v12489_v40 = vor.u32 %v14037_v55, %v12488_v13  ;;  %v12465_v34 = vor.u32 %v14031_v41, %v12464_v1  ;;  %v13100_v13 = vld [vmem:[#allocation19 + $0x698] sm:$0xf]  ;;  %v14190_v55 = vld [vmem:[#allocation19 + $0x6a0] sm:$0xf0]  ;;  %v16674_v1 = vpop.f32.mrf.mxu1 }
 0x876   :  { %9723 = vmatpush.bf16.msrb.mxu3 %v12273_v38  ;;  %9737 = vmatpush.bf16.msra.mxu0 %v12369_v50  ;;  %v12705_v38 = vor.u32 %v14091_v33, %v12704_v32  ;;  %v12680_v50 = vld [vmem:[#allocation19 + $0x350] sm:$0xf]  ;;  %v12656_v32 = vld [vmem:[#allocation19 + $0x320] sm:$0xf]  ;;  %v14079_v33 = vld [vmem:[#allocation19 + $0x328] sm:$0xf0] }
 0x877   :  { %v12681_v47 = vor.u32 %v14085_v24, %v12680_v50  ;;  %v12548_v50 = vld [vmem:[#allocation19 + $0x248] sm:$0xf]  ;;  %v14052_v24 = vld [vmem:[#allocation19 + $0x250] sm:$0xf0] }
 0x878   :  { %9746 = vmatpush.bf16.msra.mxu1 %v12525_v49  ;;  %9760 = vmatpush.bf16.msrb.mxu2 %v12621_v20  ;;  %v12477_v49 = vor.u32 %v14034_v16, %v12476_v27  ;;  %v12573_v20 = vor.u32 %v14058_v39, %v12572_v58  ;;  %v12908_v27 = vld [vmem:[#allocation19 + $0x518] sm:$0xf]  ;;  %v14142_v16 = vld [vmem:[#allocation19 + $0x520] sm:$0xf0] }
 0x879   :  { %v13004_v39 = vld [vmem:[#allocation19 + $0x5d8] sm:$0xf] }
 0x87a   :  { %9724 = vmatpush.bf16.msrb.mxu3 %v12261_v54  ;;  %9738 = vmatpush.bf16.msra.mxu0 %v12357_v28  ;;  %v14064_v54 = vld [vmem:[#allocation19 + $0x2b0] sm:$0xf0]  ;;  %v12585_v28 = vor.u32 %v14061_v36, %v12584_v46  ;;  %v12740_v36 = vld [vmem:[#allocation19 + $0x3c8] sm:$0xf] }
 0x87b   :  { %v12597_v21 = vor.u32 %v14064_v54, %v12596_v52  ;;  %v14028_v54 = vld [vmem:[#allocation19 + $0x190] sm:$0xf0] }
 0x87c   :  { %9747 = vmatpush.bf16.msra.mxu1 %v12513_v25  ;;  %9761 = vmatpush.bf16.msrb.mxu2 %v12609_v3  ;;  %v13112_v25 = vld [vmem:[#allocation19 + $0x6b0] sm:$0xf]  ;;  %v12752_v3 = vld [vmem:[#allocation19 + $0x3e0] sm:$0xf]  ;;  %v12453_v46 = vor.u32 %v14028_v54, %v12452_v53  ;;  %v14211_v53 = vld [vmem:[#allocation19 + $0x748] sm:$0xf0] }
 0x87d   :  { %9725 = vmatmul.bf16.vlgmr.msrb.gmra.mxu3 %v16566_v23  ;;  %v14088_v23 = vld [vmem:[#allocation19 + $0x370] sm:$0xf0]  ;;  %9739 = vmatmul.bf16.vlgmr.msra.gmra.mxu0 %v16572_v8 }
 0x87e   :  { %9773 = vmatpush.bf16.msra.mxu3 %v12729_v9  ;;  %9787 = vmatpush.bf16.msrb.mxu0 %v12825_v6  ;;  %v12693_v4 = vor.u32 %v14088_v23, %v12692_v60  ;;  %v12788_v9 = vld [vmem:[#allocation19 + $0x428] sm:$0xf]  ;;  %v14112_v8 = vld [vmem:[#allocation19 + $0x430] sm:$0xf0]  ;;  %v12777_v6 = vor.u32 %v14109_v42, %v12776_v61  ;;  %v14217_v61 = vld [vmem:[#allocation19 + $0x778] sm:$0xf0]  ;;  %v16669_v42 = vpop.f32.mrf.mxu3 }
 0x87f   :  { %v12789_v56 = vor.u32 %v14112_v8, %v12788_v9  ;;  %v12644_v60 = vld [vmem:[#allocation19 + $0x308] sm:$0xf]  ;;  %v14076_v23 = vld [vmem:[#allocation19 + $0x310] sm:$0xf0]  ;;  %v14145_v9 = vld [vmem:[#allocation19 + $0x538] sm:$0xf0] }
 0x880   :  { %9748 = vmatpush.bf16.msra.mxu1 %v12501_v15  ;;  %9762 = vmatpush.bf16.msrb.mxu2 %v12597_v21  ;;  %v12645_v52 = vor.u32 %v14076_v23, %v12644_v60  ;;  %v12920_v15 = vld [vmem:[#allocation19 + $0x530] sm:$0xf]  ;;  %v14163_v23 = vld [vmem:[#allocation19 + $0x5c8] sm:$0xf0] }
 0x881   :  { %v13016_v8 = vld [vmem:[#allocation19 + $0x5f0] sm:$0xf] }
 0x882   :  { %9774 = vmatpush.bf16.msra.mxu3 %v12717_v10  ;;  %9788 = vmatpush.bf16.msrb.mxu0 %v12813_v22  ;;  %v12669_v10 = vor.u32 %v14082_v44, %v12668_v37  ;;  %v12765_v22 = vor.u32 %v14106_v31, %v12764_v0  ;;  %v14100_v37 = vld [vmem:[#allocation19 + $0x3d0] sm:$0xf0]  ;;  %v12549_v44 = vor.u32 %v14052_v24, %v12548_v50  ;;  %v14187_v0 = vld [vmem:[#allocation19 + $0x688] sm:$0xf0]  ;;  %v12980_v24 = vld [vmem:[#allocation19 + $0x5a8] sm:$0xf] }
 0x883   :  { %v12741_v58 = vor.u32 %v14100_v37, %v12740_v36  ;;  %v12909_v31 = vor.u32 %v14142_v16, %v12908_v27  ;;  %v12872_v36 = vld [vmem:[#allocation19 + $0x4d0] sm:$0xf]  ;;  %v14133_v37 = vld [vmem:[#allocation19 + $0x4d8] sm:$0xf0]  ;;  %v13052_v27 = vld [vmem:[#allocation19 + $0x638] sm:$0xf] }
 0x884   :  { %9749 = vmatpush.bf16.msra.mxu1 %v12489_v40  ;;  %9763 = vmatpush.bf16.msrb.mxu2 %v12585_v28  ;;  %v13208_v40 = vld [vmem:[#allocation19 + $0x770] sm:$0xf]  ;;  %v14178_v16 = vld [vmem:[#allocation19 + $0x640] sm:$0xf0] }
 0x886   :  { %9775 = vmatpush.bf16.msra.mxu3 %v12705_v38  ;;  %9789 = vmatpush.bf16.msrb.mxu0 %v12801_v19  ;;  %v12657_v38 = vor.u32 %v14079_v33, %v12656_v32  ;;  %v13113_v19 = vor.u32 %v14193_v57, %v13112_v25  ;;  %v14166_v32 = vld [vmem:[#allocation19 + $0x5e0] sm:$0xf0]  ;;  %v16671_v33 = vpop.f32.mrf.mxu0  ;;  %v13076_v57 = vld [vmem:[#allocation19 + $0x668] sm:$0xf] }
 0x887   :  { %v13005_v41 = vor.u32 %v14166_v32, %v13004_v39  ;;  %v13160_v39 = vld [vmem:[#allocation19 + $0x710] sm:$0xf]  ;;  %v14205_v32 = vld [vmem:[#allocation19 + $0x718] sm:$0xf0] }
 0x888   :  { %9750 = vmatpush.bf16.msra.mxu1 %v12477_v49  ;;  %9764 = vmatpush.bf16.msrb.mxu2 %v12573_v20  ;;  %v13088_v49 = vld [vmem:[#allocation19 + $0x680] sm:$0xf]  ;;  %v13196_v20 = vld [vmem:[#allocation19 + $0x758] sm:$0xf] }
 0x889   :  { %v13089_v60 = vor.u32 %v14187_v0, %v13088_v49  ;;  %v12860_v49 = vld [vmem:[#allocation19 + $0x4b8] sm:$0xf]  ;;  %v14130_v0 = vld [vmem:[#allocation19 + $0x4c0] sm:$0xf0] }
 0x88a   :  { %9776 = vmatpush.bf16.msra.mxu3 %v12693_v4  ;;  %9790 = vmatpush.bf16.msrb.mxu0 %v12789_v56  ;;  %v14103_v4 = vld [vmem:[#allocation19 + $0x3e8] sm:$0xf0]  ;;  %v12921_v56 = vor.u32 %v14145_v9, %v12920_v15  ;;  %v9392_v15 = vpop.f32.mrf.mxu3 }
 0x88b   :  { %v12753_v21 = vor.u32 %v14103_v4, %v12752_v3  ;;  %v12897_v3 = vor.u32 %v14139_v43, %v12896_v59  ;;  %v13184_v4 = vld [vmem:[#allocation19 + $0x740] sm:$0xf]  ;;  %v13161_v59 = vor.u32 %v14205_v32, %v13160_v39  ;;  %v13124_v39 = vld [vmem:[#allocation19 + $0x6c8] sm:$0xf]  ;;  %v14196_v32 = vld [vmem:[#allocation19 + $0x6d0] sm:$0xf0] }
 0x88c   :  { %9751 = vmatpush.bf16.msra.mxu1 %v12465_v34  ;;  %9765 = vmatpush.bf16.msrb.mxu2 %v12561_v62  ;;  %v14184_v34 = vld [vmem:[#allocation19 + $0x670] sm:$0xf0]  ;;  %v13185_v9 = vor.u32 %v14211_v53, %v13184_v4  ;;  %v13040_v43 = vld [vmem:[#allocation19 + $0x620] sm:$0xf]  ;;  %v14127_v53 = vld [vmem:[#allocation19 + $0x4a8] sm:$0xf0] }
 0x88d   :  { %v13077_v50 = vor.u32 %v14184_v34, %v13076_v57  ;;  %v12848_v4 = vld [vmem:[#allocation19 + $0x4a0] sm:$0xf] }
 0x88e   :  { %9777 = vmatpush.bf16.msra.mxu3 %v12681_v47  ;;  %9791 = vmatpush.bf16.msrb.mxu0 %v12777_v6  ;;  %v14169_v47 = vld [vmem:[#allocation19 + $0x5f8] sm:$0xf0]  ;;  %v13209_v6 = vor.u32 %v14217_v61, %v13208_v40  ;;  %v12968_v40 = vld [vmem:[#allocation19 + $0x590] sm:$0xf] }
 0x88f   :  { %v13017_v28 = vor.u32 %v14169_v47, %v13016_v8  ;;  %v13064_v8 = vld [vmem:[#allocation19 + $0x650] sm:$0xf]  ;;  %v14157_v61 = vld [vmem:[#allocation19 + $0x598] sm:$0xf0] }
 0x890   :  { %9752 = vmatpush.bf16.msra.mxu1 %v12453_v46  ;;  %9766 = vmatpush.bf16.msrb.mxu2 %v12549_v44 }
 0x892   :  { %9778 = vmatpush.bf16.msra.mxu3 %v12669_v10  ;;  %9792 = vmatpush.bf16.msrb.mxu0 %v12765_v22  ;;  %v13101_v10 = vor.u32 %v14190_v55, %v13100_v13  ;;  %v16677_v22 = vld [vmem:[#allocation20] sm:$0x7]  ;;  %v14208_v13 = vld [vmem:[#allocation19 + $0x730] sm:$0xf0]  ;;  %v16684_v55 = vpop.f32.mrf.mxu0 }
 0x893   :  { %9753 = vmatmul.bf16.vlgmr.msra.gmra.mxu1 %v16577_v29  ;;  %9767 = vmatmul.bf16.vlgmr.msrb.gmra.mxu2 %v16579_v51  ;;  %v12884_v29 = vld [vmem:[#allocation19 + $0x4e8] sm:$0xf]  ;;  %v7839_v54 = vperm.slane %v16677_v22, 0  ;;  %v14160_v51 = vld [vmem:[#allocation19 + $0x5b0] sm:$0xf0] }
 0x894   :  { %9801 = vmatpush.bf16.msrb.mxu1 %v12921_v56  ;;  %9815 = vmatpush.bf16.msra.mxu2 %v13017_v28  ;;  %v12981_v46 = vor.u32 %v14160_v51, %v12980_v24  ;;  %v16687_v28 = vpop.f32.mrf.mxu1 }
 0x895   :  { %v9391_v44 = vadd.f32 %v16669_v42, %v7839_v54 }
 0x896   :  { %9779 = vmatpush.bf16.msra.mxu3 %v12657_v38  ;;  %9793 = vmatpush.bf16.msrb.mxu0 %v12753_v21  ;;  %v14214_v38 = vld [vmem:[#allocation19 + $0x760] sm:$0xf0]  ;;  %v14181_v21 = vld [vmem:[#allocation19 + $0x658] sm:$0xf0] }
 0x897   :  { %v13197_v25 = vor.u32 %v14214_v38, %v13196_v20  ;;  %v13065_v56 = vor.u32 %v14181_v21, %v13064_v8  ;;  %v9405_v42 = vadd.f32 %v16671_v33, %v9391_v44  ;;  %v12956_v20 = vld [vmem:[#allocation19 + $0x578] sm:$0xf]  ;;  %v14154_v38 = vld [vmem:[#allocation19 + $0x580] sm:$0xf0]  ;;  %v14172_v8 = vld [vmem:[#allocation19 + $0x610] sm:$0xf0]  ;;  %v12849_v21 = vor.u32 %v14127_v53, %v12848_v4 }
 0x898   :  { %9802 = vmatpush.bf16.msrb.mxu1 %v12909_v31  ;;  %9816 = vmatpush.bf16.msra.mxu2 %v13005_v41  ;;  %v13053_v31 = vor.u32 %v14178_v16, %v13052_v27  ;;  %v9446_v41 = vpop.f32.mrf.mxu3  ;;  %v14148_v44 = vld [vmem:[#allocation19 + $0x550] sm:$0xf0]  ;;  %v14265_v27 = vld [vmem:[#allocation19 + $0x8f8] sm:$0xf0]  ;;  %v14235_v4 = vld [vmem:[#allocation19 + $0x808] sm:$0xf0] }
 0x899   :  { %v9419_v33 = vadd.f32 %v16674_v1, %v9405_v42 }
 0x89a   :  { %9780 = vmatpush.bf16.msra.mxu3 %v12645_v52  ;;  %9794 = vmatpush.bf16.msrb.mxu0 %v12741_v58  ;;  %v14136_v52 = vld [vmem:[#allocation19 + $0x4f0] sm:$0xf0]  ;;  %v12873_v58 = vor.u32 %v14133_v37, %v12872_v36  ;;  %v9460_v34 = vpop.f32.mrf.mxu0  ;;  %v12932_v37 = vld [vmem:[#allocation19 + $0x548] sm:$0xf] }
 0x89b   :  { %v12885_v47 = vor.u32 %v14136_v52, %v12884_v29  ;;  %v12944_v52 = vld [vmem:[#allocation19 + $0x560] sm:$0xf]  ;;  %v14124_v36 = vld [vmem:[#allocation19 + $0x490] sm:$0xf0] }
 0x89c   :  { %9803 = vmatpush.bf16.msrb.mxu1 %v12897_v3  ;;  %v12957_v3 = vor.u32 %v14154_v38, %v12956_v20  ;;  %v9474_v24 = vpop.f32.mrf.mxu1  ;;  %v13125_v20 = vor.u32 %v14196_v32, %v13124_v39  ;;  %v13292_v38 = vld [vmem:[#allocation19 + $0x818] sm:$0xf]  ;;  %v14250_v32 = vld [vmem:[#allocation19 + $0x880] sm:$0xf0] }
 0x89d   :  { %9781 = vmatmul.bf16.vlgmr.msra.gmra.mxu3 %v16623_v7  ;;  %v12992_v7 = vld [vmem:[#allocation19 + $0x5c0] sm:$0xf]  ;;  %9795 = vmatmul.bf16.vlgmr.msrb.gmra.mxu0 %v16625_v5  ;;  %v13172_v5 = vld [vmem:[#allocation19 + $0x728] sm:$0xf]  ;;  %v13340_v39 = vld [vmem:[#allocation19 + $0x878] sm:$0xf] }
 0x89e   :  { %9829 = vmatpush.bf16.msrb.mxu3 %v13113_v19  ;;  %9843 = vmatpush.bf16.msra.mxu0 %v13209_v6  ;;  %v12993_v62 = vor.u32 %v14163_v23, %v12992_v7  ;;  %v16682_v19 = vpop.f32.mrf.mxu2  ;;  %v12969_v6 = vor.u32 %v14157_v61, %v12968_v40  ;;  %v12861_v7 = vor.u32 %v14130_v0, %v12860_v49  ;;  %v13148_v23 = vld [vmem:[#allocation19 + $0x6f8] sm:$0xf]  ;;  %v14241_v61 = vld [vmem:[#allocation19 + $0x838] sm:$0xf0] }
 0x89f   :  { %v9433_v1 = vadd.f32 %v16682_v19, %v9419_v33  ;;  %v12933_v19 = vor.u32 %v14148_v44, %v12932_v37 }
 0x8a0   :  { %9817 = vmatpush.bf16.msra.mxu2 %v12993_v62  ;;  %9804 = vmatpush.bf16.msrb.mxu1 %v12885_v47  ;;  %v9393_v62 = vadd.f32 %v9392_v15, %v7839_v54  ;;  %v13136_v47 = vld [vmem:[#allocation19 + $0x6e0] sm:$0xf]  ;;  %v9448_v49 = vpop.f32.mrf.mxu3 }
 0x8a1   :  { %v9447_v16 = vadd.f32 %v9446_v41, %v9433_v1  ;;  %v13388_v41 = vld [vmem:[#allocation19 + $0x8d8] sm:$0xf] }
 0x8a2   :  { %9830 = vmatpush.bf16.msrb.mxu3 %v13101_v10  ;;  %9844 = vmatpush.bf16.msra.mxu0 %v13197_v25  ;;  %v13173_v10 = vor.u32 %v14208_v13, %v13172_v5  ;;  %v14202_v25 = vld [vmem:[#allocation19 + $0x700] sm:$0xf0]  ;;  %v14199_v5 = vld [vmem:[#allocation19 + $0x6e8] sm:$0xf0]  ;;  %v9407_v54 = vadd.f32 %v16684_v55, %v9393_v62 }
 0x8a3   :  { %v13149_v51 = vor.u32 %v14202_v25, %v13148_v23  ;;  %v13137_v40 = vor.u32 %v14199_v5, %v13136_v47  ;;  %v14259_v62 = vld [vmem:[#allocation19 + $0x8c8] sm:$0xf0] }
 0x8a4   :  { %9818 = vmatpush.bf16.msra.mxu2 %v12981_v46  ;;  %9805 = vmatpush.bf16.msrb.mxu1 %v12873_v58  ;;  %v12836_v46 = vld [vmem:[#allocation19 + $0x488] sm:$0xf]  ;;  %v9421_v55 = vadd.f32 %v16687_v28, %v9407_v54  ;;  %v13352_v54 = vld [vmem:[#allocation19 + $0x890] sm:$0xf] }
 0x8a5   :  { %v12837_v58 = vor.u32 %v14124_v36, %v12836_v46  ;;  %v13256_v46 = vld [vmem:[#allocation19 + $0x7d0] sm:$0xf] }
 0x8a6   :  { %9831 = vmatpush.bf16.msrb.mxu3 %v13089_v60  ;;  %9845 = vmatpush.bf16.msra.mxu0 %v13185_v9  ;;  %v14175_v60 = vld [vmem:[#allocation19 + $0x628] sm:$0xf0]  ;;  %v9434_v57 = vpop.f32.mrf.mxu2  ;;  %v13028_v9 = vld [vmem:[#allocation19 + $0x608] sm:$0xf] }
 0x8a7   :  { %v13041_v29 = vor.u32 %v14175_v60, %v13040_v43  ;;  %v13029_v15 = vor.u32 %v14172_v8, %v13028_v9  ;;  %v9461_v43 = vadd.f32 %v9460_v34, %v9447_v16  ;;  %v14262_v60 = vld [vmem:[#allocation19 + $0x8e0] sm:$0xf0]  ;;  %v9435_v23 = vadd.f32 %v9434_v57, %v9421_v55  ;;  %v13376_v34 = vld [vmem:[#allocation19 + $0x8c0] sm:$0xf] }
 0x8a8   :  { %9819 = vmatpush.bf16.msra.mxu2 %v12969_v6  ;;  %9806 = vmatpush.bf16.msrb.mxu1 %v12861_v7  ;;  %v9476_v7 = vpop.f32.mrf.mxu1  ;;  %v13389_v25 = vor.u32 %v14262_v60, %v13388_v41 }
 0x8a9   :  { %v9475_v53 = vadd.f32 %v9474_v24, %v9461_v43  ;;  %v9449_v33 = vadd.f32 %v9448_v49, %v9435_v23  ;;  %v14256_v24 = vld [vmem:[#allocation19 + $0x8b0] sm:$0xf0]  ;;  %v14247_v43 = vld [vmem:[#allocation19 + $0x868] sm:$0xf0] }
 0x8aa   :  { %9832 = vmatpush.bf16.msrb.mxu3 %v13077_v50  ;;  %9846 = vmatpush.bf16.msra.mxu0 %v13173_v10  ;;  %v14151_v50 = vld [vmem:[#allocation19 + $0x568] sm:$0xf0]  ;;  %v13400_v10 = vld [vmem:[#allocation19 + $0x8f0] sm:$0xf] }
 0x8ab   :  { %v12945_v13 = vor.u32 %v14151_v50, %v12944_v52  ;;  %v13401_v42 = vor.u32 %v14265_v27, %v13400_v10  ;;  %v13377_v50 = vor.u32 %v14259_v62, %v13376_v34  ;;  %v13244_v10 = vld [vmem:[#allocation19 + $0x7b8] sm:$0xf]  ;;  %v14226_v27 = vld [vmem:[#allocation19 + $0x7c0] sm:$0xf0] }
 0x8ac   :  { %9820 = vmatpush.bf16.msra.mxu2 %v12957_v3  ;;  %9807 = vmatpush.bf16.msrb.mxu1 %v12849_v21  ;;  %v13280_v3 = vld [vmem:[#allocation19 + $0x800] sm:$0xf]  ;;  %v13364_v21 = vld [vmem:[#allocation19 + $0x8a8] sm:$0xf]  ;;  %v13245_v55 = vor.u32 %v14226_v27, %v13244_v10 }
 0x8ae   :  { %9833 = vmatpush.bf16.msrb.mxu3 %v13065_v56  ;;  %9847 = vmatpush.bf16.msra.mxu0 %v13161_v59  ;;  %v13304_v56 = vld [vmem:[#allocation19 + $0x830] sm:$0xf]  ;;  %v9488_v6 = vpop.f32.mrf.mxu2  ;;  %v14238_v59 = vld [vmem:[#allocation19 + $0x820] sm:$0xf0] }
 0x8af   :  { %v13305_v0 = vor.u32 %v14241_v61, %v13304_v56  ;;  %v13293_v28 = vor.u32 %v14238_v59, %v13292_v38  ;;  %v9489_v9 = vadd.f32 %v9488_v6, %v9475_v53  ;;  %v13328_v59 = vld [vmem:[#allocation19 + $0x860] sm:$0xf] }
 0x8b0   :  { %9821 = vmatpush.bf16.msra.mxu2 %v12945_v13  ;;  %9808 = vmatpush.bf16.msrb.mxu1 %v12837_v58  ;;  %v9530_v47 = vpop.f32.mrf.mxu1  ;;  %v13365_v13 = vor.u32 %v14256_v24, %v13364_v21  ;;  %v13329_v23 = vor.u32 %v14247_v43, %v13328_v59 }
 0x8b2   :  { %9834 = vmatpush.bf16.msrb.mxu3 %v13053_v31  ;;  %9848 = vmatpush.bf16.msra.mxu0 %v13149_v51  ;;  %v9462_v31 = vpop.f32.mrf.mxu0  ;;  %v13268_v51 = vld [vmem:[#allocation19 + $0x7e8] sm:$0xf] }
 0x8b3   :  { %9809 = vmatmul.bf16.vlgmr.msrb.gmra.mxu1 %v16615_v35  ;;  %v14232_v35 = vld [vmem:[#allocation19 + $0x7f0] sm:$0xf0]  ;;  %v9463_v8 = vadd.f32 %v9462_v31, %v9449_v33  ;;  %v13232_v31 = vld [vmem:[#allocation19 + $0x7a0] sm:$0xf] }
 0x8b4   :  { %9822 = vmatpush.bf16.msra.mxu2 %v12933_v19  ;;  %9857 = vmatpush.bf16.msra.mxu1 %v13305_v0 }
 0x8b5   :  { %v9477_v36 = vadd.f32 %v9476_v7, %v9463_v8 }
 0x8b6   :  { %9835 = vmatpush.bf16.msrb.mxu3 %v13041_v29  ;;  %9849 = vmatpush.bf16.msra.mxu0 %v13137_v40  ;;  %v9502_v29 = vpop.f32.mrf.mxu3  ;;  %v9490_v57 = vpop.f32.mrf.mxu2 }
 0x8b7   :  { %9823 = vmatmul.bf16.vlgmr.msra.gmra.mxu2 %v16617_v45  ;;  %v9503_v5 = vadd.f32 %v9502_v29, %v9489_v9  ;;  %v13269_v45 = vor.u32 %v14232_v35, %v13268_v51  ;;  %v9491_v16 = vadd.f32 %v9490_v57, %v9477_v36 }
 0x8b8   :  { %9871 = vmatpush.bf16.msrb.mxu2 %v13401_v42  ;;  %9858 = vmatpush.bf16.msra.mxu1 %v13293_v28  ;;  %v9532_v0 = vpop.f32.mrf.mxu1  ;;  %v13341_v42 = vor.u32 %v14250_v32, %v13340_v39  ;;  %v13220_v28 = vld [vmem:[#allocation19 + $0x788] sm:$0xf] }
 0x8ba   :  { %9836 = vmatpush.bf16.msrb.mxu3 %v13029_v15  ;;  %9850 = vmatpush.bf16.msra.mxu0 %v13125_v20  ;;  %v9516_v52 = vpop.f32.mrf.mxu0  ;;  %v14253_v15 = vld [vmem:[#allocation19 + $0x898] sm:$0xf0]  ;;  %v14223_v20 = vld [vmem:[#allocation19 + $0x7a8] sm:$0xf0] }
 0x8bb   :  { %v9517_v1 = vadd.f32 %v9516_v52, %v9503_v5  ;;  %v13353_v61 = vor.u32 %v14253_v15, %v13352_v54  ;;  %v13233_v60 = vor.u32 %v14223_v20, %v13232_v31 }
 0x8bc   :  { %9872 = vmatpush.bf16.msrb.mxu2 %v13389_v25  ;;  %v14220_v25 = vld [vmem:[#allocation19 + $0x790] sm:$0xf0] }
 0x8bd   :  { %9837 = vmatmul.bf16.vlgmr.msrb.gmra.mxu3 %v16634_v14  ;;  %9851 = vmatmul.bf16.vlgmr.msra.gmra.mxu0 %v16642_v18  ;;  %v13281_v14 = vor.u32 %v14235_v4, %v13280_v3  ;;  %v14229_v18 = vld [vmem:[#allocation19 + $0x7d8] sm:$0xf0]  ;;  %v9531_v37 = vadd.f32 %v9530_v47, %v9517_v1  ;;  %v13316_v3 = vld [vmem:[#allocation19 + $0x848] sm:$0xf]  ;;  %v14244_v4 = vld [vmem:[#allocation19 + $0x850] sm:$0xf0]  ;;  %v13221_v33 = vor.u32 %v14220_v25, %v13220_v28 }
 0x8be   :  { %v13257_v44 = vor.u32 %v14229_v18, %v13256_v46  ;;  %v9504_v56 = vpop.f32.mrf.mxu3  ;;  %v9544_v40 = vpop.f32.mrf.mxu2  ;;  %v13317_v34 = vor.u32 %v14244_v4, %v13316_v3 }
 0x8bf   :  { %9859 = vmatpush.bf16.msra.mxu1 %v13281_v14  ;;  %v9545_v58 = vadd.f32 %v9544_v40, %v9531_v37  ;;  %v9505_v49 = vadd.f32 %v9504_v56, %v9491_v16 }
 0x8c0   :  { %9873 = vmatpush.bf16.msrb.mxu2 %v13377_v50  ;;  %v9586_v14 = vpop.f32.mrf.mxu1 }
 0x8c1   :  { %v9885_v19 = vadd.f32 %v9545_v58, %v16291_v2 }
 0x8c2   :  { %v9518_v6 = vpop.f32.mrf.mxu0 }
 0x8c3   :  { %9860 = vmatpush.bf16.msra.mxu1 %v13269_v45  ;;  %v9519_v38 = vadd.f32 %v9518_v6, %v9505_v49  ;;  %9891 = vst [vmem:[#allocation22] sm:$0xff] %v9885_v19 }
 0x8c4   :  { %9874 = vmatpush.bf16.msrb.mxu2 %v13365_v13 }
 0x8c5   :  { %v9533_v41 = vadd.f32 %v9532_v0, %v9519_v38 }
 0x8c6   :  { %v9546_v7 = vpop.f32.mrf.mxu2  ;;  %v9558_v62 = vpop.f32.mrf.mxu3 }
 0x8c7   :  { %9861 = vmatpush.bf16.msra.mxu1 %v13257_v44  ;;  %v9547_v2 = vadd.f32 %v9546_v7, %v9533_v41 }
 0x8c8   :  { %9875 = vmatpush.bf16.msrb.mxu2 %v13353_v61  ;;  %v9588_v51 = vpop.f32.mrf.mxu1 }
 0x8c9   :  { %v9888_v53 = vadd.f32 %v9547_v2, %v16310_v26  ;;  %v7840_v26 = vperm.slane %v16677_v22, 1 }
 0x8ca   :  { %v9572_v29 = vpop.f32.mrf.mxu0 }
 0x8cb   :  { %9862 = vmatpush.bf16.msra.mxu1 %v13245_v55  ;;  %9894 = vst [vmem:[#allocation22 + $0x18] sm:$0xff] %v9888_v53  ;;  %v9559_v35 = vadd.f32 %v9558_v62, %v7840_v26  ;;  %v7841_v53 = vperm.slane %v16677_v22, 2 }
 0x8cc   :  { %9876 = vmatpush.bf16.msrb.mxu2 %v13341_v42 }
 0x8cd   :  { %v9573_v21 = vadd.f32 %v9572_v29, %v9559_v35 }
 0x8ce   :  { %v9600_v57 = vpop.f32.mrf.mxu2  ;;  %v9560_v52 = vpop.f32.mrf.mxu3 }
 0x8cf   :  { %9863 = vmatpush.bf16.msra.mxu1 %v13233_v60  ;;  %v9587_v24 = vadd.f32 %v9586_v14, %v9573_v21  ;;  %v9561_v13 = vadd.f32 %v9560_v52, %v7840_v26 }
 0x8d0   :  { %9877 = vmatpush.bf16.msrb.mxu2 %v13329_v23  ;;  %v9642_v5 = vpop.f32.mrf.mxu1 }
 0x8d1   :  { %v9601_v45 = vadd.f32 %v9600_v57, %v9587_v24 }
 0x8d2   :  { %v9574_v50 = vpop.f32.mrf.mxu0 }
 0x8d3   :  { %9864 = vmatpush.bf16.msra.mxu1 %v13221_v33  ;;  %v9575_v46 = vadd.f32 %v9574_v50, %v9561_v13 }
 0x8d4   :  { %9878 = vmatpush.bf16.msrb.mxu2 %v13317_v34 }
 0x8d6   :  { %9865 = vmatmul.bf16.vlgmr.msra.gmra.mxu1 %v16651_v11  ;;  %v9614_v9 = vpop.f32.mrf.mxu3  ;;  %v9602_v8 = vpop.f32.mrf.mxu2 }
 0x8d7   :  { %9879 = vmatmul.bf16.vlgmr.msrb.gmra.mxu2 %v16653_v12  ;;  %v9615_v18 = vadd.f32 %v9614_v9, %v9601_v45  ;;  %v9589_v12 = vadd.f32 %v9588_v51, %v9575_v46 }
 0x8d8   :  { %v9644_v37 = vpop.f32.mrf.mxu1 }
 0x8d9   :  { %v9603_v1 = vadd.f32 %v9602_v8, %v9589_v12 }
 0x8da   :  { %v9628_v47 = vpop.f32.mrf.mxu0 }
 0x8db   :  { %v9629_v54 = vadd.f32 %v9628_v47, %v9615_v18 }
 0x8dd   :  { %v9643_v44 = vadd.f32 %v9642_v5, %v9629_v54 }
 0x8de   :  { %v9616_v11 = vpop.f32.mrf.mxu3  ;;  %v9656_v36 = vpop.f32.mrf.mxu2 }
 0x8df   :  { %v9617_v56 = vadd.f32 %v9616_v11, %v9603_v1  ;;  %v9657_v40 = vadd.f32 %v9656_v36, %v9643_v44 }
 0x8e2   :  { %v9630_v15 = vpop.f32.mrf.mxu0 }
 0x8e3   :  { %v9631_v16 = vadd.f32 %v9630_v15, %v9617_v56 }
 0x8e5   :  { %v9645_v32 = vadd.f32 %v9644_v37, %v9631_v16 }
 0x8e6   :  { %v9670_v61 = vpop.f32.mrf.mxu3  ;;  %v9658_v10 = vpop.f32.mrf.mxu2 }
 0x8e7   :  { %v9671_v27 = vadd.f32 %v9670_v61, %v9657_v40  ;;  %v9659_v6 = vadd.f32 %v9658_v10, %v9645_v32 }
 0x8ea   :  { %v9684_v58 = vpop.f32.mrf.mxu0 }
 0x8eb   :  { %v9685_v49 = vadd.f32 %v9684_v58, %v9671_v27 }
 0x8ee   :  { %v9672_v55 = vpop.f32.mrf.mxu3 }
 0x8ef   :  { %v9673_v42 = vadd.f32 %v9672_v55, %v9659_v6 }
 0x8f0   :  { %v9698_v39 = vpop.f32.mrf.mxu1 }
 0x8f1   :  { %v9699_v19 = vadd.f32 %v9698_v39, %v9685_v49 }
 0x8f2   :  { %v9686_v38 = vpop.f32.mrf.mxu0 }
 0x8f3   :  { %v9687_v43 = vadd.f32 %v9686_v38, %v9673_v42 }
 0x8f6   :  { %v9712_v0 = vpop.f32.mrf.mxu2 }
 0x8f7   :  { %v9713_v31 = vadd.f32 %v9712_v0, %v9699_v19 }
 0x8f8   :  { %v9700_v59 = vpop.f32.mrf.mxu1 }
 0x8f9   :  { %v9886_v20 = vadd.f32 %v9713_v31, %v16289_v17  ;;  %v9701_v41 = vadd.f32 %v9700_v59, %v9687_v43 }
 0x8fa   :  { %v9740_v25 = vpop.f32.mrf.mxu0 }
 0x8fb   :  { %9892 = vst [vmem:[#allocation22 + $0x8] sm:$0xff] %v9886_v20 }
 0x8fe   :  { %v9714_v60 = vpop.f32.mrf.mxu2 }
 0x8ff   :  { %v9715_v7 = vadd.f32 %v9714_v60, %v9701_v41 }
 0x900   :  { %v9726_v28 = vpop.f32.mrf.mxu3 }
 0x901   :  { %v9889_v23 = vadd.f32 %v9715_v7, %v16305_v30  ;;  %v9727_v17 = vadd.f32 %v9726_v28, %v7841_v53 }
 0x902   :  { %v9742_v33 = vpop.f32.mrf.mxu0 }
 0x903   :  { %9895 = vst [vmem:[#allocation22 + $0x20] sm:$0xff] %v9889_v23  ;;  %v9741_v29 = vadd.f32 %v9740_v25, %v9727_v17 }
 0x908   :  { %v9728_v3 = vpop.f32.mrf.mxu3 }
 0x909   :  { %v9729_v51 = vadd.f32 %v9728_v3, %v7841_v53 }
 0x90b   :  { %v9743_v35 = vadd.f32 %v9742_v33, %v9729_v51 }
 0x910   :  { %v9754_v2 = vpop.f32.mrf.mxu1 }
 0x911   :  { %v9755_v57 = vadd.f32 %v9754_v2, %v9741_v29 }
 0x916   :  { %v9768_v4 = vpop.f32.mrf.mxu2 }
 0x917   :  { %v9769_v26 = vadd.f32 %v9768_v4, %v9755_v57 }
 0x918   :  { %v9756_v34 = vpop.f32.mrf.mxu1 }
 0x919   :  { %v9757_v21 = vadd.f32 %v9756_v34, %v9743_v35 }
 0x91a   :  { %v9796_v52 = vpop.f32.mrf.mxu0 }
 0x91e   :  { %v9770_v14 = vpop.f32.mrf.mxu2 }
 0x91f   :  { %v9771_v24 = vadd.f32 %v9770_v14, %v9757_v21 }
 0x920   :  { %v9782_v62 = vpop.f32.mrf.mxu3 }
 0x921   :  { %v9783_v30 = vadd.f32 %v9782_v62, %v9769_v26 }
 0x922   :  { %v9798_v5 = vpop.f32.mrf.mxu0 }
 0x923   :  { %v9797_v47 = vadd.f32 %v9796_v52, %v9783_v30 }
 0x928   :  { %v9784_v9 = vpop.f32.mrf.mxu3 }
 0x929   :  { %v9785_v13 = vadd.f32 %v9784_v9, %v9771_v24 }
 0x92b   :  { %v9799_v12 = vadd.f32 %v9798_v5, %v9785_v13 }
 0x930   :  { %v9810_v50 = vpop.f32.mrf.mxu1 }
 0x931   :  { %v9811_v45 = vadd.f32 %v9810_v50, %v9797_v47 }
 0x938   :  { %v9812_v22 = vpop.f32.mrf.mxu1 }
 0x939   :  { %v9813_v15 = vadd.f32 %v9812_v22, %v9799_v12 }
 0x93a   :  { %v9824_v8 = vpop.f32.mrf.mxu2  ;;  %v9852_v1 = vpop.f32.mrf.mxu0 }
 0x93b   :  { %v9825_v46 = vadd.f32 %v9824_v8, %v9811_v45 }
 0x940   :  { %v9838_v18 = vpop.f32.mrf.mxu3 }
 0x941   :  { %v9839_v36 = vadd.f32 %v9838_v18, %v9825_v46 }
 0x942   :  { %v9826_v11 = vpop.f32.mrf.mxu2  ;;  %v9854_v58 = vpop.f32.mrf.mxu0 }
 0x943   :  { %v9827_v37 = vadd.f32 %v9826_v11, %v9813_v15  ;;  %v9853_v44 = vadd.f32 %v9852_v1, %v9839_v36 }
 0x948   :  { %v9840_v40 = vpop.f32.mrf.mxu3 }
 0x949   :  { %v9841_v10 = vadd.f32 %v9840_v40, %v9827_v37 }
 0x94b   :  { %v9855_v32 = vadd.f32 %v9854_v58, %v9841_v10 }
 0x953   :  { %v9866_v54 = vpop.f32.mrf.mxu1 }
 0x954   :  { %v9867_v56 = vadd.f32 %v9866_v54, %v9853_v44 }
 0x95a   :  { %v9880_v61 = vpop.f32.mrf.mxu2 }
 0x95b   :  { %v9881_v27 = vadd.f32 %v9880_v61, %v9867_v56  ;;  %v9868_v39 = vpop.f32.mrf.mxu1 }
 0x95c   :  { %v9869_v6 = vadd.f32 %v9868_v39, %v9855_v32 }
 0x95d   :  { %v9887_v16 = vadd.f32 %v9881_v27, %v16297_v63 }
 0x95f   :  { %9893 = vst [vmem:[#allocation22 + $0x10] sm:$0xff] %v9887_v16 }
 0x962   :  { %v9882_v49 = vpop.f32.mrf.mxu2 }
 0x963   :  { %v9883_v19 = vadd.f32 %v9882_v49, %v9869_v6 }
 0x965   :  { %v9890_v55 = vadd.f32 %v9883_v19, %v16314_v48 }
 0x967   :  { %9896 = vst [vmem:[#allocation22 + $0x28] sm:$0xff] %v9890_v55 }
 0x968   :  { %9909 = dma.vmem_to_hbm [thread:$0]  %s9902_s20, 768, %s9904_s22, [#allocation4], %s14751_s13, %s14751_s13, %s14752_s14  }
 0x969   :  { %14741 = dma.done.wait [#allocation4], 768  }
 0x96a   :  { %14742 = vsyncadd [#allocation4], 4294966528 }
 0x96b   :  { %9914 = vsyncpa [#allocation3], 1 }
 0x96c   :  { %9915 = vsyncpa [#allocation6], 1 }
 0x96d   :  { %9916 = vsyncpa [#allocation9], 1 }
 0x96e   :  { %9917 = vsyncpa [#allocation12], 1 }
 0x96f   :  { %9918 = vsyncpa [#allocation15], 1 }
 0x970   :  { %9919 = vsyncpa [#allocation18], 1 }
 0x971   :  { %9920 = vsyncpa [#allocation21], 1 }
 0x972   :  { %9921 = vsyncpa [#allocation4], 1 }

</bundles_post_ra>
